<compile_context>
chip_gen: v7x
topology: tpu7x:2x2x1
jax: 0.10.0
libtpu: 0.0.40
codegen_flags: <defaults>
</compile_context>

<pallas_src>
import math

import jax
import jax.numpy as jnp
from jax.experimental import pallas as pl
from jax.experimental.pallas import tpu as pltpu

# Force the pure-JAX reference matmuls to true f32 so it matches the in-kernel
# f32 MXU math (default TPU matmul precision would otherwise be bf16-level).
jax.config.update("jax_default_matmul_precision", "highest")

HP = 128          # per-gate lane-padded width of the gate/state lane axis
OUT_PAD = 128     # lane-dense padded width of the Linear(hidden, 5) head output


def _round_up(n, m):
    return ((n + m - 1) // m) * m


# ----------------------------------------------------------------------------
# Fused Pallas kernel: all LSTM layers (wavefront-interleaved) + output head
# ----------------------------------------------------------------------------
def make_fused_kernel(L, S, B, hp, G, hk):
    def kernel(*refs):
        x_ref = refs[0]                                  # (S*B, Fin)  time-major, pre-flattened
        wih_refs = [refs[1 + 3 * l] for l in range(L)]   # (Fin or hk, G)
        whh_refs = [refs[2 + 3 * l] for l in range(L)]   # (hk, G)
        b_refs = [refs[3 + 3 * l] for l in range(L)]     # (1, G)
        wout_ref = refs[1 + 3 * L]                       # (hk, OUT_PAD)
        bout_ref = refs[2 + 3 * L]                       # (1, OUT_PAD)
        out_ref = refs[3 + 3 * L]                        # (S*B, OUT_PAD)
        gx_ref = refs[4 + 3 * L]                         # scratch (S*B, G)
        hseq_ref = refs[5 + 3 * L]                       # scratch (S*B, hp)

        # ---- hoisted layer-0 input projection: one big matmul (+ combined bias) ----
        gx_ref[...] = (jnp.dot(x_ref[...], wih_refs[0][...],
                               preferred_element_type=jnp.float32)
                       + b_refs[0][...])

        # Hoist per-layer (l>0) bias broadcast out of the loop (broadcasts aren't CSE'd).
        bias_full = [None] + [jnp.broadcast_to(b_refs[l][...], (B, G))
                              for l in range(1, L)]

        def cell(gates, c_prev):
            # Gate order (i, f, o, g): sigmoid over one contiguous 3*hp slice,
            # tanh only over the g block (no wasted EUP work on discarded lanes).
            sig = jax.nn.sigmoid(gates[:, :3 * hp])
            i_g = sig[:, 0 * hp:1 * hp]
            f_g = sig[:, 1 * hp:2 * hp]
            o_g = sig[:, 2 * hp:3 * hp]
            g_g = jnp.tanh(gates[:, 3 * hp:4 * hp])
            c_new = f_g * c_prev + i_g * g_g
            h_new = o_g * jnp.tanh(c_new)
            return h_new, c_new

        h = [jnp.zeros((B, hp), jnp.float32) for _ in range(L)]
        c = [jnp.zeros((B, hp), jnp.float32) for _ in range(L)]

        # ---- wavefront over (layer, time): fully unrolled (S, L are small) ---------
        # At macro-step m, layer l processes t = m - l; layer l reads layer l-1's
        # output of the previous macro-step (snapshot), so the per-macro-step layer
        # steps are data-independent and can overlap on MXU / EUP / VPU.
        for m in range(S + L - 1):
            prev_h = list(h)
            for l in range(L):
                t = m - l
                if not (0 <= t < S):
                    continue
                if l == 0:
                    gates = gx_ref[t * B:(t + 1) * B, :]
                else:
                    gates = (jnp.dot(prev_h[l - 1][:, :hk], wih_refs[l][...],
                                     preferred_element_type=jnp.float32)
                             + bias_full[l])
                if t > 0:
                    # Recurrent dot with the TRUE hidden width (K = hk, not 128).
                    gates = gates + jnp.dot(h[l][:, :hk], whh_refs[l][...],
                                            preferred_element_type=jnp.float32)
                h[l], c[l] = cell(gates, c[l])
                if l == L - 1:
                    hseq_ref[t * B:(t + 1) * B, :] = h[l]

        # ---- fused lane-dense head: (S*B, hk) @ (hk, OUT_PAD) ----------------------
        out_ref[...] = (jnp.dot(hseq_ref[...][:, :hk], wout_ref[...],
                                preferred_element_type=jnp.float32)
                        + bout_ref[...])

    return kernel


_VMEM_SPEC = pl.BlockSpec(memory_space=pltpu.MemorySpace.VMEM)


def _fused_forward(x2d, padded_layers, wout_p, bout_p, S, Bp):
    L = len(padded_layers)
    hk, out_w = wout_p.shape
    G = padded_layers[0][0].shape[1]
    hp = G // 4

    flat_inputs = [x2d]
    for (wih_p, whh_p, b_p) in padded_layers:
        flat_inputs += [wih_p, whh_p, b_p]
    flat_inputs += [wout_p, bout_p]

    return pl.pallas_call(
        make_fused_kernel(L, S, Bp, hp, G, hk),
        out_shape=jax.ShapeDtypeStruct((S * Bp, out_w), jnp.float32),
        in_specs=[_VMEM_SPEC] * len(flat_inputs),
        out_specs=_VMEM_SPEC,
        scratch_shapes=[pltpu.VMEM((S * Bp, G), jnp.float32),   # hoisted layer-0 gates
                        pltpu.VMEM((S * Bp, hp), jnp.float32)],  # final-layer hidden seq
    )(*flat_inputs)


@jax.jit
def lstm_model_forward(x, padded_params):
    """x: (B, S, input_size) -> (B, S, 5)  (matches the PyTorch module)."""
    padded_layers, wout_p, bout_p = padded_params
    B, S, Fin = x.shape
    Bp = _round_up(B, 8)                              # sublane multiple
    fin_p = padded_layers[0][0].shape[0]              # padded input feature width
    x_tm = jnp.transpose(x, (1, 0, 2))                # time-major (S, B, Fin)
    x_tm = jnp.pad(x_tm, ((0, 0), (0, Bp - B), (0, fin_p - Fin)))
    x2d = x_tm.reshape(S * Bp, fin_p)                 # flatten OUTSIDE the kernel
    out2d = _fused_forward(x2d, padded_layers, wout_p, bout_p, S, Bp)  # (S*Bp, 128)
    out = out2d.reshape(S, Bp, out2d.shape[-1]).transpose(1, 0, 2)     # (Bp, S, 128)
    return out[:B, :, :5]


# ----------------------------------------------------------------------------
# Parameter init (PyTorch-style U(-1/sqrt(H), 1/sqrt(H))) + gate repack / padding
# ----------------------------------------------------------------------------
def init_raw_params(key, input_size, hidden_size, num_layers):
    k = 1.0 / math.sqrt(hidden_size)
    layers = []
    for l in range(num_layers):
        fin = input_size if l == 0 else hidden_size
        key, k1, k2, k3, k4 = jax.random.split(key, 5)
        w_ih = jax.random.uniform(k1, (4 * hidden_size, fin), jnp.float32, -k, k)
        w_hh = jax.random.uniform(k2, (4 * hidden_size, hidden_size), jnp.float32, -k, k)
        b_ih = jax.random.uniform(k3, (4 * hidden_size,), jnp.float32, -k, k)
        b_hh = jax.random.uniform(k4, (4 * hidden_size,), jnp.float32, -k, k)
        layers.append((w_ih, w_hh, b_ih, b_hh))
    key, k5, k6 = jax.random.split(key, 3)
    w_out = jax.random.uniform(k5, (5, hidden_size), jnp.float32, -k, k)
    b_out = jax.random.uniform(k6, (5,), jnp.float32, -k, k)
    return layers, w_out, b_out


def pad_params(raw_layers, w_out, b_out, hidden_size):
    """Repack torch (i,f,g,o) gates as (i,f,o,g), lane-pad each gate block to HP=128
    columns (N axis only); the contraction (K) axis keeps the true width (rounded to a
    sublane multiple)."""
    H = hidden_size
    assert H <= HP
    HK = _round_up(H, 8)
    G = 4 * HP
    GATE_PERM = (0, 1, 3, 2)   # new block g_new pulls torch gate GATE_PERM[g_new]

    padded_layers = []
    for (w_ih, w_hh, b_ih, b_hh) in raw_layers:
        fin = w_ih.shape[1]
        fin_p = _round_up(fin, 8)
        wih_p = jnp.zeros((fin_p, G), jnp.float32)
        whh_p = jnp.zeros((HK, G), jnp.float32)
        b_p = jnp.zeros((1, G), jnp.float32)
        b = b_ih + b_hh
        for g_new, g_t in enumerate(GATE_PERM):
            rows = slice(g_t * H, (g_t + 1) * H)
            cols = slice(g_new * HP, g_new * HP + H)
            wih_p = wih_p.at[:fin, cols].set(w_ih[rows, :].T)
            whh_p = whh_p.at[:H, cols].set(w_hh[rows, :].T)
            b_p = b_p.at[:, cols].set(b[rows][None, :])
        padded_layers.append((wih_p, whh_p, b_p))

    wout_p = jnp.zeros((HK, OUT_PAD), jnp.float32).at[:H, :5].set(w_out.T)
    bout_p = jnp.zeros((1, OUT_PAD), jnp.float32).at[:, :5].set(b_out[None, :])
    return tuple(padded_layers), wout_p, bout_p


# ----------------------------------------------------------------------------
# Pure-JAX reference (unpadded, torch-style params) for correctness check
# ----------------------------------------------------------------------------
def reference_forward(x, raw_layers, w_out, b_out):
    B, S, _ = x.shape
    h_seq = x
    for (w_ih, w_hh, b_ih, b_hh) in raw_layers:
        H = w_hh.shape[1]
        h = jnp.zeros((B, H), jnp.float32)
        c = jnp.zeros((B, H), jnp.float32)
        outs = []
        for t in range(S):
            gates = h_seq[:, t, :] @ w_ih.T + b_ih + h @ w_hh.T + b_hh
            i_g = jax.nn.sigmoid(gates[:, 0 * H:1 * H])
            f_g = jax.nn.sigmoid(gates[:, 1 * H:2 * H])
            g_g = jnp.tanh(gates[:, 2 * H:3 * H])
            o_g = jax.nn.sigmoid(gates[:, 3 * H:4 * H])
            c = f_g * c + i_g * g_g
            h = o_g * jnp.tanh(c)
            outs.append(h)
        h_seq = jnp.stack(outs, axis=1)
    return h_seq @ w_out.T + b_out


# ----------------------------------------------------------------------------
if __name__ == "__main__":
    INPUT_SIZE = 16
    HIDDEN_SIZE = 32
    NUM_LAYERS = 2
    BATCH = 4
    SEQ = 8

    key = jax.random.PRNGKey(0)
    key, xkey = jax.random.split(key)
    x = jax.random.normal(xkey, (BATCH, SEQ, INPUT_SIZE), jnp.float32)

    raw_layers, w_out, b_out = init_raw_params(key, INPUT_SIZE, HIDDEN_SIZE, NUM_LAYERS)
    padded_params = pad_params(raw_layers, w_out, b_out, HIDDEN_SIZE)

    out = lstm_model_forward(x, padded_params)
    out = jax.block_until_ready(out)

    ref = reference_forward(x, raw_layers, w_out, b_out)
    assert out.shape == (BATCH, SEQ, 5), out.shape
    max_err = float(jnp.max(jnp.abs(out - ref)))
    assert jnp.allclose(out, ref, rtol=1e-3, atol=1e-3), max_err

    print("KERNEL_OK")
</pallas_src>

<mosaic_0001>
module attributes {stable_mosaic.version = 11 : i64} {
  func.func @kernel(%arg0: memref<64x16xf32, #tpu.memory_space<vmem>>, %arg1: memref<16x512xf32, #tpu.memory_space<vmem>>, %arg2: memref<32x512xf32, #tpu.memory_space<vmem>>, %arg3: memref<1x512xf32, #tpu.memory_space<vmem>>, %arg4: memref<32x512xf32, #tpu.memory_space<vmem>>, %arg5: memref<32x512xf32, #tpu.memory_space<vmem>>, %arg6: memref<1x512xf32, #tpu.memory_space<vmem>>, %arg7: memref<32x128xf32, #tpu.memory_space<vmem>>, %arg8: memref<1x128xf32, #tpu.memory_space<vmem>>, %arg9: memref<64x128xf32, #tpu.memory_space<vmem>>, %arg10: memref<64x512xf32, #tpu.memory_space<vmem>>, %arg11: memref<64x128xf32, #tpu.memory_space<vmem>>) attributes {dimension_semantics = [], scalar_prefetch = 0 : i64, scratch_operands = 2 : i64, tpu.core_type = #tpu.core_type<tc>} {
    %c0 = arith.constant 0 : index
    %c0_0 = arith.constant 0 : index
    %0 = vector.load %arg0[%c0, %c0_0] : memref<64x16xf32, #tpu.memory_space<vmem>>, vector<64x16xf32>
    %c0_1 = arith.constant 0 : index
    %c0_2 = arith.constant 0 : index
    %1 = vector.load %arg1[%c0_1, %c0_2] : memref<16x512xf32, #tpu.memory_space<vmem>>, vector<16x512xf32>
    %cst = arith.constant dense<0.000000e+00> : vector<64x512xf32>
    %2 = tpu.matmul %0, %1, %cst {dimension_numbers = #tpu.dot_dimension_numbers<[1], [0], [0], [1], [0, 0, 1, 1], [], []>, precision = #tpu.contract_precision<fp32>} : vector<64x16xf32>, vector<16x512xf32>, vector<64x512xf32> -> vector<64x512xf32>
    %c0_3 = arith.constant 0 : index
    %c0_4 = arith.constant 0 : index
    %3 = vector.load %arg3[%c0_3, %c0_4] : memref<1x512xf32, #tpu.memory_space<vmem>>, vector<1x512xf32>
    %4 = vector.broadcast %3 : vector<1x512xf32> to vector<64x512xf32>
    %5 = arith.addf %2, %4 : vector<64x512xf32>
    %c0_5 = arith.constant 0 : index
    %c0_6 = arith.constant 0 : index
    %6 = vector.load %arg10[%c0_5, %c0_6] : memref<64x512xf32, #tpu.memory_space<vmem>>, vector<64x512xf32>
    tpu.vector_store %arg10[%c0_5, %c0_6], %5 {strides = array<i32>} : memref<64x512xf32, #tpu.memory_space<vmem>>, vector<64x512xf32>,
    %c0_7 = arith.constant 0 : index
    %c0_8 = arith.constant 0 : index
    %7 = vector.load %arg6[%c0_7, %c0_8] : memref<1x512xf32, #tpu.memory_space<vmem>>, vector<1x512xf32>
    %8 = vector.shape_cast %7 : vector<1x512xf32> to vector<1x512xf32>
    %9 = vector.broadcast %8 : vector<1x512xf32> to vector<8x512xf32>
    %cst_9 = arith.constant 0.000000e+00 : f32
    %10 = vector.broadcast %cst_9 : f32 to vector<8x128xf32>
    %cst_10 = arith.constant 0.000000e+00 : f32
    %11 = vector.broadcast %cst_10 : f32 to vector<8x128xf32>
    %c0_11 = arith.constant 0 : index
    %c0_12 = arith.constant 0 : index
    %12 = vector.load %arg10[%c0_11, %c0_12] : memref<64x512xf32, #tpu.memory_space<vmem>>, vector<8x512xf32>
    %13 = vector.extract_strided_slice %12 {offsets = [0, 0], sizes = [8, 384], strides = [1, 1]} : vector<8x512xf32> to vector<8x384xf32>
    %14 = arith.negf %13 : vector<8x384xf32>
    %15 = math.exp %14 : vector<8x384xf32>
    %cst_13 = arith.constant 1.000000e+00 : f32
    %16 = vector.broadcast %cst_13 : f32 to vector<8x384xf32>
    %17 = arith.addf %16, %15 : vector<8x384xf32>
    %18 = arith.divf %16, %17 : vector<8x384xf32>
    %19 = vector.extract_strided_slice %18 {offsets = [0, 0], sizes = [8, 128], strides = [1, 1]} : vector<8x384xf32> to vector<8x128xf32>
    %20 = vector.extract_strided_slice %18 {offsets = [0, 128], sizes = [8, 128], strides = [1, 1]} : vector<8x384xf32> to vector<8x128xf32>
    %21 = vector.extract_strided_slice %18 {offsets = [0, 256], sizes = [8, 128], strides = [1, 1]} : vector<8x384xf32> to vector<8x128xf32>
    %22 = vector.extract_strided_slice %12 {offsets = [0, 384], sizes = [8, 128], strides = [1, 1]} : vector<8x512xf32> to vector<8x128xf32>
    %23 = math.tanh %22 : vector<8x128xf32>
    %24 = arith.mulf %20, %10 : vector<8x128xf32>
    %25 = arith.mulf %19, %23 : vector<8x128xf32>
    %26 = arith.addf %24, %25 : vector<8x128xf32>
    %27 = math.tanh %26 : vector<8x128xf32>
    %28 = arith.mulf %21, %27 : vector<8x128xf32>
    %c8 = arith.constant 8 : index
    %c0_14 = arith.constant 0 : index
    %29 = vector.load %arg10[%c8, %c0_14] : memref<64x512xf32, #tpu.memory_space<vmem>>, vector<8x512xf32>
    %30 = vector.extract_strided_slice %28 {offsets = [0, 0], sizes = [8, 32], strides = [1, 1]} : vector<8x128xf32> to vector<8x32xf32>
    %c0_15 = arith.constant 0 : index
    %c0_16 = arith.constant 0 : index
    %31 = vector.load %arg2[%c0_15, %c0_16] : memref<32x512xf32, #tpu.memory_space<vmem>>, vector<32x512xf32>
    %cst_17 = arith.constant dense<0.000000e+00> : vector<8x512xf32>
    %32 = tpu.matmul %30, %31, %cst_17 {dimension_numbers = #tpu.dot_dimension_numbers<[1], [0], [0], [1], [0, 0, 1, 1], [], []>, precision = #tpu.contract_precision<fp32>} : vector<8x32xf32>, vector<32x512xf32>, vector<8x512xf32> -> vector<8x512xf32>
    %33 = arith.addf %29, %32 : vector<8x512xf32>
    %34 = vector.extract_strided_slice %33 {offsets = [0, 0], sizes = [8, 384], strides = [1, 1]} : vector<8x512xf32> to vector<8x384xf32>
    %35 = arith.negf %34 : vector<8x384xf32>
    %36 = math.exp %35 : vector<8x384xf32>
    %cst_18 = arith.constant 1.000000e+00 : f32
    %37 = vector.broadcast %cst_18 : f32 to vector<8x384xf32>
    %38 = arith.addf %37, %36 : vector<8x384xf32>
    %39 = arith.divf %37, %38 : vector<8x384xf32>
    %40 = vector.extract_strided_slice %39 {offsets = [0, 0], sizes = [8, 128], strides = [1, 1]} : vector<8x384xf32> to vector<8x128xf32>
    %41 = vector.extract_strided_slice %39 {offsets = [0, 128], sizes = [8, 128], strides = [1, 1]} : vector<8x384xf32> to vector<8x128xf32>
    %42 = vector.extract_strided_slice %39 {offsets = [0, 256], sizes = [8, 128], strides = [1, 1]} : vector<8x384xf32> to vector<8x128xf32>
    %43 = vector.extract_strided_slice %33 {offsets = [0, 384], sizes = [8, 128], strides = [1, 1]} : vector<8x512xf32> to vector<8x128xf32>
    %44 = math.tanh %43 : vector<8x128xf32>
    %45 = arith.mulf %41, %26 : vector<8x128xf32>
    %46 = arith.mulf %40, %44 : vector<8x128xf32>
    %47 = arith.addf %45, %46 : vector<8x128xf32>
    %48 = math.tanh %47 : vector<8x128xf32>
    %49 = arith.mulf %42, %48 : vector<8x128xf32>
    %50 = vector.extract_strided_slice %28 {offsets = [0, 0], sizes = [8, 32], strides = [1, 1]} : vector<8x128xf32> to vector<8x32xf32>
    %c0_19 = arith.constant 0 : index
    %c0_20 = arith.constant 0 : index
    %51 = vector.load %arg4[%c0_19, %c0_20] : memref<32x512xf32, #tpu.memory_space<vmem>>, vector<32x512xf32>
    %cst_21 = arith.constant dense<0.000000e+00> : vector<8x512xf32>
    %52 = tpu.matmul %50, %51, %cst_21 {dimension_numbers = #tpu.dot_dimension_numbers<[1], [0], [0], [1], [0, 0, 1, 1], [], []>, precision = #tpu.contract_precision<fp32>} : vector<8x32xf32>, vector<32x512xf32>, vector<8x512xf32> -> vector<8x512xf32>
    %53 = arith.addf %52, %9 : vector<8x512xf32>
    %54 = vector.extract_strided_slice %53 {offsets = [0, 0], sizes = [8, 384], strides = [1, 1]} : vector<8x512xf32> to vector<8x384xf32>
    %55 = arith.negf %54 : vector<8x384xf32>
    %56 = math.exp %55 : vector<8x384xf32>
    %cst_22 = arith.constant 1.000000e+00 : f32
    %57 = vector.broadcast %cst_22 : f32 to vector<8x384xf32>
    %58 = arith.addf %57, %56 : vector<8x384xf32>
    %59 = arith.divf %57, %58 : vector<8x384xf32>
    %60 = vector.extract_strided_slice %59 {offsets = [0, 0], sizes = [8, 128], strides = [1, 1]} : vector<8x384xf32> to vector<8x128xf32>
    %61 = vector.extract_strided_slice %59 {offsets = [0, 128], sizes = [8, 128], strides = [1, 1]} : vector<8x384xf32> to vector<8x128xf32>
    %62 = vector.extract_strided_slice %59 {offsets = [0, 256], sizes = [8, 128], strides = [1, 1]} : vector<8x384xf32> to vector<8x128xf32>
    %63 = vector.extract_strided_slice %53 {offsets = [0, 384], sizes = [8, 128], strides = [1, 1]} : vector<8x512xf32> to vector<8x128xf32>
    %64 = math.tanh %63 : vector<8x128xf32>
    %65 = arith.mulf %61, %11 : vector<8x128xf32>
    %66 = arith.mulf %60, %64 : vector<8x128xf32>
    %67 = arith.addf %65, %66 : vector<8x128xf32>
    %68 = math.tanh %67 : vector<8x128xf32>
    %69 = arith.mulf %62, %68 : vector<8x128xf32>
    %c0_23 = arith.constant 0 : index
    %c0_24 = arith.constant 0 : index
    %70 = vector.load %arg11[%c0_23, %c0_24] : memref<64x128xf32, #tpu.memory_space<vmem>>, vector<8x128xf32>
    tpu.vector_store %arg11[%c0_23, %c0_24], %69 {strides = array<i32>} : memref<64x128xf32, #tpu.memory_space<vmem>>, vector<8x128xf32>,
    %c16 = arith.constant 16 : index
    %c0_25 = arith.constant 0 : index
    %71 = vector.load %arg10[%c16, %c0_25] : memref<64x512xf32, #tpu.memory_space<vmem>>, vector<8x512xf32>
    %72 = vector.extract_strided_slice %49 {offsets = [0, 0], sizes = [8, 32], strides = [1, 1]} : vector<8x128xf32> to vector<8x32xf32>
    %c0_26 = arith.constant 0 : index
    %c0_27 = arith.constant 0 : index
    %73 = vector.load %arg2[%c0_26, %c0_27] : memref<32x512xf32, #tpu.memory_space<vmem>>, vector<32x512xf32>
    %cst_28 = arith.constant dense<0.000000e+00> : vector<8x512xf32>
    %74 = tpu.matmul %72, %73, %cst_28 {dimension_numbers = #tpu.dot_dimension_numbers<[1], [0], [0], [1], [0, 0, 1, 1], [], []>, precision = #tpu.contract_precision<fp32>} : vector<8x32xf32>, vector<32x512xf32>, vector<8x512xf32> -> vector<8x512xf32>
    %75 = arith.addf %71, %74 : vector<8x512xf32>
    %76 = vector.extract_strided_slice %75 {offsets = [0, 0], sizes = [8, 384], strides = [1, 1]} : vector<8x512xf32> to vector<8x384xf32>
    %77 = arith.negf %76 : vector<8x384xf32>
    %78 = math.exp %77 : vector<8x384xf32>
    %cst_29 = arith.constant 1.000000e+00 : f32
    %79 = vector.broadcast %cst_29 : f32 to vector<8x384xf32>
    %80 = arith.addf %79, %78 : vector<8x384xf32>
    %81 = arith.divf %79, %80 : vector<8x384xf32>
    %82 = vector.extract_strided_slice %81 {offsets = [0, 0], sizes = [8, 128], strides = [1, 1]} : vector<8x384xf32> to vector<8x128xf32>
    %83 = vector.extract_strided_slice %81 {offsets = [0, 128], sizes = [8, 128], strides = [1, 1]} : vector<8x384xf32> to vector<8x128xf32>
    %84 = vector.extract_strided_slice %81 {offsets = [0, 256], sizes = [8, 128], strides = [1, 1]} : vector<8x384xf32> to vector<8x128xf32>
    %85 = vector.extract_strided_slice %75 {offsets = [0, 384], sizes = [8, 128], strides = [1, 1]} : vector<8x512xf32> to vector<8x128xf32>
    %86 = math.tanh %85 : vector<8x128xf32>
    %87 = arith.mulf %83, %47 : vector<8x128xf32>
    %88 = arith.mulf %82, %86 : vector<8x128xf32>
    %89 = arith.addf %87, %88 : vector<8x128xf32>
    %90 = math.tanh %89 : vector<8x128xf32>
    %91 = arith.mulf %84, %90 : vector<8x128xf32>
    %92 = vector.extract_strided_slice %49 {offsets = [0, 0], sizes = [8, 32], strides = [1, 1]} : vector<8x128xf32> to vector<8x32xf32>
    %c0_30 = arith.constant 0 : index
    %c0_31 = arith.constant 0 : index
    %93 = vector.load %arg4[%c0_30, %c0_31] : memref<32x512xf32, #tpu.memory_space<vmem>>, vector<32x512xf32>
    %cst_32 = arith.constant dense<0.000000e+00> : vector<8x512xf32>
    %94 = tpu.matmul %92, %93, %cst_32 {dimension_numbers = #tpu.dot_dimension_numbers<[1], [0], [0], [1], [0, 0, 1, 1], [], []>, precision = #tpu.contract_precision<fp32>} : vector<8x32xf32>, vector<32x512xf32>, vector<8x512xf32> -> vector<8x512xf32>
    %95 = arith.addf %94, %9 : vector<8x512xf32>
    %96 = vector.extract_strided_slice %69 {offsets = [0, 0], sizes = [8, 32], strides = [1, 1]} : vector<8x128xf32> to vector<8x32xf32>
    %c0_33 = arith.constant 0 : index
    %c0_34 = arith.constant 0 : index
    %97 = vector.load %arg5[%c0_33, %c0_34] : memref<32x512xf32, #tpu.memory_space<vmem>>, vector<32x512xf32>
    %cst_35 = arith.constant dense<0.000000e+00> : vector<8x512xf32>
    %98 = tpu.matmul %96, %97, %cst_35 {dimension_numbers = #tpu.dot_dimension_numbers<[1], [0], [0], [1], [0, 0, 1, 1], [], []>, precision = #tpu.contract_precision<fp32>} : vector<8x32xf32>, vector<32x512xf32>, vector<8x512xf32> -> vector<8x512xf32>
    %99 = arith.addf %95, %98 : vector<8x512xf32>
    %100 = vector.extract_strided_slice %99 {offsets = [0, 0], sizes = [8, 384], strides = [1, 1]} : vector<8x512xf32> to vector<8x384xf32>
    %101 = arith.negf %100 : vector<8x384xf32>
    %102 = math.exp %101 : vector<8x384xf32>
    %cst_36 = arith.constant 1.000000e+00 : f32
    %103 = vector.broadcast %cst_36 : f32 to vector<8x384xf32>
    %104 = arith.addf %103, %102 : vector<8x384xf32>
    %105 = arith.divf %103, %104 : vector<8x384xf32>
    %106 = vector.extract_strided_slice %105 {offsets = [0, 0], sizes = [8, 128], strides = [1, 1]} : vector<8x384xf32> to vector<8x128xf32>
    %107 = vector.extract_strided_slice %105 {offsets = [0, 128], sizes = [8, 128], strides = [1, 1]} : vector<8x384xf32> to vector<8x128xf32>
    %108 = vector.extract_strided_slice %105 {offsets = [0, 256], sizes = [8, 128], strides = [1, 1]} : vector<8x384xf32> to vector<8x128xf32>
    %109 = vector.extract_strided_slice %99 {offsets = [0, 384], sizes = [8, 128], strides = [1, 1]} : vector<8x512xf32> to vector<8x128xf32>
    %110 = math.tanh %109 : vector<8x128xf32>
    %111 = arith.mulf %107, %67 : vector<8x128xf32>
    %112 = arith.mulf %106, %110 : vector<8x128xf32>
    %113 = arith.addf %111, %112 : vector<8x128xf32>
    %114 = math.tanh %113 : vector<8x128xf32>
    %115 = arith.mulf %108, %114 : vector<8x128xf32>
    %c8_37 = arith.constant 8 : index
    %c0_38 = arith.constant 0 : index
    %116 = vector.load %arg11[%c8_37, %c0_38] : memref<64x128xf32, #tpu.memory_space<vmem>>, vector<8x128xf32>
    tpu.vector_store %arg11[%c8_37, %c0_38], %115 {strides = array<i32>} : memref<64x128xf32, #tpu.memory_space<vmem>>, vector<8x128xf32>,
    %c24 = arith.constant 24 : index
    %c0_39 = arith.constant 0 : index
    %117 = vector.load %arg10[%c24, %c0_39] : memref<64x512xf32, #tpu.memory_space<vmem>>, vector<8x512xf32>
    %118 = vector.extract_strided_slice %91 {offsets = [0, 0], sizes = [8, 32], strides = [1, 1]} : vector<8x128xf32> to vector<8x32xf32>
    %c0_40 = arith.constant 0 : index
    %c0_41 = arith.constant 0 : index
    %119 = vector.load %arg2[%c0_40, %c0_41] : memref<32x512xf32, #tpu.memory_space<vmem>>, vector<32x512xf32>
    %cst_42 = arith.constant dense<0.000000e+00> : vector<8x512xf32>
    %120 = tpu.matmul %118, %119, %cst_42 {dimension_numbers = #tpu.dot_dimension_numbers<[1], [0], [0], [1], [0, 0, 1, 1], [], []>, precision = #tpu.contract_precision<fp32>} : vector<8x32xf32>, vector<32x512xf32>, vector<8x512xf32> -> vector<8x512xf32>
    %121 = arith.addf %117, %120 : vector<8x512xf32>
    %122 = vector.extract_strided_slice %121 {offsets = [0, 0], sizes = [8, 384], strides = [1, 1]} : vector<8x512xf32> to vector<8x384xf32>
    %123 = arith.negf %122 : vector<8x384xf32>
    %124 = math.exp %123 : vector<8x384xf32>
    %cst_43 = arith.constant 1.000000e+00 : f32
    %125 = vector.broadcast %cst_43 : f32 to vector<8x384xf32>
    %126 = arith.addf %125, %124 : vector<8x384xf32>
    %127 = arith.divf %125, %126 : vector<8x384xf32>
    %128 = vector.extract_strided_slice %127 {offsets = [0, 0], sizes = [8, 128], strides = [1, 1]} : vector<8x384xf32> to vector<8x128xf32>
    %129 = vector.extract_strided_slice %127 {offsets = [0, 128], sizes = [8, 128], strides = [1, 1]} : vector<8x384xf32> to vector<8x128xf32>
    %130 = vector.extract_strided_slice %127 {offsets = [0, 256], sizes = [8, 128], strides = [1, 1]} : vector<8x384xf32> to vector<8x128xf32>
    %131 = vector.extract_strided_slice %121 {offsets = [0, 384], sizes = [8, 128], strides = [1, 1]} : vector<8x512xf32> to vector<8x128xf32>
    %132 = math.tanh %131 : vector<8x128xf32>
    %133 = arith.mulf %129, %89 : vector<8x128xf32>
    %134 = arith.mulf %128, %132 : vector<8x128xf32>
    %135 = arith.addf %133, %134 : vector<8x128xf32>
    %136 = math.tanh %135 : vector<8x128xf32>
    %137 = arith.mulf %130, %136 : vector<8x128xf32>
    %138 = vector.extract_strided_slice %91 {offsets = [0, 0], sizes = [8, 32], strides = [1, 1]} : vector<8x128xf32> to vector<8x32xf32>
    %c0_44 = arith.constant 0 : index
    %c0_45 = arith.constant 0 : index
    %139 = vector.load %arg4[%c0_44, %c0_45] : memref<32x512xf32, #tpu.memory_space<vmem>>, vector<32x512xf32>
    %cst_46 = arith.constant dense<0.000000e+00> : vector<8x512xf32>
    %140 = tpu.matmul %138, %139, %cst_46 {dimension_numbers = #tpu.dot_dimension_numbers<[1], [0], [0], [1], [0, 0, 1, 1], [], []>, precision = #tpu.contract_precision<fp32>} : vector<8x32xf32>, vector<32x512xf32>, vector<8x512xf32> -> vector<8x512xf32>
    %141 = arith.addf %140, %9 : vector<8x512xf32>
    %142 = vector.extract_strided_slice %115 {offsets = [0, 0], sizes = [8, 32], strides = [1, 1]} : vector<8x128xf32> to vector<8x32xf32>
    %c0_47 = arith.constant 0 : index
    %c0_48 = arith.constant 0 : index
    %143 = vector.load %arg5[%c0_47, %c0_48] : memref<32x512xf32, #tpu.memory_space<vmem>>, vector<32x512xf32>
    %cst_49 = arith.constant dense<0.000000e+00> : vector<8x512xf32>
    %144 = tpu.matmul %142, %143, %cst_49 {dimension_numbers = #tpu.dot_dimension_numbers<[1], [0], [0], [1], [0, 0, 1, 1], [], []>, precision = #tpu.contract_precision<fp32>} : vector<8x32xf32>, vector<32x512xf32>, vector<8x512xf32> -> vector<8x512xf32>
    %145 = arith.addf %141, %144 : vector<8x512xf32>
    %146 = vector.extract_strided_slice %145 {offsets = [0, 0], sizes = [8, 384], strides = [1, 1]} : vector<8x512xf32> to vector<8x384xf32>
    %147 = arith.negf %146 : vector<8x384xf32>
    %148 = math.exp %147 : vector<8x384xf32>
    %cst_50 = arith.constant 1.000000e+00 : f32
    %149 = vector.broadcast %cst_50 : f32 to vector<8x384xf32>
    %150 = arith.addf %149, %148 : vector<8x384xf32>
    %151 = arith.divf %149, %150 : vector<8x384xf32>
    %152 = vector.extract_strided_slice %151 {offsets = [0, 0], sizes = [8, 128], strides = [1, 1]} : vector<8x384xf32> to vector<8x128xf32>
    %153 = vector.extract_strided_slice %151 {offsets = [0, 128], sizes = [8, 128], strides = [1, 1]} : vector<8x384xf32> to vector<8x128xf32>
    %154 = vector.extract_strided_slice %151 {offsets = [0, 256], sizes = [8, 128], strides = [1, 1]} : vector<8x384xf32> to vector<8x128xf32>
    %155 = vector.extract_strided_slice %145 {offsets = [0, 384], sizes = [8, 128], strides = [1, 1]} : vector<8x512xf32> to vector<8x128xf32>
    %156 = math.tanh %155 : vector<8x128xf32>
    %157 = arith.mulf %153, %113 : vector<8x128xf32>
    %158 = arith.mulf %152, %156 : vector<8x128xf32>
    %159 = arith.addf %157, %158 : vector<8x128xf32>
    %160 = math.tanh %159 : vector<8x128xf32>
    %161 = arith.mulf %154, %160 : vector<8x128xf32>
    %c16_51 = arith.constant 16 : index
    %c0_52 = arith.constant 0 : index
    %162 = vector.load %arg11[%c16_51, %c0_52] : memref<64x128xf32, #tpu.memory_space<vmem>>, vector<8x128xf32>
    tpu.vector_store %arg11[%c16_51, %c0_52], %161 {strides = array<i32>} : memref<64x128xf32, #tpu.memory_space<vmem>>, vector<8x128xf32>,
    %c32 = arith.constant 32 : index
    %c0_53 = arith.constant 0 : index
    %163 = vector.load %arg10[%c32, %c0_53] : memref<64x512xf32, #tpu.memory_space<vmem>>, vector<8x512xf32>
    %164 = vector.extract_strided_slice %137 {offsets = [0, 0], sizes = [8, 32], strides = [1, 1]} : vector<8x128xf32> to vector<8x32xf32>
    %c0_54 = arith.constant 0 : index
    %c0_55 = arith.constant 0 : index
    %165 = vector.load %arg2[%c0_54, %c0_55] : memref<32x512xf32, #tpu.memory_space<vmem>>, vector<32x512xf32>
    %cst_56 = arith.constant dense<0.000000e+00> : vector<8x512xf32>
    %166 = tpu.matmul %164, %165, %cst_56 {dimension_numbers = #tpu.dot_dimension_numbers<[1], [0], [0], [1], [0, 0, 1, 1], [], []>, precision = #tpu.contract_precision<fp32>} : vector<8x32xf32>, vector<32x512xf32>, vector<8x512xf32> -> vector<8x512xf32>
    %167 = arith.addf %163, %166 : vector<8x512xf32>
    %168 = vector.extract_strided_slice %167 {offsets = [0, 0], sizes = [8, 384], strides = [1, 1]} : vector<8x512xf32> to vector<8x384xf32>
    %169 = arith.negf %168 : vector<8x384xf32>
    %170 = math.exp %169 : vector<8x384xf32>
    %cst_57 = arith.constant 1.000000e+00 : f32
    %171 = vector.broadcast %cst_57 : f32 to vector<8x384xf32>
    %172 = arith.addf %171, %170 : vector<8x384xf32>
    %173 = arith.divf %171, %172 : vector<8x384xf32>
    %174 = vector.extract_strided_slice %173 {offsets = [0, 0], sizes = [8, 128], strides = [1, 1]} : vector<8x384xf32> to vector<8x128xf32>
    %175 = vector.extract_strided_slice %173 {offsets = [0, 128], sizes = [8, 128], strides = [1, 1]} : vector<8x384xf32> to vector<8x128xf32>
    %176 = vector.extract_strided_slice %173 {offsets = [0, 256], sizes = [8, 128], strides = [1, 1]} : vector<8x384xf32> to vector<8x128xf32>
    %177 = vector.extract_strided_slice %167 {offsets = [0, 384], sizes = [8, 128], strides = [1, 1]} : vector<8x512xf32> to vector<8x128xf32>
    %178 = math.tanh %177 : vector<8x128xf32>
    %179 = arith.mulf %175, %135 : vector<8x128xf32>
    %180 = arith.mulf %174, %178 : vector<8x128xf32>
    %181 = arith.addf %179, %180 : vector<8x128xf32>
    %182 = math.tanh %181 : vector<8x128xf32>
    %183 = arith.mulf %176, %182 : vector<8x128xf32>
    %184 = vector.extract_strided_slice %137 {offsets = [0, 0], sizes = [8, 32], strides = [1, 1]} : vector<8x128xf32> to vector<8x32xf32>
    %c0_58 = arith.constant 0 : index
    %c0_59 = arith.constant 0 : index
    %185 = vector.load %arg4[%c0_58, %c0_59] : memref<32x512xf32, #tpu.memory_space<vmem>>, vector<32x512xf32>
    %cst_60 = arith.constant dense<0.000000e+00> : vector<8x512xf32>
    %186 = tpu.matmul %184, %185, %cst_60 {dimension_numbers = #tpu.dot_dimension_numbers<[1], [0], [0], [1], [0, 0, 1, 1], [], []>, precision = #tpu.contract_precision<fp32>} : vector<8x32xf32>, vector<32x512xf32>, vector<8x512xf32> -> vector<8x512xf32>
    %187 = arith.addf %186, %9 : vector<8x512xf32>
    %188 = vector.extract_strided_slice %161 {offsets = [0, 0], sizes = [8, 32], strides = [1, 1]} : vector<8x128xf32> to vector<8x32xf32>
    %c0_61 = arith.constant 0 : index
    %c0_62 = arith.constant 0 : index
    %189 = vector.load %arg5[%c0_61, %c0_62] : memref<32x512xf32, #tpu.memory_space<vmem>>, vector<32x512xf32>
    %cst_63 = arith.constant dense<0.000000e+00> : vector<8x512xf32>
    %190 = tpu.matmul %188, %189, %cst_63 {dimension_numbers = #tpu.dot_dimension_numbers<[1], [0], [0], [1], [0, 0, 1, 1], [], []>, precision = #tpu.contract_precision<fp32>} : vector<8x32xf32>, vector<32x512xf32>, vector<8x512xf32> -> vector<8x512xf32>
    %191 = arith.addf %187, %190 : vector<8x512xf32>
    %192 = vector.extract_strided_slice %191 {offsets = [0, 0], sizes = [8, 384], strides = [1, 1]} : vector<8x512xf32> to vector<8x384xf32>
    %193 = arith.negf %192 : vector<8x384xf32>
    %194 = math.exp %193 : vector<8x384xf32>
    %cst_64 = arith.constant 1.000000e+00 : f32
    %195 = vector.broadcast %cst_64 : f32 to vector<8x384xf32>
    %196 = arith.addf %195, %194 : vector<8x384xf32>
    %197 = arith.divf %195, %196 : vector<8x384xf32>
    %198 = vector.extract_strided_slice %197 {offsets = [0, 0], sizes = [8, 128], strides = [1, 1]} : vector<8x384xf32> to vector<8x128xf32>
    %199 = vector.extract_strided_slice %197 {offsets = [0, 128], sizes = [8, 128], strides = [1, 1]} : vector<8x384xf32> to vector<8x128xf32>
    %200 = vector.extract_strided_slice %197 {offsets = [0, 256], sizes = [8, 128], strides = [1, 1]} : vector<8x384xf32> to vector<8x128xf32>
    %201 = vector.extract_strided_slice %191 {offsets = [0, 384], sizes = [8, 128], strides = [1, 1]} : vector<8x512xf32> to vector<8x128xf32>
    %202 = math.tanh %201 : vector<8x128xf32>
    %203 = arith.mulf %199, %159 : vector<8x128xf32>
    %204 = arith.mulf %198, %202 : vector<8x128xf32>
    %205 = arith.addf %203, %204 : vector<8x128xf32>
    %206 = math.tanh %205 : vector<8x128xf32>
    %207 = arith.mulf %200, %206 : vector<8x128xf32>
    %c24_65 = arith.constant 24 : index
    %c0_66 = arith.constant 0 : index
    %208 = vector.load %arg11[%c24_65, %c0_66] : memref<64x128xf32, #tpu.memory_space<vmem>>, vector<8x128xf32>
    tpu.vector_store %arg11[%c24_65, %c0_66], %207 {strides = array<i32>} : memref<64x128xf32, #tpu.memory_space<vmem>>, vector<8x128xf32>,
    %c40 = arith.constant 40 : index
    %c0_67 = arith.constant 0 : index
    %209 = vector.load %arg10[%c40, %c0_67] : memref<64x512xf32, #tpu.memory_space<vmem>>, vector<8x512xf32>
    %210 = vector.extract_strided_slice %183 {offsets = [0, 0], sizes = [8, 32], strides = [1, 1]} : vector<8x128xf32> to vector<8x32xf32>
    %c0_68 = arith.constant 0 : index
    %c0_69 = arith.constant 0 : index
    %211 = vector.load %arg2[%c0_68, %c0_69] : memref<32x512xf32, #tpu.memory_space<vmem>>, vector<32x512xf32>
    %cst_70 = arith.constant dense<0.000000e+00> : vector<8x512xf32>
    %212 = tpu.matmul %210, %211, %cst_70 {dimension_numbers = #tpu.dot_dimension_numbers<[1], [0], [0], [1], [0, 0, 1, 1], [], []>, precision = #tpu.contract_precision<fp32>} : vector<8x32xf32>, vector<32x512xf32>, vector<8x512xf32> -> vector<8x512xf32>
    %213 = arith.addf %209, %212 : vector<8x512xf32>
    %214 = vector.extract_strided_slice %213 {offsets = [0, 0], sizes = [8, 384], strides = [1, 1]} : vector<8x512xf32> to vector<8x384xf32>
    %215 = arith.negf %214 : vector<8x384xf32>
    %216 = math.exp %215 : vector<8x384xf32>
    %cst_71 = arith.constant 1.000000e+00 : f32
    %217 = vector.broadcast %cst_71 : f32 to vector<8x384xf32>
    %218 = arith.addf %217, %216 : vector<8x384xf32>
    %219 = arith.divf %217, %218 : vector<8x384xf32>
    %220 = vector.extract_strided_slice %219 {offsets = [0, 0], sizes = [8, 128], strides = [1, 1]} : vector<8x384xf32> to vector<8x128xf32>
    %221 = vector.extract_strided_slice %219 {offsets = [0, 128], sizes = [8, 128], strides = [1, 1]} : vector<8x384xf32> to vector<8x128xf32>
    %222 = vector.extract_strided_slice %219 {offsets = [0, 256], sizes = [8, 128], strides = [1, 1]} : vector<8x384xf32> to vector<8x128xf32>
    %223 = vector.extract_strided_slice %213 {offsets = [0, 384], sizes = [8, 128], strides = [1, 1]} : vector<8x512xf32> to vector<8x128xf32>
    %224 = math.tanh %223 : vector<8x128xf32>
    %225 = arith.mulf %221, %181 : vector<8x128xf32>
    %226 = arith.mulf %220, %224 : vector<8x128xf32>
    %227 = arith.addf %225, %226 : vector<8x128xf32>
    %228 = math.tanh %227 : vector<8x128xf32>
    %229 = arith.mulf %222, %228 : vector<8x128xf32>
    %230 = vector.extract_strided_slice %183 {offsets = [0, 0], sizes = [8, 32], strides = [1, 1]} : vector<8x128xf32> to vector<8x32xf32>
    %c0_72 = arith.constant 0 : index
    %c0_73 = arith.constant 0 : index
    %231 = vector.load %arg4[%c0_72, %c0_73] : memref<32x512xf32, #tpu.memory_space<vmem>>, vector<32x512xf32>
    %cst_74 = arith.constant dense<0.000000e+00> : vector<8x512xf32>
    %232 = tpu.matmul %230, %231, %cst_74 {dimension_numbers = #tpu.dot_dimension_numbers<[1], [0], [0], [1], [0, 0, 1, 1], [], []>, precision = #tpu.contract_precision<fp32>} : vector<8x32xf32>, vector<32x512xf32>, vector<8x512xf32> -> vector<8x512xf32>
    %233 = arith.addf %232, %9 : vector<8x512xf32>
    %234 = vector.extract_strided_slice %207 {offsets = [0, 0], sizes = [8, 32], strides = [1, 1]} : vector<8x128xf32> to vector<8x32xf32>
    %c0_75 = arith.constant 0 : index
    %c0_76 = arith.constant 0 : index
    %235 = vector.load %arg5[%c0_75, %c0_76] : memref<32x512xf32, #tpu.memory_space<vmem>>, vector<32x512xf32>
    %cst_77 = arith.constant dense<0.000000e+00> : vector<8x512xf32>
    %236 = tpu.matmul %234, %235, %cst_77 {dimension_numbers = #tpu.dot_dimension_numbers<[1], [0], [0], [1], [0, 0, 1, 1], [], []>, precision = #tpu.contract_precision<fp32>} : vector<8x32xf32>, vector<32x512xf32>, vector<8x512xf32> -> vector<8x512xf32>
    %237 = arith.addf %233, %236 : vector<8x512xf32>
    %238 = vector.extract_strided_slice %237 {offsets = [0, 0], sizes = [8, 384], strides = [1, 1]} : vector<8x512xf32> to vector<8x384xf32>
    %239 = arith.negf %238 : vector<8x384xf32>
    %240 = math.exp %239 : vector<8x384xf32>
    %cst_78 = arith.constant 1.000000e+00 : f32
    %241 = vector.broadcast %cst_78 : f32 to vector<8x384xf32>
    %242 = arith.addf %241, %240 : vector<8x384xf32>
    %243 = arith.divf %241, %242 : vector<8x384xf32>
    %244 = vector.extract_strided_slice %243 {offsets = [0, 0], sizes = [8, 128], strides = [1, 1]} : vector<8x384xf32> to vector<8x128xf32>
    %245 = vector.extract_strided_slice %243 {offsets = [0, 128], sizes = [8, 128], strides = [1, 1]} : vector<8x384xf32> to vector<8x128xf32>
    %246 = vector.extract_strided_slice %243 {offsets = [0, 256], sizes = [8, 128], strides = [1, 1]} : vector<8x384xf32> to vector<8x128xf32>
    %247 = vector.extract_strided_slice %237 {offsets = [0, 384], sizes = [8, 128], strides = [1, 1]} : vector<8x512xf32> to vector<8x128xf32>
    %248 = math.tanh %247 : vector<8x128xf32>
    %249 = arith.mulf %245, %205 : vector<8x128xf32>
    %250 = arith.mulf %244, %248 : vector<8x128xf32>
    %251 = arith.addf %249, %250 : vector<8x128xf32>
    %252 = math.tanh %251 : vector<8x128xf32>
    %253 = arith.mulf %246, %252 : vector<8x128xf32>
    %c32_79 = arith.constant 32 : index
    %c0_80 = arith.constant 0 : index
    %254 = vector.load %arg11[%c32_79, %c0_80] : memref<64x128xf32, #tpu.memory_space<vmem>>, vector<8x128xf32>
    tpu.vector_store %arg11[%c32_79, %c0_80], %253 {strides = array<i32>} : memref<64x128xf32, #tpu.memory_space<vmem>>, vector<8x128xf32>,
    %c48 = arith.constant 48 : index
    %c0_81 = arith.constant 0 : index
    %255 = vector.load %arg10[%c48, %c0_81] : memref<64x512xf32, #tpu.memory_space<vmem>>, vector<8x512xf32>
    %256 = vector.extract_strided_slice %229 {offsets = [0, 0], sizes = [8, 32], strides = [1, 1]} : vector<8x128xf32> to vector<8x32xf32>
    %c0_82 = arith.constant 0 : index
    %c0_83 = arith.constant 0 : index
    %257 = vector.load %arg2[%c0_82, %c0_83] : memref<32x512xf32, #tpu.memory_space<vmem>>, vector<32x512xf32>
    %cst_84 = arith.constant dense<0.000000e+00> : vector<8x512xf32>
    %258 = tpu.matmul %256, %257, %cst_84 {dimension_numbers = #tpu.dot_dimension_numbers<[1], [0], [0], [1], [0, 0, 1, 1], [], []>, precision = #tpu.contract_precision<fp32>} : vector<8x32xf32>, vector<32x512xf32>, vector<8x512xf32> -> vector<8x512xf32>
    %259 = arith.addf %255, %258 : vector<8x512xf32>
    %260 = vector.extract_strided_slice %259 {offsets = [0, 0], sizes = [8, 384], strides = [1, 1]} : vector<8x512xf32> to vector<8x384xf32>
    %261 = arith.negf %260 : vector<8x384xf32>
    %262 = math.exp %261 : vector<8x384xf32>
    %cst_85 = arith.constant 1.000000e+00 : f32
    %263 = vector.broadcast %cst_85 : f32 to vector<8x384xf32>
    %264 = arith.addf %263, %262 : vector<8x384xf32>
    %265 = arith.divf %263, %264 : vector<8x384xf32>
    %266 = vector.extract_strided_slice %265 {offsets = [0, 0], sizes = [8, 128], strides = [1, 1]} : vector<8x384xf32> to vector<8x128xf32>
    %267 = vector.extract_strided_slice %265 {offsets = [0, 128], sizes = [8, 128], strides = [1, 1]} : vector<8x384xf32> to vector<8x128xf32>
    %268 = vector.extract_strided_slice %265 {offsets = [0, 256], sizes = [8, 128], strides = [1, 1]} : vector<8x384xf32> to vector<8x128xf32>
    %269 = vector.extract_strided_slice %259 {offsets = [0, 384], sizes = [8, 128], strides = [1, 1]} : vector<8x512xf32> to vector<8x128xf32>
    %270 = math.tanh %269 : vector<8x128xf32>
    %271 = arith.mulf %267, %227 : vector<8x128xf32>
    %272 = arith.mulf %266, %270 : vector<8x128xf32>
    %273 = arith.addf %271, %272 : vector<8x128xf32>
    %274 = math.tanh %273 : vector<8x128xf32>
    %275 = arith.mulf %268, %274 : vector<8x128xf32>
    %276 = vector.extract_strided_slice %229 {offsets = [0, 0], sizes = [8, 32], strides = [1, 1]} : vector<8x128xf32> to vector<8x32xf32>
    %c0_86 = arith.constant 0 : index
    %c0_87 = arith.constant 0 : index
    %277 = vector.load %arg4[%c0_86, %c0_87] : memref<32x512xf32, #tpu.memory_space<vmem>>, vector<32x512xf32>
    %cst_88 = arith.constant dense<0.000000e+00> : vector<8x512xf32>
    %278 = tpu.matmul %276, %277, %cst_88 {dimension_numbers = #tpu.dot_dimension_numbers<[1], [0], [0], [1], [0, 0, 1, 1], [], []>, precision = #tpu.contract_precision<fp32>} : vector<8x32xf32>, vector<32x512xf32>, vector<8x512xf32> -> vector<8x512xf32>
    %279 = arith.addf %278, %9 : vector<8x512xf32>
    %280 = vector.extract_strided_slice %253 {offsets = [0, 0], sizes = [8, 32], strides = [1, 1]} : vector<8x128xf32> to vector<8x32xf32>
    %c0_89 = arith.constant 0 : index
    %c0_90 = arith.constant 0 : index
    %281 = vector.load %arg5[%c0_89, %c0_90] : memref<32x512xf32, #tpu.memory_space<vmem>>, vector<32x512xf32>
    %cst_91 = arith.constant dense<0.000000e+00> : vector<8x512xf32>
    %282 = tpu.matmul %280, %281, %cst_91 {dimension_numbers = #tpu.dot_dimension_numbers<[1], [0], [0], [1], [0, 0, 1, 1], [], []>, precision = #tpu.contract_precision<fp32>} : vector<8x32xf32>, vector<32x512xf32>, vector<8x512xf32> -> vector<8x512xf32>
    %283 = arith.addf %279, %282 : vector<8x512xf32>
    %284 = vector.extract_strided_slice %283 {offsets = [0, 0], sizes = [8, 384], strides = [1, 1]} : vector<8x512xf32> to vector<8x384xf32>
    %285 = arith.negf %284 : vector<8x384xf32>
    %286 = math.exp %285 : vector<8x384xf32>
    %cst_92 = arith.constant 1.000000e+00 : f32
    %287 = vector.broadcast %cst_92 : f32 to vector<8x384xf32>
    %288 = arith.addf %287, %286 : vector<8x384xf32>
    %289 = arith.divf %287, %288 : vector<8x384xf32>
    %290 = vector.extract_strided_slice %289 {offsets = [0, 0], sizes = [8, 128], strides = [1, 1]} : vector<8x384xf32> to vector<8x128xf32>
    %291 = vector.extract_strided_slice %289 {offsets = [0, 128], sizes = [8, 128], strides = [1, 1]} : vector<8x384xf32> to vector<8x128xf32>
    %292 = vector.extract_strided_slice %289 {offsets = [0, 256], sizes = [8, 128], strides = [1, 1]} : vector<8x384xf32> to vector<8x128xf32>
    %293 = vector.extract_strided_slice %283 {offsets = [0, 384], sizes = [8, 128], strides = [1, 1]} : vector<8x512xf32> to vector<8x128xf32>
    %294 = math.tanh %293 : vector<8x128xf32>
    %295 = arith.mulf %291, %251 : vector<8x128xf32>
    %296 = arith.mulf %290, %294 : vector<8x128xf32>
    %297 = arith.addf %295, %296 : vector<8x128xf32>
    %298 = math.tanh %297 : vector<8x128xf32>
    %299 = arith.mulf %292, %298 : vector<8x128xf32>
    %c40_93 = arith.constant 40 : index
    %c0_94 = arith.constant 0 : index
    %300 = vector.load %arg11[%c40_93, %c0_94] : memref<64x128xf32, #tpu.memory_space<vmem>>, vector<8x128xf32>
    tpu.vector_store %arg11[%c40_93, %c0_94], %299 {strides = array<i32>} : memref<64x128xf32, #tpu.memory_space<vmem>>, vector<8x128xf32>,
    %c56 = arith.constant 56 : index
    %c0_95 = arith.constant 0 : index
    %301 = vector.load %arg10[%c56, %c0_95] : memref<64x512xf32, #tpu.memory_space<vmem>>, vector<8x512xf32>
    %302 = vector.extract_strided_slice %275 {offsets = [0, 0], sizes = [8, 32], strides = [1, 1]} : vector<8x128xf32> to vector<8x32xf32>
    %c0_96 = arith.constant 0 : index
    %c0_97 = arith.constant 0 : index
    %303 = vector.load %arg2[%c0_96, %c0_97] : memref<32x512xf32, #tpu.memory_space<vmem>>, vector<32x512xf32>
    %cst_98 = arith.constant dense<0.000000e+00> : vector<8x512xf32>
    %304 = tpu.matmul %302, %303, %cst_98 {dimension_numbers = #tpu.dot_dimension_numbers<[1], [0], [0], [1], [0, 0, 1, 1], [], []>, precision = #tpu.contract_precision<fp32>} : vector<8x32xf32>, vector<32x512xf32>, vector<8x512xf32> -> vector<8x512xf32>
    %305 = arith.addf %301, %304 : vector<8x512xf32>
    %306 = vector.extract_strided_slice %305 {offsets = [0, 0], sizes = [8, 384], strides = [1, 1]} : vector<8x512xf32> to vector<8x384xf32>
    %307 = arith.negf %306 : vector<8x384xf32>
    %308 = math.exp %307 : vector<8x384xf32>
    %cst_99 = arith.constant 1.000000e+00 : f32
    %309 = vector.broadcast %cst_99 : f32 to vector<8x384xf32>
    %310 = arith.addf %309, %308 : vector<8x384xf32>
    %311 = arith.divf %309, %310 : vector<8x384xf32>
    %312 = vector.extract_strided_slice %311 {offsets = [0, 0], sizes = [8, 128], strides = [1, 1]} : vector<8x384xf32> to vector<8x128xf32>
    %313 = vector.extract_strided_slice %311 {offsets = [0, 128], sizes = [8, 128], strides = [1, 1]} : vector<8x384xf32> to vector<8x128xf32>
    %314 = vector.extract_strided_slice %311 {offsets = [0, 256], sizes = [8, 128], strides = [1, 1]} : vector<8x384xf32> to vector<8x128xf32>
    %315 = vector.extract_strided_slice %305 {offsets = [0, 384], sizes = [8, 128], strides = [1, 1]} : vector<8x512xf32> to vector<8x128xf32>
    %316 = math.tanh %315 : vector<8x128xf32>
    %317 = arith.mulf %313, %273 : vector<8x128xf32>
    %318 = arith.mulf %312, %316 : vector<8x128xf32>
    %319 = arith.addf %317, %318 : vector<8x128xf32>
    %320 = math.tanh %319 : vector<8x128xf32>
    %321 = arith.mulf %314, %320 : vector<8x128xf32>
    %322 = vector.extract_strided_slice %275 {offsets = [0, 0], sizes = [8, 32], strides = [1, 1]} : vector<8x128xf32> to vector<8x32xf32>
    %c0_100 = arith.constant 0 : index
    %c0_101 = arith.constant 0 : index
    %323 = vector.load %arg4[%c0_100, %c0_101] : memref<32x512xf32, #tpu.memory_space<vmem>>, vector<32x512xf32>
    %cst_102 = arith.constant dense<0.000000e+00> : vector<8x512xf32>
    %324 = tpu.matmul %322, %323, %cst_102 {dimension_numbers = #tpu.dot_dimension_numbers<[1], [0], [0], [1], [0, 0, 1, 1], [], []>, precision = #tpu.contract_precision<fp32>} : vector<8x32xf32>, vector<32x512xf32>, vector<8x512xf32> -> vector<8x512xf32>
    %325 = arith.addf %324, %9 : vector<8x512xf32>
    %326 = vector.extract_strided_slice %299 {offsets = [0, 0], sizes = [8, 32], strides = [1, 1]} : vector<8x128xf32> to vector<8x32xf32>
    %c0_103 = arith.constant 0 : index
    %c0_104 = arith.constant 0 : index
    %327 = vector.load %arg5[%c0_103, %c0_104] : memref<32x512xf32, #tpu.memory_space<vmem>>, vector<32x512xf32>
    %cst_105 = arith.constant dense<0.000000e+00> : vector<8x512xf32>
    %328 = tpu.matmul %326, %327, %cst_105 {dimension_numbers = #tpu.dot_dimension_numbers<[1], [0], [0], [1], [0, 0, 1, 1], [], []>, precision = #tpu.contract_precision<fp32>} : vector<8x32xf32>, vector<32x512xf32>, vector<8x512xf32> -> vector<8x512xf32>
    %329 = arith.addf %325, %328 : vector<8x512xf32>
    %330 = vector.extract_strided_slice %329 {offsets = [0, 0], sizes = [8, 384], strides = [1, 1]} : vector<8x512xf32> to vector<8x384xf32>
    %331 = arith.negf %330 : vector<8x384xf32>
    %332 = math.exp %331 : vector<8x384xf32>
    %cst_106 = arith.constant 1.000000e+00 : f32
    %333 = vector.broadcast %cst_106 : f32 to vector<8x384xf32>
    %334 = arith.addf %333, %332 : vector<8x384xf32>
    %335 = arith.divf %333, %334 : vector<8x384xf32>
    %336 = vector.extract_strided_slice %335 {offsets = [0, 0], sizes = [8, 128], strides = [1, 1]} : vector<8x384xf32> to vector<8x128xf32>
    %337 = vector.extract_strided_slice %335 {offsets = [0, 128], sizes = [8, 128], strides = [1, 1]} : vector<8x384xf32> to vector<8x128xf32>
    %338 = vector.extract_strided_slice %335 {offsets = [0, 256], sizes = [8, 128], strides = [1, 1]} : vector<8x384xf32> to vector<8x128xf32>
    %339 = vector.extract_strided_slice %329 {offsets = [0, 384], sizes = [8, 128], strides = [1, 1]} : vector<8x512xf32> to vector<8x128xf32>
    %340 = math.tanh %339 : vector<8x128xf32>
    %341 = arith.mulf %337, %297 : vector<8x128xf32>
    %342 = arith.mulf %336, %340 : vector<8x128xf32>
    %343 = arith.addf %341, %342 : vector<8x128xf32>
    %344 = math.tanh %343 : vector<8x128xf32>
    %345 = arith.mulf %338, %344 : vector<8x128xf32>
    %c48_107 = arith.constant 48 : index
    %c0_108 = arith.constant 0 : index
    %346 = vector.load %arg11[%c48_107, %c0_108] : memref<64x128xf32, #tpu.memory_space<vmem>>, vector<8x128xf32>
    tpu.vector_store %arg11[%c48_107, %c0_108], %345 {strides = array<i32>} : memref<64x128xf32, #tpu.memory_space<vmem>>, vector<8x128xf32>,
    %347 = vector.extract_strided_slice %321 {offsets = [0, 0], sizes = [8, 32], strides = [1, 1]} : vector<8x128xf32> to vector<8x32xf32>
    %c0_109 = arith.constant 0 : index
    %c0_110 = arith.constant 0 : index
    %348 = vector.load %arg4[%c0_109, %c0_110] : memref<32x512xf32, #tpu.memory_space<vmem>>, vector<32x512xf32>
    %cst_111 = arith.constant dense<0.000000e+00> : vector<8x512xf32>
    %349 = tpu.matmul %347, %348, %cst_111 {dimension_numbers = #tpu.dot_dimension_numbers<[1], [0], [0], [1], [0, 0, 1, 1], [], []>, precision = #tpu.contract_precision<fp32>} : vector<8x32xf32>, vector<32x512xf32>, vector<8x512xf32> -> vector<8x512xf32>
    %350 = arith.addf %349, %9 : vector<8x512xf32>
    %351 = vector.extract_strided_slice %345 {offsets = [0, 0], sizes = [8, 32], strides = [1, 1]} : vector<8x128xf32> to vector<8x32xf32>
    %c0_112 = arith.constant 0 : index
    %c0_113 = arith.constant 0 : index
    %352 = vector.load %arg5[%c0_112, %c0_113] : memref<32x512xf32, #tpu.memory_space<vmem>>, vector<32x512xf32>
    %cst_114 = arith.constant dense<0.000000e+00> : vector<8x512xf32>
    %353 = tpu.matmul %351, %352, %cst_114 {dimension_numbers = #tpu.dot_dimension_numbers<[1], [0], [0], [1], [0, 0, 1, 1], [], []>, precision = #tpu.contract_precision<fp32>} : vector<8x32xf32>, vector<32x512xf32>, vector<8x512xf32> -> vector<8x512xf32>
    %354 = arith.addf %350, %353 : vector<8x512xf32>
    %355 = vector.extract_strided_slice %354 {offsets = [0, 0], sizes = [8, 384], strides = [1, 1]} : vector<8x512xf32> to vector<8x384xf32>
    %356 = arith.negf %355 : vector<8x384xf32>
    %357 = math.exp %356 : vector<8x384xf32>
    %cst_115 = arith.constant 1.000000e+00 : f32
    %358 = vector.broadcast %cst_115 : f32 to vector<8x384xf32>
    %359 = arith.addf %358, %357 : vector<8x384xf32>
    %360 = arith.divf %358, %359 : vector<8x384xf32>
    %361 = vector.extract_strided_slice %360 {offsets = [0, 0], sizes = [8, 128], strides = [1, 1]} : vector<8x384xf32> to vector<8x128xf32>
    %362 = vector.extract_strided_slice %360 {offsets = [0, 128], sizes = [8, 128], strides = [1, 1]} : vector<8x384xf32> to vector<8x128xf32>
    %363 = vector.extract_strided_slice %360 {offsets = [0, 256], sizes = [8, 128], strides = [1, 1]} : vector<8x384xf32> to vector<8x128xf32>
    %364 = vector.extract_strided_slice %354 {offsets = [0, 384], sizes = [8, 128], strides = [1, 1]} : vector<8x512xf32> to vector<8x128xf32>
    %365 = math.tanh %364 : vector<8x128xf32>
    %366 = arith.mulf %362, %343 : vector<8x128xf32>
    %367 = arith.mulf %361, %365 : vector<8x128xf32>
    %368 = arith.addf %366, %367 : vector<8x128xf32>
    %369 = math.tanh %368 : vector<8x128xf32>
    %370 = arith.mulf %363, %369 : vector<8x128xf32>
    %c56_116 = arith.constant 56 : index
    %c0_117 = arith.constant 0 : index
    %371 = vector.load %arg11[%c56_116, %c0_117] : memref<64x128xf32, #tpu.memory_space<vmem>>, vector<8x128xf32>
    tpu.vector_store %arg11[%c56_116, %c0_117], %370 {strides = array<i32>} : memref<64x128xf32, #tpu.memory_space<vmem>>, vector<8x128xf32>,
    %c0_118 = arith.constant 0 : index
    %c0_119 = arith.constant 0 : index
    %372 = vector.load %arg11[%c0_118, %c0_119] : memref<64x128xf32, #tpu.memory_space<vmem>>, vector<64x128xf32>
    %373 = vector.extract_strided_slice %372 {offsets = [0, 0], sizes = [64, 32], strides = [1, 1]} : vector<64x128xf32> to vector<64x32xf32>
    %c0_120 = arith.constant 0 : index
    %c0_121 = arith.constant 0 : index
    %374 = vector.load %arg7[%c0_120, %c0_121] : memref<32x128xf32, #tpu.memory_space<vmem>>, vector<32x128xf32>
    %cst_122 = arith.constant dense<0.000000e+00> : vector<64x128xf32>
    %375 = tpu.matmul %373, %374, %cst_122 {dimension_numbers = #tpu.dot_dimension_numbers<[1], [0], [0], [1], [0, 0, 1, 1], [], []>, precision = #tpu.contract_precision<fp32>} : vector<64x32xf32>, vector<32x128xf32>, vector<64x128xf32> -> vector<64x128xf32>
    %c0_123 = arith.constant 0 : index
    %c0_124 = arith.constant 0 : index
    %376 = vector.load %arg8[%c0_123, %c0_124] : memref<1x128xf32, #tpu.memory_space<vmem>>, vector<1x128xf32>
    %377 = vector.broadcast %376 : vector<1x128xf32> to vector<64x128xf32>
    %378 = arith.addf %375, %377 : vector<64x128xf32>
    %c0_125 = arith.constant 0 : index
    %c0_126 = arith.constant 0 : index
    %379 = vector.load %arg9[%c0_125, %c0_126] : memref<64x128xf32, #tpu.memory_space<vmem>>, vector<64x128xf32>
    tpu.vector_store %arg9[%c0_125, %c0_126], %378 {strides = array<i32>} : memref<64x128xf32, #tpu.memory_space<vmem>>, vector<64x128xf32>,
    return
  }
}

</mosaic_0001>

<bundles_post_ra>
// kernel: lstm_model_forward.1
= control target key start
LH: loop header
LB: loop body
LE: loop exit
PB: predicated region body
PF: predicated region fallthrough
CT: control target
= control target key end

     0   :  { %14 = vsyncpa [#allocation5], 0  ;;  %s36668_s0 = inlined_call_operand.vmem [shape: f32[64,16], index: 0, kind: input, shape index: {}]   ;;  %s36669_s1 = inlined_call_operand.hbm [shape: f32[16,512], index: 1, kind: input, shape index: {}]   ;;  %s36670_s2 = inlined_call_operand.vmem [shape: f32[32,512], index: 2, kind: input, shape index: {}]   ;;  %s36671_s3 = inlined_call_operand.vmem [shape: f32[1,512], index: 3, kind: input, shape index: {}]   ;;  %s36672_s4 = inlined_call_operand.hbm [shape: f32[32,512], index: 4, kind: input, shape index: {}]   ;;  %s36673_s5 = inlined_call_operand.hbm [shape: f32[32,512], index: 5, kind: input, shape index: {}]   ;;  %s36674_s6 = inlined_call_operand.vmem [shape: f32[1,512], index: 6, kind: input, shape index: {}]   ;;  %s36675_s7 = inlined_call_operand.vmem [shape: f32[32,128], index: 7, kind: input, shape index: {}]   ;;  %s36676_s8 = inlined_call_operand.vmem [shape: f32[1,128], index: 8, kind: input, shape index: {}]   ;;  %s36677_s9 = inlined_call_operand.vmem [shape: f32[64,128], index: 9, kind: output, shape index: {}]  }
   0x1   :  { %15 = vsyncpa [#allocation7], 0  ;;  %s31022_s30 = smov [#allocation6]   ;;  %s31023_s11 = smov [#allocation4]  }
   0x2   :  { %s39_s10 = sshll.u32 %s31022_s30, 4  ;;  %s23_s12 = sshll.u32 %s31023_s11, 4  ;;  %s40_s10 = int_to_ptr.vmem [resolvable:$true] %s39_s10  ;;  %s31078_s12 = int_to_ptr.vmem [resolvable:$true] %s23_s12 }
   0x3   :  { %s30952_s15 = scalar_lea.hbm %s36672_s4, 2048 }
   0x4   :  { %p30953_p0 = scmp.ne.s32.totalorder %s36672_s4, %s30952_s15  ;;  %p30956_p1 = scmp.lt.u32.totalorder %s30952_s15, %s36672_s4 }
   0x6   :  { %p30958_p2 = pnand %p30956_p1, %p30953_p0 }
   0x8   :  { %30961 = shalt.err (!%p30958_p2)
}
   0x9   :  { %s30962_s20 = scalar_lea.vmem %s40_s10, 2048  ;;  %p30967_p4 = scmp.lt.s32.totalorder %s40_s10, %s40_s10 }
   0xa   :  { %p30963_p3 = scmp.ne.s32.totalorder %s40_s10, %s30962_s20  ;;  %p30968_p5 = scmp.lt.s32.totalorder %s30962_s20, %s30962_s20 }
   0xc   :  { %p30969_p6 = por %p30968_p5, %p30967_p4 }
   0xe   :  { %p30970_p7 = pnand %p30969_p6, %p30963_p3 }
  0x10   :  { %30973 = shalt.err (!%p30970_p7)
}
  0x11   :  { %s31024_s21 = smov 512   ;;  %s31025_s22 = smov 32  }
  0x12   :  { %45 = dma.hbm_to_vmem [thread:$0]  %s36672_s4, 2048, %s40_s10, [#allocation7], %s31024_s21, %s31024_s21, %s31025_s22  }
  0x13   :  { %s30974_s27 = scalar_lea.hbm %s36669_s1, 1024 }
  0x14   :  { %p30975_p8 = scmp.ne.s32.totalorder %s36669_s1, %s30974_s27  ;;  %p30978_p9 = scmp.lt.u32.totalorder %s30974_s27, %s36669_s1 }
  0x16   :  { %p30980_p10 = pnand %p30978_p9, %p30975_p8 }
  0x18   :  { %30983 = shalt.err (!%p30980_p10)
}
  0x19   :  { %s30984_s13 = scalar_lea.vmem %s31078_s12, 1024  ;;  %p30989_p12 = scmp.lt.s32.totalorder %s31078_s12, %s31078_s12 }
  0x1a   :  { %p30985_p11 = scmp.ne.s32.totalorder %s31078_s12, %s30984_s13  ;;  %p30990_p13 = scmp.lt.s32.totalorder %s30984_s13, %s30984_s13 }
  0x1c   :  { %p30991_p0 = por %p30990_p13, %p30989_p12 }
  0x1e   :  { %p30992_p1 = pnand %p30991_p0, %p30985_p11 }
  0x20   :  { %30995 = shalt.err (!%p30992_p1)
}
  0x21   :  { %29 = dma.hbm_to_vmem [thread:$0]  %s36669_s1, 1024, %s31078_s12, [#allocation5], %s31024_s21, %s31024_s21, %s31025_s22  }
  0x22   :  { %s31026_s14 = smov [#allocation8]   ;;  %s30996_s18 = scalar_lea.hbm %s36673_s5, 2048 }
  0x23   :  { %s51_s15 = sshll.u32 %s31026_s14, 4  ;;  %p30997_p2 = scmp.ne.s32.totalorder %s36673_s5, %s30996_s18  ;;  %s52_s15 = int_to_ptr.vmem [resolvable:$true] %s51_s15 }
  0x24   :  { %p31000_p3 = scmp.lt.u32.totalorder %s30996_s18, %s36673_s5 }
  0x26   :  { %p31002_p4 = pnand %p31000_p3, %p30997_p2 }
  0x28   :  { %31005 = shalt.err (!%p31002_p4)
}
  0x29   :  { %s31006_s25 = scalar_lea.vmem %s52_s15, 2048  ;;  %p31011_p6 = scmp.lt.s32.totalorder %s52_s15, %s52_s15 }
  0x2a   :  { %p31007_p5 = scmp.ne.s32.totalorder %s52_s15, %s31006_s25  ;;  %p31012_p7 = scmp.lt.s32.totalorder %s31006_s25, %s31006_s25 }
  0x2c   :  { %p31013_p8 = por %p31012_p7, %p31011_p6 }
  0x2e   :  { %p31014_p9 = pnand %p31013_p8, %p31007_p5 }
  0x30   :  { %31017 = shalt.err (!%p31014_p9)
}
  0x31   :  { %57 = dma.hbm_to_vmem [thread:$0]  %s36673_s5, 2048, %s52_s15, [#allocation7], %s31024_s21, %s31024_s21, %s31025_s22  }
  0x32   :  { %31018 = dma.done.wait [#allocation5], 1024  }
  0x33   :  { %31019 = vsyncadd [#allocation5], 4294966272 }
  0x34   :  { %31020 = dma.done.wait [#allocation7], 4096  }
  0x35   :  { %31021 = vsyncadd [#allocation7], 4294963200  ;;  %v36680_v0 = vmov 0.0   ;;  %vm111_vm0 = vcmask 130048   ;;  %v82_v1 = vld [vmem:[#allocation4 + $0x8] sm:$0xff]  ;;  %v81_v3 = vld [vmem:[#allocation4] sm:$0xff] }
  0x36   :  { %204 = vmatprep.mubr.f32.mxu1 %v36680_v0  ;;  %377 = vmatprep.mubr.f32.mxu0 %v36680_v0  ;;  %v86_v2 = vld [vmem:[#allocation4 + $0x28] sm:$0xff]  ;;  %v136_v4 = vand.u32 4294901760, %v82_v1  ;;  %v85_v6 = vld [vmem:[#allocation4 + $0x20] sm:$0xff]  ;;  %v138_v7 = vand.u32 4294901760, %v81_v3  ;;  %v75_v13 = vld [vmem:[%s36668_s0 + $0x10] sm:$0xff]  ;;  %vm1906_vm1 = vcmask 261120  }
  0x37   :  { %v140_v5 = vand.u32 4294901760, %v86_v2  ;;  %v73_v8 = vld [vmem:[%s36668_s0] sm:$0xff]  ;;  %v74_v9 = vld [vmem:[%s36668_s0 + $0x8] sm:$0xff]  ;;  %v142_v10 = vand.u32 4294901760, %v85_v6  ;;  %v76_v22 = vld [vmem:[%s36668_s0 + $0x18] sm:$0xff]  ;;  %v119_v26 = vsel %vm111_vm0, %v75_v13, 0 }
  0x38   :  { %v113_v11 = vsel %vm111_vm0, %v73_v8, 0  ;;  %v116_v12 = vsel %vm111_vm0, %v74_v9, 0  ;;  %v31145_v15 = vsub.f32 %v82_v1, %v136_v4  ;;  %v31149_v17 = vsub.f32 %v81_v3, %v138_v7  ;;  %v77_v39 = vld [vmem:[%s36668_s0 + $0x20] sm:$0xff]  ;;  %v78_v48 = vld [vmem:[%s36668_s0 + $0x28] sm:$0xff]  ;;  %v79_v55 = vld [vmem:[%s36668_s0 + $0x30] sm:$0xff] }
  0x39   :  { %v31143_v14 = vpack.c.bf16 %v140_v5, %v136_v4  ;;  %v31147_v16 = vsub.f32 %v86_v2, %v140_v5  ;;  %v31151_v18 = vpack.c.bf16 %v142_v10, %v138_v7  ;;  %v31153_v19 = vsub.f32 %v85_v6, %v142_v10  ;;  %v84_v60 = vld [vmem:[#allocation4 + $0x18] sm:$0xff] }
  0x3a   :  { %v31155_v20 = vand.u32 4294901760, %v113_v11  ;;  %v31157_v21 = vand.u32 4294901760, %v116_v12  ;;  %v295_v23 = vand.u32 4294901760, %v31145_v15  ;;  %v301_v25 = vand.u32 4294901760, %v31149_v17  ;;  %v88_v61 = vld [vmem:[#allocation4 + $0x38] sm:$0xff] }
  0x3b   :  { %27713 = vmatprep.subr.bf16.mxu1 %v31143_v14  ;;  %v307_v24 = vand.u32 4294901760, %v31147_v16  ;;  %v313_v28 = vand.u32 4294901760, %v31153_v19  ;;  %v31175_v30 = vand.u32 4294901760, %v119_v26  ;;  %v122_v34 = vsel %vm111_vm0, %v76_v22, 0  ;;  %v80_v1 = vld [vmem:[%s36668_s0 + $0x38] sm:$0xff]  ;;  %v31266_v22 = vld [vmem:[#allocation4 + $0x10] sm:$0xff] }
  0x3c   :  { %27715 = vmatpush1.bf16.msra.mxu1 %v31151_v18  ;;  %v31169_v27 = vsub.f32 %v113_v11, %v31155_v20  ;;  %v31173_v29 = vsub.f32 %v116_v12, %v31157_v21  ;;  %v296_v31 = vsub.f32 %v31145_v15, %v295_v23  ;;  %v302_v33 = vsub.f32 %v31149_v17, %v301_v25 }
  0x3d   :  { %v308_v32 = vsub.f32 %v31147_v16, %v307_v24  ;;  %v314_v36 = vsub.f32 %v31153_v19, %v313_v28  ;;  %v31197_v38 = vsub.f32 %v119_v26, %v31175_v30  ;;  %v31202_v43 = vand.u32 4294901760, %v122_v34  ;;  %v87_v26 = vld [vmem:[#allocation4 + $0x30] sm:$0xff] }
  0x3e   :  { %v31188_v35 = vand.u32 4294901760, %v31169_v27  ;;  %v31194_v37 = vand.u32 4294901760, %v31173_v29  ;;  %v297_v40 = vand.u32 4294901760, %v296_v31  ;;  %v303_v42 = vand.u32 4294901760, %v302_v33 }
  0x3f   :  { %v309_v41 = vand.u32 4294901760, %v308_v32  ;;  %v315_v45 = vand.u32 4294901760, %v314_v36  ;;  %v31209_v47 = vand.u32 4294901760, %v31197_v38  ;;  %v31215_v50 = vsub.f32 %v122_v34, %v31202_v43 }
  0x40   :  { %v208_v44 = vsub.f32 %v31169_v27, %v31188_v35  ;;  %v219_v46 = vsub.f32 %v31173_v29, %v31194_v37  ;;  %v125_v51 = vsel %vm111_vm0, %v77_v39, 0  ;;  %v27720_v54 = vpack.c.bf16 %v31147_v16, %v31145_v15 }
  0x41   :  { %v27716_v49 = vpack.c.bf16 %v309_v41, %v297_v40  ;;  %v27718_v53 = vpack.c.bf16 %v315_v45, %v303_v42  ;;  %v230_v56 = vsub.f32 %v31197_v38, %v31209_v47  ;;  %v31228_v57 = vand.u32 4294901760, %v31215_v50 }
  0x42   :  { %v31218_v52 = vand.u32 4294901760, %v208_v44  ;;  %v31230_v58 = vand.u32 4294901760, %v125_v51  ;;  %v128_v59 = vsel %vm111_vm0, %v78_v48, 0  ;;  %v31234_v62 = vand.u32 4294901760, %v219_v46 }
  0x43   :  { %27717 = vmatprep.subr.bf16.mxu0 %v27716_v49  ;;  %29920 = vmatprep.subr.bf16.mxu1 %v27716_v49  ;;  %v31236_v63 = vand.u32 4294901760, %v128_v59  ;;  %v27722_v3 = vpack.c.bf16 %v31153_v19, %v31149_v17  ;;  %v131_v4 = vsel %vm111_vm0, %v79_v55, 0  ;;  %v970_v5 = vand.u32 4294901760, %v84_v60 }
  0x44   :  { %210 = vmatmul.mubr.f32.vlgmr.msra.gmra.mrb[0].mxu1 %v31218_v52  ;;  %27719 = vmatpush1.bf16.msra.mxu0 %v27718_v53  ;;  %v31243_v2 = vsub.f32 %v125_v51, %v31230_v58  ;;  %v974_v6 = vand.u32 4294901760, %v88_v61  ;;  %v31249_v7 = vand.u32 4294901760, %v230_v56  ;;  %v241_v8 = vsub.f32 %v31215_v50, %v31228_v57 }
  0x45   :  { %29921 = vmatpush1.bf16.msra.mxu1 %v27718_v53  ;;  %215 = vmatprep.mubr.f32.mxu1 %v36680_v0  ;;  %v134_v9 = vsel %vm111_vm0, %v80_v1, 0  ;;  %v31260_v11 = vsub.f32 %v128_v59, %v31236_v63  ;;  %v31262_v12 = vand.u32 4294901760, %v131_v4  ;;  %v972_v33 = vand.u32 4294901760, %v31266_v22 }
  0x46   :  { %27721 = vmatprep.subr.bf16.mxu0 %v27720_v54  ;;  %v31257_v10 = vand.u32 4294901760, %v31243_v2  ;;  %v31264_v13 = vpack.c.bf16 %v974_v6, %v970_v5  ;;  %v31272_v31 = vand.u32 4294901760, %v241_v8  ;;  %v31274_v32 = vand.u32 4294901760, %v134_v9 }
  0x47   :  { %379 = vmatmul.mubr.f32.vlgmr.msra.gmra.mrb[0].mxu0 %v31155_v20  ;;  %v31282_v36 = vand.u32 4294901760, %v31260_v11  ;;  %v31285_v39 = vsub.f32 %v131_v4, %v31262_v12  ;;  %v976_v40 = vand.u32 4294901760, %v87_v26  ;;  %v31288_v41 = vsub.f32 %v84_v60, %v970_v5 }
  0x48   :  { %221 = vmatmul.mubr.f32.gmra.mrb[2].mxu1 %v31234_v62  ;;  %384 = vmatprep.mubr.f32.mxu0 %v36680_v0  ;;  %v252_v34 = vsub.f32 %v31243_v2, %v31257_v10  ;;  %v31290_v42 = vsub.f32 %v88_v61, %v974_v6  ;;  %v31293_v44 = vsub.f32 %v31266_v22, %v972_v33  ;;  %v91_v17 = vlaneseq }
  0x49   :  { %226 = vmatprep.mubr.f32.mxu1 %v36680_v0  ;;  %27723 = vmatpush1.bf16.msra.mxu0 %v27722_v3  ;;  %v31295_v45 = vsub.f32 %v87_v26, %v976_v40  ;;  %v31299_v46 = vsub.f32 %v134_v9, %v31274_v32  ;;  %v263_v49 = vsub.f32 %v31260_v11, %v31282_v36  ;;  %v31308_v51 = vand.u32 4294901760, %v31285_v39 }
  0x4a   :  { %27737 = vmatprep.subr.bf16.mxu1 %v31264_v13  ;;  %27725 = vmatprep.subr.bf16.mxu0 %v31143_v14  ;;  %v31302_v48 = vand.u32 4294901760, %v252_v34  ;;  %v1129_v53 = vand.u32 4294901760, %v31288_v41  ;;  %v1141_v54 = vand.u32 4294901760, %v31290_v42  ;;  %v1135_v55 = vand.u32 4294901760, %v31293_v44 }
  0x4b   :  { %386 = vmatmul.mubr.f32.gmra.mrb[2].mxu0 %v31157_v21  ;;  %v1147_v56 = vand.u32 4294901760, %v31295_v45  ;;  %v31317_v59 = vand.u32 4294901760, %v31299_v46  ;;  %v31320_v60 = vand.u32 4294901760, %v263_v49  ;;  %v274_v61 = vsub.f32 %v31285_v39, %v31308_v51 }
  0x4c   :  { %232 = vmatmul.mubr.f32.gmra.mrb[4].mxu1 %v31249_v7  ;;  %391 = vmatprep.mubr.f32.mxu0 %v36680_v0  ;;  %v31325_v1 = vpack.c.bf16 %v1141_v54, %v1129_v53  ;;  %v27728_v4 = vpack.c.bf16 %v307_v24, %v295_v23  ;;  %v1130_v15 = vsub.f32 %v31288_v41, %v1129_v53 }
  0x4d   :  { %237 = vmatprep.mubr.f32.mxu1 %v36680_v0  ;;  %v31327_v3 = vpack.c.bf16 %v1147_v56, %v1135_v55  ;;  %v31336_v5 = vand.u32 4294901760, %v274_v61  ;;  %v285_v6 = vsub.f32 %v31299_v46, %v31317_v59  ;;  %v1142_v16 = vsub.f32 %v31290_v42, %v1141_v54  ;;  %v1890_v61 = vld [vmem:[%s36670_s2] sm:$0xff] }
  0x4e   :  { %v1131_v24 = vand.u32 4294901760, %v1130_v15  ;;  %v31355_v9 = vpack.c.bf16 %v976_v40, %v972_v33  ;;  %v1136_v26 = vsub.f32 %v31293_v44, %v1135_v55  ;;  %v1148_v33 = vsub.f32 %v31295_v45, %v1147_v56  ;;  %v1895_v55 = vld [vmem:[%s36670_s2 + $0x28] sm:$0xff]  ;;  %v1893_v56 = vld [vmem:[%s36670_s2 + $0x18] sm:$0xff] }
  0x4f   :  { %393 = vmatmul.mubr.f32.gmra.mrb[4].mxu0 %v31175_v30  ;;  %v31347_v23 = vand.u32 4294901760, %v285_v6  ;;  %v1143_v8 = vand.u32 4294901760, %v1142_v16  ;;  %v27744_v53 = vpack.c.bf16 %v31290_v42, %v31288_v41  ;;  %v27730_v54 = vpack.c.bf16 %v313_v28, %v301_v25  ;;  %v31530_v25 = vld [vmem:[%s36671_s3] sm:$0xf]  ;;  %v1892_v16 = vld [vmem:[%s36670_s2 + $0x10] sm:$0xff] }
  0x50   :  { %243 = vmatmul.mubr.f32.gmra.mrb[6].mxu1 %v31272_v31  ;;  %398 = vmatprep.mubr.f32.mxu0 %v36680_v0  ;;  %v1137_v34 = vand.u32 4294901760, %v1136_v26  ;;  %v1149_v40 = vand.u32 4294901760, %v1148_v33  ;;  %v2453_v6 = vand.u32 4294901760, %v1893_v56 }
  0x51   :  { %248 = vmatprep.mubr.f32.mxu1 %v36680_v0  ;;  %v27740_v22 = vpack.c.bf16 %v1143_v8, %v1131_v24 }
  0x52   :  { %v27742_v49 = vpack.c.bf16 %v1149_v40, %v1137_v34 }
  0x53   :  { %400 = vmatmul.mubr.f32.gmra.mrb[6].mxu0 %v31202_v43 }
  0x54   :  { %254 = vmatmul.mubr.f32.gmra.mrb[8].mxu1 %v31302_v48  ;;  %506 = vmatprep.mubr.f32.mxu0 %v36680_v0 }
  0x55   :  { %259 = vmatprep.mubr.f32.mxu1 %v36680_v0 }
  0x57   :  { %509 = vmatmul.mubr.f32.vlgmr.msra.gmra.mrb[0].mxu0 %v31169_v27 }
  0x58   :  { %265 = vmatmul.mubr.f32.gmra.mrb[10].mxu1 %v31320_v60  ;;  %514 = vmatprep.mubr.f32.mxu0 %v36680_v0 }
  0x59   :  { %270 = vmatprep.mubr.f32.mxu1 %v36680_v0  ;;  %27727 = vmatpush1.bf16.msra.mxu0 %v31151_v18 }
  0x5a   :  { %27729 = vmatprep.subr.bf16.mxu0 %v27728_v4  ;;  %v1912_v4 = vand.u32 4294901760, %v1890_v61 }
  0x5b   :  { %517 = vmatmul.mubr.f32.gmra.mrb[2].mxu0 %v31173_v29 }
  0x5c   :  { %276 = vmatmul.mubr.f32.gmra.mrb[12].mxu1 %v31336_v5  ;;  %522 = vmatprep.mubr.f32.mxu0 %v36680_v0  ;;  %v31609_v33 = vsub.f32 %v1890_v61, %v1912_v4 }
  0x5d   :  { %281 = vmatprep.mubr.f32.mxu1 %v36680_v0 }
  0x5f   :  { %525 = vmatmul.mubr.f32.gmra.mrb[4].mxu0 %v31197_v38 }
  0x60   :  { %287 = vmatmul.mubr.f32.gmra.mrb[14].mxu1 %v31347_v23  ;;  %530 = vmatprep.mubr.f32.mxu0 %v36680_v0 }
  0x61   :  { %405 = vmatprep.mubr.f32.mxu1 %v36680_v0 }
  0x63   :  { %533 = vmatmul.mubr.f32.gmra.mrb[6].mxu0 %v31215_v50 }
  0x64   :  { %407 = vmatmul.mubr.f32.vlgmr.msra.gmra.mrb[8].mxu1 %v31230_v58  ;;  %538 = vmatprep.mubr.f32.mxu0 %v36680_v0 }
  0x65   :  { %27739 = vmatpush1.bf16.msra.mxu1 %v31355_v9  ;;  %412 = vmatprep.mubr.f32.mxu1 %v36680_v0 }
  0x66   :  { %27741 = vmatprep.subr.bf16.mxu1 %v27740_v22  ;;  %v2455_v22 = vand.u32 4294901760, %v1892_v16 }
  0x67   :  { %541 = vmatmul.mubr.f32.gmra.mrb[8].mxu0 %v31243_v2 }
  0x68   :  { %414 = vmatmul.mubr.f32.gmra.mrb[10].mxu1 %v31236_v63  ;;  %546 = vmatprep.mubr.f32.mxu0 %v36680_v0 }
  0x69   :  { %419 = vmatprep.mubr.f32.mxu1 %v36680_v0 }
  0x6b   :  { %549 = vmatmul.mubr.f32.gmra.mrb[10].mxu0 %v31260_v11 }
  0x6c   :  { %421 = vmatmul.mubr.f32.gmra.mrb[12].mxu1 %v31262_v12  ;;  %554 = vmatprep.mubr.f32.mxu0 %v36680_v0 }
  0x6d   :  { %426 = vmatprep.mubr.f32.mxu1 %v36680_v0 }
  0x6f   :  { %557 = vmatmul.mubr.f32.gmra.mrb[12].mxu0 %v31285_v39 }
  0x70   :  { %428 = vmatmul.mubr.f32.gmra.mrb[14].mxu1 %v31274_v32  ;;  %562 = vmatprep.mubr.f32.mxu0 %v36680_v0 }
  0x71   :  { %1038 = vmatprep.mubr.f32.mxu1 %v36680_v0 }
  0x73   :  { %565 = vmatmul.mubr.f32.gmra.mrb[14].mxu0 %v31299_v46 }
  0x74   :  { %1044 = vmatmul.mubr.f32.vlgmr.msra.gmra.mrb[16].mxu1 %v31218_v52  ;;  %639 = vmatprep.mubr.f32.mxu0 %v36680_v0 }
  0x75   :  { %27743 = vmatpush1.bf16.msra.mxu1 %v27742_v49  ;;  %1049 = vmatprep.mubr.f32.mxu1 %v36680_v0  ;;  %v1899_v49 = vld [vmem:[%s36670_s2 + $0x48] sm:$0xff] }
  0x76   :  { %27745 = vmatprep.subr.bf16.mxu1 %v27744_v53  ;;  %v1903_v53 = vld [vmem:[%s36670_s2 + $0x68] sm:$0xff] }
  0x77   :  { %643 = vmatmul.mubr.f32.vlgmr.msra.gmra.mrb[0].mxu0 %v31188_v35 }
  0x78   :  { %1055 = vmatmul.mubr.f32.gmra.mrb[18].mxu1 %v31234_v62  ;;  %648 = vmatprep.mubr.f32.mxu0 %v36680_v0 }
  0x79   :  { %1060 = vmatprep.mubr.f32.mxu1 %v36680_v0  ;;  %27731 = vmatpush1.bf16.msra.mxu0 %v27730_v54 }
  0x7a   :  { %27733 = vmatprep.subr.bf16.mxu0 %v31143_v14  ;;  %v27746_v14 = vpack.c.bf16 %v31295_v45, %v31293_v44 }
  0x7b   :  { %652 = vmatmul.mubr.f32.gmra.mrb[2].mxu0 %v31194_v37 }
  0x7c   :  { %1066 = vmatmul.mubr.f32.gmra.mrb[20].mxu1 %v31249_v7  ;;  %657 = vmatprep.mubr.f32.mxu0 %v36680_v0 }
  0x7d   :  { %1071 = vmatprep.mubr.f32.mxu1 %v36680_v0 }
  0x7f   :  { %661 = vmatmul.mubr.f32.gmra.mrb[4].mxu0 %v31209_v47 }
  0x80   :  { %1077 = vmatmul.mubr.f32.gmra.mrb[22].mxu1 %v31272_v31  ;;  %666 = vmatprep.mubr.f32.mxu0 %v36680_v0 }
  0x81   :  { %1082 = vmatprep.mubr.f32.mxu1 %v36680_v0 }
  0x83   :  { %670 = vmatmul.mubr.f32.gmra.mrb[6].mxu0 %v31228_v57 }
  0x84   :  { %1088 = vmatmul.mubr.f32.gmra.mrb[24].mxu1 %v31302_v48  ;;  %675 = vmatprep.mubr.f32.mxu0 %v36680_v0 }
  0x85   :  { %1093 = vmatprep.mubr.f32.mxu1 %v36680_v0 }
  0x87   :  { %679 = vmatmul.mubr.f32.gmra.mrb[8].mxu0 %v31257_v10 }
  0x88   :  { %1099 = vmatmul.mubr.f32.gmra.mrb[26].mxu1 %v31320_v60  ;;  %684 = vmatprep.mubr.f32.mxu0 %v36680_v0  ;;  %v1914_v60 = vand.u32 4294901760, %v1895_v55 }
  0x89   :  { %1104 = vmatprep.mubr.f32.mxu1 %v36680_v0 }
  0x8b   :  { %688 = vmatmul.mubr.f32.gmra.mrb[10].mxu0 %v31282_v36 }
  0x8c   :  { %1110 = vmatmul.mubr.f32.gmra.mrb[28].mxu1 %v31336_v5  ;;  %693 = vmatprep.mubr.f32.mxu0 %v36680_v0 }
  0x8d   :  { %1115 = vmatprep.mubr.f32.mxu1 %v36680_v0 }
  0x8f   :  { %697 = vmatmul.mubr.f32.gmra.mrb[12].mxu0 %v31308_v51 }
  0x90   :  { %1121 = vmatmul.mubr.f32.gmra.mrb[30].mxu1 %v31347_v23  ;;  %702 = vmatprep.mubr.f32.mxu0 %v36680_v0 }
  0x91   :  { %1211 = vmatprep.mubr.f32.mxu1 %v36680_v0 }
  0x93   :  { %706 = vmatmul.mubr.f32.gmra.mrb[14].mxu0 %v31317_v59 }
  0x94   :  { %1213 = vmatmul.mubr.f32.vlgmr.msra.gmra.mrb[16].mxu1 %v31155_v20  ;;  %788 = vmatprep.mubr.f32.mxu0 %v36680_v0 }
  0x95   :  { %27747 = vmatpush1.bf16.msra.mxu1 %v27746_v14  ;;  %1218 = vmatprep.mubr.f32.mxu1 %v36680_v0  ;;  %v31624_v14 = vsub.f32 %v1895_v55, %v1914_v60 }
  0x96   :  { %27749 = vmatprep.subr.bf16.mxu1 %v31264_v13 }
  0x97   :  { %790 = vmatmul.mubr.f32.vlgmr.msra.gmra.mrb[0].mxu0 %v31155_v20 }
  0x98   :  { %1220 = vmatmul.mubr.f32.gmra.mrb[18].mxu1 %v31157_v21  ;;  %795 = vmatprep.mubr.f32.mxu0 %v36680_v0 }
  0x99   :  { %1225 = vmatprep.mubr.f32.mxu1 %v36680_v0  ;;  %27735 = vmatpush1.bf16.msra.mxu0 %v31151_v18  ;;  %v31522_v18 = vshrl.u32 %v91_v17, 7  ;;  %v1918_v17 = vand.u32 4294901760, %v1899_v49 }
  0x9b   :  { %797 = vmatmul.mubr.f32.gmra.mrb[2].mxu0 %v31157_v21  ;;  %36933 = vst [vmem:[#allocation11_spill] sm:$0xff] %v31522_v18  ;;  %v36679_v19 = vsub.s32 0, %v31522_v18  ;;  %v36678_v28 = vsub.s32 1, %v31522_v18 }
  0x9c   :  { %1227 = vmatmul.mubr.f32.gmra.mrb[20].mxu1 %v31175_v30  ;;  %802 = vmatprep.mubr.f32.mxu0 %v36680_v0 }
  0x9d   :  { %1232 = vmatprep.mubr.f32.mxu1 %v36680_v0 }
  0x9f   :  { %804 = vmatmul.mubr.f32.gmra.mrb[4].mxu0 %v31175_v30 }
  0xa0   :  { %1234 = vmatmul.mubr.f32.gmra.mrb[22].mxu1 %v31202_v43  ;;  %809 = vmatprep.mubr.f32.mxu0 %v36680_v0 }
  0xa1   :  { %1239 = vmatprep.mubr.f32.mxu1 %v36680_v0 }
  0xa3   :  { %811 = vmatmul.mubr.f32.gmra.mrb[6].mxu0 %v31202_v43 }
  0xa4   :  { %1241 = vmatmul.mubr.f32.gmra.mrb[24].mxu1 %v31230_v58  ;;  %816 = vmatprep.mubr.f32.mxu0 %v36680_v0 }
  0xa5   :  { %1246 = vmatprep.mubr.f32.mxu1 %v36680_v0 }
  0xa7   :  { %818 = vmatmul.mubr.f32.gmra.mrb[8].mxu0 %v31230_v58 }
  0xa8   :  { %1248 = vmatmul.mubr.f32.gmra.mrb[26].mxu1 %v31236_v63  ;;  %823 = vmatprep.mubr.f32.mxu0 %v36680_v0 }
  0xa9   :  { %1253 = vmatprep.mubr.f32.mxu1 %v36680_v0 }
  0xab   :  { %825 = vmatmul.mubr.f32.gmra.mrb[10].mxu0 %v31236_v63 }
  0xac   :  { %1255 = vmatmul.mubr.f32.gmra.mrb[28].mxu1 %v31262_v12  ;;  %830 = vmatprep.mubr.f32.mxu0 %v36680_v0 }
  0xad   :  { %1260 = vmatprep.mubr.f32.mxu1 %v36680_v0 }
  0xaf   :  { %832 = vmatmul.mubr.f32.gmra.mrb[12].mxu0 %v31262_v12 }
  0xb0   :  { %1262 = vmatmul.mubr.f32.gmra.mrb[30].mxu1 %v31274_v32  ;;  %837 = vmatprep.mubr.f32.mxu0 %v36680_v0 }
  0xb1   :  { %1340 = vmatprep.mubr.f32.mxu1 %v36680_v0 }
  0xb3   :  { %839 = vmatmul.mubr.f32.gmra.mrb[14].mxu0 %v31274_v32 }
  0xb4   :  { %1343 = vmatmul.mubr.f32.vlgmr.msra.gmra.mrb[16].mxu1 %v31169_v27  ;;  %913 = vmatprep.mubr.f32.mxu0 %v36680_v0 }
  0xb5   :  { %27751 = vmatpush1.bf16.msra.mxu1 %v31355_v9  ;;  %1348 = vmatprep.mubr.f32.mxu1 %v36680_v0 }
  0xb6   :  { %27753 = vmatprep.subr.bf16.mxu1 %v31325_v1  ;;  %v1894_v1 = vld [vmem:[%s36670_s2 + $0x20] sm:$0xff] }
  0xb7   :  { %915 = vmatmul.mubr.f32.vlgmr.msra.gmra.mrb[0].mxu0 %v31155_v20  ;;  %v1916_v5 = vand.u32 4294901760, %v1894_v1 }
  0xb8   :  { %1351 = vmatmul.mubr.f32.gmra.mrb[18].mxu1 %v31173_v29  ;;  %920 = vmatprep.mubr.f32.mxu0 %v36680_v0 }
  0xb9   :  { %1356 = vmatprep.mubr.f32.mxu1 %v36680_v0  ;;  %v31607_v26 = vpack.c.bf16 %v1916_v5, %v1912_v4  ;;  %v31611_v34 = vsub.f32 %v1894_v1, %v1916_v5 }
  0xbb   :  { %922 = vmatmul.mubr.f32.gmra.mrb[2].mxu0 %v31157_v21 }
  0xbc   :  { %1359 = vmatmul.mubr.f32.gmra.mrb[20].mxu1 %v31197_v38  ;;  %927 = vmatprep.mubr.f32.mxu0 %v36680_v0 }
  0xbd   :  { %1364 = vmatprep.mubr.f32.mxu1 %v36680_v0 }
  0xbf   :  { %929 = vmatmul.mubr.f32.gmra.mrb[4].mxu0 %v31175_v30 }
  0xc0   :  { %1367 = vmatmul.mubr.f32.gmra.mrb[22].mxu1 %v31215_v50  ;;  %934 = vmatprep.mubr.f32.mxu0 %v36680_v0 }
  0xc1   :  { %1372 = vmatprep.mubr.f32.mxu1 %v36680_v0 }
  0xc3   :  { %936 = vmatmul.mubr.f32.gmra.mrb[6].mxu0 %v31202_v43 }
  0xc4   :  { %1375 = vmatmul.mubr.f32.gmra.mrb[24].mxu1 %v31243_v2  ;;  %941 = vmatprep.mubr.f32.mxu0 %v36680_v0 }
  0xc5   :  { %1380 = vmatprep.mubr.f32.mxu1 %v36680_v0 }
  0xc7   :  { %943 = vmatmul.mubr.f32.gmra.mrb[8].mxu0 %v31230_v58 }
  0xc8   :  { %1383 = vmatmul.mubr.f32.gmra.mrb[26].mxu1 %v31260_v11  ;;  %948 = vmatprep.mubr.f32.mxu0 %v36680_v0 }
  0xc9   :  { %1388 = vmatprep.mubr.f32.mxu1 %v36680_v0 }
  0xcb   :  { %950 = vmatmul.mubr.f32.gmra.mrb[10].mxu0 %v31236_v63 }
  0xcc   :  { %1391 = vmatmul.mubr.f32.gmra.mrb[28].mxu1 %v31285_v39  ;;  %955 = vmatprep.mubr.f32.mxu0 %v36680_v0 }
  0xcd   :  { %1396 = vmatprep.mubr.f32.mxu1 %v36680_v0 }
  0xcf   :  { %957 = vmatmul.mubr.f32.gmra.mrb[12].mxu0 %v31262_v12 }
  0xd0   :  { %1399 = vmatmul.mubr.f32.gmra.mrb[30].mxu1 %v31299_v46  ;;  %962 = vmatprep.mubr.f32.mxu0 %v36680_v0 }
  0xd1   :  { %1473 = vmatprep.mubr.f32.mxu1 %v36680_v0 }
  0xd3   :  { %964 = vmatmul.mubr.f32.gmra.mrb[14].mxu0 %v31274_v32 }
  0xd4   :  { %1477 = vmatmul.mubr.f32.vlgmr.msra.gmra.mrb[16].mxu1 %v31188_v35  ;;  %1982 = vmatprep.mubr.f32.mxu0 %v36680_v0  ;;  %v98_v35 = vrot.slane %v31530_v25, %v36678_v28 }
  0xd5   :  { %27755 = vmatpush1.bf16.msra.mxu1 %v31327_v3  ;;  %1482 = vmatprep.mubr.f32.mxu1 %v36680_v0  ;;  %v1897_v3 = vld [vmem:[%s36670_s2 + $0x38] sm:$0xff] }
  0xd6   :  { %27757 = vmatprep.subr.bf16.mxu1 %v31264_v13  ;;  %v2457_v15 = vand.u32 4294901760, %v1897_v3 }
  0xd8   :  { %1486 = vmatmul.mubr.f32.gmra.mrb[18].mxu1 %v31194_v37  ;;  %v31613_v40 = vpack.c.bf16 %v2457_v15, %v2453_v6  ;;  %v31671_v5 = vsub.f32 %v1897_v3, %v2457_v15 }
  0xd9   :  { %1491 = vmatprep.mubr.f32.mxu1 %v36680_v0 }
  0xdc   :  { %1495 = vmatmul.mubr.f32.gmra.mrb[20].mxu1 %v31209_v47 }
  0xdd   :  { %1500 = vmatprep.mubr.f32.mxu1 %v36680_v0 }
  0xe0   :  { %1504 = vmatmul.mubr.f32.gmra.mrb[22].mxu1 %v31228_v57 }
  0xe1   :  { %1509 = vmatprep.mubr.f32.mxu1 %v36680_v0 }
  0xe4   :  { %1513 = vmatmul.mubr.f32.gmra.mrb[24].mxu1 %v31257_v10 }
  0xe5   :  { %1518 = vmatprep.mubr.f32.mxu1 %v36680_v0 }
  0xe8   :  { %1522 = vmatmul.mubr.f32.gmra.mrb[26].mxu1 %v31282_v36 }
  0xe9   :  { %1527 = vmatprep.mubr.f32.mxu1 %v36680_v0 }
  0xec   :  { %1531 = vmatmul.mubr.f32.gmra.mrb[28].mxu1 %v31308_v51  ;;  %v1891_v51 = vld [vmem:[%s36670_s2 + $0x8] sm:$0xff] }
  0xed   :  { %1536 = vmatprep.mubr.f32.mxu1 %v36680_v0 }
  0xf0   :  { %1540 = vmatmul.mubr.f32.gmra.mrb[30].mxu1 %v31317_v59  ;;  %v1910_v59 = vand.u32 4294901760, %v1891_v51 }
  0xf1   :  { %1622 = vmatprep.mubr.f32.mxu1 %v36680_v0 }
  0xf2   :  { %v31602_v8 = vpack.c.bf16 %v1914_v60, %v1910_v59  ;;  %v31622_v54 = vsub.f32 %v1891_v51, %v1910_v59  ;;  %v31664_v60 = vsub.f32 %v1893_v56, %v2453_v6  ;;  %v36685_v6 = vand.u32 4294901760, %v31624_v14 }
  0xf4   :  { %1624 = vmatmul.mubr.f32.vlgmr.msra.gmra.mrb[16].mxu1 %v31155_v20  ;;  %27761 = vmatprep.subr.bf16.mxu0 %v31602_v8  ;;  %v36686_v56 = vand.u32 4294901760, %v31622_v54 }
  0xf5   :  { %27759 = vmatpush1.bf16.msra.mxu1 %v31355_v9  ;;  %1629 = vmatprep.mubr.f32.mxu1 %v36680_v0  ;;  %v1896_v9 = vld [vmem:[%s36670_s2 + $0x30] sm:$0xff] }
  0xf6   :  { %27763 = vmatpush1.bf16.msra.mxu0 %v31607_v26  ;;  %27809 = vmatprep.subr.bf16.mxu1 %v31613_v40 }
  0xf8   :  { %1631 = vmatmul.mubr.f32.gmra.mrb[18].mxu1 %v31157_v21 }
  0xf9   :  { %1636 = vmatprep.mubr.f32.mxu1 %v36680_v0 }
  0xfc   :  { %1638 = vmatmul.mubr.f32.gmra.mrb[20].mxu1 %v31175_v30 }
  0xfd   :  { %1643 = vmatprep.mubr.f32.mxu1 %v36680_v0 }
 0x100   :  { %1645 = vmatmul.mubr.f32.gmra.mrb[22].mxu1 %v31202_v43 }
 0x101   :  { %1650 = vmatprep.mubr.f32.mxu1 %v36680_v0 }
 0x104   :  { %1652 = vmatmul.mubr.f32.gmra.mrb[24].mxu1 %v31230_v58 }
 0x105   :  { %1657 = vmatprep.mubr.f32.mxu1 %v36680_v0 }
 0x108   :  { %1659 = vmatmul.mubr.f32.gmra.mrb[26].mxu1 %v31236_v63 }
 0x109   :  { %1664 = vmatprep.mubr.f32.mxu1 %v36680_v0 }
 0x10c   :  { %1666 = vmatmul.mubr.f32.gmra.mrb[28].mxu1 %v31262_v12 }
 0x10d   :  { %1671 = vmatprep.mubr.f32.mxu1 %v36680_v0 }
 0x110   :  { %1673 = vmatmul.mubr.f32.gmra.mrb[30].mxu1 %v31274_v32 }
 0x111   :  { %1747 = vmatprep.mubr.f32.mxu1 %v36680_v0 }
 0x114   :  { %1749 = vmatmul.mubr.f32.vlgmr.msra.gmra.mrb[16].mxu1 %v31155_v20  ;;  %v94_v20 = vrot.slane %v31530_v25, %v36679_v19 }
 0x115   :  { %1754 = vmatprep.mubr.f32.mxu1 %v36680_v0 }
 0x117   :  { %v211_v27 = vpop.f32.mrb[0].mxu1 }
 0x118   :  { %v213_v29 = vpop.f32.mrb[1].mxu1  ;;  %1756 = vmatmul.mubr.f32.gmra.mrb[18].mxu1 %v31157_v21  ;;  %v212_v23 = vadd.f32 %v211_v27, %v94_v20  ;;  %v1922_v27 = vand.u32 4294901760, %v1903_v53 }
 0x119   :  { %1761 = vmatprep.mubr.f32.mxu1 %v36680_v0  ;;  %v214_v24 = vadd.f32 %v213_v29, %v98_v35  ;;  %v1898_v29 = vld [vmem:[%s36670_s2 + $0x40] sm:$0xff] }
 0x11b   :  { %v222_v37 = vpop.f32.mrb[2].mxu1 }
 0x11c   :  { %v31541_v38 = vadd.f32 %v222_v37, %v94_v20  ;;  %v224_v47 = vpop.f32.mrb[3].mxu1  ;;  %1763 = vmatmul.mubr.f32.gmra.mrb[20].mxu1 %v31175_v30  ;;  %v2459_v37 = vand.u32 4294901760, %v1896_v9 }
 0x11d   :  { %v31544_v50 = vadd.f32 %v224_v47, %v98_v35  ;;  %1768 = vmatprep.mubr.f32.mxu1 %v36680_v0  ;;  %v31634_v47 = vsub.f32 %v1892_v16, %v2455_v22 }
 0x11e   :  { %v31658_v51 = vpack.c.bf16 %v2459_v37, %v2455_v22  ;;  %v31660_v55 = vsub.f32 %v1896_v9, %v2459_v37  ;;  %v2014_v37 = vand.u32 4294901760, %v31611_v34 }
 0x11f   :  { %36934 = vst [vmem:[#allocation12_spill] sm:$0xff] %v31544_v50  ;;  %v233_v21 = vpop.f32.mrb[4].mxu1 }
 0x120   :  { %v31547_v52 = vadd.f32 %v233_v21, %v94_v20  ;;  %v235_v57 = vpop.f32.mrb[5].mxu1  ;;  %1770 = vmatmul.mubr.f32.gmra.mrb[22].mxu1 %v31202_v43  ;;  %v1920_v21 = vand.u32 4294901760, %v1898_v29 }
 0x121   :  { %v31550_v62 = vadd.f32 %v235_v57, %v98_v35  ;;  %1775 = vmatprep.mubr.f32.mxu1 %v36680_v0  ;;  %27811 = vmatpush1.bf16.msra.mxu1 %v31658_v51 }
 0x122   :  { %36935 = vst [vmem:[#allocation13_spill] sm:$0xff] %v31547_v52  ;;  %v31667_v61 = vsub.f32 %v1898_v29, %v1920_v21  ;;  %v36683_v29 = vand.u32 4294901760, %v31664_v60  ;;  %v3039_v52 = vld [vmem:[#allocation6 + $0x78] sm:$0xff] }
 0x123   :  { %36936 = vst [vmem:[#allocation14_spill] sm:$0xff] %v31550_v62  ;;  %v244_v2 = vpop.f32.mrb[6].mxu1  ;;  %v3035_v62 = vld [vmem:[#allocation6 + $0x58] sm:$0xff] }
 0x124   :  { %v31553_v7 = vadd.f32 %v244_v2, %v94_v20  ;;  %v246_v10 = vpop.f32.mrb[7].mxu1  ;;  %1777 = vmatmul.mubr.f32.gmra.mrb[24].mxu1 %v31230_v58  ;;  %v1901_v2 = vld [vmem:[%s36670_s2 + $0x58] sm:$0xff] }
 0x125   :  { %v31556_v30 = vadd.f32 %v246_v10, %v98_v35  ;;  %1782 = vmatprep.mubr.f32.mxu1 %v36680_v0  ;;  %v2461_v4 = vand.u32 4294901760, %v1901_v2 }
 0x126   :  { %36937 = vst [vmem:[#allocation15_spill] sm:$0xff] %v31553_v7 }
 0x127   :  { %36938 = vst [vmem:[#allocation16_spill] sm:$0xff] %v31556_v30  ;;  %v31675_v9 = vsub.f32 %v1901_v2, %v2461_v4  ;;  %v2545_v2 = vand.u32 4294901760, %v31634_v47 }
 0x128   :  { %1784 = vmatmul.mubr.f32.gmra.mrb[26].mxu1 %v31236_v63 }
 0x129   :  { %1789 = vmatprep.mubr.f32.mxu1 %v36680_v0 }
 0x12c   :  { %1791 = vmatmul.mubr.f32.gmra.mrb[28].mxu1 %v31262_v12 }
 0x12d   :  { %1796 = vmatprep.mubr.f32.mxu1 %v36680_v0 }
 0x130   :  { %1798 = vmatmul.mubr.f32.gmra.mrb[30].mxu1 %v31274_v32 }
 0x131   :  { %2525 = vmatprep.mubr.f32.mxu1 %v36680_v0 }
 0x137   :  { %v408_v43 = vpop.f32.mrb[8].mxu1 }
 0x138   :  { %v31565_v11 = vadd.f32 %v408_v43, %v94_v20  ;;  %v410_v58 = vpop.f32.mrb[9].mxu1 }
 0x139   :  { %v31567_v13 = vadd.f32 %v410_v58, %v98_v35  ;;  %v31641_v58 = vpack.c.bf16 %v1922_v27, %v1918_v17 }
 0x13a   :  { %36939 = vst [vmem:[#allocation17_spill] sm:$0xff] %v31565_v11 }
 0x13b   :  { %36940 = vst [vmem:[#allocation18_spill] sm:$0xff] %v31567_v13  ;;  %v415_v31 = vpop.f32.mrb[10].mxu1  ;;  %27765 = vmatprep.subr.bf16.mxu0 %v31641_v58 }
 0x13c   :  { %v31569_v36 = vadd.f32 %v415_v31, %v94_v20  ;;  %v417_v63 = vpop.f32.mrb[11].mxu1  ;;  %v31643_v31 = vsub.f32 %v1899_v49, %v1918_v17  ;;  %v1997_v17 = vsub.f32 %v31622_v54, %v36686_v56  ;;  %v2563_v56 = vand.u32 4294901760, %v31675_v9 }
 0x13d   :  { %v31571_v39 = vadd.f32 %v417_v63, %v98_v35  ;;  %v31645_v63 = vsub.f32 %v1903_v53, %v1922_v27  ;;  %v2009_v27 = vsub.f32 %v31624_v14, %v36685_v6 }
 0x13e   :  { %36941 = vst [vmem:[#allocation19_spill] sm:$0xff] %v31569_v36 }
 0x13f   :  { %36942 = vst [vmem:[#allocation20_spill] sm:$0xff] %v31571_v39  ;;  %v422_v41 = vpop.f32.mrb[12].mxu1  ;;  %v2032_v6 = vand.u32 4294901760, %v31645_v63 }
 0x140   :  { %v31573_v12 = vadd.f32 %v422_v41, %v94_v20  ;;  %v424_v42 = vpop.f32.mrb[13].mxu1  ;;  %v1905_v41 = vld [vmem:[%s36670_s2 + $0x78] sm:$0xff] }
 0x141   :  { %v31575_v44 = vadd.f32 %v424_v42, %v98_v35  ;;  %v1900_v42 = vld [vmem:[%s36670_s2 + $0x50] sm:$0xff]  ;;  %v2465_v16 = vand.u32 4294901760, %v1905_v41 }
 0x142   :  { %36943 = vst [vmem:[#allocation21_spill] sm:$0xff] %v31573_v12 }
 0x143   :  { %36944 = vst [vmem:[#allocation22_spill] sm:$0xff] %v31575_v44  ;;  %v429_v32 = vpop.f32.mrb[14].mxu1  ;;  %v31679_v22 = vpack.c.bf16 %v2465_v16, %v2461_v4  ;;  %v31681_v49 = vsub.f32 %v1905_v41, %v2465_v16  ;;  %v2540_v41 = vsub.f32 %v31664_v60, %v36683_v29  ;;  %v2015_v4 = vsub.f32 %v31611_v34, %v2014_v37 }
 0x144   :  { %v31577_v45 = vadd.f32 %v429_v32, %v94_v20  ;;  %v431_v46 = vpop.f32.mrb[15].mxu1  ;;  %v1902_v20 = vld [vmem:[%s36670_s2 + $0x60] sm:$0xff]  ;;  %v1904_v32 = vld [vmem:[%s36670_s2 + $0x70] sm:$0xff] }
 0x145   :  { %v31579_v48 = vadd.f32 %v431_v46, %v98_v35  ;;  %v1924_v57 = vand.u32 4294901760, %v1902_v20  ;;  %27813 = vmatprep.subr.bf16.mxu1 %v31679_v22  ;;  %v2016_v0 = vand.u32 4294901760, %v2015_v4  ;;  %v2026_v4 = vand.u32 4294901760, %v31667_v61 }
 0x146   :  { %36945 = vst [vmem:[#allocation23_spill] sm:$0xff] %v31577_v45 }
 0x147   :  { %36946 = vst [vmem:[#allocation24_spill] sm:$0xff] %v31579_v48  ;;  %v31662_v59 = vpack.c.bf16 %v1924_v57, %v1920_v21  ;;  %v31669_v1 = vsub.f32 %v1902_v20, %v1924_v57  ;;  %v36682_v20 = vand.u32 4294901760, %v31671_v5  ;;  %v1998_v21 = vand.u32 4294901760, %v1997_v17 }
 0x148   :  { %v2010_v57 = vand.u32 4294901760, %v2009_v27  ;;  %v2020_v17 = vand.u32 4294901760, %v31643_v31  ;;  %v2541_v27 = vand.u32 4294901760, %v2540_v41  ;;  %v2575_v48 = vand.u32 4294901760, %v31681_v49 }
 0x149   :  { %27767 = vmatpush1.bf16.msra.mxu0 %v31662_v59 }
 0x14a   :  { %v31713_v16 = vpack.c.bf16 %v2010_v57, %v1998_v21 }
 0x14c   :  { %27769 = vmatprep.subr.bf16.mxu0 %v31713_v16 }
 0x18a   :  { %v916_v35 = vpop.f32.mrb[0].mxu0 }
 0x18b   :  { %v31639_v10 = vadd.f32 %v916_v35, %v212_v23  ;;  %v918_v43 = vpop.f32.mrb[1].mxu0  ;;  %v2463_v23 = vand.u32 4294901760, %v1900_v42  ;;  %v36684_v35 = vand.u32 4294901760, %v31609_v33 }
 0x18c   :  { %v31656_v46 = vadd.f32 %v918_v43, %v214_v24  ;;  %v2467_v24 = vand.u32 4294901760, %v1904_v32  ;;  %v2557_v43 = vand.u32 4294901760, %v31660_v55 }
 0x18d   :  { %v31685_v3 = vsub.f32 %v1900_v42, %v2463_v23  ;;  %v2552_v42 = vsub.f32 %v31671_v5, %v36682_v20 }
 0x18e   :  { %v31683_v53 = vpack.c.bf16 %v2467_v24, %v2463_v23  ;;  %v31687_v15 = vsub.f32 %v1904_v32, %v2467_v24  ;;  %v2003_v32 = vsub.f32 %v31609_v33, %v36684_v35  ;;  %v2546_v23 = vsub.f32 %v31634_v47, %v2545_v2 }
 0x18f   :  { %v2558_v24 = vsub.f32 %v31660_v55, %v2557_v43  ;;  %v2553_v28 = vand.u32 4294901760, %v2552_v42  ;;  %v2021_v35 = vsub.f32 %v31643_v31, %v2020_v17 }
 0x190   :  { %27815 = vmatpush1.bf16.msra.mxu1 %v31683_v53  ;;  %v2004_v19 = vand.u32 4294901760, %v2003_v32  ;;  %v2547_v20 = vand.u32 4294901760, %v2546_v23  ;;  %v2033_v32 = vsub.f32 %v31645_v63, %v2032_v6  ;;  %v2564_v23 = vsub.f32 %v31675_v9, %v2563_v56 }
 0x191   :  { %v2559_v29 = vand.u32 4294901760, %v2558_v24  ;;  %v31721_v21 = vpack.c.bf16 %v2553_v28, %v2541_v27  ;;  %v2022_v42 = vand.u32 4294901760, %v2021_v35  ;;  %v2576_v28 = vsub.f32 %v31681_v49, %v2575_v48 }
 0x192   :  { %v31723_v57 = vpack.c.bf16 %v2016_v0, %v2004_v19  ;;  %v2038_v0 = vand.u32 4294901760, %v31669_v1  ;;  %v2034_v19 = vand.u32 4294901760, %v2033_v32  ;;  %v2027_v24 = vsub.f32 %v31667_v61, %v2026_v4 }
 0x193   :  { %v31727_v41 = vpack.c.bf16 %v2559_v29, %v2547_v20  ;;  %27817 = vmatprep.subr.bf16.mxu1 %v31721_v21  ;;  %v2569_v27 = vand.u32 4294901760, %v31685_v3  ;;  %v2565_v29 = vand.u32 4294901760, %v2564_v23  ;;  %v2577_v20 = vand.u32 4294901760, %v2576_v28 }
 0x194   :  { %36947 = vst [vmem:[#allocation25_spill] sm:$0xff] %v31723_v57  ;;  %v2039_v35 = vsub.f32 %v31669_v1, %v2038_v0  ;;  %v31738_v45 = vpack.c.bf16 %v2034_v19, %v2022_v42  ;;  %v2028_v44 = vand.u32 4294901760, %v2027_v24  ;;  %v2581_v13 = vand.u32 4294901760, %v31687_v15 }
 0x195   :  { %36948 = vst [vmem:[#allocation26_spill] sm:$0xff] %v31727_v41  ;;  %v2570_v12 = vsub.f32 %v31685_v3, %v2569_v27  ;;  %v31741_v39 = vpack.c.bf16 %v2577_v20, %v2565_v29  ;;  %v31746_v32 = vpack.c.bf16 %v31624_v14, %v31622_v54  ;;  %v31750_v23 = vpack.c.bf16 %v31671_v5, %v31664_v60 }
 0x196   :  { %36949 = vst [vmem:[#allocation27_spill] sm:$0xff] %v31738_v45  ;;  %v2040_v36 = vand.u32 4294901760, %v2039_v35  ;;  %v31754_v42 = vpack.c.bf16 %v31611_v34, %v31609_v33  ;;  %v31758_v28 = vpack.c.bf16 %v31660_v55, %v31634_v47  ;;  %v2582_v24 = vsub.f32 %v31687_v15, %v2581_v13 }
 0x197   :  { %36950 = vst [vmem:[#allocation28_spill] sm:$0xff] %v31741_v39  ;;  %36951 = vst [vmem:[#allocation29_spill] sm:$0xff] %v31746_v32  ;;  %v2571_v11 = vand.u32 4294901760, %v2570_v12  ;;  %v31765_v29 = vpack.c.bf16 %v31645_v63, %v31643_v31  ;;  %v31769_v12 = vpack.c.bf16 %v31681_v49, %v31675_v9  ;;  %v31773_v34 = vpack.c.bf16 %v31669_v1, %v31667_v61 }
 0x198   :  { %36952 = vst [vmem:[#allocation30_spill] sm:$0xff] %v31750_v23  ;;  %36953 = vst [vmem:[#allocation31_spill] sm:$0xff] %v31754_v42  ;;  %v31760_v19 = vpack.c.bf16 %v2040_v36, %v2028_v44  ;;  %v31777_v47 = vpack.c.bf16 %v31687_v15, %v31685_v3  ;;  %v2583_v36 = vand.u32 4294901760, %v2582_v24  ;;  %v36961_v55 = vand.u32 4294901760, %v31622_v54 }
 0x199   :  { %36954 = vst [vmem:[#allocation32_spill] sm:$0xff] %v31758_v28  ;;  %36956 = vst [vmem:[#allocation34_spill] sm:$0xff] %v31765_v29  ;;  %v36962_v31 = vand.u32 4294901760, %v31624_v14  ;;  %v36964_v9 = vand.u32 4294901760, %v31664_v60  ;;  %v36965_v49 = vand.u32 4294901760, %v31671_v5  ;;  %v36967_v61 = vand.u32 4294901760, %v31609_v33 }
 0x19a   :  { %36955 = vst [vmem:[#allocation33_spill] sm:$0xff] %v31760_v19  ;;  %36957 = vst [vmem:[#allocation35_spill] sm:$0xff] %v31769_v12  ;;  %v31779_v44 = vpack.c.bf16 %v2583_v36, %v2571_v11  ;;  %v31797_v3 = vpack.c.bf16 %v2557_v43, %v2545_v2  ;;  %v31799_v11 = vpack.c.bf16 %v2032_v6, %v2020_v17  ;;  %v27472_v60 = vmul.f32 -1.442695, %v31656_v46 }
 0x19b   :  { %36958 = vst [vmem:[#allocation36_spill] sm:$0xff] %v31773_v34  ;;  %36959 = vst [vmem:[#allocation37_spill] sm:$0xff] %v31777_v47  ;;  %v31785_v63 = vpack.c.bf16 %v36962_v31, %v36961_v55  ;;  %v31791_v20 = vpack.c.bf16 %v36965_v49, %v36964_v9  ;;  %v31795_v1 = vpack.c.bf16 %v2014_v37, %v36967_v61  ;;  %v27471_v5 = vmul.f32 -1.442695, %v31639_v10 }
 0x19c   :  { %36960 = vst [vmem:[#allocation38_spill] sm:$0xff] %v31779_v44  ;;  %36969 = vst [vmem:[#allocation42_spill] sm:$0xff] %v31797_v3  ;;  %v31801_v15 = vpack.c.bf16 %v2575_v48, %v2563_v56  ;;  %v31803_v54 = vpack.c.bf16 %v2038_v0, %v2026_v4  ;;  %v31805_v14 = vpack.c.bf16 %v2581_v13, %v2569_v27  ;;  %30696 = vpow2.f32 %v27472_v60 }
 0x19d   :  { %36963 = vst [vmem:[#allocation39_spill] sm:$0xff] %v31785_v63  ;;  %36966 = vst [vmem:[#allocation40_spill] sm:$0xff] %v31791_v20  ;;  %30698 = vpow2.f32 %v27471_v5  ;;  %v36687_v33 = vsub.s32 2, %v31522_v18  ;;  %v36688_v37 = vsub.s32 3, %v31522_v18 }
 0x19e   :  { %36968 = vst [vmem:[#allocation41_spill] sm:$0xff] %v31795_v1  ;;  %36970 = vst [vmem:[#allocation43_spill] sm:$0xff] %v31799_v11 }
 0x19f   :  { %36971 = vst [vmem:[#allocation44_spill] sm:$0xff] %v31801_v15  ;;  %36972 = vst [vmem:[#allocation45_spill] sm:$0xff] %v31803_v54  ;;  %v31814_v48 = vrot.slane %v31530_v25, %v36687_v33  ;;  %v31819_v13 = vrot.slane %v31530_v25, %v36688_v37  ;;  %v3037_v33 = vld [vmem:[#allocation6 + $0x68] sm:$0xff] }
 0x1a0   :  { %36973 = vst [vmem:[#allocation46_spill] sm:$0xff] %v31805_v14 }
 0x1a1   :  { %36974 = vst [vmem:[#allocation47_spill] sm:$0xff] %v31814_v48  ;;  %36975 = vst [vmem:[#allocation48_spill] sm:$0xff] %v31819_v13 }
 0x1a6   :  { %v30697_v2 = vpop.eup %30696 }
 0x1a7   :  { %v30699_v43 = vpop.eup %30698  ;;  %v1872_v56 = vadd.f32 1.0, %v30697_v2 }
 0x1a8   :  { %v1871_v10 = vadd.f32 1.0, %v30699_v43 }
 0x1a9   :  { %30700 = vrcp.f32 %v1872_v56 }
 0x1aa   :  { %30702 = vrcp.f32 %v1871_v10 }
 0x1b3   :  { %v30701_v27 = vpop.eup %30700 }
 0x1b4   :  { %v30703_v35 = vpop.eup %30702  ;;  %v1881_v55 = vmul.f32 0.0, %v30701_v27  ;;  %v3031_v27 = vld [vmem:[#allocation6 + $0x38] sm:$0xff] }
 0x1e7   :  { %v1750_v46 = vpop.f32.mrb[16].mxu1 }
 0x1e8   :  { %v29954_v6 = vadd.f32 %v1750_v46, %v31814_v48  ;;  %v1752_v17 = vpop.f32.mrb[17].mxu1 }
 0x1e9   :  { %v29955_v4 = vadd.f32 %v1752_v17, %v31819_v13  ;;  %v3025_v17 = vld [vmem:[#allocation6 + $0x8] sm:$0xff] }
 0x1ea   :  { %v27473_v0 = vmul.f32 -1.442695, %v29954_v6  ;;  %v36977_v6 = vmov 0.0  }
 0x1eb   :  { %30704 = vtanh.f32 %v29955_v4  ;;  %v3029_v4 = vld [vmem:[#allocation6 + $0x28] sm:$0xff] }
 0x1ec   :  { %30706 = vpow2.f32 %v27473_v0  ;;  %v3027_v0 = vld [vmem:[#allocation6 + $0x18] sm:$0xff] }
 0x1f5   :  { %v30705_v24 = vpop.eup %30704 }
 0x1f6   :  { %v30707_v36 = vpop.eup %30706  ;;  %v1882_v31 = vmul.f32 %v30705_v24, %v30703_v35  ;;  %v3024_v35 = vld [vmem:[#allocation6] sm:$0xff] }
 0x1f7   :  { %v1873_v25 = vadd.f32 1.0, %v30707_v36  ;;  %v3028_v24 = vld [vmem:[#allocation6 + $0x20] sm:$0xff]  ;;  %v3040_v36 = vand.u32 4294901760, %v3025_v17 }
 0x1f8   :  { %v31823_v9 = vadd.f32 %v1882_v31, %v1881_v55  ;;  %v3044_v55 = vand.u32 4294901760, %v3029_v4  ;;  %v3583_v31 = vand.u32 4294901760, %v3027_v0 }
 0x1f9   :  { %30708 = vrcp.f32 %v1873_v25  ;;  %v3587_v25 = vand.u32 4294901760, %v3031_v27  ;;  %v31875_v37 = vsub.f32 %v3025_v17, %v3040_v36 }
 0x1fa   :  { %36976 = vst [vmem:[#allocation49_spill] sm:$0xff] %v31823_v9  ;;  %30710 = vtanh.f32 %v31823_v9 }
 0x203   :  { %v30709_v49 = vpop.eup %30708 }
 0x204   :  { %v30711_v61 = vpop.eup %30710 }
 0x205   :  { %v1885_v60 = vmul.f32 %v30711_v61, %v30709_v49  ;;  %v3026_v49 = vld [vmem:[#allocation6 + $0x10] sm:$0xff] }
 0x206   :  { %v3030_v61 = vld [vmem:[#allocation6 + $0x30] sm:$0xff]  ;;  %v3585_v30 = vand.u32 4294901760, %v3026_v49 }
 0x207   :  { %v1908_v5 = vsel %vm1906_vm1, %v1885_v60, 0  ;;  %v3042_v60 = vand.u32 4294901760, %v3024_v35  ;;  %v3589_v7 = vand.u32 4294901760, %v3030_v61 }
 0x208   :  { %v31827_v2 = vand.u32 4294901760, %v1908_v5 }
 0x20a   :  { %v31830_v43 = vsub.f32 %v1908_v5, %v31827_v2  ;;  %v3046_v5 = vand.u32 4294901760, %v3028_v24 }
 0x20c   :  { %v31833_v56 = vand.u32 4294901760, %v31830_v43  ;;  %v31889_v17 = vpack.c.bf16 %v3046_v5, %v3042_v60 }
 0x20e   :  { %v1986_v10 = vsub.f32 %v31830_v43, %v31833_v56 }
 0x210   :  { %v31837_v46 = vand.u32 4294901760, %v1986_v10  ;;  %v3033_v10 = vld [vmem:[#allocation6 + $0x48] sm:$0xff] }
 0x212   :  { %1988 = vmatmul.mubr.f32.vlgmr.msra.gmra.mrb[2].mxu0 %v31837_v46  ;;  %2531 = vmatmul.mubr.f32.vlgmr.msra.gmra.mrb[18].mxu1 %v31837_v46 }
 0x213   :  { %27771 = vmatpush1.bf16.msra.mxu0 %v31723_v57  ;;  %27819 = vmatpush1.bf16.msra.mxu1 %v31727_v41 }
 0x214   :  { %27773 = vmatprep.subr.bf16.mxu0 %v31738_v45  ;;  %27821 = vmatprep.subr.bf16.mxu1 %v31741_v39 }
 0x215   :  { %2098 = vmatprep.mubr.f32.mxu0 %v36977_v6  ;;  %2641 = vmatprep.mubr.f32.mxu1 %v36977_v6 }
 0x217   :  { %27775 = vmatpush1.bf16.msra.mxu0 %v31760_v19  ;;  %27823 = vmatpush1.bf16.msra.mxu1 %v31779_v44 }
 0x218   :  { %27777 = vmatprep.subr.bf16.mxu0 %v31746_v32  ;;  %27825 = vmatprep.subr.bf16.mxu1 %v31750_v23  ;;  %v31903_v32 = vld [vmem:[#allocation6 + $0x50] sm:$0xff] }
 0x21a   :  { %2100 = vmatmul.mubr.f32.vlgmr.msra.gmra.mrb[2].mxu0 %v31827_v2  ;;  %2643 = vmatmul.mubr.f32.vlgmr.msra.gmra.mrb[18].mxu1 %v31827_v2 }
 0x21b   :  { %27779 = vmatpush1.bf16.msra.mxu0 %v31754_v42  ;;  %27827 = vmatpush1.bf16.msra.mxu1 %v31758_v28  ;;  %v3032_v28 = vld [vmem:[#allocation6 + $0x40] sm:$0xff]  ;;  %v3052_v42 = vand.u32 4294901760, %v3037_v33 }
 0x21c   :  { %27781 = vmatprep.subr.bf16.mxu0 %v31765_v29  ;;  %27829 = vmatprep.subr.bf16.mxu1 %v31769_v12  ;;  %v31881_v12 = vsub.f32 %v3027_v0, %v3583_v31  ;;  %v31883_v29 = vsub.f32 %v3031_v27, %v3587_v25  ;;  %v31895_v0 = vsub.f32 %v3028_v24, %v3046_v5  ;;  %v3591_v27 = vand.u32 4294901760, %v3035_v62 }
 0x21d   :  { %2186 = vmatprep.mubr.f32.mxu0 %v36977_v6  ;;  %2729 = vmatprep.mubr.f32.mxu1 %v36977_v6  ;;  %v3050_v23 = vand.u32 4294901760, %v3032_v28  ;;  %v31910_v24 = vsub.f32 %v3030_v61, %v3589_v7  ;;  %v3593_v61 = vand.u32 4294901760, %v31903_v32 }
 0x21e   :  { %v36982_v19 = vand.u32 4294901760, %v31895_v0 }
 0x21f   :  { %27783 = vmatpush1.bf16.msra.mxu0 %v31773_v34  ;;  %27831 = vmatpush1.bf16.msra.mxu1 %v31777_v47  ;;  %v31877_v47 = vpack.c.bf16 %v3044_v55, %v3040_v36  ;;  %v31879_v34 = vsub.f32 %v3029_v4, %v3044_v55  ;;  %v31893_v4 = vsub.f32 %v3024_v35, %v3042_v60  ;;  %v3595_v36 = vand.u32 4294901760, %v3039_v52  ;;  %v3036_v55 = vld [vmem:[#allocation6 + $0x60] sm:$0xff] }
 0x220   :  { %27785 = vmatprep.subr.bf16.mxu0 %v31602_v8  ;;  %27833 = vmatprep.subr.bf16.mxu1 %v31613_v40 }
 0x221   :  { %v36705_v60 = vand.u32 4294901760, %v31879_v34  ;;  %v31923_v35 = vpack.c.bf16 %v3595_v36, %v3591_v27 }
 0x222   :  { %2189 = vmatmul.mubr.f32.vlgmr.msra.gmra.mrb[2].mxu0 %v31830_v43  ;;  %2732 = vmatmul.mubr.f32.vlgmr.msra.gmra.mrb[18].mxu1 %v31830_v43 }
 0x223   :  { %27787 = vmatpush1.bf16.msra.mxu0 %v31607_v26  ;;  %27835 = vmatpush1.bf16.msra.mxu1 %v31658_v51 }
 0x224   :  { %27789 = vmatprep.subr.bf16.mxu0 %v31641_v58  ;;  %27837 = vmatprep.subr.bf16.mxu1 %v31679_v22 }
 0x225   :  { %2267 = vmatprep.mubr.f32.mxu0 %v36977_v6  ;;  %2810 = vmatprep.mubr.f32.mxu1 %v36977_v6 }
 0x227   :  { %27791 = vmatpush1.bf16.msra.mxu0 %v31662_v59  ;;  %27839 = vmatpush1.bf16.msra.mxu1 %v31683_v53 }
 0x228   :  { %27793 = vmatprep.subr.bf16.mxu0 %v31785_v63  ;;  %27841 = vmatprep.subr.bf16.mxu1 %v31791_v20  ;;  %v31887_v20 = vpack.c.bf16 %v3587_v25, %v3583_v31  ;;  %v3048_v63 = vand.u32 4294901760, %v3033_v10  ;;  %v31899_v31 = vpack.c.bf16 %v3589_v7, %v3585_v30  ;;  %v31901_v25 = vsub.f32 %v3026_v49, %v3585_v30 }
 0x229   :  { %v31925_v7 = vsub.f32 %v3035_v62, %v3591_v27  ;;  %v3139_v62 = vsub.f32 %v31879_v34, %v36705_v60  ;;  %v36979_v27 = vand.u32 4294901760, %v31881_v12 }
 0x22a   :  { %2271 = vmatmul.mubr.f32.vlgmr.msra.gmra.mrb[2].mxu0 %v31833_v56  ;;  %2814 = vmatmul.mubr.f32.vlgmr.msra.gmra.mrb[18].mxu1 %v31833_v56  ;;  %v31915_v49 = vpack.c.bf16 %v3052_v42, %v3048_v63  ;;  %v36983_v60 = vand.u32 4294901760, %v31901_v25 }
 0x22b   :  { %27795 = vmatpush1.bf16.msra.mxu0 %v31795_v1  ;;  %27843 = vmatpush1.bf16.msra.mxu1 %v31797_v3  ;;  %v31905_v1 = vld [vmem:[#allocation6 + $0x70] sm:$0xff]  ;;  %v3054_v3 = vand.u32 4294901760, %v3036_v55  ;;  %v3670_v30 = vsub.f32 %v31881_v12, %v36979_v27  ;;  %v36987_v45 = vand.u32 4294901760, %v31925_v7 }
 0x22c   :  { %27797 = vmatprep.subr.bf16.mxu0 %v31799_v11  ;;  %27845 = vmatprep.subr.bf16.mxu1 %v31801_v15  ;;  %v31917_v15 = vsub.f32 %v3033_v10, %v3048_v63  ;;  %v31919_v11 = vsub.f32 %v3037_v33, %v3052_v42  ;;  %v3597_v5 = vand.u32 4294901760, %v31905_v1  ;;  %v31931_v63 = vsub.f32 %v3039_v52, %v3595_v36 }
 0x22d   :  { %2365 = vmatprep.mubr.f32.mxu0 %v36977_v6  ;;  %2908 = vmatprep.mubr.f32.mxu1 %v36977_v6  ;;  %v31933_v42 = vsub.f32 %v3032_v28, %v3050_v23  ;;  %v36978_v33 = vand.u32 4294901760, %v31875_v37  ;;  %v31950_v28 = vpack.c.bf16 %v3054_v3, %v3050_v23  ;;  %v31957_v27 = vsub.f32 %v3036_v55, %v3054_v3 }
 0x22e   :  { %v31963_v52 = vsub.f32 %v31905_v1, %v3597_v5  ;;  %v3671_v1 = vand.u32 4294901760, %v3670_v30  ;;  %v36981_v23 = vand.u32 4294901760, %v31893_v4  ;;  %v3676_v36 = vsub.f32 %v31901_v25, %v36983_v60 }
 0x22f   :  { %27799 = vmatpush1.bf16.msra.mxu0 %v31803_v54  ;;  %27847 = vmatpush1.bf16.msra.mxu1 %v31805_v14  ;;  %v3127_v10 = vsub.f32 %v31875_v37, %v36978_v33  ;;  %v36980_v14 = vand.u32 4294901760, %v31883_v29  ;;  %v36984_v3 = vand.u32 4294901760, %v31910_v24  ;;  %v3694_v41 = vsub.f32 %v31925_v7, %v36987_v45 }
 0x230   :  { %27801 = vmatprep.subr.bf16.mxu0 %v31602_v8  ;;  %27849 = vmatprep.subr.bf16.mxu1 %v31613_v40  ;;  %v3133_v44 = vsub.f32 %v31893_v4, %v36981_v23  ;;  %v32005_v57 = vpack.c.bf16 %v3597_v5, %v3593_v61  ;;  %v3677_v9 = vand.u32 4294901760, %v3676_v36  ;;  %v36989_v45 = vand.u32 4294901760, %v31933_v42 }
 0x231   :  { %v3682_v54 = vsub.f32 %v31883_v29, %v36980_v14  ;;  %v31960_v14 = vsub.f32 %v31903_v32, %v3593_v61  ;;  %v3128_v33 = vand.u32 4294901760, %v3127_v10  ;;  %v3140_v32 = vand.u32 4294901760, %v3139_v62 }
 0x232   :  { %2367 = vmatmul.mubr.f32.vlgmr.msra.gmra.mrb[2].mxu0 %v31827_v2  ;;  %2910 = vmatmul.mubr.f32.vlgmr.msra.gmra.mrb[18].mxu1 %v31827_v2  ;;  %v3145_v10 = vsub.f32 %v31895_v0, %v36982_v19  ;;  %v3688_v39 = vsub.f32 %v31910_v24, %v36984_v3  ;;  %v36986_v3 = vand.u32 4294901760, %v31919_v11  ;;  %v3134_v18 = vand.u32 4294901760, %v3133_v44 }
 0x233   :  { %27803 = vmatpush1.bf16.msra.mxu0 %v31607_v26  ;;  %27851 = vmatpush1.bf16.msra.mxu1 %v31658_v51  ;;  %v3683_v55 = vand.u32 4294901760, %v3682_v54  ;;  %v36985_v54 = vand.u32 4294901760, %v31917_v15  ;;  %v32007_v23 = vpack.c.bf16 %v3140_v32, %v3128_v33  ;;  %v3157_v48 = vsub.f32 %v31933_v42, %v36989_v45 }
 0x234   :  { %27805 = vmatprep.subr.bf16.mxu0 %v31641_v58  ;;  %27853 = vmatprep.subr.bf16.mxu1 %v31679_v22  ;;  %v3163_v62 = vsub.f32 %v31919_v11, %v36986_v3  ;;  %v3146_v3 = vand.u32 4294901760, %v3145_v10  ;;  %v3689_v13 = vand.u32 4294901760, %v3688_v39  ;;  %v36990_v5 = vand.u32 4294901760, %v31957_v27 }
 0x235   :  { %2445 = vmatprep.mubr.f32.mxu0 %v36977_v6  ;;  %2988 = vmatprep.mubr.f32.mxu1 %v36977_v6  ;;  %v3151_v30 = vsub.f32 %v31917_v15, %v36985_v54  ;;  %v36988_v54 = vand.u32 4294901760, %v31931_v63  ;;  %v32009_v60 = vpack.c.bf16 %v3683_v55, %v3671_v1  ;;  %v36991_v44 = vand.u32 4294901760, %v31960_v14 }
 0x236   :  { %v3169_v61 = vsub.f32 %v31957_v27, %v36990_v5  ;;  %v36992_v32 = vand.u32 4294901760, %v31963_v52  ;;  %v3164_v1 = vand.u32 4294901760, %v3163_v62  ;;  %v3695_v55 = vand.u32 4294901760, %v3694_v41 }
 0x237   :  { %27807 = vmatpush1.bf16.msra.mxu0 %v31662_v59  ;;  %27855 = vmatpush1.bf16.msra.mxu1 %v31683_v53  ;;  %v3706_v19 = vsub.f32 %v31931_v63, %v36988_v54  ;;  %v3700_v33 = vsub.f32 %v31960_v14, %v36991_v44  ;;  %v3152_v36 = vand.u32 4294901760, %v3151_v30  ;;  %v32031_v54 = vpack.c.bf16 %v3146_v3, %v3134_v18 }
 0x238   :  { %27857 = vmatprep.subr.bf16.mxu0 %v31877_v47  ;;  %27905 = vmatprep.subr.bf16.mxu1 %v31887_v20  ;;  %v3712_v39 = vsub.f32 %v31963_v52, %v36992_v32  ;;  %v32033_v45 = vpack.c.bf16 %v3689_v13, %v3677_v9  ;;  %v3158_v5 = vand.u32 4294901760, %v3157_v48  ;;  %v3170_v44 = vand.u32 4294901760, %v3169_v61 }
 0x239   :  { %v3707_v10 = vand.u32 4294901760, %v3706_v19  ;;  %v3701_v32 = vand.u32 4294901760, %v3700_v33  ;;  %v32039_v41 = vpack.c.bf16 %v3164_v1, %v3152_v36  ;;  %v32055_v13 = vpack.c.bf16 %v31879_v34, %v31875_v37 }
 0x23a   :  { %2447 = vmatmul.mubr.f32.vlgmr.msra.gmra.mrb[2].mxu0 %v31827_v2  ;;  %2990 = vmatmul.mubr.f32.vlgmr.msra.gmra.mrb[18].mxu1 %v31827_v2  ;;  %v3713_v50 = vand.u32 4294901760, %v3712_v39  ;;  %v32047_v18 = vpack.c.bf16 %v3170_v44, %v3158_v5  ;;  %v32059_v9 = vpack.c.bf16 %v31883_v29, %v31881_v12  ;;  %v32077_v30 = vpack.c.bf16 %v31919_v11, %v31917_v15 }
 0x23b   :  { %27859 = vmatpush1.bf16.msra.mxu0 %v31889_v17  ;;  %27907 = vmatpush1.bf16.msra.mxu1 %v31899_v31  ;;  %v32041_v62 = vpack.c.bf16 %v3707_v10, %v3695_v55  ;;  %v32081_v19 = vpack.c.bf16 %v31931_v63, %v31925_v7  ;;  %v32089_v3 = vpack.c.bf16 %v31957_v27, %v31933_v42  ;;  %v36993_v33 = vand.u32 4294901760, %v31875_v37 }
 0x23c   :  { %27861 = vmatprep.subr.bf16.mxu0 %v31915_v49  ;;  %27909 = vmatprep.subr.bf16.mxu1 %v31923_v35  ;;  %v32049_v48 = vpack.c.bf16 %v3713_v50, %v3701_v32  ;;  %v32067_v50 = vpack.c.bf16 %v31895_v0, %v31893_v4  ;;  %v32093_v61 = vpack.c.bf16 %v31963_v52, %v31960_v14  ;;  %v36994_v39 = vand.u32 4294901760, %v31879_v34 }
 0x23d   :  { %3112 = vmatprep.mubr.f32.mxu0 %v36977_v6  ;;  %3655 = vmatprep.mubr.f32.mxu1 %v36977_v6  ;;  %v36995_v1 = vand.u32 4294901760, %v31881_v12  ;;  %v36996_v55 = vand.u32 4294901760, %v31883_v29  ;;  %v36997_v37 = vand.u32 4294901760, %v31893_v4  ;;  %v36998_v34 = vand.u32 4294901760, %v31895_v0 }
 0x23e   :  { %v32113_v36 = vpack.c.bf16 %v36994_v39, %v36993_v33  ;;  %v36999_v12 = vand.u32 4294901760, %v31901_v25  ;;  %v37000_v29 = vand.u32 4294901760, %v31910_v24  ;;  %v37001_v44 = vand.u32 4294901760, %v31917_v15 }
 0x23f   :  { %27863 = vmatpush1.bf16.msra.mxu0 %v31950_v28  ;;  %27911 = vmatpush1.bf16.msra.mxu1 %v32005_v57  ;;  %v32119_v10 = vpack.c.bf16 %v36996_v55, %v36995_v1  ;;  %v37002_v32 = vand.u32 4294901760, %v31919_v11  ;;  %v37003_v4 = vand.u32 4294901760, %v31925_v7  ;;  %v37004_v0 = vand.u32 4294901760, %v31931_v63 }
 0x240   :  { %27865 = vmatprep.subr.bf16.mxu0 %v32007_v23  ;;  %27913 = vmatprep.subr.bf16.mxu1 %v32009_v60  ;;  %v32135_v5 = vpack.c.bf16 %v37000_v29, %v36999_v12  ;;  %v37005_v15 = vand.u32 4294901760, %v31933_v42  ;;  %v37006_v11 = vand.u32 4294901760, %v31957_v27  ;;  %v37008_v7 = vand.u32 4294901760, %v31963_v52  ;;  %v37011_v29 = vld [vmem:[#allocation48_spill] sm:$0xff] }
 0x241   :  { %v32143_v33 = vpack.c.bf16 %v37002_v32, %v37001_v44  ;;  %v32149_v39 = vpack.c.bf16 %v37004_v0, %v37003_v4 }
 0x242   :  { %3118 = vmatmul.mubr.f32.vlgmr.msra.gmra.mrb[16].mxu0 %v31837_v46  ;;  %3661 = vmatmul.mubr.f32.vlgmr.msra.gmra.mrb[32].mxu1 %v31837_v46  ;;  %v32071_v46 = vpack.c.bf16 %v31910_v24, %v31901_v25  ;;  %v32159_v25 = vpack.c.bf16 %v37006_v11, %v37005_v15  ;;  %v37007_v24 = vand.u32 4294901760, %v31960_v14  ;;  %v37009_v14 = vld [vmem:[#allocation12_spill] sm:$0xff] }
 0x243   :  { %27867 = vmatpush1.bf16.msra.mxu0 %v32031_v54  ;;  %27915 = vmatpush1.bf16.msra.mxu1 %v32033_v45 }
 0x244   :  { %27869 = vmatprep.subr.bf16.mxu0 %v32039_v41  ;;  %27917 = vmatprep.subr.bf16.mxu1 %v32041_v62  ;;  %v32165_v63 = vpack.c.bf16 %v37008_v7, %v37007_v24 }
 0x245   :  { %3228 = vmatprep.mubr.f32.mxu0 %v36977_v6  ;;  %3771 = vmatprep.mubr.f32.mxu1 %v36977_v6 }
 0x247   :  { %27871 = vmatpush1.bf16.msra.mxu0 %v32047_v18  ;;  %27919 = vmatpush1.bf16.msra.mxu1 %v32049_v48 }
 0x248   :  { %27873 = vmatprep.subr.bf16.mxu0 %v32055_v13  ;;  %27921 = vmatprep.subr.bf16.mxu1 %v32059_v9 }
 0x24a   :  { %3230 = vmatmul.mubr.f32.vlgmr.msra.gmra.mrb[16].mxu0 %v31827_v2  ;;  %3773 = vmatmul.mubr.f32.vlgmr.msra.gmra.mrb[32].mxu1 %v31827_v2 }
 0x24b   :  { %27875 = vmatpush1.bf16.msra.mxu0 %v32067_v50  ;;  %27923 = vmatpush1.bf16.msra.mxu1 %v32071_v46 }
 0x24c   :  { %27877 = vmatprep.subr.bf16.mxu0 %v32077_v30  ;;  %27925 = vmatprep.subr.bf16.mxu1 %v32081_v19 }
 0x24d   :  { %3316 = vmatprep.mubr.f32.mxu0 %v36977_v6  ;;  %3859 = vmatprep.mubr.f32.mxu1 %v36977_v6 }
 0x24f   :  { %27879 = vmatpush1.bf16.msra.mxu0 %v32089_v3  ;;  %27927 = vmatpush1.bf16.msra.mxu1 %v32093_v61 }
 0x250   :  { %27881 = vmatprep.subr.bf16.mxu0 %v31877_v47  ;;  %27929 = vmatprep.subr.bf16.mxu1 %v31887_v20 }
 0x252   :  { %3319 = vmatmul.mubr.f32.vlgmr.msra.gmra.mrb[16].mxu0 %v31830_v43  ;;  %3862 = vmatmul.mubr.f32.vlgmr.msra.gmra.mrb[32].mxu1 %v31830_v43  ;;  %v32129_v43 = vpack.c.bf16 %v36998_v34, %v36997_v37  ;;  %v37010_v34 = vld [vmem:[#allocation47_spill] sm:$0xff] }
 0x253   :  { %27883 = vmatpush1.bf16.msra.mxu0 %v31889_v17  ;;  %27931 = vmatpush1.bf16.msra.mxu1 %v31899_v31 }
 0x254   :  { %27885 = vmatprep.subr.bf16.mxu0 %v31915_v49  ;;  %27933 = vmatprep.subr.bf16.mxu1 %v31923_v35 }
 0x255   :  { %3397 = vmatprep.mubr.f32.mxu0 %v36977_v6  ;;  %3940 = vmatprep.mubr.f32.mxu1 %v36977_v6 }
 0x257   :  { %27887 = vmatpush1.bf16.msra.mxu0 %v31950_v28  ;;  %27935 = vmatpush1.bf16.msra.mxu1 %v32005_v57 }
 0x258   :  { %27889 = vmatprep.subr.bf16.mxu0 %v32113_v36  ;;  %27937 = vmatprep.subr.bf16.mxu1 %v32119_v10 }
 0x25a   :  { %3401 = vmatmul.mubr.f32.vlgmr.msra.gmra.mrb[16].mxu0 %v31833_v56  ;;  %3944 = vmatmul.mubr.f32.vlgmr.msra.gmra.mrb[32].mxu1 %v31833_v56 }
 0x25b   :  { %27891 = vmatpush1.bf16.msra.mxu0 %v32129_v43  ;;  %27939 = vmatpush1.bf16.msra.mxu1 %v32135_v5 }
 0x25c   :  { %27893 = vmatprep.subr.bf16.mxu0 %v32143_v33  ;;  %27941 = vmatprep.subr.bf16.mxu1 %v32149_v39 }
 0x25d   :  { %3495 = vmatprep.mubr.f32.mxu0 %v36977_v6  ;;  %4038 = vmatprep.mubr.f32.mxu1 %v36977_v6 }
 0x25f   :  { %27895 = vmatpush1.bf16.msra.mxu0 %v32159_v25  ;;  %27943 = vmatpush1.bf16.msra.mxu1 %v32165_v63 }
 0x260   :  { %27897 = vmatprep.subr.bf16.mxu0 %v31877_v47  ;;  %27945 = vmatprep.subr.bf16.mxu1 %v31887_v20 }
 0x262   :  { %3497 = vmatmul.mubr.f32.vlgmr.msra.gmra.mrb[16].mxu0 %v31827_v2  ;;  %4040 = vmatmul.mubr.f32.vlgmr.msra.gmra.mrb[32].mxu1 %v31827_v2 }
 0x263   :  { %27899 = vmatpush1.bf16.msra.mxu0 %v31889_v17  ;;  %27947 = vmatpush1.bf16.msra.mxu1 %v31899_v31 }
 0x264   :  { %27901 = vmatprep.subr.bf16.mxu0 %v31915_v49  ;;  %27949 = vmatprep.subr.bf16.mxu1 %v31923_v35 }
 0x265   :  { %3575 = vmatprep.mubr.f32.mxu0 %v36977_v6  ;;  %4118 = vmatprep.mubr.f32.mxu1 %v36977_v6 }
 0x267   :  { %27903 = vmatpush1.bf16.msra.mxu0 %v31950_v28  ;;  %27951 = vmatpush1.bf16.msra.mxu1 %v32005_v57 }
 0x268   :  { %27953 = vmatprep.subr.bf16.mxu0 %v31602_v8  ;;  %28001 = vmatprep.subr.bf16.mxu1 %v31613_v40 }
 0x26a   :  { %3577 = vmatmul.mubr.f32.vlgmr.msra.gmra.mrb[16].mxu0 %v31827_v2  ;;  %4120 = vmatmul.mubr.f32.vlgmr.msra.gmra.mrb[32].mxu1 %v31827_v2 }
 0x26b   :  { %27955 = vmatpush1.bf16.msra.mxu0 %v31607_v26  ;;  %28003 = vmatpush1.bf16.msra.mxu1 %v31658_v51 }
 0x26c   :  { %27957 = vmatprep.subr.bf16.mxu0 %v31641_v58  ;;  %28005 = vmatprep.subr.bf16.mxu1 %v31679_v22 }
 0x26d   :  { %4246 = vmatprep.mubr.f32.mxu0 %v36977_v6  ;;  %4789 = vmatprep.mubr.f32.mxu1 %v36977_v6 }
 0x26f   :  { %27959 = vmatpush1.bf16.msra.mxu0 %v31662_v59  ;;  %28007 = vmatpush1.bf16.msra.mxu1 %v31683_v53 }
 0x270   :  { %27961 = vmatprep.subr.bf16.mxu0 %v31713_v16  ;;  %28009 = vmatprep.subr.bf16.mxu1 %v31721_v21 }
 0x30d   :  { %v2448_v2 = vpop.f32.mrb[2].mxu0  ;;  %v2991_v56 = vpop.f32.mrb[18].mxu1 }
 0x30e   :  { %v29927_v42 = vadd.f32 %v2448_v2, %v31541_v38  ;;  %v2450_v52 = vpop.f32.mrb[3].mxu0  ;;  %v2993_v27 = vpop.f32.mrb[19].mxu1  ;;  %v29956_v12 = vadd.f32 %v2991_v56, %v37010_v34 }
 0x30f   :  { %v29929_v1 = vadd.f32 %v2450_v52, %v37009_v14  ;;  %v29957_v44 = vadd.f32 %v2993_v27, %v37011_v29  ;;  %v32210_v27 = vld [vmem:[%s36674_s6] sm:$0xf] }
 0x310   :  { %v27474_v55 = vmul.f32 -1.442695, %v29927_v42  ;;  %v27476_v32 = vmul.f32 -1.442695, %v29956_v12  ;;  %v37012_v42 = vld [vmem:[#allocation49_spill] sm:$0xff] }
 0x311   :  { %v27475_v37 = vmul.f32 -1.442695, %v29929_v1 }
 0x312   :  { %30712 = vpow2.f32 %v27474_v55  ;;  %v37013_v55 = vld [vmem:[#allocation11_spill] sm:$0xff] }
 0x313   :  { %30714 = vpow2.f32 %v27475_v37  ;;  %v37014_v37 = vsub.s32 0, %v37013_v55 }
 0x314   :  { %30716 = vtanh.f32 %v29957_v44 }
 0x315   :  { %30718 = vpow2.f32 %v27476_v32  ;;  %v32215_v12 = vrot.slane %v32210_v27, %v37014_v37  ;;  %v37016_v32 = vsub.s32 1, %v37013_v55  ;;  %v37018_v37 = vsub.s32 3, %v37013_v55 }
 0x317   :  { %37015 = vst [vmem:[#allocation12_spill] sm:$0xff] %v32215_v12 }
 0x31c   :  { %v30713_v16 = vpop.eup %30712 }
 0x31d   :  { %v3009_v4 = vadd.f32 1.0, %v30713_v16  ;;  %v30715_v21 = vpop.eup %30714  ;;  %v32220_v16 = vrot.slane %v32210_v27, %v37016_v32 }
 0x31e   :  { %v3010_v38 = vadd.f32 1.0, %v30715_v21  ;;  %v30717_v0 = vpop.eup %30716 }
 0x31f   :  { %30720 = vrcp.f32 %v3009_v4  ;;  %v30719_v15 = vpop.eup %30718  ;;  %37017 = vst [vmem:[#allocation47_spill] sm:$0xff] %v32220_v16 }
 0x320   :  { %30722 = vrcp.f32 %v3010_v38  ;;  %v3011_v2 = vadd.f32 1.0, %v30719_v15 }
 0x322   :  { %30724 = vrcp.f32 %v3011_v2 }
 0x329   :  { %v30721_v11 = vpop.eup %30720 }
 0x32a   :  { %v3020_v24 = vmul.f32 %v30721_v11, %v30717_v0  ;;  %v30723_v7 = vpop.eup %30722 }
 0x32b   :  { %v3019_v52 = vmul.f32 %v30723_v7, %v37012_v42 }
 0x32c   :  { %v30725_v14 = vpop.eup %30724 }
 0x32d   :  { %v32204_v56 = vadd.f32 %v3020_v24, %v3019_v52 }
 0x32f   :  { %30726 = vtanh.f32 %v32204_v56 }
 0x339   :  { %v30727_v1 = vpop.eup %30726 }
 0x33a   :  { %v3023_v44 = vmul.f32 %v30727_v1, %v30725_v14 }
 0x33c   :  { %v4172_v38 = vsel %vm1906_vm1, %v3023_v44, 0  ;;  %v32240_v44 = vrot.slane %v32210_v27, %v37018_v37  ;;  %v37025_v37 = vld [vmem:[#allocation38_spill] sm:$0xff] }
 0x33d   :  { %v3578_v4 = vpop.f32.mrb[16].mxu0  ;;  %v32222_v21 = vpop.f32.mrb[32].mxu1  ;;  %v32226_v24 = vand.u32 4294901760, %v4172_v38 }
 0x33e   :  { %v29970_v0 = vadd.f32 %v3578_v4, %v32215_v12  ;;  %v3580_v15 = vpop.f32.mrb[17].mxu0  ;;  %v4123_v11 = vpop.f32.mrb[33].mxu1  ;;  %37019 = vst [vmem:[#allocation48_spill] sm:$0xff] %v32240_v44  ;;  %v37020_v4 = vld [vmem:[#allocation25_spill] sm:$0xff] }
 0x33f   :  { %v29971_v7 = vadd.f32 %v3580_v15, %v32220_v16  ;;  %v32230_v42 = vsub.f32 %v4172_v38, %v32226_v24  ;;  %v37021_v38 = vld [vmem:[#allocation26_spill] sm:$0xff]  ;;  %v37022_v15 = vld [vmem:[#allocation27_spill] sm:$0xff] }
 0x340   :  { %v27477_v2 = vmul.f32 -1.442695, %v29970_v0  ;;  %v29973_v0 = vadd.f32 %v4123_v11, %v32240_v44 }
 0x341   :  { %v27478_v52 = vmul.f32 -1.442695, %v29971_v7  ;;  %v32233_v14 = vand.u32 4294901760, %v32230_v42  ;;  %v37023_v7 = vld [vmem:[#allocation28_spill] sm:$0xff] }
 0x342   :  { %30728 = vpow2.f32 %v27477_v2 }
 0x343   :  { %30730 = vpow2.f32 %v27478_v52  ;;  %v4250_v1 = vsub.f32 %v32230_v42, %v32233_v14 }
 0x344   :  { %30732 = vtanh.f32 %v29973_v0  ;;  %v37032_v0 = vld [vmem:[#allocation36_spill] sm:$0xff] }
 0x345   :  { %v32242_v32 = vand.u32 4294901760, %v4250_v1  ;;  %v37024_v1 = vld [vmem:[#allocation33_spill] sm:$0xff] }
 0x347   :  { %4252 = vmatmul.mubr.f32.vlgmr.msra.gmra.mrb[4].mxu0 %v32242_v32  ;;  %4795 = vmatmul.mubr.f32.vlgmr.msra.gmra.mrb[20].mxu1 %v32242_v32 }
 0x348   :  { %27963 = vmatpush1.bf16.msra.mxu0 %v37020_v4  ;;  %28011 = vmatpush1.bf16.msra.mxu1 %v37021_v38  ;;  %v37026_v4 = vld [vmem:[#allocation29_spill] sm:$0xff]  ;;  %v37027_v38 = vld [vmem:[#allocation30_spill] sm:$0xff] }
 0x349   :  { %27965 = vmatprep.subr.bf16.mxu0 %v37022_v15  ;;  %28013 = vmatprep.subr.bf16.mxu1 %v37023_v7  ;;  %v37028_v15 = vld [vmem:[#allocation31_spill] sm:$0xff]  ;;  %v37029_v7 = vld [vmem:[#allocation32_spill] sm:$0xff] }
 0x34a   :  { %4362 = vmatprep.mubr.f32.mxu0 %v36977_v6  ;;  %4905 = vmatprep.mubr.f32.mxu1 %v36977_v6 }
 0x34c   :  { %v30729_v2 = vpop.eup %30728  ;;  %27967 = vmatpush1.bf16.msra.mxu0 %v37024_v1  ;;  %28015 = vmatpush1.bf16.msra.mxu1 %v37025_v37  ;;  %v37031_v1 = vld [vmem:[#allocation35_spill] sm:$0xff] }
 0x34d   :  { %v4135_v52 = vadd.f32 1.0, %v30729_v2  ;;  %v30731_v16 = vpop.eup %30730  ;;  %27969 = vmatprep.subr.bf16.mxu0 %v37026_v4  ;;  %28017 = vmatprep.subr.bf16.mxu1 %v37027_v38  ;;  %v37030_v2 = vld [vmem:[#allocation34_spill] sm:$0xff] }
 0x34e   :  { %v4136_v11 = vadd.f32 1.0, %v30731_v16  ;;  %v37033_v16 = vld [vmem:[#allocation37_spill] sm:$0xff] }
 0x34f   :  { %30734 = vrcp.f32 %v4135_v52  ;;  %4364 = vmatmul.mubr.f32.vlgmr.msra.gmra.mrb[4].mxu0 %v32226_v24  ;;  %4907 = vmatmul.mubr.f32.vlgmr.msra.gmra.mrb[20].mxu1 %v32226_v24  ;;  %v30733_v52 = vpop.eup %30732 }
 0x350   :  { %30736 = vrcp.f32 %v4136_v11  ;;  %27971 = vmatpush1.bf16.msra.mxu0 %v37028_v15  ;;  %28019 = vmatpush1.bf16.msra.mxu1 %v37029_v7  ;;  %v37035_v7 = vld [vmem:[#allocation39_spill] sm:$0xff] }
 0x351   :  { %27973 = vmatprep.subr.bf16.mxu0 %v37030_v2  ;;  %28021 = vmatprep.subr.bf16.mxu1 %v37031_v1  ;;  %v37036_v2 = vld [vmem:[#allocation40_spill] sm:$0xff]  ;;  %v37037_v1 = vld [vmem:[#allocation41_spill] sm:$0xff] }
 0x352   :  { %4450 = vmatprep.mubr.f32.mxu0 %v36977_v6  ;;  %4993 = vmatprep.mubr.f32.mxu1 %v36977_v6 }
 0x354   :  { %27975 = vmatpush1.bf16.msra.mxu0 %v37032_v0  ;;  %28023 = vmatpush1.bf16.msra.mxu1 %v37033_v16  ;;  %v37038_v0 = vld [vmem:[#allocation42_spill] sm:$0xff]  ;;  %v37039_v16 = vld [vmem:[#allocation43_spill] sm:$0xff] }
 0x355   :  { %27977 = vmatprep.subr.bf16.mxu0 %v31602_v8  ;;  %28025 = vmatprep.subr.bf16.mxu1 %v31613_v40 }
 0x357   :  { %4453 = vmatmul.mubr.f32.vlgmr.msra.gmra.mrb[4].mxu0 %v32230_v42  ;;  %4996 = vmatmul.mubr.f32.vlgmr.msra.gmra.mrb[20].mxu1 %v32230_v42 }
 0x358   :  { %27979 = vmatpush1.bf16.msra.mxu0 %v31607_v26  ;;  %28027 = vmatpush1.bf16.msra.mxu1 %v31658_v51 }
 0x359   :  { %v30735_v37 = vpop.eup %30734  ;;  %27981 = vmatprep.subr.bf16.mxu0 %v31641_v58  ;;  %28029 = vmatprep.subr.bf16.mxu1 %v31679_v22 }
 0x35a   :  { %v4146_v4 = vmul.f32 %v30735_v37, %v30733_v52  ;;  %v30737_v38 = vpop.eup %30736  ;;  %4531 = vmatprep.mubr.f32.mxu0 %v36977_v6  ;;  %5074 = vmatprep.mubr.f32.mxu1 %v36977_v6  ;;  %v37040_v52 = vld [vmem:[#allocation44_spill] sm:$0xff]  ;;  %v37041_v37 = vld [vmem:[#allocation45_spill] sm:$0xff] }
 0x35b   :  { %v4145_v11 = vmul.f32 0.0, %v30737_v38  ;;  %v37043_v38 = vsub.s32 2, %v37013_v55  ;;  %v6405_v55 = vld [vmem:[#allocation8 + $0x78] sm:$0xff] }
 0x35c   :  { %27983 = vmatpush1.bf16.msra.mxu0 %v31662_v59  ;;  %28031 = vmatpush1.bf16.msra.mxu1 %v31683_v53 }
 0x35d   :  { %v32279_v15 = vadd.f32 %v4146_v4, %v4145_v11  ;;  %27985 = vmatprep.subr.bf16.mxu0 %v37035_v7  ;;  %28033 = vmatprep.subr.bf16.mxu1 %v37036_v2  ;;  %v37042_v4 = vld [vmem:[#allocation46_spill] sm:$0xff]  ;;  %v32298_v11 = vrot.slane %v32210_v27, %v37043_v38  ;;  %v6964_v38 = vand.u32 4294901760, %v6405_v55 }
 0x35e   :  { %v6401_v27 = vld [vmem:[#allocation8 + $0x58] sm:$0xff] }
 0x35f   :  { %37034 = vst [vmem:[#allocation49_spill] sm:$0xff] %v32279_v15  ;;  %4535 = vmatmul.mubr.f32.vlgmr.msra.gmra.mrb[4].mxu0 %v32233_v14  ;;  %5078 = vmatmul.mubr.f32.vlgmr.msra.gmra.mrb[20].mxu1 %v32233_v14  ;;  %37044 = vst [vmem:[#allocation11_spill] sm:$0xff] %v32298_v11 }
 0x360   :  { %27987 = vmatpush1.bf16.msra.mxu0 %v37037_v1  ;;  %28035 = vmatpush1.bf16.msra.mxu1 %v37038_v0 }
 0x361   :  { %27989 = vmatprep.subr.bf16.mxu0 %v37039_v16  ;;  %28037 = vmatprep.subr.bf16.mxu1 %v37040_v52  ;;  %v6398_v16 = vld [vmem:[#allocation8 + $0x40] sm:$0xff] }
 0x362   :  { %4629 = vmatprep.mubr.f32.mxu0 %v36977_v6  ;;  %5172 = vmatprep.mubr.f32.mxu1 %v36977_v6  ;;  %v6402_v52 = vld [vmem:[#allocation8 + $0x60] sm:$0xff] }
 0x364   :  { %27991 = vmatpush1.bf16.msra.mxu0 %v37041_v37  ;;  %28039 = vmatpush1.bf16.msra.mxu1 %v37042_v4  ;;  %v6960_v4 = vand.u32 4294901760, %v6401_v27 }
 0x365   :  { %27993 = vmatprep.subr.bf16.mxu0 %v31602_v8  ;;  %28041 = vmatprep.subr.bf16.mxu1 %v31613_v40  ;;  %v29972_v8 = vadd.f32 %v32222_v21, %v32298_v11 }
 0x367   :  { %4631 = vmatmul.mubr.f32.vlgmr.msra.gmra.mrb[4].mxu0 %v32226_v24  ;;  %5174 = vmatmul.mubr.f32.vlgmr.msra.gmra.mrb[20].mxu1 %v32226_v24 }
 0x368   :  { %27995 = vmatpush1.bf16.msra.mxu0 %v31607_v26  ;;  %28043 = vmatpush1.bf16.msra.mxu1 %v31658_v51  ;;  %v27479_v26 = vmul.f32 -1.442695, %v29972_v8  ;;  %v6391_v51 = vld [vmem:[#allocation8 + $0x8] sm:$0xff] }
 0x369   :  { %27997 = vmatprep.subr.bf16.mxu0 %v31641_v58  ;;  %28045 = vmatprep.subr.bf16.mxu1 %v31679_v22  ;;  %v6393_v22 = vld [vmem:[#allocation8 + $0x18] sm:$0xff] }
 0x36a   :  { %4709 = vmatprep.mubr.f32.mxu0 %v36977_v6  ;;  %5252 = vmatprep.mubr.f32.mxu1 %v36977_v6  ;;  %30738 = vpow2.f32 %v27479_v26 }
 0x36b   :  { %30740 = vtanh.f32 %v32279_v15 }
 0x36c   :  { %27999 = vmatpush1.bf16.msra.mxu0 %v31662_v59  ;;  %28047 = vmatpush1.bf16.msra.mxu1 %v31683_v53  ;;  %v6395_v59 = vld [vmem:[#allocation8 + $0x28] sm:$0xff]  ;;  %v6397_v53 = vld [vmem:[#allocation8 + $0x38] sm:$0xff] }
 0x36d   :  { %28049 = vmatprep.subr.bf16.mxu0 %v31877_v47  ;;  %28097 = vmatprep.subr.bf16.mxu1 %v31887_v20 }
 0x36f   :  { %4711 = vmatmul.mubr.f32.vlgmr.msra.gmra.mrb[4].mxu0 %v32226_v24  ;;  %5254 = vmatmul.mubr.f32.vlgmr.msra.gmra.mrb[20].mxu1 %v32226_v24 }
 0x370   :  { %28051 = vmatpush1.bf16.msra.mxu0 %v31889_v17  ;;  %28099 = vmatpush1.bf16.msra.mxu1 %v31899_v31 }
 0x371   :  { %28053 = vmatprep.subr.bf16.mxu0 %v31915_v49  ;;  %28101 = vmatprep.subr.bf16.mxu1 %v31923_v35 }
 0x372   :  { %5376 = vmatprep.mubr.f32.mxu0 %v36977_v6  ;;  %5919 = vmatprep.mubr.f32.mxu1 %v36977_v6 }
 0x374   :  { %28055 = vmatpush1.bf16.msra.mxu0 %v31950_v28  ;;  %28103 = vmatpush1.bf16.msra.mxu1 %v32005_v57  ;;  %v30739_v40 = vpop.eup %30738 }
 0x375   :  { %28057 = vmatprep.subr.bf16.mxu0 %v32007_v23  ;;  %28105 = vmatprep.subr.bf16.mxu1 %v32009_v60  ;;  %v4137_v58 = vadd.f32 1.0, %v30739_v40  ;;  %v6390_v23 = vld [vmem:[#allocation8] sm:$0xff] }
 0x376   :  { %v6394_v60 = vld [vmem:[#allocation8 + $0x20] sm:$0xff] }
 0x377   :  { %5382 = vmatmul.mubr.f32.vlgmr.msra.gmra.mrb[18].mxu0 %v32242_v32  ;;  %5925 = vmatmul.mubr.f32.vlgmr.msra.gmra.mrb[34].mxu1 %v32242_v32  ;;  %30742 = vrcp.f32 %v4137_v58 }
 0x378   :  { %28059 = vmatpush1.bf16.msra.mxu0 %v32031_v54  ;;  %28107 = vmatpush1.bf16.msra.mxu1 %v32033_v45  ;;  %v6409_v54 = vand.u32 4294901760, %v6391_v51  ;;  %v6413_v45 = vand.u32 4294901760, %v6395_v59 }
 0x379   :  { %28061 = vmatprep.subr.bf16.mxu0 %v32039_v41  ;;  %28109 = vmatprep.subr.bf16.mxu1 %v32041_v62  ;;  %v6952_v41 = vand.u32 4294901760, %v6393_v22  ;;  %v6956_v62 = vand.u32 4294901760, %v6397_v53 }
 0x37a   :  { %5492 = vmatprep.mubr.f32.mxu0 %v36977_v6  ;;  %6035 = vmatprep.mubr.f32.mxu1 %v36977_v6  ;;  %v32367_v32 = vsub.f32 %v6395_v59, %v6413_v45  ;;  %v6419_v59 = vand.u32 4294901760, %v6398_v16 }
 0x37b   :  { %v32369_v7 = vpack.c.bf16 %v6956_v62, %v6952_v41  ;;  %v32371_v2 = vsub.f32 %v6393_v22, %v6952_v41  ;;  %v32373_v1 = vsub.f32 %v6397_v53, %v6956_v62  ;;  %v32394_v22 = vld [vmem:[#allocation8 + $0x50] sm:$0xff]  ;;  %v32410_v41 = vpack.c.bf16 %v6964_v38, %v6960_v4 }
 0x37c   :  { %28063 = vmatpush1.bf16.msra.mxu0 %v32047_v18  ;;  %28111 = vmatpush1.bf16.msra.mxu1 %v32049_v48  ;;  %v6392_v18 = vld [vmem:[#allocation8 + $0x10] sm:$0xff]  ;;  %v32414_v62 = vsub.f32 %v6401_v27, %v6960_v4 }
 0x37d   :  { %28065 = vmatprep.subr.bf16.mxu0 %v32055_v13  ;;  %28113 = vmatprep.subr.bf16.mxu1 %v32059_v9  ;;  %v6396_v48 = vld [vmem:[#allocation8 + $0x30] sm:$0xff]  ;;  %v6411_v13 = vand.u32 4294901760, %v6390_v23  ;;  %v6415_v9 = vand.u32 4294901760, %v6394_v60 }
 0x37f   :  { %5494 = vmatmul.mubr.f32.vlgmr.msra.gmra.mrb[18].mxu0 %v32226_v24  ;;  %6037 = vmatmul.mubr.f32.vlgmr.msra.gmra.mrb[34].mxu1 %v32226_v24  ;;  %v32375_v0 = vpack.c.bf16 %v6415_v9, %v6411_v13  ;;  %v32381_v8 = vsub.f32 %v6390_v23, %v6411_v13  ;;  %v32383_v26 = vsub.f32 %v6394_v60, %v6415_v9  ;;  %v36726_v23 = vand.u32 4294901760, %v32373_v1 }
 0x380   :  { %28067 = vmatpush1.bf16.msra.mxu0 %v32067_v50  ;;  %28115 = vmatpush1.bf16.msra.mxu1 %v32071_v46  ;;  %v30741_v50 = vpop.eup %30740  ;;  %v6399_v46 = vld [vmem:[#allocation8 + $0x48] sm:$0xff]  ;;  %v32423_v9 = vsub.f32 %v6405_v55, %v6964_v38 }
 0x381   :  { %28069 = vmatprep.subr.bf16.mxu0 %v32077_v30  ;;  %28117 = vmatprep.subr.bf16.mxu1 %v32081_v19  ;;  %v32361_v30 = vsub.f32 %v6391_v51, %v6409_v54  ;;  %v6954_v19 = vand.u32 4294901760, %v6392_v18  ;;  %v30743_v21 = vpop.eup %30742 }
 0x382   :  { %5580 = vmatprep.mubr.f32.mxu0 %v36977_v6  ;;  %6123 = vmatprep.mubr.f32.mxu1 %v36977_v6  ;;  %v4149_v37 = vmul.f32 %v30743_v21, %v30741_v50 }
 0x383   :  { %v6495_v58 = vand.u32 4294901760, %v32361_v30 }
 0x384   :  { %28071 = vmatpush1.bf16.msra.mxu0 %v32089_v3  ;;  %28119 = vmatpush1.bf16.msra.mxu1 %v32093_v61  ;;  %v6958_v3 = vand.u32 4294901760, %v6396_v48  ;;  %v6403_v61 = vld [vmem:[#allocation8 + $0x68] sm:$0xff]  ;;  %v6407_v53 = vsel %vm1906_vm1, %v4149_v37, 0 }
 0x385   :  { %28073 = vmatprep.subr.bf16.mxu0 %v31877_v47  ;;  %28121 = vmatprep.subr.bf16.mxu1 %v31887_v20  ;;  %v6496_v13 = vsub.f32 %v32361_v30, %v6495_v58 }
 0x386   :  { %v32385_v40 = vpack.c.bf16 %v6958_v3, %v6954_v19  ;;  %v32392_v51 = vsub.f32 %v6396_v48, %v6958_v3 }
 0x387   :  { %5583 = vmatmul.mubr.f32.vlgmr.msra.gmra.mrb[18].mxu0 %v32230_v42  ;;  %6126 = vmatmul.mubr.f32.vlgmr.msra.gmra.mrb[34].mxu1 %v32230_v42  ;;  %v32365_v42 = vpack.c.bf16 %v6413_v45, %v6409_v54  ;;  %v6497_v37 = vand.u32 4294901760, %v6496_v13 }
 0x388   :  { %28075 = vmatpush1.bf16.msra.mxu0 %v31889_v17  ;;  %28123 = vmatpush1.bf16.msra.mxu1 %v31899_v31  ;;  %v36722_v55 = vand.u32 4294901760, %v32392_v51 }
 0x389   :  { %28077 = vmatprep.subr.bf16.mxu0 %v31915_v49  ;;  %28125 = vmatprep.subr.bf16.mxu1 %v31923_v35 }
 0x38a   :  { %5661 = vmatprep.mubr.f32.mxu0 %v36977_v6  ;;  %6204 = vmatprep.mubr.f32.mxu1 %v36977_v6 }
 0x38c   :  { %28079 = vmatpush1.bf16.msra.mxu0 %v31950_v28  ;;  %28127 = vmatpush1.bf16.msra.mxu1 %v32005_v57 }
 0x38d   :  { %28081 = vmatprep.subr.bf16.mxu0 %v32113_v36  ;;  %28129 = vmatprep.subr.bf16.mxu1 %v32119_v10  ;;  %v6417_v36 = vand.u32 4294901760, %v6399_v46  ;;  %v6421_v10 = vand.u32 4294901760, %v6403_v61 }
 0x38f   :  { %5665 = vmatmul.mubr.f32.vlgmr.msra.gmra.mrb[18].mxu0 %v32233_v14  ;;  %6208 = vmatmul.mubr.f32.vlgmr.msra.gmra.mrb[34].mxu1 %v32233_v14  ;;  %v32390_v14 = vsub.f32 %v6392_v18, %v6954_v19  ;;  %v32404_v60 = vpack.c.bf16 %v6421_v10, %v6417_v36  ;;  %v32406_v54 = vsub.f32 %v6399_v46, %v6417_v36  ;;  %v6962_v18 = vand.u32 4294901760, %v32394_v22 }
 0x390   :  { %28083 = vmatpush1.bf16.msra.mxu0 %v32129_v43  ;;  %28131 = vmatpush1.bf16.msra.mxu1 %v32135_v5  ;;  %v6423_v43 = vand.u32 4294901760, %v6402_v52  ;;  %v32396_v5 = vld [vmem:[#allocation8 + $0x70] sm:$0xff]  ;;  %v32408_v45 = vsub.f32 %v6403_v61, %v6421_v10  ;;  %v36724_v61 = vand.u32 4294901760, %v32383_v26  ;;  %v7074_v10 = vand.u32 4294901760, %v32423_v9 }
 0x391   :  { %28085 = vmatprep.subr.bf16.mxu0 %v32143_v33  ;;  %28133 = vmatprep.subr.bf16.mxu1 %v32149_v39  ;;  %v6507_v33 = vand.u32 4294901760, %v32367_v32  ;;  %v36727_v39 = vand.u32 4294901760, %v32371_v2  ;;  %v6966_v48 = vand.u32 4294901760, %v32396_v5  ;;  %v36723_v27 = vand.u32 4294901760, %v32390_v14 }
 0x392   :  { %5759 = vmatprep.mubr.f32.mxu0 %v36977_v6  ;;  %6302 = vmatprep.mubr.f32.mxu1 %v36977_v6  ;;  %v32425_v50 = vpack.c.bf16 %v6423_v43, %v6419_v59  ;;  %v32443_v3 = vsub.f32 %v6402_v52, %v6423_v43  ;;  %v32451_v21 = vsub.f32 %v32394_v22, %v6962_v18  ;;  %v36721_v52 = vand.u32 4294901760, %v32406_v54 }
 0x393   :  { %v6508_v46 = vsub.f32 %v32367_v32, %v6507_v33  ;;  %v7039_v19 = vsub.f32 %v32371_v2, %v36727_v39  ;;  %v7045_v43 = vsub.f32 %v32390_v14, %v36723_v27  ;;  %v7057_v22 = vsub.f32 %v32392_v51, %v36722_v55 }
 0x394   :  { %28087 = vmatpush1.bf16.msra.mxu0 %v32159_v25  ;;  %28135 = vmatpush1.bf16.msra.mxu1 %v32165_v63  ;;  %v32427_v25 = vsub.f32 %v6398_v16, %v6419_v59  ;;  %v32429_v63 = vand.u32 4294901760, %v6407_v53  ;;  %v32454_v16 = vsub.f32 %v32396_v5, %v6966_v48  ;;  %v36732_v13 = vand.u32 4294901760, %v32443_v3 }
 0x395   :  { %28089 = vmatprep.subr.bf16.mxu0 %v31877_v47  ;;  %28137 = vmatprep.subr.bf16.mxu1 %v31887_v20  ;;  %v7051_v47 = vsub.f32 %v32373_v1, %v36726_v23  ;;  %v36725_v20 = vand.u32 4294901760, %v32381_v8  ;;  %v6509_v4 = vand.u32 4294901760, %v6508_v46  ;;  %v7040_v38 = vand.u32 4294901760, %v7039_v19 }
 0x396   :  { %37045 = vst [vmem:[#allocation25_spill] sm:$0xff] %v32429_v63  ;;  %v32460_v36 = vsub.f32 %v6407_v53, %v32429_v63  ;;  %v6525_v5 = vand.u32 4294901760, %v32427_v25  ;;  %v6520_v53 = vsub.f32 %v32406_v54, %v36721_v52  ;;  %v36731_v46 = vand.u32 4294901760, %v32451_v21 }
 0x397   :  { %5761 = vmatmul.mubr.f32.vlgmr.msra.gmra.mrb[18].mxu0 %v32226_v24  ;;  %6304 = vmatmul.mubr.f32.vlgmr.msra.gmra.mrb[34].mxu1 %v32226_v24  ;;  %v7052_v59 = vand.u32 4294901760, %v7051_v47  ;;  %v36730_v19 = vand.u32 4294901760, %v32454_v16  ;;  %v7075_v52 = vsub.f32 %v32423_v9, %v7074_v10  ;;  %v32502_v55 = vpack.c.bf16 %v6966_v48, %v6962_v18 }
 0x398   :  { %28091 = vmatpush1.bf16.msra.mxu0 %v31889_v17  ;;  %28139 = vmatpush1.bf16.msra.mxu1 %v31899_v31  ;;  %37046 = vst [vmem:[#allocation26_spill] sm:$0xff] %v32460_v36  ;;  %v36728_v17 = vand.u32 4294901760, %v32408_v45  ;;  %v36729_v31 = vand.u32 4294901760, %v32414_v62  ;;  %v32491_v47 = vand.u32 4294901760, %v32460_v36  ;;  %v28152_v27 = vpack.c.bf16 %v6509_v4, %v6497_v37 }
 0x399   :  { %28093 = vmatprep.subr.bf16.mxu0 %v31915_v49  ;;  %28141 = vmatprep.subr.bf16.mxu1 %v31923_v35  ;;  %v6502_v35 = vsub.f32 %v32381_v8, %v36725_v20  ;;  %v6514_v49 = vsub.f32 %v32383_v26, %v36724_v61  ;;  %v28200_v61 = vpack.c.bf16 %v7052_v59, %v7040_v38  ;;  %v7046_v39 = vand.u32 4294901760, %v7045_v43 }
 0x39a   :  { %5839 = vmatprep.mubr.f32.mxu0 %v36977_v6  ;;  %6382 = vmatprep.mubr.f32.mxu1 %v36977_v6  ;;  %37047 = vst [vmem:[#allocation27_spill] sm:$0xff] %v32491_v47  ;;  %v6521_v18 = vand.u32 4294901760, %v6520_v53  ;;  %v6538_v48 = vsub.f32 %v32443_v3, %v36732_v13  ;;  %v7081_v37 = vsub.f32 %v32454_v16, %v36730_v19 }
 0x39b   :  { %v6503_v20 = vand.u32 4294901760, %v6502_v35  ;;  %v6515_v23 = vand.u32 4294901760, %v6514_v49  ;;  %v6485_v4 = vsub.f32 %v32460_v36, %v32491_v47  ;;  %v7076_v35 = vand.u32 4294901760, %v7075_v52 }
 0x39c   :  { %28095 = vmatpush1.bf16.msra.mxu0 %v31950_v28  ;;  %28143 = vmatpush1.bf16.msra.mxu1 %v32005_v57  ;;  %v6532_v57 = vsub.f32 %v32408_v45, %v36728_v17  ;;  %v7063_v28 = vsub.f32 %v32414_v62, %v36729_v31  ;;  %v7058_v17 = vand.u32 4294901760, %v7057_v22  ;;  %v6526_v31 = vsub.f32 %v32427_v25, %v6525_v5 }
 0x39d   :  { %28145 = vmatprep.subr.bf16.mxu0 %v32365_v42  ;;  %28193 = vmatprep.subr.bf16.mxu1 %v32369_v7  ;;  %v28154_v49 = vpack.c.bf16 %v6515_v23, %v6503_v20  ;;  %v6539_v53 = vand.u32 4294901760, %v6538_v48  ;;  %v32528_v13 = vand.u32 4294901760, %v6485_v4  ;;  %v28160_v20 = vpack.c.bf16 %v32367_v32, %v32361_v30 }
 0x39e   :  { %v6533_v38 = vand.u32 4294901760, %v6532_v57  ;;  %v7064_v59 = vand.u32 4294901760, %v7063_v28  ;;  %v28202_v43 = vpack.c.bf16 %v7058_v17, %v7046_v39  ;;  %v6527_v22 = vand.u32 4294901760, %v6526_v31 }
 0x39f   :  { %5841 = vmatmul.mubr.f32.vlgmr.msra.gmra.mrb[18].mxu0 %v32226_v24  ;;  %6384 = vmatmul.mubr.f32.vlgmr.msra.gmra.mrb[34].mxu1 %v32226_v24  ;;  %v7069_v24 = vsub.f32 %v32451_v21, %v36731_v46  ;;  %v7082_v46 = vand.u32 4294901760, %v7081_v37  ;;  %37048 = vst [vmem:[#allocation28_spill] sm:$0xff] %v32528_v13  ;;  %v28208_v17 = vpack.c.bf16 %v32373_v1, %v32371_v2  ;;  %v37049_v48 = vand.u32 4294901760, %v32371_v2 }
 0x3a0   :  { %28147 = vmatpush1.bf16.msra.mxu0 %v32375_v0  ;;  %28195 = vmatpush1.bf16.msra.mxu1 %v32385_v40  ;;  %v28156_v57 = vpack.c.bf16 %v6533_v38, %v6521_v18  ;;  %v28204_v52 = vpack.c.bf16 %v7076_v35, %v7064_v59  ;;  %v28158_v39 = vpack.c.bf16 %v6539_v53, %v6527_v22  ;;  %v37051_v4 = vand.u32 4294901760, %v32381_v8  ;;  %v7541_v53 = vld [vmem:[%s36670_s2 + $0x68] sm:$0xff] }
 0x3a1   :  { %28149 = vmatprep.subr.bf16.mxu0 %v32404_v60  ;;  %28197 = vmatprep.subr.bf16.mxu1 %v32410_v41  ;;  %v7070_v19 = vand.u32 4294901760, %v7069_v24  ;;  %v28164_v31 = vpack.c.bf16 %v32408_v45, %v32406_v54  ;;  %v28214_v28 = vpack.c.bf16 %v32454_v16, %v32451_v21  ;;  %v28176_v18 = vpack.c.bf16 %v6507_v33, %v6495_v58 }
 0x3a2   :  { %6481 = vmatprep.mubr.f32.mxu0 %v36977_v6  ;;  %7024 = vmatprep.mubr.f32.mxu1 %v36977_v6  ;;  %v37050_v24 = vand.u32 4294901760, %v32373_v1  ;;  %v37052_v30 = vand.u32 4294901760, %v32383_v26  ;;  %v37053_v32 = vand.u32 4294901760, %v32390_v14  ;;  %v37054_v2 = vand.u32 4294901760, %v32392_v51 }
 0x3a3   :  { %v28206_v23 = vpack.c.bf16 %v7082_v46, %v7070_v19  ;;  %v28212_v46 = vpack.c.bf16 %v32423_v9, %v32414_v62  ;;  %v28166_v19 = vpack.c.bf16 %v32443_v3, %v32427_v25  ;;  %v37055_v1 = vand.u32 4294901760, %v32406_v54  ;;  %v7528_v9 = vld [vmem:[%s36670_s2] sm:$0xff] }
 0x3a4   :  { %28151 = vmatpush1.bf16.msra.mxu0 %v32425_v50  ;;  %28199 = vmatpush1.bf16.msra.mxu1 %v32502_v55  ;;  %v28224_v37 = vpack.c.bf16 %v37050_v24, %v37049_v48  ;;  %v28178_v38 = vpack.c.bf16 %v37052_v30, %v37051_v4  ;;  %v28226_v58 = vpack.c.bf16 %v37054_v2, %v37053_v32  ;;  %v37056_v33 = vand.u32 4294901760, %v32408_v45  ;;  %v7540_v24 = vld [vmem:[%s36670_s2 + $0x60] sm:$0xff]  ;;  %v7538_v4 = vld [vmem:[%s36670_s2 + $0x50] sm:$0xff] }
 0x3a5   :  { %28153 = vmatprep.subr.bf16.mxu0 %v28152_v27  ;;  %28201 = vmatprep.subr.bf16.mxu1 %v28200_v61  ;;  %v28162_v61 = vpack.c.bf16 %v32383_v26, %v32381_v8  ;;  %v28210_v27 = vpack.c.bf16 %v32392_v51, %v32390_v14  ;;  %v37057_v35 = vand.u32 4294901760, %v32414_v62  ;;  %v37058_v26 = vand.u32 4294901760, %v32443_v3 }
 0x3a6   :  { %v28180_v59 = vpack.c.bf16 %v37056_v33, %v37055_v1  ;;  %v37059_v51 = vand.u32 4294901760, %v32451_v21  ;;  %v37060_v54 = vand.u32 4294901760, %v32454_v16  ;;  %v7549_v3 = vand.u32 4294901760, %v7528_v9  ;;  %v7530_v21 = vld [vmem:[%s36670_s2 + $0x10] sm:$0xff] }
 0x3a7   :  { %6487 = vmatmul.mubr.f32.vlgmr.msra.gmra.mrb[18].mxu0 %v32528_v13  ;;  %7030 = vmatmul.mubr.f32.vlgmr.msra.gmra.mrb[34].mxu1 %v32528_v13  ;;  %v28228_v8 = vpack.c.bf16 %v7074_v10, %v37057_v35  ;;  %v28182_v14 = vpack.c.bf16 %v37058_v26, %v6525_v5  ;;  %v7534_v16 = vld [vmem:[%s36670_s2 + $0x30] sm:$0xff]  ;;  %v7537_v10 = vld [vmem:[%s36670_s2 + $0x48] sm:$0xff]  ;;  %v7561_v26 = vand.u32 4294901760, %v7540_v24 }
 0x3a8   :  { %28155 = vmatpush1.bf16.msra.mxu0 %v28154_v49  ;;  %28203 = vmatpush1.bf16.msra.mxu1 %v28202_v43  ;;  %v28230_v45 = vpack.c.bf16 %v37060_v54, %v37059_v51  ;;  %v8100_v51 = vand.u32 4294901760, %v7538_v4 }
 0x3a9   :  { %28157 = vmatprep.subr.bf16.mxu0 %v28156_v57  ;;  %28205 = vmatprep.subr.bf16.mxu1 %v28204_v52  ;;  %v7539_v57 = vld [vmem:[%s36670_s2 + $0x58] sm:$0xff] }
 0x3aa   :  { %6597 = vmatprep.mubr.f32.mxu0 %v36977_v6  ;;  %7140 = vmatprep.mubr.f32.mxu1 %v36977_v6  ;;  %v7543_v52 = vld [vmem:[%s36670_s2 + $0x78] sm:$0xff] }
 0x3ab   :  { %v8102_v48 = vand.u32 4294901760, %v7543_v52 }
 0x3ac   :  { %28159 = vmatpush1.bf16.msra.mxu0 %v28158_v39  ;;  %28207 = vmatpush1.bf16.msra.mxu1 %v28206_v23 }
 0x3ad   :  { %28161 = vmatprep.subr.bf16.mxu0 %v28160_v20  ;;  %28209 = vmatprep.subr.bf16.mxu1 %v28208_v17  ;;  %v32668_v17 = vsub.f32 %v7528_v9, %v7549_v3 }
 0x3af   :  { %6599 = vmatmul.mubr.f32.vlgmr.msra.gmra.mrb[18].mxu0 %v32429_v63  ;;  %7142 = vmatmul.mubr.f32.vlgmr.msra.gmra.mrb[34].mxu1 %v32429_v63 }
 0x3b0   :  { %28163 = vmatpush1.bf16.msra.mxu0 %v28162_v61  ;;  %28211 = vmatpush1.bf16.msra.mxu1 %v28210_v27  ;;  %v7536_v61 = vld [vmem:[%s36670_s2 + $0x40] sm:$0xff] }
 0x3b1   :  { %28165 = vmatprep.subr.bf16.mxu0 %v28164_v31  ;;  %28213 = vmatprep.subr.bf16.mxu1 %v28212_v46  ;;  %v8092_v31 = vand.u32 4294901760, %v7530_v21  ;;  %v8096_v46 = vand.u32 4294901760, %v7534_v16 }
 0x3b2   :  { %6685 = vmatprep.mubr.f32.mxu0 %v36977_v6  ;;  %7228 = vmatprep.mubr.f32.mxu1 %v36977_v6 }
 0x3b3   :  { %v32684_v30 = vpack.c.bf16 %v8096_v46, %v8092_v31  ;;  %v32688_v32 = vsub.f32 %v7534_v16, %v8096_v46 }
 0x3b4   :  { %28167 = vmatpush1.bf16.msra.mxu0 %v28166_v19  ;;  %28215 = vmatpush1.bf16.msra.mxu1 %v28214_v28  ;;  %v7555_v19 = vand.u32 4294901760, %v7537_v10  ;;  %v7559_v28 = vand.u32 4294901760, %v7541_v53 }
 0x3b5   :  { %28169 = vmatprep.subr.bf16.mxu0 %v32365_v42  ;;  %28217 = vmatprep.subr.bf16.mxu1 %v32369_v7 }
 0x3b6   :  { %v32690_v2 = vsub.f32 %v7537_v10, %v7555_v19  ;;  %v32695_v1 = vpack.c.bf16 %v7559_v28, %v7555_v19  ;;  %v32697_v33 = vsub.f32 %v7541_v53, %v7559_v28 }
 0x3b7   :  { %6688 = vmatmul.mubr.f32.vlgmr.msra.gmra.mrb[18].mxu0 %v32460_v36  ;;  %7231 = vmatmul.mubr.f32.vlgmr.msra.gmra.mrb[34].mxu1 %v32460_v36 }
 0x3b8   :  { %28171 = vmatpush1.bf16.msra.mxu0 %v32375_v0  ;;  %28219 = vmatpush1.bf16.msra.mxu1 %v32385_v40 }
 0x3b9   :  { %28173 = vmatprep.subr.bf16.mxu0 %v32404_v60  ;;  %28221 = vmatprep.subr.bf16.mxu1 %v32410_v41 }
 0x3ba   :  { %6766 = vmatprep.mubr.f32.mxu0 %v36977_v6  ;;  %7309 = vmatprep.mubr.f32.mxu1 %v36977_v6 }
 0x3bc   :  { %28175 = vmatpush1.bf16.msra.mxu0 %v32425_v50  ;;  %28223 = vmatpush1.bf16.msra.mxu1 %v32502_v55 }
 0x3bd   :  { %28177 = vmatprep.subr.bf16.mxu0 %v28176_v18  ;;  %28225 = vmatprep.subr.bf16.mxu1 %v28224_v37  ;;  %v8098_v18 = vand.u32 4294901760, %v7539_v57  ;;  %v7557_v37 = vand.u32 4294901760, %v7536_v61 }
 0x3bf   :  { %6770 = vmatmul.mubr.f32.vlgmr.msra.gmra.mrb[18].mxu0 %v32491_v47  ;;  %7313 = vmatmul.mubr.f32.vlgmr.msra.gmra.mrb[34].mxu1 %v32491_v47  ;;  %v32701_v35 = vsub.f32 %v7539_v57, %v8098_v18 }
 0x3c0   :  { %28179 = vmatpush1.bf16.msra.mxu0 %v28178_v38  ;;  %28227 = vmatpush1.bf16.msra.mxu1 %v28226_v58  ;;  %v32686_v38 = vsub.f32 %v7530_v21, %v8092_v31  ;;  %v7542_v58 = vld [vmem:[%s36670_s2 + $0x70] sm:$0xff]  ;;  %v7639_v21 = vand.u32 4294901760, %v32668_v17 }
 0x3c1   :  { %28181 = vmatprep.subr.bf16.mxu0 %v28180_v59  ;;  %28229 = vmatprep.subr.bf16.mxu1 %v28228_v8  ;;  %v32699_v59 = vpack.c.bf16 %v8102_v48, %v8098_v18  ;;  %v32704_v8 = vsub.f32 %v7543_v52, %v8102_v48  ;;  %v8104_v54 = vand.u32 4294901760, %v7542_v58  ;;  %v8194_v52 = vand.u32 4294901760, %v32688_v32 }
 0x3c2   :  { %6864 = vmatprep.mubr.f32.mxu0 %v36977_v6  ;;  %7407 = vmatprep.mubr.f32.mxu1 %v36977_v6  ;;  %v8182_v57 = vand.u32 4294901760, %v32686_v38  ;;  %v7640_v46 = vsub.f32 %v32668_v17, %v7639_v21 }
 0x3c3   :  { %v32722_v9 = vsub.f32 %v7542_v58, %v8104_v54  ;;  %v8195_v48 = vsub.f32 %v32688_v32, %v8194_v52 }
 0x3c4   :  { %28183 = vmatpush1.bf16.msra.mxu0 %v28182_v14  ;;  %28231 = vmatpush1.bf16.msra.mxu1 %v28230_v45  ;;  %v32706_v14 = vsub.f32 %v7536_v61, %v7557_v37  ;;  %v8183_v18 = vsub.f32 %v32686_v38, %v8182_v57 }
 0x3c5   :  { %28185 = vmatprep.subr.bf16.mxu0 %v32365_v42  ;;  %28233 = vmatprep.subr.bf16.mxu1 %v32369_v7  ;;  %v7529_v42 = vld [vmem:[%s36670_s2 + $0x8] sm:$0xff] }
 0x3c6   :  { %v7533_v7 = vld [vmem:[%s36670_s2 + $0x28] sm:$0xff] }
 0x3c7   :  { %6866 = vmatmul.mubr.f32.vlgmr.msra.gmra.mrb[18].mxu0 %v32429_v63  ;;  %7409 = vmatmul.mubr.f32.vlgmr.msra.gmra.mrb[34].mxu1 %v32429_v63 }
 0x3c8   :  { %28187 = vmatpush1.bf16.msra.mxu0 %v32375_v0  ;;  %28235 = vmatpush1.bf16.msra.mxu1 %v32385_v40  ;;  %v7531_v0 = vld [vmem:[%s36670_s2 + $0x18] sm:$0xff]  ;;  %v7547_v40 = vand.u32 4294901760, %v7529_v42 }
 0x3c9   :  { %28189 = vmatprep.subr.bf16.mxu0 %v32404_v60  ;;  %28237 = vmatprep.subr.bf16.mxu1 %v32410_v41  ;;  %v7551_v60 = vand.u32 4294901760, %v7533_v7  ;;  %v7535_v41 = vld [vmem:[%s36670_s2 + $0x38] sm:$0xff]  ;;  %v8090_v62 = vand.u32 4294901760, %v7531_v0 }
 0x3ca   :  { %6944 = vmatprep.mubr.f32.mxu0 %v36977_v6  ;;  %7487 = vmatprep.mubr.f32.mxu1 %v36977_v6  ;;  %v8094_v25 = vand.u32 4294901760, %v7535_v41  ;;  %v32647_v49 = vsub.f32 %v7529_v42, %v7547_v40 }
 0x3cb   :  { %v32645_v5 = vpack.c.bf16 %v7551_v60, %v7547_v40  ;;  %v32649_v43 = vsub.f32 %v7533_v7, %v7551_v60  ;;  %v32651_v22 = vsub.f32 %v7531_v0, %v8090_v62  ;;  %v32713_v0 = vpack.c.bf16 %v7561_v26, %v7557_v37 }
 0x3cc   :  { %28191 = vmatpush1.bf16.msra.mxu0 %v32425_v50  ;;  %28239 = vmatpush1.bf16.msra.mxu1 %v32502_v55  ;;  %v7532_v50 = vld [vmem:[%s36670_s2 + $0x20] sm:$0xff]  ;;  %v32662_v39 = vpack.c.bf16 %v8094_v25, %v8090_v62  ;;  %v32664_v23 = vsub.f32 %v7535_v41, %v8094_v25  ;;  %v36736_v45 = vand.u32 4294901760, %v32647_v49  ;;  %v32715_v40 = vsub.f32 %v7540_v24, %v7561_v26 }
 0x3cd   :  { %v7553_v55 = vand.u32 4294901760, %v7532_v50  ;;  %28241 = vmatprep.subr.bf16.mxu0 %v32645_v5  ;;  %v36735_v42 = vand.u32 4294901760, %v32649_v43  ;;  %v36734_v7 = vand.u32 4294901760, %v32651_v22  ;;  %v32717_v60 = vsub.f32 %v7538_v4, %v8100_v51 }
 0x3ce   :  { %28289 = vmatprep.subr.bf16.mxu1 %v32662_v39  ;;  %v36733_v41 = vand.u32 4294901760, %v32664_v23  ;;  %v32720_v62 = vpack.c.bf16 %v8104_v54, %v8100_v51  ;;  %v7657_v24 = vand.u32 4294901760, %v32690_v2  ;;  %v7641_v4 = vand.u32 4294901760, %v7640_v46 }
 0x3cf   :  { %6946 = vmatmul.mubr.f32.vlgmr.msra.gmra.mrb[18].mxu0 %v32429_v63  ;;  %7489 = vmatmul.mubr.f32.vlgmr.msra.gmra.mrb[34].mxu1 %v32429_v63  ;;  %v32666_v20 = vpack.c.bf16 %v7553_v55, %v7549_v3  ;;  %v32674_v27 = vsub.f32 %v7532_v50, %v7553_v55  ;;  %v7634_v50 = vsub.f32 %v32647_v49, %v36736_v45  ;;  %v7669_v26 = vand.u32 4294901760, %v32697_v33 }
 0x3d0   :  { %7619 = vmatprep.mubr.f32.mxu0 %v36977_v6  ;;  %8162 = vmatprep.mubr.f32.mxu1 %v36977_v6  ;;  %v7646_v25 = vsub.f32 %v32649_v43, %v36735_v42  ;;  %v8177_v3 = vsub.f32 %v32651_v22, %v36734_v7  ;;  %v8189_v55 = vsub.f32 %v32664_v23, %v36733_v41  ;;  %v8184_v51 = vand.u32 4294901760, %v8183_v18 }
 0x3d1   :  { %28243 = vmatpush1.bf16.msra.mxu0 %v32666_v20  ;;  %28291 = vmatpush1.bf16.msra.mxu1 %v32684_v30  ;;  %v7651_v16 = vand.u32 4294901760, %v32674_v27  ;;  %v7635_v10 = vand.u32 4294901760, %v7634_v50  ;;  %v8196_v54 = vand.u32 4294901760, %v8195_v48  ;;  %v7658_v50 = vsub.f32 %v32690_v2, %v7657_v24 }
 0x3d2   :  { %28245 = vmatprep.subr.bf16.mxu0 %v32695_v1  ;;  %28293 = vmatprep.subr.bf16.mxu1 %v32699_v59  ;;  %v7647_v53 = vand.u32 4294901760, %v7646_v25  ;;  %v8178_v61 = vand.u32 4294901760, %v8177_v3  ;;  %v8190_v31 = vand.u32 4294901760, %v8189_v55  ;;  %v8200_v25 = vand.u32 4294901760, %v32701_v35 }
 0x3d3   :  { %v7652_v19 = vsub.f32 %v32674_v27, %v7651_v16  ;;  %v7670_v55 = vsub.f32 %v32697_v33, %v7669_v26  ;;  %v8218_v41 = vand.u32 4294901760, %v32722_v9 }
 0x3d4   :  { %v28248_v28 = vpack.c.bf16 %v7647_v53, %v7635_v10  ;;  %v28296_v37 = vpack.c.bf16 %v8190_v31, %v8178_v61  ;;  %v8212_v10 = vand.u32 4294901760, %v32704_v8  ;;  %v7663_v53 = vand.u32 4294901760, %v32706_v14 }
 0x3d5   :  { %28247 = vmatpush1.bf16.msra.mxu0 %v32713_v0  ;;  %28295 = vmatpush1.bf16.msra.mxu1 %v32720_v62  ;;  %v7653_v58 = vand.u32 4294901760, %v7652_v19  ;;  %v32755_v61 = vpack.c.bf16 %v8196_v54, %v8184_v51  ;;  %v7659_v31 = vand.u32 4294901760, %v7658_v50  ;;  %v8201_v46 = vsub.f32 %v32701_v35, %v8200_v25  ;;  %v37065_v51 = vld [vmem:[#allocation13_spill] sm:$0xff] }
 0x3d6   :  { %28249 = vmatprep.subr.bf16.mxu0 %v28248_v28  ;;  %28297 = vmatprep.subr.bf16.mxu1 %v28296_v37  ;;  %v7675_v19 = vand.u32 4294901760, %v32715_v40  ;;  %v7671_v28 = vand.u32 4294901760, %v7670_v55  ;;  %v8213_v18 = vsub.f32 %v32704_v8, %v8212_v10  ;;  %v7664_v48 = vsub.f32 %v32706_v14, %v7663_v53 }
 0x3d7   :  { %v32750_v3 = vpack.c.bf16 %v7653_v58, %v7641_v4  ;;  %v8206_v37 = vand.u32 4294901760, %v32717_v60  ;;  %v8202_v4 = vand.u32 4294901760, %v8201_v46  ;;  %v8219_v45 = vsub.f32 %v32722_v9, %v8218_v41 }
 0x3d8   :  { %v7676_v58 = vsub.f32 %v32715_v40, %v7675_v19  ;;  %v32766_v54 = vpack.c.bf16 %v7671_v28, %v7659_v31  ;;  %v8214_v50 = vand.u32 4294901760, %v8213_v18  ;;  %v7665_v7 = vand.u32 4294901760, %v7664_v48 }
 0x3d9   :  { %v8207_v55 = vsub.f32 %v32717_v60, %v8206_v37  ;;  %v8220_v18 = vand.u32 4294901760, %v8219_v45  ;;  %v37063_v31 = vand.u32 4294901760, %v32651_v22  ;;  %v37064_v45 = vand.u32 4294901760, %v32664_v23 }
 0x3da   :  { %v7677_v42 = vand.u32 4294901760, %v7676_v58  ;;  %v28300_v36 = vpack.c.bf16 %v8214_v50, %v8202_v4  ;;  %v37061_v4 = vand.u32 4294901760, %v32647_v49  ;;  %v37062_v50 = vand.u32 4294901760, %v32649_v43 }
 0x3db   :  { %v8208_v63 = vand.u32 4294901760, %v8207_v55  ;;  %v32798_v48 = vpack.c.bf16 %v8194_v52, %v8182_v57  ;;  %v32800_v58 = vpack.c.bf16 %v7669_v26, %v7657_v24  ;;  %v32802_v47 = vpack.c.bf16 %v8212_v10, %v8200_v25 }
 0x3dc   :  { %v28254_v28 = vpack.c.bf16 %v7677_v42, %v7665_v7  ;;  %v32788_v55 = vpack.c.bf16 %v37062_v50, %v37061_v4  ;;  %v32794_v42 = vpack.c.bf16 %v37064_v45, %v37063_v31  ;;  %v32796_v7 = vpack.c.bf16 %v7651_v16, %v7639_v21  ;;  %v37066_v31 = vld [vmem:[#allocation14_spill] sm:$0xff] }
 0x3dd   :  { %v28302_v46 = vpack.c.bf16 %v8220_v18, %v8208_v63  ;;  %v32804_v63 = vpack.c.bf16 %v7675_v19, %v7663_v53  ;;  %v32806_v18 = vpack.c.bf16 %v8218_v41, %v8206_v37 }
 0x442   :  { %v4712_v4 = vpop.f32.mrb[4].mxu0  ;;  %v5255_v50 = vpop.f32.mrb[20].mxu1 }
 0x443   :  { %v29931_v13 = vadd.f32 %v4712_v4, %v37065_v51  ;;  %v4714_v15 = vpop.f32.mrb[5].mxu0  ;;  %v5257_v44 = vpop.f32.mrb[21].mxu1  ;;  %v29958_v57 = vadd.f32 %v5255_v50, %v37010_v34 }
 0x444   :  { %v29933_v45 = vadd.f32 %v4714_v15, %v37066_v31  ;;  %v29959_v52 = vadd.f32 %v5257_v44, %v37011_v29 }
 0x445   :  { %v27480_v21 = vmul.f32 -1.442695, %v29931_v13  ;;  %v27482_v24 = vmul.f32 -1.442695, %v29958_v57 }
 0x446   :  { %v27481_v16 = vmul.f32 -1.442695, %v29933_v45 }
 0x447   :  { %30744 = vpow2.f32 %v27480_v21 }
 0x448   :  { %30746 = vpow2.f32 %v27481_v16 }
 0x449   :  { %30748 = vtanh.f32 %v29959_v52 }
 0x44a   :  { %30750 = vpow2.f32 %v27482_v24 }
 0x451   :  { %v30745_v26 = vpop.eup %30744 }
 0x452   :  { %v5273_v41 = vadd.f32 1.0, %v30745_v26  ;;  %v30747_v25 = vpop.eup %30746  ;;  %v37067_v26 = vpack.c.bf16 %v32649_v43, %v32647_v49  ;;  %v37071_v49 = vpack.c.bf16 %v32697_v33, %v32690_v2  ;;  %v37072_v43 = vpack.c.bf16 %v32704_v8, %v32701_v35 }
 0x453   :  { %v5274_v10 = vadd.f32 1.0, %v30747_v25  ;;  %v30749_v53 = vpop.eup %30748 }
 0x454   :  { %30752 = vrcp.f32 %v5273_v41  ;;  %v30751_v19 = vpop.eup %30750  ;;  %v37068_v41 = vpack.c.bf16 %v32664_v23, %v32651_v22  ;;  %v8662_v22 = vld [vmem:[#allocation6 + $0x8] sm:$0xff] }
 0x455   :  { %30754 = vrcp.f32 %v5274_v10  ;;  %v5275_v51 = vadd.f32 1.0, %v30751_v19  ;;  %v8666_v23 = vld [vmem:[#allocation6 + $0x28] sm:$0xff]  ;;  %v8677_v2 = vand.u32 4294901760, %v8662_v22 }
 0x456   :  { %v8681_v33 = vand.u32 4294901760, %v8666_v23  ;;  %v8674_v19 = vld [vmem:[#allocation6 + $0x68] sm:$0xff] }
 0x457   :  { %30756 = vrcp.f32 %v5275_v51 }
 0x45e   :  { %v30753_v15 = vpop.eup %30752 }
 0x45f   :  { %v5284_v13 = vmul.f32 %v30753_v15, %v30749_v53  ;;  %v30755_v37 = vpop.eup %30754  ;;  %v8670_v53 = vld [vmem:[#allocation6 + $0x48] sm:$0xff]  ;;  %v32886_v15 = vpack.c.bf16 %v8681_v33, %v8677_v2 }
 0x460   :  { %v5283_v4 = vmul.f32 %v30755_v37, %v32204_v56 }
 0x461   :  { %v30757_v44 = vpop.eup %30756 }
 0x462   :  { %v32813_v50 = vadd.f32 %v5284_v13, %v5283_v4  ;;  %v8672_v4 = vld [vmem:[#allocation6 + $0x58] sm:$0xff] }
 0x464   :  { %30758 = vtanh.f32 %v32813_v50 }
 0x46e   :  { %v30759_v31 = vpop.eup %30758 }
 0x46f   :  { %v5287_v45 = vmul.f32 %v30759_v31, %v30757_v44  ;;  %v8676_v44 = vld [vmem:[#allocation6 + $0x78] sm:$0xff]  ;;  %v8669_v31 = vld [vmem:[#allocation6 + $0x40] sm:$0xff] }
 0x471   :  { %v7545_v21 = vsel %vm1906_vm1, %v5287_v45, 0 }
 0x472   :  { %v32817_v16 = vand.u32 4294901760, %v7545_v21 }
 0x474   :  { %v32820_v57 = vsub.f32 %v7545_v21, %v32817_v16  ;;  %v8685_v21 = vand.u32 4294901760, %v8670_v53 }
 0x476   :  { %v32823_v52 = vand.u32 4294901760, %v32820_v57 }
 0x478   :  { %v7623_v56 = vsub.f32 %v32820_v57, %v32823_v52 }
 0x47a   :  { %v32827_v24 = vand.u32 4294901760, %v7623_v56  ;;  %v8673_v56 = vld [vmem:[#allocation6 + $0x60] sm:$0xff] }
 0x47c   :  { %7625 = vmatmul.mubr.f32.vlgmr.msra.gmra.mrb[6].mxu0 %v32827_v24  ;;  %8168 = vmatmul.mubr.f32.vlgmr.msra.gmra.mrb[22].mxu1 %v32827_v24 }
 0x47d   :  { %28251 = vmatpush1.bf16.msra.mxu0 %v32750_v3  ;;  %28299 = vmatpush1.bf16.msra.mxu1 %v32755_v61  ;;  %v37070_v3 = vpack.c.bf16 %v32688_v32, %v32686_v38  ;;  %v8664_v38 = vld [vmem:[#allocation6 + $0x18] sm:$0xff] }
 0x47e   :  { %28253 = vmatprep.subr.bf16.mxu0 %v32766_v54  ;;  %28301 = vmatprep.subr.bf16.mxu1 %v28300_v36  ;;  %v37069_v36 = vpack.c.bf16 %v32674_v27, %v32668_v17  ;;  %v37073_v17 = vpack.c.bf16 %v32715_v40, %v32706_v14  ;;  %v37074_v27 = vpack.c.bf16 %v32722_v9, %v32717_v60  ;;  %v8668_v32 = vld [vmem:[#allocation6 + $0x38] sm:$0xff]  ;;  %v9220_v35 = vand.u32 4294901760, %v8664_v38  ;;  %v8661_v14 = vld [vmem:[#allocation6] sm:$0xff] }
 0x47f   :  { %7735 = vmatprep.mubr.f32.mxu0 %v36977_v6  ;;  %8278 = vmatprep.mubr.f32.mxu1 %v36977_v6  ;;  %v9224_v8 = vand.u32 4294901760, %v8668_v32  ;;  %v8665_v40 = vld [vmem:[#allocation6 + $0x20] sm:$0xff]  ;;  %v32874_v60 = vsub.f32 %v8662_v22, %v8677_v2  ;;  %v32876_v9 = vsub.f32 %v8666_v23, %v8681_v33  ;;  %v8679_v61 = vand.u32 4294901760, %v8661_v14  ;;  %v8671_v2 = vld [vmem:[#allocation6 + $0x50] sm:$0xff] }
 0x480   :  { %v8683_v54 = vand.u32 4294901760, %v8665_v40  ;;  %v32878_v25 = vsub.f32 %v8664_v38, %v9220_v35  ;;  %v9232_v22 = vand.u32 4294901760, %v8676_v44  ;;  %v8687_v23 = vand.u32 4294901760, %v8669_v31 }
 0x481   :  { %28255 = vmatpush1.bf16.msra.mxu0 %v28254_v28  ;;  %28303 = vmatpush1.bf16.msra.mxu1 %v28302_v46  ;;  %v8663_v46 = vld [vmem:[#allocation6 + $0x10] sm:$0xff]  ;;  %v32880_v10 = vsub.f32 %v8668_v32, %v9224_v8  ;;  %v32888_v13 = vpack.c.bf16 %v9224_v8, %v9220_v35  ;;  %v8691_v32 = vand.u32 4294901760, %v8673_v56 }
 0x482   :  { %28257 = vmatprep.subr.bf16.mxu0 %v37067_v26  ;;  %28305 = vmatprep.subr.bf16.mxu1 %v37068_v41  ;;  %v8667_v28 = vld [vmem:[#allocation6 + $0x30] sm:$0xff]  ;;  %v9222_v37 = vand.u32 4294901760, %v8663_v46  ;;  %v32890_v45 = vpack.c.bf16 %v8683_v54, %v8679_v61  ;;  %v8763_v26 = vand.u32 4294901760, %v32874_v60  ;;  %v36754_v41 = vand.u32 4294901760, %v32876_v9 }
 0x483   :  { %v9226_v51 = vand.u32 4294901760, %v8667_v28 }
 0x484   :  { %7737 = vmatmul.mubr.f32.vlgmr.msra.gmra.mrb[6].mxu0 %v32817_v16  ;;  %8280 = vmatmul.mubr.f32.vlgmr.msra.gmra.mrb[22].mxu1 %v32817_v16 }
 0x485   :  { %28259 = vmatpush1.bf16.msra.mxu0 %v37069_v36  ;;  %28307 = vmatpush1.bf16.msra.mxu1 %v37070_v3  ;;  %v36752_v36 = vand.u32 4294901760, %v32878_v25  ;;  %v36751_v3 = vand.u32 4294901760, %v32880_v10  ;;  %v32910_v38 = vsub.f32 %v8667_v28, %v9226_v51  ;;  %v32940_v28 = vsub.f32 %v8676_v44, %v9232_v22 }
 0x486   :  { %28261 = vmatprep.subr.bf16.mxu0 %v37071_v49  ;;  %28309 = vmatprep.subr.bf16.mxu1 %v37072_v43  ;;  %v32902_v49 = vsub.f32 %v8665_v40, %v8683_v54  ;;  %v9228_v43 = vand.u32 4294901760, %v8672_v4  ;;  %v9230_v54 = vand.u32 4294901760, %v8671_v2 }
 0x487   :  { %7823 = vmatprep.mubr.f32.mxu0 %v36977_v6  ;;  %8366 = vmatprep.mubr.f32.mxu1 %v36977_v6  ;;  %v9307_v8 = vsub.f32 %v32878_v25, %v36752_v36  ;;  %v36747_v44 = vand.u32 4294901760, %v32910_v38 }
 0x488   :  { %v32934_v40 = vpack.c.bf16 %v9232_v22, %v9228_v43 }
 0x489   :  { %28263 = vmatpush1.bf16.msra.mxu0 %v37073_v17  ;;  %28311 = vmatpush1.bf16.msra.mxu1 %v37074_v27  ;;  %v32906_v17 = vpack.c.bf16 %v9226_v51, %v9222_v37  ;;  %v32908_v27 = vsub.f32 %v8663_v46, %v9222_v37  ;;  %v36749_v51 = vand.u32 4294901760, %v32902_v49 }
 0x48a   :  { %28265 = vmatprep.subr.bf16.mxu0 %v32645_v5  ;;  %28313 = vmatprep.subr.bf16.mxu1 %v32662_v39 }
 0x48c   :  { %7826 = vmatmul.mubr.f32.vlgmr.msra.gmra.mrb[6].mxu0 %v32820_v57  ;;  %8369 = vmatmul.mubr.f32.vlgmr.msra.gmra.mrb[22].mxu1 %v32820_v57 }
 0x48d   :  { %28267 = vmatpush1.bf16.msra.mxu0 %v32666_v20  ;;  %28315 = vmatpush1.bf16.msra.mxu1 %v32684_v30 }
 0x48e   :  { %28269 = vmatprep.subr.bf16.mxu0 %v32695_v1  ;;  %28317 = vmatprep.subr.bf16.mxu1 %v32699_v59 }
 0x48f   :  { %7904 = vmatprep.mubr.f32.mxu0 %v36977_v6  ;;  %8447 = vmatprep.mubr.f32.mxu1 %v36977_v6 }
 0x491   :  { %28271 = vmatpush1.bf16.msra.mxu0 %v32713_v0  ;;  %28319 = vmatpush1.bf16.msra.mxu1 %v32720_v62 }
 0x492   :  { %28273 = vmatprep.subr.bf16.mxu0 %v32788_v55  ;;  %28321 = vmatprep.subr.bf16.mxu1 %v32794_v42  ;;  %v32896_v55 = vsub.f32 %v8661_v14, %v8679_v61  ;;  %v8689_v42 = vand.u32 4294901760, %v8674_v19  ;;  %v9319_v14 = vsub.f32 %v32880_v10, %v36751_v3  ;;  %v32936_v61 = vsub.f32 %v8672_v4, %v9228_v43 }
 0x493   :  { %v36748_v4 = vand.u32 4294901760, %v32908_v27 }
 0x494   :  { %7908 = vmatmul.mubr.f32.vlgmr.msra.gmra.mrb[6].mxu0 %v32823_v52  ;;  %8451 = vmatmul.mubr.f32.vlgmr.msra.gmra.mrb[22].mxu1 %v32823_v52  ;;  %v32922_v33 = vpack.c.bf16 %v8689_v42, %v8685_v21  ;;  %v32924_v35 = vsub.f32 %v8674_v19, %v8689_v42  ;;  %v32944_v19 = vsub.f32 %v8669_v31, %v8687_v23 }
 0x495   :  { %28275 = vmatpush1.bf16.msra.mxu0 %v32796_v7  ;;  %28323 = vmatpush1.bf16.msra.mxu1 %v32798_v48  ;;  %v8675_v7 = vld [vmem:[#allocation6 + $0x70] sm:$0xff]  ;;  %v32914_v48 = vsub.f32 %v8670_v53, %v8685_v21  ;;  %v32942_v53 = vpack.c.bf16 %v8691_v32, %v8687_v23  ;;  %v32955_v31 = vsub.f32 %v8673_v56, %v8691_v32  ;;  %v9342_v56 = vand.u32 4294901760, %v32940_v28 }
 0x496   :  { %28277 = vmatprep.subr.bf16.mxu0 %v32800_v58  ;;  %28325 = vmatprep.subr.bf16.mxu1 %v32802_v47  ;;  %v8764_v58 = vsub.f32 %v32874_v60, %v8763_v26  ;;  %v8776_v47 = vsub.f32 %v32876_v9, %v36754_v41  ;;  %v9234_v46 = vand.u32 4294901760, %v8675_v7  ;;  %v32957_v42 = vsub.f32 %v8671_v2, %v9230_v54 }
 0x497   :  { %8002 = vmatprep.mubr.f32.mxu0 %v36977_v6  ;;  %8545 = vmatprep.mubr.f32.mxu1 %v36977_v6  ;;  %v36745_v21 = vand.u32 4294901760, %v32914_v48  ;;  %v36746_v22 = vand.u32 4294901760, %v32924_v35 }
 0x498   :  { %v8765_v37 = vand.u32 4294901760, %v8764_v58  ;;  %v32959_v43 = vsub.f32 %v8675_v7, %v9234_v46  ;;  %v32964_v23 = vpack.c.bf16 %v9234_v46, %v9230_v54  ;;  %v9325_v7 = vsub.f32 %v32910_v38, %v36747_v44 }
 0x499   :  { %28279 = vmatpush1.bf16.msra.mxu0 %v32804_v63  ;;  %28327 = vmatpush1.bf16.msra.mxu1 %v32806_v18  ;;  %v36750_v63 = vand.u32 4294901760, %v32896_v55  ;;  %v8777_v18 = vand.u32 4294901760, %v8776_v47  ;;  %v8788_v58 = vsub.f32 %v32914_v48, %v36745_v21  ;;  %v36758_v47 = vand.u32 4294901760, %v32944_v19 }
 0x49a   :  { %28281 = vmatprep.subr.bf16.mxu0 %v32645_v5  ;;  %28329 = vmatprep.subr.bf16.mxu1 %v32662_v39  ;;  %v9308_v5 = vand.u32 4294901760, %v9307_v8  ;;  %v9320_v39 = vand.u32 4294901760, %v9319_v14  ;;  %v8800_v54 = vsub.f32 %v32924_v35, %v36746_v22  ;;  %v36757_v46 = vand.u32 4294901760, %v32955_v31  ;;  %v37075_v22 = vld [vmem:[#allocation47_spill] sm:$0xff] }
 0x49b   :  { %v28344_v32 = vpack.c.bf16 %v8777_v18, %v8765_v37  ;;  %v36756_v37 = vand.u32 4294901760, %v32957_v42  ;;  %v36755_v18 = vand.u32 4294901760, %v32959_v43  ;;  %v9326_v3 = vand.u32 4294901760, %v9325_v7 }
 0x49c   :  { %8004 = vmatmul.mubr.f32.vlgmr.msra.gmra.mrb[6].mxu0 %v32817_v16  ;;  %8547 = vmatmul.mubr.f32.vlgmr.msra.gmra.mrb[22].mxu1 %v32817_v16  ;;  %v28392_v2 = vpack.c.bf16 %v9320_v39, %v9308_v5  ;;  %v8789_v36 = vand.u32 4294901760, %v8788_v58 }
 0x49d   :  { %28283 = vmatpush1.bf16.msra.mxu0 %v32666_v20  ;;  %28331 = vmatpush1.bf16.msra.mxu1 %v32684_v30  ;;  %v8770_v20 = vsub.f32 %v32896_v55, %v36750_v63  ;;  %v36753_v30 = vand.u32 4294901760, %v32936_v61 }
 0x49e   :  { %28285 = vmatprep.subr.bf16.mxu0 %v32695_v1  ;;  %28333 = vmatprep.subr.bf16.mxu1 %v32699_v59  ;;  %v8782_v1 = vsub.f32 %v32902_v49, %v36749_v51  ;;  %v9313_v59 = vsub.f32 %v32908_v27, %v36748_v4 }
 0x49f   :  { %8082 = vmatprep.mubr.f32.mxu0 %v36977_v6  ;;  %8625 = vmatprep.mubr.f32.mxu1 %v36977_v6  ;;  %v8771_v4 = vand.u32 4294901760, %v8770_v20  ;;  %v8806_v20 = vsub.f32 %v32955_v31, %v36757_v46 }
 0x4a0   :  { %v8783_v51 = vand.u32 4294901760, %v8782_v1  ;;  %v9314_v63 = vand.u32 4294901760, %v9313_v59  ;;  %v9337_v1 = vsub.f32 %v32957_v42, %v36756_v37  ;;  %v9349_v59 = vsub.f32 %v32959_v43, %v36755_v18 }
 0x4a1   :  { %28287 = vmatpush1.bf16.msra.mxu0 %v32713_v0  ;;  %28335 = vmatpush1.bf16.msra.mxu1 %v32720_v62  ;;  %v9331_v0 = vsub.f32 %v32936_v61, %v36753_v30  ;;  %v9343_v62 = vsub.f32 %v32940_v28, %v9342_v56  ;;  %v8794_v30 = vsub.f32 %v32944_v19, %v36758_v47 }
 0x4a2   :  { %v6947_v8 = vpop.f32.mrb[18].mxu0  ;;  %v7490_v14 = vpop.f32.mrb[34].mxu1  ;;  %28337 = vmatprep.subr.bf16.mxu0 %v32886_v15  ;;  %28385 = vmatprep.subr.bf16.mxu1 %v32888_v13  ;;  %v9338_v37 = vand.u32 4294901760, %v9337_v1  ;;  %v9350_v46 = vand.u32 4294901760, %v9349_v59  ;;  %v9768_v1 = vld [vmem:[#allocation8 + $0x28] sm:$0xff]  ;;  %v9766_v59 = vld [vmem:[#allocation8 + $0x18] sm:$0xff] }
 0x4a3   :  { %v29974_v5 = vadd.f32 %v6947_v8, %v32215_v12  ;;  %v6949_v39 = vpop.f32.mrb[19].mxu0  ;;  %v7492_v21 = vpop.f32.mrb[35].mxu1  ;;  %v9332_v7 = vand.u32 4294901760, %v9331_v0  ;;  %v9344_v58 = vand.u32 4294901760, %v9343_v62  ;;  %v8795_v18 = vand.u32 4294901760, %v8794_v30 }
 0x4a4   :  { %v29975_v44 = vadd.f32 %v6949_v39, %v37075_v22  ;;  %8084 = vmatmul.mubr.f32.vlgmr.msra.gmra.mrb[6].mxu0 %v32817_v16  ;;  %8627 = vmatmul.mubr.f32.vlgmr.msra.gmra.mrb[22].mxu1 %v32817_v16  ;;  %v28394_v39 = vpack.c.bf16 %v9326_v3, %v9314_v63  ;;  %v29976_v47 = vadd.f32 %v7490_v14, %v32298_v11 }
 0x4a5   :  { %v27483_v8 = vmul.f32 -1.442695, %v29974_v5  ;;  %28339 = vmatpush1.bf16.msra.mxu0 %v32890_v45  ;;  %28387 = vmatpush1.bf16.msra.mxu1 %v32906_v17  ;;  %v28346_v5 = vpack.c.bf16 %v8783_v51, %v8771_v4  ;;  %v28396_v0 = vpack.c.bf16 %v9344_v58, %v9332_v7  ;;  %v28398_v51 = vpack.c.bf16 %v9350_v46, %v9338_v37  ;;  %v9763_v58 = vld [vmem:[#allocation8] sm:$0xff] }
 0x4a6   :  { %v27484_v41 = vmul.f32 -1.442695, %v29975_v44  ;;  %28341 = vmatprep.subr.bf16.mxu0 %v32922_v33  ;;  %28389 = vmatprep.subr.bf16.mxu1 %v32934_v40  ;;  %v8801_v44 = vand.u32 4294901760, %v8800_v54  ;;  %v27485_v4 = vmul.f32 -1.442695, %v29976_v47  ;;  %v28352_v30 = vpack.c.bf16 %v32876_v9, %v32874_v60 }
 0x4a7   :  { %30760 = vpow2.f32 %v27483_v8  ;;  %8749 = vmatprep.mubr.f32.mxu0 %v36977_v6  ;;  %9292 = vmatprep.mubr.f32.mxu1 %v36977_v6  ;;  %v8807_v8 = vand.u32 4294901760, %v8806_v20  ;;  %v28356_v14 = vpack.c.bf16 %v32924_v35, %v32914_v48  ;;  %v28404_v46 = vpack.c.bf16 %v32940_v28, %v32936_v61  ;;  %v9764_v20 = vld [vmem:[#allocation8 + $0x8] sm:$0xff] }
 0x4a8   :  { %30762 = vpow2.f32 %v27484_v41  ;;  %v28348_v54 = vpack.c.bf16 %v8801_v44, %v8789_v36  ;;  %v37076_v41 = vld [vmem:[#allocation48_spill] sm:$0xff]  ;;  %v28400_v36 = vpack.c.bf16 %v32880_v10, %v32878_v25  ;;  %v28406_v62 = vpack.c.bf16 %v32959_v43, %v32957_v42  ;;  %v9770_v44 = vld [vmem:[#allocation8 + $0x38] sm:$0xff] }
 0x4a9   :  { %28343 = vmatpush1.bf16.msra.mxu0 %v32942_v53  ;;  %28391 = vmatpush1.bf16.msra.mxu1 %v32964_v23  ;;  %v29977_v3 = vadd.f32 %v7492_v21, %v37076_v41  ;;  %v28350_v63 = vpack.c.bf16 %v8807_v8, %v8795_v18  ;;  %v28354_v21 = vpack.c.bf16 %v32902_v49, %v32896_v55  ;;  %v37077_v8 = vand.u32 4294901760, %v32876_v9  ;;  %v9772_v28 = vld [vmem:[#allocation8 + $0x48] sm:$0xff] }
 0x4aa   :  { %28345 = vmatprep.subr.bf16.mxu0 %v28344_v32  ;;  %28393 = vmatprep.subr.bf16.mxu1 %v28392_v2  ;;  %v28402_v2 = vpack.c.bf16 %v32910_v38, %v32908_v27  ;;  %v28358_v18 = vpack.c.bf16 %v32955_v31, %v32944_v19  ;;  %v37082_v9 = vand.u32 4294901760, %v32908_v27 }
 0x4ab   :  { %30764 = vtanh.f32 %v29977_v3  ;;  %v37079_v3 = vand.u32 4294901760, %v32880_v10  ;;  %v10329_v10 = vand.u32 4294901760, %v9770_v44 }
 0x4ac   :  { %8755 = vmatmul.mubr.f32.vlgmr.msra.gmra.mrb[20].mxu0 %v32827_v24  ;;  %9298 = vmatmul.mubr.f32.vlgmr.msra.gmra.mrb[36].mxu1 %v32827_v24  ;;  %30766 = vpow2.f32 %v27485_v4  ;;  %v9786_v4 = vand.u32 4294901760, %v9768_v1 }
 0x4ad   :  { %28347 = vmatpush1.bf16.msra.mxu0 %v28346_v5  ;;  %28395 = vmatpush1.bf16.msra.mxu1 %v28394_v39  ;;  %v9767_v5 = vld [vmem:[#allocation8 + $0x20] sm:$0xff] }
 0x4ae   :  { %28349 = vmatprep.subr.bf16.mxu0 %v28348_v54  ;;  %28397 = vmatprep.subr.bf16.mxu1 %v28396_v0  ;;  %v28368_v54 = vpack.c.bf16 %v37077_v8, %v8763_v26  ;;  %v37078_v0 = vand.u32 4294901760, %v32878_v25  ;;  %v37083_v26 = vand.u32 4294901760, %v32910_v38  ;;  %v37086_v38 = vand.u32 4294901760, %v32936_v61 }
 0x4af   :  { %8865 = vmatprep.mubr.f32.mxu0 %v36977_v6  ;;  %9408 = vmatprep.mubr.f32.mxu1 %v36977_v6  ;;  %v37090_v8 = vand.u32 4294901760, %v32959_v43  ;;  %v33099_v61 = vsub.f32 %v9768_v1, %v9786_v4 }
 0x4b0   :  { %v28418_v25 = vpack.c.bf16 %v37083_v26, %v37082_v9  ;;  %v9778_v9 = vld [vmem:[#allocation8 + $0x78] sm:$0xff] }
 0x4b1   :  { %v30761_v24 = vpop.eup %30760  ;;  %28351 = vmatpush1.bf16.msra.mxu0 %v28350_v63  ;;  %28399 = vmatpush1.bf16.msra.mxu1 %v28398_v51  ;;  %v28416_v63 = vpack.c.bf16 %v37079_v3, %v37078_v0  ;;  %v9782_v51 = vand.u32 4294901760, %v9764_v20 }
 0x4b2   :  { %v7508_v32 = vadd.f32 1.0, %v30761_v24  ;;  %v30763_v47 = vpop.eup %30762  ;;  %28353 = vmatprep.subr.bf16.mxu0 %v28352_v30  ;;  %28401 = vmatprep.subr.bf16.mxu1 %v28400_v36  ;;  %v37080_v36 = vand.u32 4294901760, %v32896_v55  ;;  %v10325_v24 = vand.u32 4294901760, %v9766_v59 }
 0x4b3   :  { %v7509_v37 = vadd.f32 1.0, %v30763_v47  ;;  %v9784_v47 = vand.u32 4294901760, %v9763_v58 }
 0x4b4   :  { %30768 = vrcp.f32 %v7508_v32  ;;  %8867 = vmatmul.mubr.f32.vlgmr.msra.gmra.mrb[20].mxu0 %v32817_v16  ;;  %9410 = vmatmul.mubr.f32.vlgmr.msra.gmra.mrb[36].mxu1 %v32817_v16 }
 0x4b5   :  { %30770 = vrcp.f32 %v7509_v37  ;;  %28355 = vmatpush1.bf16.msra.mxu0 %v28354_v21  ;;  %28403 = vmatpush1.bf16.msra.mxu1 %v28402_v2  ;;  %v30765_v7 = vpop.eup %30764  ;;  %v37084_v21 = vand.u32 4294901760, %v32914_v48  ;;  %v37085_v2 = vand.u32 4294901760, %v32924_v35  ;;  %v37087_v48 = vand.u32 4294901760, %v32944_v19 }
 0x4b6   :  { %28357 = vmatprep.subr.bf16.mxu0 %v28356_v14  ;;  %28405 = vmatprep.subr.bf16.mxu1 %v28404_v46  ;;  %v30767_v39 = vpop.eup %30766  ;;  %v9765_v14 = vld [vmem:[#allocation8 + $0x10] sm:$0xff]  ;;  %v37088_v35 = vand.u32 4294901760, %v32955_v31  ;;  %v33103_v19 = vpack.c.bf16 %v10329_v10, %v10325_v24  ;;  %v33105_v31 = vsub.f32 %v9766_v59, %v10325_v24  ;;  %v9775_v59 = vld [vmem:[#allocation8 + $0x60] sm:$0xff] }
 0x4b7   :  { %8953 = vmatprep.mubr.f32.mxu0 %v36977_v6  ;;  %9496 = vmatprep.mubr.f32.mxu1 %v36977_v6  ;;  %v28372_v55 = vpack.c.bf16 %v37085_v2, %v37084_v21  ;;  %v9769_v46 = vld [vmem:[#allocation8 + $0x30] sm:$0xff]  ;;  %v7510_v37 = vadd.f32 1.0, %v30767_v39  ;;  %v9771_v2 = vld [vmem:[#allocation8 + $0x40] sm:$0xff] }
 0x4b8   :  { %v37091_v39 = vld [vmem:[#allocation49_spill] sm:$0xff]  ;;  %v10331_v43 = vand.u32 4294901760, %v9769_v46 }
 0x4b9   :  { %28359 = vmatpush1.bf16.msra.mxu0 %v28358_v18  ;;  %28407 = vmatpush1.bf16.msra.mxu1 %v28406_v62  ;;  %v28420_v18 = vpack.c.bf16 %v9342_v56, %v37086_v38  ;;  %v28374_v62 = vpack.c.bf16 %v37088_v35, %v37087_v48  ;;  %v9776_v56 = vld [vmem:[#allocation8 + $0x68] sm:$0xff]  ;;  %30772 = vrcp.f32 %v7510_v37 }
 0x4ba   :  { %28361 = vmatprep.subr.bf16.mxu0 %v32886_v15  ;;  %28409 = vmatprep.subr.bf16.mxu1 %v32888_v13  ;;  %v9794_v21 = vand.u32 4294901760, %v9776_v56  ;;  %v33126_v37 = vsub.f32 %v9769_v46, %v10331_v43 }
 0x4bc   :  { %8956 = vmatmul.mubr.f32.vlgmr.msra.gmra.mrb[20].mxu0 %v32820_v57  ;;  %9499 = vmatmul.mubr.f32.vlgmr.msra.gmra.mrb[36].mxu1 %v32820_v57  ;;  %v37081_v57 = vand.u32 4294901760, %v32902_v49  ;;  %v9788_v49 = vand.u32 4294901760, %v9767_v5 }
 0x4bd   :  { %28363 = vmatpush1.bf16.msra.mxu0 %v32890_v45  ;;  %28411 = vmatpush1.bf16.msra.mxu1 %v32906_v17 }
 0x4be   :  { %v30769_v30 = vpop.eup %30768  ;;  %v28370_v60 = vpack.c.bf16 %v37081_v57, %v37080_v36  ;;  %28365 = vmatprep.subr.bf16.mxu0 %v32922_v33  ;;  %28413 = vmatprep.subr.bf16.mxu1 %v32934_v40  ;;  %v33097_v36 = vsub.f32 %v9764_v20, %v9782_v51  ;;  %v9774_v57 = vld [vmem:[#allocation8 + $0x58] sm:$0xff]  ;;  %v33109_v20 = vsub.f32 %v9770_v44, %v10329_v10  ;;  %v10337_v44 = vand.u32 4294901760, %v9778_v9  ;;  %v9773_v10 = vld [vmem:[#allocation8 + $0x50] sm:$0xff] }
 0x4bf   :  { %v7519_v32 = vmul.f32 %v30769_v30, %v30765_v7  ;;  %v30771_v27 = vpop.eup %30770  ;;  %9034 = vmatprep.mubr.f32.mxu0 %v36977_v6  ;;  %9577 = vmatprep.mubr.f32.mxu1 %v36977_v6  ;;  %v37089_v7 = vand.u32 4294901760, %v32957_v42  ;;  %v33095_v30 = vpack.c.bf16 %v9786_v4, %v9782_v51  ;;  %v10327_v42 = vand.u32 4294901760, %v9765_v14 }
 0x4c0   :  { %v7518_v3 = vmul.f32 %v30771_v27, %v37091_v39  ;;  %v33111_v1 = vpack.c.bf16 %v9788_v49, %v9784_v47  ;;  %v33113_v51 = vsub.f32 %v9763_v58, %v9784_v47  ;;  %v9790_v4 = vand.u32 4294901760, %v9772_v28 }
 0x4c1   :  { %v28422_v0 = vpack.c.bf16 %v37090_v8, %v37089_v7  ;;  %28367 = vmatpush1.bf16.msra.mxu0 %v32942_v53  ;;  %28415 = vmatpush1.bf16.msra.mxu1 %v32964_v23  ;;  %v33118_v24 = vsub.f32 %v9767_v5, %v9788_v49  ;;  %v33122_v58 = vsub.f32 %v9765_v14, %v10327_v42  ;;  %v9868_v47 = vand.u32 4294901760, %v33097_v36 }
 0x4c2   :  { %v33107_v26 = vadd.f32 %v7519_v32, %v7518_v3  ;;  %28369 = vmatprep.subr.bf16.mxu0 %v28368_v54  ;;  %28417 = vmatprep.subr.bf16.mxu1 %v28416_v63  ;;  %v10333_v54 = vand.u32 4294901760, %v9774_v57  ;;  %v33120_v63 = vpack.c.bf16 %v10331_v43, %v10327_v42  ;;  %v9777_v32 = vld [vmem:[#allocation8 + $0x70] sm:$0xff]  ;;  %v9880_v27 = vand.u32 4294901760, %v33099_v61 }
 0x4c3   :  { %v9796_v5 = vand.u32 4294901760, %v9775_v59  ;;  %v10411_v49 = vand.u32 4294901760, %v33105_v31  ;;  %v33135_v14 = vsub.f32 %v9776_v56, %v9794_v21  ;;  %v36765_v38 = vand.u32 4294901760, %v33109_v20 }
 0x4c4   :  { %37092 = vst [vmem:[#allocation33_spill] sm:$0xff] %v33107_v26  ;;  %30774 = vtanh.f32 %v33107_v26  ;;  %9038 = vmatmul.mubr.f32.vlgmr.msra.gmra.mrb[20].mxu0 %v32823_v52  ;;  %9581 = vmatmul.mubr.f32.vlgmr.msra.gmra.mrb[36].mxu1 %v32823_v52  ;;  %v9792_v52 = vand.u32 4294901760, %v9771_v2  ;;  %v33140_v46 = vsub.f32 %v9774_v57, %v10333_v54  ;;  %v10339_v48 = vand.u32 4294901760, %v9777_v32 }
 0x4c5   :  { %28371 = vmatpush1.bf16.msra.mxu0 %v28370_v60  ;;  %28419 = vmatpush1.bf16.msra.mxu1 %v28418_v25  ;;  %v33131_v60 = vpack.c.bf16 %v9794_v21, %v9790_v4  ;;  %v33133_v25 = vsub.f32 %v9772_v28, %v9790_v4  ;;  %v33142_v35 = vsub.f32 %v9778_v9, %v10337_v44  ;;  %v36763_v56 = vand.u32 4294901760, %v33113_v51  ;;  %v30773_v9 = vpop.eup %30772 }
 0x4c6   :  { %28373 = vmatprep.subr.bf16.mxu0 %v28372_v55  ;;  %28421 = vmatprep.subr.bf16.mxu1 %v28420_v18  ;;  %v33138_v55 = vpack.c.bf16 %v10337_v44, %v10333_v54  ;;  %v10335_v18 = vand.u32 4294901760, %v9773_v10  ;;  %v9869_v7 = vsub.f32 %v33097_v36, %v9868_v47  ;;  %v9881_v8 = vsub.f32 %v33099_v61, %v9880_v27 }
 0x4c7   :  { %9132 = vmatprep.mubr.f32.mxu0 %v36977_v6  ;;  %9675 = vmatprep.mubr.f32.mxu1 %v36977_v6  ;;  %v33152_v39 = vpack.c.bf16 %v9796_v5, %v9792_v52  ;;  %v33154_v3 = vsub.f32 %v9771_v2, %v9792_v52  ;;  %v10424_v28 = vsub.f32 %v33109_v20, %v36765_v38  ;;  %v36761_v42 = vand.u32 4294901760, %v33122_v58 }
 0x4c8   :  { %v36760_v43 = vand.u32 4294901760, %v33126_v37  ;;  %v36759_v57 = vand.u32 4294901760, %v33133_v25  ;;  %v33175_v4 = vsub.f32 %v9773_v10, %v10335_v18  ;;  %v33177_v21 = vsub.f32 %v9777_v32, %v10339_v48 }
 0x4c9   :  { %28375 = vmatpush1.bf16.msra.mxu0 %v28374_v62  ;;  %28423 = vmatpush1.bf16.msra.mxu1 %v28422_v0  ;;  %v10412_v62 = vsub.f32 %v33105_v31, %v10411_v49  ;;  %v33159_v0 = vsub.f32 %v9775_v59, %v9796_v5  ;;  %v9870_v2 = vand.u32 4294901760, %v9869_v7  ;;  %v9882_v59 = vand.u32 4294901760, %v9881_v8 }
 0x4ca   :  { %28377 = vmatprep.subr.bf16.mxu0 %v32886_v15  ;;  %28425 = vmatprep.subr.bf16.mxu1 %v32888_v13  ;;  %v36762_v15 = vand.u32 4294901760, %v33118_v24  ;;  %v33168_v13 = vpack.c.bf16 %v10339_v48, %v10335_v18  ;;  %v36764_v52 = vand.u32 4294901760, %v33135_v14  ;;  %v36766_v5 = vand.u32 4294901760, %v33140_v46 }
 0x4cb   :  { %v10413_v44 = vand.u32 4294901760, %v10412_v62  ;;  %v10425_v10 = vand.u32 4294901760, %v10424_v28  ;;  %v9875_v32 = vsub.f32 %v33113_v51, %v36763_v56  ;;  %v10430_v18 = vsub.f32 %v33126_v37, %v36760_v43 }
 0x4cc   :  { %9134 = vmatmul.mubr.f32.vlgmr.msra.gmra.mrb[20].mxu0 %v32817_v16  ;;  %9677 = vmatmul.mubr.f32.vlgmr.msra.gmra.mrb[36].mxu1 %v32817_v16  ;;  %v9893_v48 = vsub.f32 %v33133_v25, %v36759_v57  ;;  %v36770_v7 = vand.u32 4294901760, %v33154_v3  ;;  %v36769_v62 = vand.u32 4294901760, %v33159_v0  ;;  %v36768_v28 = vand.u32 4294901760, %v33175_v4 }
 0x4cd   :  { %28379 = vmatpush1.bf16.msra.mxu0 %v32890_v45  ;;  %28427 = vmatpush1.bf16.msra.mxu1 %v32906_v17  ;;  %v10447_v45 = vand.u32 4294901760, %v33142_v35  ;;  %v28440_v57 = vpack.c.bf16 %v9882_v59, %v9870_v2  ;;  %v28488_v43 = vpack.c.bf16 %v10425_v10, %v10413_v44  ;;  %v10431_v38 = vand.u32 4294901760, %v10430_v18 }
 0x4ce   :  { %v30775_v54 = vpop.eup %30774  ;;  %28381 = vmatprep.subr.bf16.mxu0 %v32922_v33  ;;  %28429 = vmatprep.subr.bf16.mxu1 %v32934_v40  ;;  %v9887_v33 = vsub.f32 %v33118_v24, %v36762_v15  ;;  %v10418_v40 = vsub.f32 %v33122_v58, %v36761_v42  ;;  %v9876_v42 = vand.u32 4294901760, %v9875_v32  ;;  %v9894_v2 = vand.u32 4294901760, %v9893_v48 }
 0x4cf   :  { %9212 = vmatprep.mubr.f32.mxu0 %v36977_v6  ;;  %9755 = vmatprep.mubr.f32.mxu1 %v36977_v6  ;;  %v7522_v17 = vmul.f32 %v30775_v54, %v30773_v9  ;;  %v36767_v9 = vand.u32 4294901760, %v33177_v21  ;;  %v9911_v59 = vsub.f32 %v33159_v0, %v36769_v62 }
 0x4d0   :  { %v9888_v15 = vand.u32 4294901760, %v9887_v33 }
 0x4d1   :  { %28383 = vmatpush1.bf16.msra.mxu0 %v32942_v53  ;;  %28431 = vmatpush1.bf16.msra.mxu1 %v32964_v23  ;;  %v9780_v8 = vsel %vm1906_vm1, %v7522_v17, 0  ;;  %v9905_v53 = vsub.f32 %v33135_v14, %v36764_v52  ;;  %v10436_v23 = vsub.f32 %v33140_v46, %v36766_v5  ;;  %v10448_v17 = vsub.f32 %v33142_v35, %v10447_v45 }
 0x4d2   :  { %28433 = vmatprep.subr.bf16.mxu0 %v33095_v30  ;;  %28481 = vmatprep.subr.bf16.mxu1 %v33103_v19  ;;  %v33210_v54 = vand.u32 4294901760, %v9780_v8  ;;  %v10419_v52 = vand.u32 4294901760, %v10418_v40  ;;  %v9899_v5 = vsub.f32 %v33154_v3, %v36770_v7  ;;  %v10454_v44 = vsub.f32 %v33177_v21, %v36767_v9 }
 0x4d3   :  { %v9906_v32 = vand.u32 4294901760, %v9905_v53  ;;  %v10437_v33 = vand.u32 4294901760, %v10436_v23  ;;  %v10449_v40 = vand.u32 4294901760, %v10448_v17  ;;  %v28442_v48 = vpack.c.bf16 %v9888_v15, %v9876_v42 }
 0x4d4   :  { %37093 = vst [vmem:[#allocation38_spill] sm:$0xff] %v33210_v54  ;;  %9214 = vmatmul.mubr.f32.vlgmr.msra.gmra.mrb[20].mxu0 %v32817_v16  ;;  %9757 = vmatmul.mubr.f32.vlgmr.msra.gmra.mrb[36].mxu1 %v32817_v16  ;;  %v33224_v56 = vsub.f32 %v9780_v8, %v33210_v54  ;;  %v10442_v16 = vsub.f32 %v33175_v4, %v36768_v28  ;;  %v9900_v9 = vand.u32 4294901760, %v9899_v5  ;;  %v9912_v28 = vand.u32 4294901760, %v9911_v59 }
 0x4d5   :  { %28435 = vmatpush1.bf16.msra.mxu0 %v33111_v1  ;;  %28483 = vmatpush1.bf16.msra.mxu1 %v33120_v63  ;;  %v28490_v8 = vpack.c.bf16 %v10431_v38, %v10419_v52  ;;  %v10455_v7 = vand.u32 4294901760, %v10454_v44  ;;  %v28444_v23 = vpack.c.bf16 %v9906_v32, %v9894_v2  ;;  %v28492_v17 = vpack.c.bf16 %v10449_v40, %v10437_v33 }
 0x4d6   :  { %37094 = vst [vmem:[#allocation29_spill] sm:$0xff] %v33224_v56  ;;  %28437 = vmatprep.subr.bf16.mxu0 %v33131_v60  ;;  %28485 = vmatprep.subr.bf16.mxu1 %v33138_v55  ;;  %v33243_v10 = vand.u32 4294901760, %v33224_v56  ;;  %v10443_v62 = vand.u32 4294901760, %v10442_v16  ;;  %v28446_v38 = vpack.c.bf16 %v9912_v28, %v9900_v9  ;;  %v28448_v42 = vpack.c.bf16 %v33099_v61, %v33097_v36 }
 0x4d7   :  { %9854 = vmatprep.mubr.f32.mxu0 %v36977_v6  ;;  %10397 = vmatprep.mubr.f32.mxu1 %v36977_v6  ;;  %v28496_v52 = vpack.c.bf16 %v33109_v20, %v33105_v31  ;;  %v28452_v5 = vpack.c.bf16 %v33135_v14, %v33133_v25  ;;  %v28502_v28 = vpack.c.bf16 %v33177_v21, %v33175_v4  ;;  %v37097_v2 = vand.u32 4294901760, %v33109_v20 }
 0x4d8   :  { %37095 = vst [vmem:[#allocation30_spill] sm:$0xff] %v33243_v10  ;;  %v9858_v18 = vsub.f32 %v33224_v56, %v33243_v10  ;;  %v28494_v15 = vpack.c.bf16 %v10455_v7, %v10443_v62  ;;  %v28500_v7 = vpack.c.bf16 %v33142_v35, %v33140_v46  ;;  %v28454_v62 = vpack.c.bf16 %v33159_v0, %v33154_v3  ;;  %v10901_v35 = vld [vmem:[%s36670_s2] sm:$0xff] }
 0x4d9   :  { %28439 = vmatpush1.bf16.msra.mxu0 %v33152_v39  ;;  %28487 = vmatpush1.bf16.msra.mxu1 %v33168_v13  ;;  %v28464_v9 = vpack.c.bf16 %v9880_v27, %v9868_v47  ;;  %v28512_v59 = vpack.c.bf16 %v37097_v2, %v10411_v49  ;;  %v37098_v16 = vand.u32 4294901760, %v33113_v51  ;;  %v37099_v36 = vand.u32 4294901760, %v33118_v24 }
 0x4da   :  { %v33251_v53 = vand.u32 4294901760, %v9858_v18  ;;  %28441 = vmatprep.subr.bf16.mxu0 %v28440_v57  ;;  %28489 = vmatprep.subr.bf16.mxu1 %v28488_v43  ;;  %v28450_v43 = vpack.c.bf16 %v33118_v24, %v33113_v51  ;;  %v28498_v57 = vpack.c.bf16 %v33126_v37, %v33122_v58  ;;  %v37100_v61 = vand.u32 4294901760, %v33122_v58 }
 0x4db   :  { %v28466_v44 = vpack.c.bf16 %v37099_v36, %v37098_v16  ;;  %v37101_v31 = vand.u32 4294901760, %v33126_v37  ;;  %v37102_v20 = vand.u32 4294901760, %v33133_v25  ;;  %v37103_v27 = vand.u32 4294901760, %v33135_v14  ;;  %v10913_v16 = vld [vmem:[%s36670_s2 + $0x60] sm:$0xff] }
 0x4dc   :  { %37096 = vst [vmem:[#allocation31_spill] sm:$0xff] %v33251_v53  ;;  %9860 = vmatmul.mubr.f32.vlgmr.msra.gmra.mrb[20].mxu0 %v33251_v53  ;;  %10403 = vmatmul.mubr.f32.vlgmr.msra.gmra.mrb[36].mxu1 %v33251_v53  ;;  %v37104_v32 = vand.u32 4294901760, %v33140_v46  ;;  %v37105_v24 = vand.u32 4294901760, %v33154_v3  ;;  %v37106_v58 = vand.u32 4294901760, %v33159_v0  ;;  %v37107_v25 = vand.u32 4294901760, %v33175_v4  ;;  %v10903_v4 = vld [vmem:[%s36670_s2 + $0x10] sm:$0xff] }
 0x4dd   :  { %28443 = vmatpush1.bf16.msra.mxu0 %v28442_v48  ;;  %28491 = vmatpush1.bf16.msra.mxu1 %v28490_v8  ;;  %v28514_v47 = vpack.c.bf16 %v37101_v31, %v37100_v61  ;;  %v28468_v49 = vpack.c.bf16 %v37103_v27, %v37102_v20  ;;  %v37108_v14 = vand.u32 4294901760, %v33177_v21  ;;  %v10922_v0 = vand.u32 4294901760, %v10901_v35  ;;  %v10907_v21 = vld [vmem:[%s36670_s2 + $0x30] sm:$0xff] }
 0x4de   :  { %28445 = vmatprep.subr.bf16.mxu0 %v28444_v23  ;;  %28493 = vmatprep.subr.bf16.mxu1 %v28492_v17  ;;  %v28516_v51 = vpack.c.bf16 %v10447_v45, %v37104_v32  ;;  %v28470_v37 = vpack.c.bf16 %v37106_v58, %v37105_v24  ;;  %v10910_v45 = vld [vmem:[%s36670_s2 + $0x48] sm:$0xff]  ;;  %v10912_v17 = vld [vmem:[%s36670_s2 + $0x58] sm:$0xff]  ;;  %v10915_v27 = vld [vmem:[%s36670_s2 + $0x70] sm:$0xff] }
 0x4df   :  { %9970 = vmatprep.mubr.f32.mxu0 %v36977_v6  ;;  %10513 = vmatprep.mubr.f32.mxu1 %v36977_v6  ;;  %v28518_v33 = vpack.c.bf16 %v37108_v14, %v37107_v25  ;;  %v10914_v23 = vld [vmem:[%s36670_s2 + $0x68] sm:$0xff]  ;;  %v11471_v2 = vand.u32 4294901760, %v10912_v17 }
 0x4e1   :  { %28447 = vmatpush1.bf16.msra.mxu0 %v28446_v38  ;;  %28495 = vmatpush1.bf16.msra.mxu1 %v28494_v15  ;;  %v10916_v38 = vld [vmem:[%s36670_s2 + $0x78] sm:$0xff]  ;;  %v33424_v24 = vsub.f32 %v10912_v17, %v11471_v2 }
 0x4e2   :  { %28449 = vmatprep.subr.bf16.mxu0 %v28448_v42  ;;  %28497 = vmatprep.subr.bf16.mxu1 %v28496_v52 }
 0x4e4   :  { %9972 = vmatmul.mubr.f32.vlgmr.msra.gmra.mrb[20].mxu0 %v33210_v54  ;;  %10515 = vmatmul.mubr.f32.vlgmr.msra.gmra.mrb[36].mxu1 %v33210_v54 }
 0x4e5   :  { %28451 = vmatpush1.bf16.msra.mxu0 %v28450_v43  ;;  %28499 = vmatpush1.bf16.msra.mxu1 %v28498_v57  ;;  %v33391_v43 = vsub.f32 %v10901_v35, %v10922_v0  ;;  %v10909_v57 = vld [vmem:[%s36670_s2 + $0x40] sm:$0xff] }
 0x4e6   :  { %28453 = vmatprep.subr.bf16.mxu0 %v28452_v5  ;;  %28501 = vmatprep.subr.bf16.mxu1 %v28500_v7  ;;  %v11465_v7 = vand.u32 4294901760, %v10903_v4  ;;  %v10930_v36 = vand.u32 4294901760, %v10909_v57 }
 0x4e7   :  { %10058 = vmatprep.mubr.f32.mxu0 %v36977_v6  ;;  %10601 = vmatprep.mubr.f32.mxu1 %v36977_v6 }
 0x4e8   :  { %v33409_v31 = vsub.f32 %v10903_v4, %v11465_v7  ;;  %v33429_v25 = vsub.f32 %v10909_v57, %v10930_v36 }
 0x4e9   :  { %28455 = vmatpush1.bf16.msra.mxu0 %v28454_v62  ;;  %28503 = vmatpush1.bf16.msra.mxu1 %v28502_v28  ;;  %v11469_v62 = vand.u32 4294901760, %v10907_v21  ;;  %v10928_v28 = vand.u32 4294901760, %v10910_v45 }
 0x4ea   :  { %28457 = vmatprep.subr.bf16.mxu0 %v33095_v30  ;;  %28505 = vmatprep.subr.bf16.mxu1 %v33103_v19 }
 0x4eb   :  { %v33407_v61 = vpack.c.bf16 %v11469_v62, %v11465_v7  ;;  %v33413_v20 = vsub.f32 %v10910_v45, %v10928_v28 }
 0x4ec   :  { %10061 = vmatmul.mubr.f32.vlgmr.msra.gmra.mrb[20].mxu0 %v33224_v56  ;;  %10604 = vmatmul.mubr.f32.vlgmr.msra.gmra.mrb[36].mxu1 %v33224_v56 }
 0x4ed   :  { %28459 = vmatpush1.bf16.msra.mxu0 %v33111_v1  ;;  %28507 = vmatpush1.bf16.msra.mxu1 %v33120_v63 }
 0x4ee   :  { %28461 = vmatprep.subr.bf16.mxu0 %v33131_v60  ;;  %28509 = vmatprep.subr.bf16.mxu1 %v33138_v55 }
 0x4ef   :  { %10139 = vmatprep.mubr.f32.mxu0 %v36977_v6  ;;  %10682 = vmatprep.mubr.f32.mxu1 %v36977_v6 }
 0x4f1   :  { %28463 = vmatpush1.bf16.msra.mxu0 %v33152_v39  ;;  %28511 = vmatpush1.bf16.msra.mxu1 %v33168_v13 }
 0x4f2   :  { %28465 = vmatprep.subr.bf16.mxu0 %v28464_v9  ;;  %28513 = vmatprep.subr.bf16.mxu1 %v28512_v59  ;;  %v10932_v9 = vand.u32 4294901760, %v10914_v23  ;;  %v11475_v59 = vand.u32 4294901760, %v10916_v38 }
 0x4f4   :  { %10143 = vmatmul.mubr.f32.vlgmr.msra.gmra.mrb[20].mxu0 %v33243_v10  ;;  %10686 = vmatmul.mubr.f32.vlgmr.msra.gmra.mrb[36].mxu1 %v33243_v10  ;;  %v33420_v32 = vsub.f32 %v10914_v23, %v10932_v9  ;;  %v33427_v58 = vsub.f32 %v10916_v38, %v11475_v59  ;;  %v11555_v38 = vand.u32 4294901760, %v33409_v31 }
 0x4f5   :  { %28467 = vmatpush1.bf16.msra.mxu0 %v28466_v44  ;;  %28515 = vmatpush1.bf16.msra.mxu1 %v28514_v47  ;;  %v10911_v44 = vld [vmem:[%s36670_s2 + $0x50] sm:$0xff]  ;;  %v33411_v47 = vsub.f32 %v10907_v21, %v11469_v62  ;;  %v11012_v21 = vand.u32 4294901760, %v33391_v43 }
 0x4f6   :  { %28469 = vmatprep.subr.bf16.mxu0 %v28468_v49  ;;  %28517 = vmatprep.subr.bf16.mxu1 %v28516_v51  ;;  %v33418_v49 = vpack.c.bf16 %v10932_v9, %v10928_v28  ;;  %v33422_v51 = vpack.c.bf16 %v11475_v59, %v11471_v2  ;;  %v11473_v14 = vand.u32 4294901760, %v10911_v44  ;;  %v11556_v59 = vsub.f32 %v33409_v31, %v11555_v38 }
 0x4f7   :  { %10237 = vmatprep.mubr.f32.mxu0 %v36977_v6  ;;  %10780 = vmatprep.mubr.f32.mxu1 %v36977_v6  ;;  %v11567_v57 = vand.u32 4294901760, %v33411_v47  ;;  %v11013_v28 = vsub.f32 %v33391_v43, %v11012_v21 }
 0x4f9   :  { %28471 = vmatpush1.bf16.msra.mxu0 %v28470_v37  ;;  %28519 = vmatpush1.bf16.msra.mxu1 %v28518_v33  ;;  %v10934_v37 = vand.u32 4294901760, %v10913_v16  ;;  %v11477_v33 = vand.u32 4294901760, %v10915_v27 }
 0x4fa   :  { %28473 = vmatprep.subr.bf16.mxu0 %v33095_v30  ;;  %28521 = vmatprep.subr.bf16.mxu1 %v33103_v19  ;;  %v10902_v30 = vld [vmem:[%s36670_s2 + $0x8] sm:$0xff] }
 0x4fb   :  { %v10906_v19 = vld [vmem:[%s36670_s2 + $0x28] sm:$0xff]  ;;  %v33443_v35 = vpack.c.bf16 %v11477_v33, %v11473_v14 }
 0x4fc   :  { %10239 = vmatmul.mubr.f32.vlgmr.msra.gmra.mrb[20].mxu0 %v33210_v54  ;;  %10782 = vmatmul.mubr.f32.vlgmr.msra.gmra.mrb[36].mxu1 %v33210_v54 }
 0x4fd   :  { %28475 = vmatpush1.bf16.msra.mxu0 %v33111_v1  ;;  %28523 = vmatpush1.bf16.msra.mxu1 %v33120_v63  ;;  %v10904_v1 = vld [vmem:[%s36670_s2 + $0x18] sm:$0xff]  ;;  %v10920_v63 = vand.u32 4294901760, %v10902_v30 }
 0x4fe   :  { %28477 = vmatprep.subr.bf16.mxu0 %v33131_v60  ;;  %28525 = vmatprep.subr.bf16.mxu1 %v33138_v55  ;;  %v10924_v60 = vand.u32 4294901760, %v10906_v19  ;;  %v10908_v55 = vld [vmem:[%s36670_s2 + $0x38] sm:$0xff]  ;;  %v11463_v46 = vand.u32 4294901760, %v10904_v1 }
 0x4ff   :  { %10317 = vmatprep.mubr.f32.mxu0 %v36977_v6  ;;  %10860 = vmatprep.mubr.f32.mxu1 %v36977_v6  ;;  %v11467_v3 = vand.u32 4294901760, %v10908_v55  ;;  %v33370_v18 = vsub.f32 %v10902_v30, %v10920_v63 }
 0x500   :  { %v33368_v40 = vpack.c.bf16 %v10924_v60, %v10920_v63  ;;  %v33372_v48 = vsub.f32 %v10906_v19, %v10924_v60  ;;  %v33374_v8 = vsub.f32 %v10904_v1, %v11463_v46  ;;  %v33436_v63 = vpack.c.bf16 %v10934_v37, %v10930_v36 }
 0x501   :  { %28479 = vmatpush1.bf16.msra.mxu0 %v33152_v39  ;;  %28527 = vmatpush1.bf16.msra.mxu1 %v33168_v13  ;;  %v10905_v39 = vld [vmem:[%s36670_s2 + $0x20] sm:$0xff]  ;;  %v33385_v15 = vpack.c.bf16 %v11467_v3, %v11463_v46  ;;  %v33387_v42 = vsub.f32 %v10908_v55, %v11467_v3  ;;  %v36774_v30 = vand.u32 4294901760, %v33370_v18  ;;  %v33438_v60 = vsub.f32 %v10913_v16, %v10934_v37 }
 0x502   :  { %v10926_v13 = vand.u32 4294901760, %v10905_v39  ;;  %28529 = vmatprep.subr.bf16.mxu0 %v33368_v40  ;;  %v36773_v19 = vand.u32 4294901760, %v33372_v48  ;;  %v36772_v1 = vand.u32 4294901760, %v33374_v8  ;;  %v33440_v55 = vsub.f32 %v10911_v44, %v11473_v14 }
 0x503   :  { %28577 = vmatprep.subr.bf16.mxu1 %v33385_v15  ;;  %v36771_v46 = vand.u32 4294901760, %v33387_v42  ;;  %v11007_v3 = vsub.f32 %v33370_v18, %v36774_v30  ;;  %v11568_v16 = vsub.f32 %v33411_v47, %v11567_v57  ;;  %v11030_v36 = vand.u32 4294901760, %v33413_v20 }
 0x504   :  { %10319 = vmatmul.mubr.f32.vlgmr.msra.gmra.mrb[20].mxu0 %v33210_v54  ;;  %10862 = vmatmul.mubr.f32.vlgmr.msra.gmra.mrb[36].mxu1 %v33210_v54  ;;  %v33389_v52 = vpack.c.bf16 %v10926_v13, %v10922_v0  ;;  %v33397_v5 = vsub.f32 %v10905_v39, %v10926_v13  ;;  %v33445_v39 = vsub.f32 %v10915_v27, %v11477_v33  ;;  %v11014_v27 = vand.u32 4294901760, %v11013_v28 }
 0x505   :  { %10992 = vmatprep.mubr.f32.mxu0 %v36977_v6  ;;  %11535 = vmatprep.mubr.f32.mxu1 %v36977_v6  ;;  %v11019_v0 = vsub.f32 %v33372_v48, %v36773_v19  ;;  %v11550_v13 = vsub.f32 %v33374_v8, %v36772_v1  ;;  %v11562_v4 = vsub.f32 %v33387_v42, %v36771_v46  ;;  %v11008_v23 = vand.u32 4294901760, %v11007_v3 }
 0x506   :  { %28531 = vmatpush1.bf16.msra.mxu0 %v33389_v52  ;;  %28579 = vmatpush1.bf16.msra.mxu1 %v33407_v61  ;;  %v11024_v45 = vand.u32 4294901760, %v33397_v5  ;;  %v11042_v14 = vand.u32 4294901760, %v33420_v32  ;;  %v11557_v33 = vand.u32 4294901760, %v11556_v59  ;;  %v11569_v3 = vand.u32 4294901760, %v11568_v16 }
 0x507   :  { %28533 = vmatprep.subr.bf16.mxu0 %v33418_v49  ;;  %28581 = vmatprep.subr.bf16.mxu1 %v33422_v51  ;;  %v11020_v17 = vand.u32 4294901760, %v11019_v0  ;;  %v11551_v7 = vand.u32 4294901760, %v11550_v13  ;;  %v11563_v62 = vand.u32 4294901760, %v11562_v4  ;;  %v11031_v0 = vsub.f32 %v33413_v20, %v11030_v36 }
 0x508   :  { %v11025_v9 = vsub.f32 %v33397_v5, %v11024_v45  ;;  %v11573_v13 = vand.u32 4294901760, %v33424_v24  ;;  %v11591_v1 = vand.u32 4294901760, %v33445_v39 }
 0x509   :  { %v28536_v2 = vpack.c.bf16 %v11020_v17, %v11008_v23  ;;  %v28584_v44 = vpack.c.bf16 %v11563_v62, %v11551_v7  ;;  %v11043_v23 = vsub.f32 %v33420_v32, %v11042_v14  ;;  %v11585_v17 = vand.u32 4294901760, %v33427_v58 }
 0x50a   :  { %28535 = vmatpush1.bf16.msra.mxu0 %v33436_v63  ;;  %28583 = vmatpush1.bf16.msra.mxu1 %v33443_v35  ;;  %v11026_v37 = vand.u32 4294901760, %v11025_v9  ;;  %v11036_v7 = vand.u32 4294901760, %v33429_v25  ;;  %v33478_v62 = vpack.c.bf16 %v11569_v3, %v11557_v33  ;;  %v11032_v28 = vand.u32 4294901760, %v11031_v0  ;;  %v37113_v33 = vld [vmem:[#allocation15_spill] sm:$0xff] }
 0x50b   :  { %28537 = vmatprep.subr.bf16.mxu0 %v28536_v2  ;;  %28585 = vmatprep.subr.bf16.mxu1 %v28584_v44  ;;  %v11574_v9 = vsub.f32 %v33424_v24, %v11573_v13  ;;  %v11048_v2 = vand.u32 4294901760, %v33438_v60  ;;  %v11044_v59 = vand.u32 4294901760, %v11043_v23  ;;  %v11586_v16 = vsub.f32 %v33427_v58, %v11585_v17 }
 0x50c   :  { %v33473_v4 = vpack.c.bf16 %v11026_v37, %v11014_v27  ;;  %v11037_v44 = vsub.f32 %v33429_v25, %v11036_v7  ;;  %v11579_v27 = vand.u32 4294901760, %v33440_v55  ;;  %v11592_v10 = vsub.f32 %v33445_v39, %v11591_v1 }
 0x50d   :  { %v11575_v37 = vand.u32 4294901760, %v11574_v9  ;;  %v11049_v46 = vsub.f32 %v33438_v60, %v11048_v2  ;;  %v33489_v3 = vpack.c.bf16 %v11044_v59, %v11032_v28  ;;  %v11587_v0 = vand.u32 4294901760, %v11586_v16 }
 0x50e   :  { %v11038_v19 = vand.u32 4294901760, %v11037_v44  ;;  %v11580_v23 = vsub.f32 %v33440_v55, %v11579_v27  ;;  %v11593_v16 = vand.u32 4294901760, %v11592_v10  ;;  %v37111_v28 = vand.u32 4294901760, %v33374_v8 }
 0x50f   :  { %v11050_v30 = vand.u32 4294901760, %v11049_v46  ;;  %v28588_v54 = vpack.c.bf16 %v11587_v0, %v11575_v37  ;;  %v37109_v37 = vand.u32 4294901760, %v33370_v18  ;;  %v37110_v0 = vand.u32 4294901760, %v33372_v48 }
 0x510   :  { %v11581_v53 = vand.u32 4294901760, %v11580_v23  ;;  %v37112_v10 = vand.u32 4294901760, %v33387_v42  ;;  %v33521_v46 = vpack.c.bf16 %v11567_v57, %v11555_v38  ;;  %v33523_v44 = vpack.c.bf16 %v11042_v14, %v11030_v36 }
 0x511   :  { %v28542_v59 = vpack.c.bf16 %v11050_v30, %v11038_v19  ;;  %v33511_v23 = vpack.c.bf16 %v37110_v0, %v37109_v37  ;;  %v33519_v19 = vpack.c.bf16 %v11024_v45, %v11012_v21  ;;  %v33525_v56 = vpack.c.bf16 %v11585_v17, %v11573_v13 }
 0x512   :  { %v28590_v9 = vpack.c.bf16 %v11593_v16, %v11581_v53  ;;  %v33517_v30 = vpack.c.bf16 %v37112_v10, %v37111_v28  ;;  %v33527_v53 = vpack.c.bf16 %v11048_v2, %v11036_v7  ;;  %v33529_v16 = vpack.c.bf16 %v11591_v1, %v11579_v27  ;;  %v37114_v28 = vld [vmem:[#allocation16_spill] sm:$0xff] }
 0x577   :  { %v8085_v37 = vpop.f32.mrb[6].mxu0  ;;  %v8628_v0 = vpop.f32.mrb[22].mxu1 }
 0x578   :  { %v29935_v26 = vadd.f32 %v8085_v37, %v37113_v33  ;;  %v8087_v41 = vpop.f32.mrb[7].mxu0  ;;  %v8630_v11 = vpop.f32.mrb[23].mxu1  ;;  %v29960_v38 = vadd.f32 %v8628_v0, %v37010_v34 }
 0x579   :  { %v29937_v10 = vadd.f32 %v8087_v41, %v37114_v28  ;;  %v29961_v57 = vadd.f32 %v8630_v11, %v37011_v29 }
 0x57a   :  { %v27486_v21 = vmul.f32 -1.442695, %v29935_v26  ;;  %v27488_v36 = vmul.f32 -1.442695, %v29960_v38 }
 0x57b   :  { %v27487_v45 = vmul.f32 -1.442695, %v29937_v10 }
 0x57c   :  { %30776 = vpow2.f32 %v27486_v21 }
 0x57d   :  { %30778 = vpow2.f32 %v27487_v45 }
 0x57e   :  { %30780 = vtanh.f32 %v29961_v57 }
 0x57f   :  { %30782 = vpow2.f32 %v27488_v36 }
 0x586   :  { %v30777_v14 = vpop.eup %30776 }
 0x587   :  { %v8646_v1 = vadd.f32 1.0, %v30777_v14  ;;  %v30779_v13 = vpop.eup %30778  ;;  %v37115_v14 = vpack.c.bf16 %v33372_v48, %v33370_v18  ;;  %v37119_v18 = vpack.c.bf16 %v33420_v32, %v33413_v20  ;;  %v37120_v48 = vpack.c.bf16 %v33427_v58, %v33424_v24 }
 0x588   :  { %v8647_v17 = vadd.f32 1.0, %v30779_v13  ;;  %v30781_v7 = vpop.eup %30780 }
 0x589   :  { %30784 = vrcp.f32 %v8646_v1  ;;  %v30783_v2 = vpop.eup %30782  ;;  %v37116_v1 = vpack.c.bf16 %v33387_v42, %v33374_v8  ;;  %v12035_v8 = vld [vmem:[#allocation6 + $0x8] sm:$0xff] }
 0x58a   :  { %30786 = vrcp.f32 %v8647_v17  ;;  %v8648_v33 = vadd.f32 1.0, %v30783_v2  ;;  %v12039_v42 = vld [vmem:[#allocation6 + $0x28] sm:$0xff]  ;;  %v12050_v20 = vand.u32 4294901760, %v12035_v8 }
 0x58b   :  { %v12054_v32 = vand.u32 4294901760, %v12039_v42  ;;  %v12047_v2 = vld [vmem:[#allocation6 + $0x68] sm:$0xff] }
 0x58c   :  { %30788 = vrcp.f32 %v8648_v33 }
 0x593   :  { %v30785_v41 = vpop.eup %30784 }
 0x594   :  { %v8657_v26 = vmul.f32 %v30785_v41, %v30781_v7  ;;  %v30787_v27 = vpop.eup %30786  ;;  %v12043_v7 = vld [vmem:[#allocation6 + $0x48] sm:$0xff]  ;;  %v33609_v41 = vpack.c.bf16 %v12054_v32, %v12050_v20 }
 0x595   :  { %v8656_v37 = vmul.f32 %v30787_v27, %v32813_v50 }
 0x596   :  { %v30789_v11 = vpop.eup %30788 }
 0x597   :  { %v33536_v0 = vadd.f32 %v8657_v26, %v8656_v37  ;;  %v12045_v37 = vld [vmem:[#allocation6 + $0x58] sm:$0xff] }
 0x599   :  { %30790 = vtanh.f32 %v33536_v0 }
 0x5a3   :  { %v30791_v28 = vpop.eup %30790 }
 0x5a4   :  { %v8660_v10 = vmul.f32 %v30791_v28, %v30789_v11  ;;  %v12049_v11 = vld [vmem:[#allocation6 + $0x78] sm:$0xff]  ;;  %v12042_v28 = vld [vmem:[#allocation6 + $0x40] sm:$0xff] }
 0x5a6   :  { %v10918_v21 = vsel %vm1906_vm1, %v8660_v10, 0 }
 0x5a7   :  { %v33540_v45 = vand.u32 4294901760, %v10918_v21 }
 0x5a9   :  { %v33543_v38 = vsub.f32 %v10918_v21, %v33540_v45  ;;  %v12058_v21 = vand.u32 4294901760, %v12043_v7 }
 0x5ab   :  { %v33546_v57 = vand.u32 4294901760, %v33543_v38 }
 0x5ad   :  { %v10996_v50 = vsub.f32 %v33543_v38, %v33546_v57 }
 0x5af   :  { %v33550_v36 = vand.u32 4294901760, %v10996_v50  ;;  %v12046_v50 = vld [vmem:[#allocation6 + $0x60] sm:$0xff] }
 0x5b1   :  { %10998 = vmatmul.mubr.f32.vlgmr.msra.gmra.mrb[8].mxu0 %v33550_v36  ;;  %11541 = vmatmul.mubr.f32.vlgmr.msra.gmra.mrb[24].mxu1 %v33550_v36 }
 0x5b2   :  { %28539 = vmatpush1.bf16.msra.mxu0 %v33473_v4  ;;  %28587 = vmatpush1.bf16.msra.mxu1 %v33478_v62  ;;  %v37118_v4 = vpack.c.bf16 %v33411_v47, %v33409_v31  ;;  %v12037_v31 = vld [vmem:[#allocation6 + $0x18] sm:$0xff] }
 0x5b3   :  { %28541 = vmatprep.subr.bf16.mxu0 %v33489_v3  ;;  %28589 = vmatprep.subr.bf16.mxu1 %v28588_v54  ;;  %v37117_v54 = vpack.c.bf16 %v33397_v5, %v33391_v43  ;;  %v37121_v43 = vpack.c.bf16 %v33438_v60, %v33429_v25  ;;  %v37122_v5 = vpack.c.bf16 %v33445_v39, %v33440_v55  ;;  %v12041_v47 = vld [vmem:[#allocation6 + $0x38] sm:$0xff]  ;;  %v12593_v24 = vand.u32 4294901760, %v12037_v31  ;;  %v12034_v25 = vld [vmem:[#allocation6] sm:$0xff] }
 0x5b4   :  { %11108 = vmatprep.mubr.f32.mxu0 %v36977_v6  ;;  %11651 = vmatprep.mubr.f32.mxu1 %v36977_v6  ;;  %v12597_v58 = vand.u32 4294901760, %v12041_v47  ;;  %v12038_v60 = vld [vmem:[#allocation6 + $0x20] sm:$0xff]  ;;  %v33597_v55 = vsub.f32 %v12035_v8, %v12050_v20  ;;  %v33599_v39 = vsub.f32 %v12039_v42, %v12054_v32  ;;  %v12052_v62 = vand.u32 4294901760, %v12034_v25  ;;  %v12044_v20 = vld [vmem:[#allocation6 + $0x50] sm:$0xff] }
 0x5b5   :  { %v12056_v3 = vand.u32 4294901760, %v12038_v60  ;;  %v33601_v13 = vsub.f32 %v12037_v31, %v12593_v24  ;;  %v12605_v8 = vand.u32 4294901760, %v12049_v11  ;;  %v12060_v42 = vand.u32 4294901760, %v12042_v28 }
 0x5b6   :  { %28543 = vmatpush1.bf16.msra.mxu0 %v28542_v59  ;;  %28591 = vmatpush1.bf16.msra.mxu1 %v28590_v9  ;;  %v12036_v9 = vld [vmem:[#allocation6 + $0x10] sm:$0xff]  ;;  %v33603_v17 = vsub.f32 %v12041_v47, %v12597_v58  ;;  %v33611_v26 = vpack.c.bf16 %v12597_v58, %v12593_v24  ;;  %v12064_v47 = vand.u32 4294901760, %v12046_v50 }
 0x5b7   :  { %28545 = vmatprep.subr.bf16.mxu0 %v37115_v14  ;;  %28593 = vmatprep.subr.bf16.mxu1 %v37116_v1  ;;  %v12040_v59 = vld [vmem:[#allocation6 + $0x30] sm:$0xff]  ;;  %v12595_v27 = vand.u32 4294901760, %v12036_v9  ;;  %v33613_v10 = vpack.c.bf16 %v12056_v3, %v12052_v62  ;;  %v12136_v14 = vand.u32 4294901760, %v33597_v55  ;;  %v12148_v1 = vand.u32 4294901760, %v33599_v39 }
 0x5b8   :  { %v12599_v33 = vand.u32 4294901760, %v12040_v59 }
 0x5b9   :  { %11110 = vmatmul.mubr.f32.vlgmr.msra.gmra.mrb[8].mxu0 %v33540_v45  ;;  %11653 = vmatmul.mubr.f32.vlgmr.msra.gmra.mrb[24].mxu1 %v33540_v45 }
 0x5ba   :  { %28547 = vmatpush1.bf16.msra.mxu0 %v37117_v54  ;;  %28595 = vmatpush1.bf16.msra.mxu1 %v37118_v4  ;;  %v36791_v54 = vand.u32 4294901760, %v33601_v13  ;;  %v36789_v4 = vand.u32 4294901760, %v33603_v17  ;;  %v33633_v31 = vsub.f32 %v12040_v59, %v12599_v33  ;;  %v33663_v59 = vsub.f32 %v12049_v11, %v12605_v8 }
 0x5bb   :  { %28549 = vmatprep.subr.bf16.mxu0 %v37119_v18  ;;  %28597 = vmatprep.subr.bf16.mxu1 %v37120_v48  ;;  %v33625_v18 = vsub.f32 %v12038_v60, %v12056_v3  ;;  %v12601_v48 = vand.u32 4294901760, %v12045_v37  ;;  %v12603_v3 = vand.u32 4294901760, %v12044_v20 }
 0x5bc   :  { %11196 = vmatprep.mubr.f32.mxu0 %v36977_v6  ;;  %11739 = vmatprep.mubr.f32.mxu1 %v36977_v6  ;;  %v12680_v58 = vsub.f32 %v33601_v13, %v36791_v54  ;;  %v36785_v11 = vand.u32 4294901760, %v33633_v31 }
 0x5bd   :  { %v33657_v60 = vpack.c.bf16 %v12605_v8, %v12601_v48 }
 0x5be   :  { %28551 = vmatpush1.bf16.msra.mxu0 %v37121_v43  ;;  %28599 = vmatpush1.bf16.msra.mxu1 %v37122_v5  ;;  %v33629_v43 = vpack.c.bf16 %v12599_v33, %v12595_v27  ;;  %v33631_v5 = vsub.f32 %v12036_v9, %v12595_v27  ;;  %v36787_v33 = vand.u32 4294901760, %v33625_v18 }
 0x5bf   :  { %28553 = vmatprep.subr.bf16.mxu0 %v33368_v40  ;;  %28601 = vmatprep.subr.bf16.mxu1 %v33385_v15 }
 0x5c1   :  { %11199 = vmatmul.mubr.f32.vlgmr.msra.gmra.mrb[8].mxu0 %v33543_v38  ;;  %11742 = vmatmul.mubr.f32.vlgmr.msra.gmra.mrb[24].mxu1 %v33543_v38 }
 0x5c2   :  { %28555 = vmatpush1.bf16.msra.mxu0 %v33389_v52  ;;  %28603 = vmatpush1.bf16.msra.mxu1 %v33407_v61 }
 0x5c3   :  { %28557 = vmatprep.subr.bf16.mxu0 %v33418_v49  ;;  %28605 = vmatprep.subr.bf16.mxu1 %v33422_v51 }
 0x5c4   :  { %11277 = vmatprep.mubr.f32.mxu0 %v36977_v6  ;;  %11820 = vmatprep.mubr.f32.mxu1 %v36977_v6 }
 0x5c6   :  { %28559 = vmatpush1.bf16.msra.mxu0 %v33436_v63  ;;  %28607 = vmatpush1.bf16.msra.mxu1 %v33443_v35 }
 0x5c7   :  { %28561 = vmatprep.subr.bf16.mxu0 %v33511_v23  ;;  %28609 = vmatprep.subr.bf16.mxu1 %v33517_v30  ;;  %v33619_v23 = vsub.f32 %v12034_v25, %v12052_v62  ;;  %v12062_v30 = vand.u32 4294901760, %v12047_v2  ;;  %v12692_v25 = vsub.f32 %v33603_v17, %v36789_v4  ;;  %v33659_v62 = vsub.f32 %v12045_v37, %v12601_v48 }
 0x5c8   :  { %v36786_v37 = vand.u32 4294901760, %v33631_v5 }
 0x5c9   :  { %11281 = vmatmul.mubr.f32.vlgmr.msra.gmra.mrb[8].mxu0 %v33546_v57  ;;  %11824 = vmatmul.mubr.f32.vlgmr.msra.gmra.mrb[24].mxu1 %v33546_v57  ;;  %v33645_v32 = vpack.c.bf16 %v12062_v30, %v12058_v21  ;;  %v33647_v24 = vsub.f32 %v12047_v2, %v12062_v30  ;;  %v33667_v2 = vsub.f32 %v12042_v28, %v12060_v42 }
 0x5ca   :  { %28563 = vmatpush1.bf16.msra.mxu0 %v33519_v19  ;;  %28611 = vmatpush1.bf16.msra.mxu1 %v33521_v46  ;;  %v12048_v19 = vld [vmem:[#allocation6 + $0x70] sm:$0xff]  ;;  %v33637_v46 = vsub.f32 %v12043_v7, %v12058_v21  ;;  %v33665_v7 = vpack.c.bf16 %v12064_v47, %v12060_v42  ;;  %v33678_v28 = vsub.f32 %v12046_v50, %v12064_v47  ;;  %v36796_v50 = vand.u32 4294901760, %v33663_v59 }
 0x5cb   :  { %28565 = vmatprep.subr.bf16.mxu0 %v33523_v44  ;;  %28613 = vmatprep.subr.bf16.mxu1 %v33525_v56  ;;  %v12137_v44 = vsub.f32 %v33597_v55, %v12136_v14  ;;  %v12149_v56 = vsub.f32 %v33599_v39, %v12148_v1  ;;  %v12607_v9 = vand.u32 4294901760, %v12048_v19  ;;  %v33680_v30 = vsub.f32 %v12044_v20, %v12603_v3 }
 0x5cc   :  { %11375 = vmatprep.mubr.f32.mxu0 %v36977_v6  ;;  %11918 = vmatprep.mubr.f32.mxu1 %v36977_v6  ;;  %v36783_v21 = vand.u32 4294901760, %v33637_v46  ;;  %v36784_v8 = vand.u32 4294901760, %v33647_v24 }
 0x5cd   :  { %v12138_v27 = vand.u32 4294901760, %v12137_v44  ;;  %v33682_v48 = vsub.f32 %v12048_v19, %v12607_v9  ;;  %v33687_v42 = vpack.c.bf16 %v12607_v9, %v12603_v3  ;;  %v12698_v19 = vsub.f32 %v33633_v31, %v36785_v11 }
 0x5ce   :  { %28567 = vmatpush1.bf16.msra.mxu0 %v33527_v53  ;;  %28615 = vmatpush1.bf16.msra.mxu1 %v33529_v16  ;;  %v36788_v53 = vand.u32 4294901760, %v33619_v23  ;;  %v12150_v16 = vand.u32 4294901760, %v12149_v56  ;;  %v12161_v44 = vsub.f32 %v33637_v46, %v36783_v21  ;;  %v36795_v56 = vand.u32 4294901760, %v33667_v2 }
 0x5cf   :  { %28569 = vmatprep.subr.bf16.mxu0 %v33368_v40  ;;  %28617 = vmatprep.subr.bf16.mxu1 %v33385_v15  ;;  %v12681_v40 = vand.u32 4294901760, %v12680_v58  ;;  %v12693_v15 = vand.u32 4294901760, %v12692_v25  ;;  %v12173_v3 = vsub.f32 %v33647_v24, %v36784_v8  ;;  %v36794_v9 = vand.u32 4294901760, %v33678_v28 }
 0x5d0   :  { %v28632_v47 = vpack.c.bf16 %v12150_v16, %v12138_v27  ;;  %v36793_v27 = vand.u32 4294901760, %v33680_v30  ;;  %v36792_v16 = vand.u32 4294901760, %v33682_v48  ;;  %v12162_v4 = vand.u32 4294901760, %v12161_v44 }
 0x5d1   :  { %11377 = vmatmul.mubr.f32.vlgmr.msra.gmra.mrb[8].mxu0 %v33540_v45  ;;  %11920 = vmatmul.mubr.f32.vlgmr.msra.gmra.mrb[24].mxu1 %v33540_v45  ;;  %v28680_v20 = vpack.c.bf16 %v12693_v15, %v12681_v40 }
 0x5d2   :  { %28571 = vmatpush1.bf16.msra.mxu0 %v33389_v52  ;;  %28619 = vmatpush1.bf16.msra.mxu1 %v33407_v61  ;;  %v12143_v52 = vsub.f32 %v33619_v23, %v36788_v53  ;;  %v36790_v61 = vand.u32 4294901760, %v33659_v62  ;;  %v12699_v53 = vand.u32 4294901760, %v12698_v19 }
 0x5d3   :  { %28573 = vmatprep.subr.bf16.mxu0 %v33418_v49  ;;  %28621 = vmatprep.subr.bf16.mxu1 %v33422_v51  ;;  %v12155_v49 = vsub.f32 %v33625_v18, %v36787_v33  ;;  %v12686_v51 = vsub.f32 %v33631_v5, %v36786_v37 }
 0x5d4   :  { %11455 = vmatprep.mubr.f32.mxu0 %v36977_v6  ;;  %11998 = vmatprep.mubr.f32.mxu1 %v36977_v6  ;;  %v12144_v11 = vand.u32 4294901760, %v12143_v52  ;;  %v12179_v52 = vsub.f32 %v33678_v28, %v36794_v9 }
 0x5d5   :  { %v12156_v37 = vand.u32 4294901760, %v12155_v49  ;;  %v12687_v33 = vand.u32 4294901760, %v12686_v51  ;;  %v12710_v49 = vsub.f32 %v33680_v30, %v36793_v27  ;;  %v12722_v51 = vsub.f32 %v33682_v48, %v36792_v16 }
 0x5d6   :  { %28575 = vmatpush1.bf16.msra.mxu0 %v33436_v63  ;;  %28623 = vmatpush1.bf16.msra.mxu1 %v33443_v35  ;;  %v12704_v63 = vsub.f32 %v33659_v62, %v36790_v61  ;;  %v12716_v35 = vsub.f32 %v33663_v59, %v36796_v50  ;;  %v12167_v61 = vsub.f32 %v33667_v2, %v36795_v56  ;;  %v37123_v56 = vld [vmem:[#allocation11_spill] sm:$0xff] }
 0x5d7   :  { %v10320_v58 = vpop.f32.mrb[20].mxu0  ;;  %v10863_v25 = vpop.f32.mrb[36].mxu1  ;;  %28625 = vmatprep.subr.bf16.mxu0 %v33609_v41  ;;  %28673 = vmatprep.subr.bf16.mxu1 %v33611_v26  ;;  %v12711_v27 = vand.u32 4294901760, %v12710_v49  ;;  %v12723_v9 = vand.u32 4294901760, %v12722_v51  ;;  %v13141_v49 = vld [vmem:[#allocation8 + $0x28] sm:$0xff]  ;;  %v13139_v51 = vld [vmem:[#allocation8 + $0x18] sm:$0xff] }
 0x5d8   :  { %v29978_v40 = vadd.f32 %v10320_v58, %v32215_v12  ;;  %v10322_v15 = vpop.f32.mrb[21].mxu0  ;;  %v10865_v21 = vpop.f32.mrb[37].mxu1  ;;  %v12705_v19 = vand.u32 4294901760, %v12704_v63  ;;  %v12717_v44 = vand.u32 4294901760, %v12716_v35  ;;  %v12168_v16 = vand.u32 4294901760, %v12167_v61 }
 0x5d9   :  { %v29979_v8 = vadd.f32 %v10322_v15, %v37075_v22  ;;  %11457 = vmatmul.mubr.f32.vlgmr.msra.gmra.mrb[8].mxu0 %v33540_v45  ;;  %12000 = vmatmul.mubr.f32.vlgmr.msra.gmra.mrb[24].mxu1 %v33540_v45  ;;  %v28682_v15 = vpack.c.bf16 %v12699_v53, %v12687_v33  ;;  %v29980_v50 = vadd.f32 %v10863_v25, %v37123_v56 }
 0x5da   :  { %v27489_v58 = vmul.f32 -1.442695, %v29978_v40  ;;  %28627 = vmatpush1.bf16.msra.mxu0 %v33613_v10  ;;  %28675 = vmatpush1.bf16.msra.mxu1 %v33629_v43  ;;  %v28634_v40 = vpack.c.bf16 %v12156_v37, %v12144_v11  ;;  %v28684_v63 = vpack.c.bf16 %v12717_v44, %v12705_v19  ;;  %v28686_v37 = vpack.c.bf16 %v12723_v9, %v12711_v27  ;;  %v13136_v44 = vld [vmem:[#allocation8] sm:$0xff] }
 0x5db   :  { %v27490_v54 = vmul.f32 -1.442695, %v29979_v8  ;;  %28629 = vmatprep.subr.bf16.mxu0 %v33645_v32  ;;  %28677 = vmatprep.subr.bf16.mxu1 %v33657_v60  ;;  %v12174_v8 = vand.u32 4294901760, %v12173_v3  ;;  %v27491_v11 = vmul.f32 -1.442695, %v29980_v50  ;;  %v28640_v61 = vpack.c.bf16 %v33599_v39, %v33597_v55 }
 0x5dc   :  { %30792 = vpow2.f32 %v27489_v58  ;;  %12122 = vmatprep.mubr.f32.mxu0 %v36977_v6  ;;  %12665 = vmatprep.mubr.f32.mxu1 %v36977_v6  ;;  %v12180_v58 = vand.u32 4294901760, %v12179_v52  ;;  %v28690_v50 = vpack.c.bf16 %v33633_v31, %v33631_v5  ;;  %v28644_v25 = vpack.c.bf16 %v33647_v24, %v33637_v46  ;;  %v13137_v52 = vld [vmem:[#allocation8 + $0x8] sm:$0xff] }
 0x5dd   :  { %30794 = vpow2.f32 %v27490_v54  ;;  %v28636_v3 = vpack.c.bf16 %v12174_v8, %v12162_v4  ;;  %v37124_v54 = vld [vmem:[#allocation48_spill] sm:$0xff]  ;;  %v28688_v4 = vpack.c.bf16 %v33603_v17, %v33601_v13  ;;  %v28692_v9 = vpack.c.bf16 %v33663_v59, %v33659_v62  ;;  %v13143_v8 = vld [vmem:[#allocation8 + $0x38] sm:$0xff] }
 0x5de   :  { %28631 = vmatpush1.bf16.msra.mxu0 %v33665_v7  ;;  %28679 = vmatpush1.bf16.msra.mxu1 %v33687_v42  ;;  %v29981_v53 = vadd.f32 %v10865_v21, %v37124_v54  ;;  %v28638_v33 = vpack.c.bf16 %v12180_v58, %v12168_v16  ;;  %v28642_v21 = vpack.c.bf16 %v33625_v18, %v33619_v23  ;;  %v37129_v39 = vand.u32 4294901760, %v33631_v5 }
 0x5df   :  { %28633 = vmatprep.subr.bf16.mxu0 %v28632_v47  ;;  %28681 = vmatprep.subr.bf16.mxu1 %v28680_v20  ;;  %v28646_v16 = vpack.c.bf16 %v33678_v28, %v33667_v2  ;;  %v28694_v35 = vpack.c.bf16 %v33682_v48, %v33680_v30  ;;  %v28656_v58 = vpack.c.bf16 %v12148_v1, %v12136_v14  ;;  %v37130_v14 = vand.u32 4294901760, %v33633_v31 }
 0x5e0   :  { %30796 = vtanh.f32 %v29981_v53  ;;  %v13698_v1 = vand.u32 4294901760, %v13139_v51  ;;  %v37133_v31 = vand.u32 4294901760, %v33659_v62 }
 0x5e1   :  { %12128 = vmatmul.mubr.f32.vlgmr.msra.gmra.mrb[22].mxu0 %v33550_v36  ;;  %12671 = vmatmul.mubr.f32.vlgmr.msra.gmra.mrb[38].mxu1 %v33550_v36  ;;  %30798 = vpow2.f32 %v27491_v11 }
 0x5e2   :  { %28635 = vmatpush1.bf16.msra.mxu0 %v28634_v40  ;;  %28683 = vmatpush1.bf16.msra.mxu1 %v28682_v15  ;;  %v13140_v40 = vld [vmem:[#allocation8 + $0x20] sm:$0xff] }
 0x5e3   :  { %28637 = vmatprep.subr.bf16.mxu0 %v28636_v3  ;;  %28685 = vmatprep.subr.bf16.mxu1 %v28684_v63  ;;  %v37125_v3 = vand.u32 4294901760, %v33601_v13  ;;  %v37126_v63 = vand.u32 4294901760, %v33603_v17  ;;  %v28706_v13 = vpack.c.bf16 %v37130_v14, %v37129_v39  ;;  %v13702_v17 = vand.u32 4294901760, %v13143_v8  ;;  %v13147_v39 = vld [vmem:[#allocation8 + $0x58] sm:$0xff] }
 0x5e4   :  { %12238 = vmatprep.mubr.f32.mxu0 %v36977_v6  ;;  %12781 = vmatprep.mubr.f32.mxu1 %v36977_v6  ;;  %v13151_v14 = vld [vmem:[#allocation8 + $0x78] sm:$0xff] }
 0x5e5   :  { %v28704_v53 = vpack.c.bf16 %v37126_v63, %v37125_v3 }
 0x5e6   :  { %v30793_v36 = vpop.eup %30792  ;;  %28639 = vmatpush1.bf16.msra.mxu0 %v28638_v33  ;;  %28687 = vmatpush1.bf16.msra.mxu1 %v28686_v37  ;;  %v13155_v33 = vand.u32 4294901760, %v13137_v52  ;;  %v13159_v37 = vand.u32 4294901760, %v13141_v49 }
 0x5e7   :  { %v10881_v47 = vadd.f32 1.0, %v30793_v36  ;;  %v30795_v20 = vpop.eup %30794  ;;  %28641 = vmatprep.subr.bf16.mxu0 %v28640_v61  ;;  %28689 = vmatprep.subr.bf16.mxu1 %v28688_v4  ;;  %v37127_v61 = vand.u32 4294901760, %v33619_v23  ;;  %v37131_v36 = vand.u32 4294901760, %v33637_v46  ;;  %v37135_v46 = vand.u32 4294901760, %v33667_v2 }
 0x5e8   :  { %v10882_v27 = vadd.f32 1.0, %v30795_v20  ;;  %v13142_v20 = vld [vmem:[#allocation8 + $0x30] sm:$0xff]  ;;  %v33822_v62 = vsub.f32 %v13141_v49, %v13159_v37  ;;  %v33826_v2 = vpack.c.bf16 %v13702_v17, %v13698_v1 }
 0x5e9   :  { %30800 = vrcp.f32 %v10881_v47  ;;  %12240 = vmatmul.mubr.f32.vlgmr.msra.gmra.mrb[22].mxu0 %v33540_v45  ;;  %12783 = vmatmul.mubr.f32.vlgmr.msra.gmra.mrb[38].mxu1 %v33540_v45  ;;  %v37132_v47 = vand.u32 4294901760, %v33647_v24  ;;  %v37136_v24 = vand.u32 4294901760, %v33678_v28  ;;  %v33828_v28 = vsub.f32 %v13139_v51, %v13698_v1  ;;  %v13148_v51 = vld [vmem:[#allocation8 + $0x60] sm:$0xff] }
 0x5ea   :  { %30802 = vrcp.f32 %v10882_v27  ;;  %28643 = vmatpush1.bf16.msra.mxu0 %v28642_v21  ;;  %28691 = vmatpush1.bf16.msra.mxu1 %v28690_v50  ;;  %v30797_v19 = vpop.eup %30796  ;;  %v13157_v21 = vand.u32 4294901760, %v13136_v44  ;;  %v13138_v50 = vld [vmem:[#allocation8 + $0x10] sm:$0xff] }
 0x5eb   :  { %28645 = vmatprep.subr.bf16.mxu0 %v28644_v25  ;;  %28693 = vmatprep.subr.bf16.mxu1 %v28692_v9  ;;  %v30799_v15 = vpop.eup %30798  ;;  %v28660_v23 = vpack.c.bf16 %v37132_v47, %v37131_v36  ;;  %v37134_v9 = vand.u32 4294901760, %v33663_v59  ;;  %v13145_v59 = vld [vmem:[#allocation8 + $0x48] sm:$0xff] }
 0x5ec   :  { %12326 = vmatprep.mubr.f32.mxu0 %v36977_v6  ;;  %12869 = vmatprep.mubr.f32.mxu1 %v36977_v6  ;;  %v10883_v25 = vadd.f32 1.0, %v30799_v15  ;;  %v37139_v15 = vld [vmem:[#allocation33_spill] sm:$0xff] }
 0x5ed   :  { %v28708_v27 = vpack.c.bf16 %v37134_v9, %v37133_v31 }
 0x5ee   :  { %28647 = vmatpush1.bf16.msra.mxu0 %v28646_v16  ;;  %28695 = vmatpush1.bf16.msra.mxu1 %v28694_v35  ;;  %v28662_v16 = vpack.c.bf16 %v37136_v24, %v37135_v46  ;;  %v37137_v35 = vand.u32 4294901760, %v33680_v30  ;;  %v13700_v30 = vand.u32 4294901760, %v13138_v50  ;;  %30804 = vrcp.f32 %v10883_v25 }
 0x5ef   :  { %28649 = vmatprep.subr.bf16.mxu0 %v33609_v41  ;;  %28697 = vmatprep.subr.bf16.mxu1 %v33611_v26  ;;  %v13253_v25 = vand.u32 4294901760, %v33822_v62 }
 0x5f1   :  { %12329 = vmatmul.mubr.f32.vlgmr.msra.gmra.mrb[22].mxu0 %v33543_v38  ;;  %12872 = vmatmul.mubr.f32.vlgmr.msra.gmra.mrb[38].mxu1 %v33543_v38  ;;  %v37128_v38 = vand.u32 4294901760, %v33625_v18  ;;  %v13161_v18 = vand.u32 4294901760, %v13140_v40 }
 0x5f2   :  { %28651 = vmatpush1.bf16.msra.mxu0 %v33613_v10  ;;  %28699 = vmatpush1.bf16.msra.mxu1 %v33629_v43 }
 0x5f3   :  { %v30801_v11 = vpop.eup %30800  ;;  %v28658_v55 = vpack.c.bf16 %v37128_v38, %v37127_v61  ;;  %28653 = vmatprep.subr.bf16.mxu0 %v33645_v32  ;;  %28701 = vmatprep.subr.bf16.mxu1 %v33657_v60  ;;  %v33820_v61 = vsub.f32 %v13137_v52, %v13155_v33  ;;  %v13149_v38 = vld [vmem:[#allocation8 + $0x68] sm:$0xff]  ;;  %v33832_v52 = vsub.f32 %v13143_v8, %v13702_v17  ;;  %v13710_v8 = vand.u32 4294901760, %v13151_v14  ;;  %v13146_v17 = vld [vmem:[#allocation8 + $0x50] sm:$0xff] }
 0x5f4   :  { %v10892_v4 = vmul.f32 %v30801_v11, %v30797_v19  ;;  %v30803_v5 = vpop.eup %30802  ;;  %12407 = vmatprep.mubr.f32.mxu0 %v36977_v6  ;;  %12950 = vmatprep.mubr.f32.mxu1 %v36977_v6  ;;  %v37138_v19 = vand.u32 4294901760, %v33682_v48  ;;  %v33818_v11 = vpack.c.bf16 %v13159_v37, %v13155_v33  ;;  %v13704_v48 = vand.u32 4294901760, %v13142_v20 }
 0x5f5   :  { %v10891_v63 = vmul.f32 %v30803_v5, %v37139_v15  ;;  %v33834_v49 = vpack.c.bf16 %v13161_v18, %v13157_v21  ;;  %v33836_v33 = vsub.f32 %v13136_v44, %v13157_v21  ;;  %v13163_v37 = vand.u32 4294901760, %v13145_v59  ;;  %v13144_v5 = vld [vmem:[#allocation8 + $0x40] sm:$0xff] }
 0x5f6   :  { %v28710_v3 = vpack.c.bf16 %v37138_v19, %v37137_v35  ;;  %28655 = vmatpush1.bf16.msra.mxu0 %v33665_v7  ;;  %28703 = vmatpush1.bf16.msra.mxu1 %v33687_v42  ;;  %v13167_v47 = vand.u32 4294901760, %v13149_v38  ;;  %v33841_v1 = vsub.f32 %v13140_v40, %v13161_v18  ;;  %v33845_v44 = vsub.f32 %v13138_v50, %v13700_v30 }
 0x5f7   :  { %v33830_v36 = vadd.f32 %v10892_v4, %v10891_v63  ;;  %28657 = vmatprep.subr.bf16.mxu0 %v28656_v58  ;;  %28705 = vmatprep.subr.bf16.mxu1 %v28704_v53  ;;  %v13706_v58 = vand.u32 4294901760, %v13147_v39  ;;  %v33843_v53 = vpack.c.bf16 %v13704_v48, %v13700_v30  ;;  %v13150_v4 = vld [vmem:[#allocation8 + $0x70] sm:$0xff]  ;;  %v13241_v21 = vand.u32 4294901760, %v33820_v61 }
 0x5f8   :  { %v33849_v31 = vsub.f32 %v13142_v20, %v13704_v48  ;;  %v13169_v40 = vand.u32 4294901760, %v13148_v51  ;;  %v13784_v18 = vand.u32 4294901760, %v33828_v28  ;;  %v33858_v50 = vsub.f32 %v13149_v38, %v13167_v47 }
 0x5f9   :  { %37140 = vst [vmem:[#allocation32_spill] sm:$0xff] %v33830_v36  ;;  %30806 = vtanh.f32 %v33830_v36  ;;  %12411 = vmatmul.mubr.f32.vlgmr.msra.gmra.mrb[22].mxu0 %v33546_v57  ;;  %12954 = vmatmul.mubr.f32.vlgmr.msra.gmra.mrb[38].mxu1 %v33546_v57  ;;  %v13165_v57 = vand.u32 4294901760, %v13144_v5  ;;  %v36803_v9 = vand.u32 4294901760, %v33832_v52  ;;  %v33863_v20 = vsub.f32 %v13147_v39, %v13706_v58 }
 0x5fa   :  { %28659 = vmatpush1.bf16.msra.mxu0 %v28658_v55  ;;  %28707 = vmatpush1.bf16.msra.mxu1 %v28706_v13  ;;  %v33854_v55 = vpack.c.bf16 %v13167_v47, %v13163_v37  ;;  %v33856_v13 = vsub.f32 %v13145_v59, %v13163_v37  ;;  %v13712_v46 = vand.u32 4294901760, %v13150_v4  ;;  %v33865_v24 = vsub.f32 %v13151_v14, %v13710_v8  ;;  %v30805_v14 = vpop.eup %30804 }
 0x5fb   :  { %28661 = vmatprep.subr.bf16.mxu0 %v28660_v23  ;;  %28709 = vmatprep.subr.bf16.mxu1 %v28708_v27  ;;  %v33861_v23 = vpack.c.bf16 %v13710_v8, %v13706_v58  ;;  %v13708_v27 = vand.u32 4294901760, %v13146_v17  ;;  %v13242_v35 = vsub.f32 %v33820_v61, %v13241_v21  ;;  %v13254_v19 = vsub.f32 %v33822_v62, %v13253_v25 }
 0x5fc   :  { %12505 = vmatprep.mubr.f32.mxu0 %v36977_v6  ;;  %13048 = vmatprep.mubr.f32.mxu1 %v36977_v6  ;;  %v33875_v15 = vpack.c.bf16 %v13169_v40, %v13165_v57  ;;  %v33877_v63 = vsub.f32 %v13144_v5, %v13165_v57  ;;  %v13797_v59 = vsub.f32 %v33832_v52, %v36803_v9  ;;  %v36801_v38 = vand.u32 4294901760, %v33836_v33 }
 0x5fd   :  { %v36799_v30 = vand.u32 4294901760, %v33845_v44  ;;  %v36798_v48 = vand.u32 4294901760, %v33849_v31  ;;  %v36797_v39 = vand.u32 4294901760, %v33856_v13  ;;  %v33898_v37 = vsub.f32 %v13146_v17, %v13708_v27 }
 0x5fe   :  { %28663 = vmatpush1.bf16.msra.mxu0 %v28662_v16  ;;  %28711 = vmatpush1.bf16.msra.mxu1 %v28710_v3  ;;  %v13785_v16 = vsub.f32 %v33828_v28, %v13784_v18  ;;  %v33882_v3 = vsub.f32 %v13148_v51, %v13169_v40  ;;  %v33900_v47 = vsub.f32 %v13150_v4, %v13712_v46  ;;  %v13243_v5 = vand.u32 4294901760, %v13242_v35 }
 0x5ff   :  { %28665 = vmatprep.subr.bf16.mxu0 %v33609_v41  ;;  %28713 = vmatprep.subr.bf16.mxu1 %v33611_v26  ;;  %v36800_v41 = vand.u32 4294901760, %v33841_v1  ;;  %v33891_v26 = vpack.c.bf16 %v13712_v46, %v13708_v27  ;;  %v13255_v51 = vand.u32 4294901760, %v13254_v19  ;;  %v36802_v57 = vand.u32 4294901760, %v33858_v50 }
 0x600   :  { %v13786_v8 = vand.u32 4294901760, %v13785_v16  ;;  %v36804_v40 = vand.u32 4294901760, %v33863_v20  ;;  %v13798_v17 = vand.u32 4294901760, %v13797_v59  ;;  %v13248_v4 = vsub.f32 %v33836_v33, %v36801_v38 }
 0x601   :  { %12507 = vmatmul.mubr.f32.vlgmr.msra.gmra.mrb[22].mxu0 %v33540_v45  ;;  %13050 = vmatmul.mubr.f32.vlgmr.msra.gmra.mrb[38].mxu1 %v33540_v45  ;;  %v13803_v27 = vsub.f32 %v33849_v31, %v36798_v48  ;;  %v13266_v46 = vsub.f32 %v33856_v13, %v36797_v39  ;;  %v36808_v35 = vand.u32 4294901760, %v33877_v63  ;;  %v36807_v16 = vand.u32 4294901760, %v33882_v3 }
 0x602   :  { %28667 = vmatpush1.bf16.msra.mxu0 %v33613_v10  ;;  %28715 = vmatpush1.bf16.msra.mxu1 %v33629_v43  ;;  %v13820_v10 = vand.u32 4294901760, %v33865_v24  ;;  %v36806_v59 = vand.u32 4294901760, %v33898_v37  ;;  %v28728_v39 = vpack.c.bf16 %v13255_v51, %v13243_v5  ;;  %v28776_v48 = vpack.c.bf16 %v13798_v17, %v13786_v8 }
 0x603   :  { %v30807_v58 = vpop.eup %30806  ;;  %28669 = vmatprep.subr.bf16.mxu0 %v33645_v32  ;;  %28717 = vmatprep.subr.bf16.mxu1 %v33657_v60  ;;  %v13260_v32 = vsub.f32 %v33841_v1, %v36800_v41  ;;  %v13791_v60 = vsub.f32 %v33845_v44, %v36799_v30  ;;  %v13249_v30 = vand.u32 4294901760, %v13248_v4  ;;  %v13804_v9 = vand.u32 4294901760, %v13803_v27 }
 0x604   :  { %12585 = vmatprep.mubr.f32.mxu0 %v36977_v6  ;;  %13128 = vmatprep.mubr.f32.mxu1 %v36977_v6  ;;  %v10895_v43 = vmul.f32 %v30807_v58, %v30805_v14  ;;  %v36805_v14 = vand.u32 4294901760, %v33900_v47  ;;  %v13267_v5 = vand.u32 4294901760, %v13266_v46  ;;  %v13284_v51 = vsub.f32 %v33882_v3, %v36807_v16 }
 0x605   :  { %v13261_v41 = vand.u32 4294901760, %v13260_v32 }
 0x606   :  { %28671 = vmatpush1.bf16.msra.mxu0 %v33665_v7  ;;  %28719 = vmatpush1.bf16.msra.mxu1 %v33687_v42  ;;  %v13153_v19 = vsel %vm1906_vm1, %v10895_v43, 0  ;;  %v13278_v7 = vsub.f32 %v33858_v50, %v36802_v57  ;;  %v13809_v42 = vsub.f32 %v33863_v20, %v36804_v40  ;;  %v13821_v43 = vsub.f32 %v33865_v24, %v13820_v10 }
 0x607   :  { %28721 = vmatprep.subr.bf16.mxu0 %v33818_v11  ;;  %28769 = vmatprep.subr.bf16.mxu1 %v33826_v2  ;;  %v33933_v58 = vand.u32 4294901760, %v13153_v19  ;;  %v13792_v57 = vand.u32 4294901760, %v13791_v60  ;;  %v13272_v40 = vsub.f32 %v33877_v63, %v36808_v35  ;;  %v13827_v8 = vsub.f32 %v33900_v47, %v36805_v14 }
 0x608   :  { %v13279_v4 = vand.u32 4294901760, %v13278_v7  ;;  %v13810_v32 = vand.u32 4294901760, %v13809_v42  ;;  %v13822_v60 = vand.u32 4294901760, %v13821_v43  ;;  %v28730_v46 = vpack.c.bf16 %v13261_v41, %v13249_v30 }
 0x609   :  { %37141 = vst [vmem:[#allocation34_spill] sm:$0xff] %v33933_v58  ;;  %12587 = vmatmul.mubr.f32.vlgmr.msra.gmra.mrb[22].mxu0 %v33540_v45  ;;  %13130 = vmatmul.mubr.f32.vlgmr.msra.gmra.mrb[38].mxu1 %v33540_v45  ;;  %v33947_v38 = vsub.f32 %v13153_v19, %v33933_v58  ;;  %v13815_v45 = vsub.f32 %v33898_v37, %v36806_v59  ;;  %v13273_v14 = vand.u32 4294901760, %v13272_v40  ;;  %v13285_v59 = vand.u32 4294901760, %v13284_v51 }
 0x60a   :  { %28723 = vmatpush1.bf16.msra.mxu0 %v33834_v49  ;;  %28771 = vmatpush1.bf16.msra.mxu1 %v33843_v53  ;;  %v28778_v19 = vpack.c.bf16 %v13804_v9, %v13792_v57  ;;  %v13828_v35 = vand.u32 4294901760, %v13827_v8  ;;  %v28732_v42 = vpack.c.bf16 %v13279_v4, %v13267_v5  ;;  %v28780_v43 = vpack.c.bf16 %v13822_v60, %v13810_v32 }
 0x60b   :  { %37142 = vst [vmem:[#allocation35_spill] sm:$0xff] %v33947_v38  ;;  %28725 = vmatprep.subr.bf16.mxu0 %v33854_v55  ;;  %28773 = vmatprep.subr.bf16.mxu1 %v33861_v23  ;;  %v33966_v17 = vand.u32 4294901760, %v33947_v38  ;;  %v13816_v16 = vand.u32 4294901760, %v13815_v45  ;;  %v28734_v9 = vpack.c.bf16 %v13285_v59, %v13273_v14  ;;  %v28736_v30 = vpack.c.bf16 %v33822_v62, %v33820_v61 }
 0x60c   :  { %13227 = vmatprep.mubr.f32.mxu0 %v36977_v6  ;;  %13770 = vmatprep.mubr.f32.mxu1 %v36977_v6  ;;  %v28784_v57 = vpack.c.bf16 %v33832_v52, %v33828_v28  ;;  %v28740_v40 = vpack.c.bf16 %v33858_v50, %v33856_v13  ;;  %v28790_v59 = vpack.c.bf16 %v33900_v47, %v33898_v37  ;;  %v37145_v5 = vand.u32 4294901760, %v33832_v52 }
 0x60d   :  { %37143 = vst [vmem:[#allocation36_spill] sm:$0xff] %v33966_v17  ;;  %v13231_v27 = vsub.f32 %v33947_v38, %v33966_v17  ;;  %v28782_v41 = vpack.c.bf16 %v13828_v35, %v13816_v16  ;;  %v28788_v35 = vpack.c.bf16 %v33865_v24, %v33863_v20  ;;  %v28742_v16 = vpack.c.bf16 %v33882_v3, %v33877_v63  ;;  %v14274_v24 = vld [vmem:[%s36670_s2] sm:$0xff] }
 0x60e   :  { %28727 = vmatpush1.bf16.msra.mxu0 %v33875_v15  ;;  %28775 = vmatpush1.bf16.msra.mxu1 %v33891_v26  ;;  %v28752_v14 = vpack.c.bf16 %v13253_v25, %v13241_v21  ;;  %v28800_v51 = vpack.c.bf16 %v37145_v5, %v13784_v18  ;;  %v37146_v45 = vand.u32 4294901760, %v33836_v33  ;;  %v37147_v61 = vand.u32 4294901760, %v33841_v1 }
 0x60f   :  { %v33974_v7 = vand.u32 4294901760, %v13231_v27  ;;  %28729 = vmatprep.subr.bf16.mxu0 %v28728_v39  ;;  %28777 = vmatprep.subr.bf16.mxu1 %v28776_v48  ;;  %v28738_v48 = vpack.c.bf16 %v33841_v1, %v33836_v33  ;;  %v28786_v39 = vpack.c.bf16 %v33849_v31, %v33845_v44  ;;  %v37148_v62 = vand.u32 4294901760, %v33845_v44 }
 0x610   :  { %v28754_v8 = vpack.c.bf16 %v37147_v61, %v37146_v45  ;;  %v37149_v28 = vand.u32 4294901760, %v33849_v31  ;;  %v37150_v52 = vand.u32 4294901760, %v33856_v13  ;;  %v37151_v25 = vand.u32 4294901760, %v33858_v50  ;;  %v14286_v45 = vld [vmem:[%s36670_s2 + $0x60] sm:$0xff] }
 0x611   :  { %37144 = vst [vmem:[#allocation37_spill] sm:$0xff] %v33974_v7  ;;  %13233 = vmatmul.mubr.f32.vlgmr.msra.gmra.mrb[22].mxu0 %v33974_v7  ;;  %13776 = vmatmul.mubr.f32.vlgmr.msra.gmra.mrb[38].mxu1 %v33974_v7  ;;  %v37152_v4 = vand.u32 4294901760, %v33863_v20  ;;  %v37153_v1 = vand.u32 4294901760, %v33877_v63  ;;  %v37154_v44 = vand.u32 4294901760, %v33882_v3  ;;  %v37155_v13 = vand.u32 4294901760, %v33898_v37  ;;  %v14276_v37 = vld [vmem:[%s36670_s2 + $0x10] sm:$0xff] }
 0x612   :  { %28731 = vmatpush1.bf16.msra.mxu0 %v28730_v46  ;;  %28779 = vmatpush1.bf16.msra.mxu1 %v28778_v19  ;;  %v28802_v21 = vpack.c.bf16 %v37149_v28, %v37148_v62  ;;  %v28756_v18 = vpack.c.bf16 %v37151_v25, %v37150_v52  ;;  %v37156_v50 = vand.u32 4294901760, %v33900_v47  ;;  %v14295_v3 = vand.u32 4294901760, %v14274_v24  ;;  %v14280_v47 = vld [vmem:[%s36670_s2 + $0x30] sm:$0xff] }
 0x613   :  { %28733 = vmatprep.subr.bf16.mxu0 %v28732_v42  ;;  %28781 = vmatprep.subr.bf16.mxu1 %v28780_v43  ;;  %v28804_v33 = vpack.c.bf16 %v13820_v10, %v37152_v4  ;;  %v28758_v31 = vpack.c.bf16 %v37154_v44, %v37153_v1  ;;  %v14283_v10 = vld [vmem:[%s36670_s2 + $0x48] sm:$0xff]  ;;  %v14285_v43 = vld [vmem:[%s36670_s2 + $0x58] sm:$0xff]  ;;  %v14288_v25 = vld [vmem:[%s36670_s2 + $0x70] sm:$0xff] }
 0x614   :  { %13343 = vmatprep.mubr.f32.mxu0 %v36977_v6  ;;  %13886 = vmatprep.mubr.f32.mxu1 %v36977_v6  ;;  %v28806_v32 = vpack.c.bf16 %v37156_v50, %v37155_v13  ;;  %v14287_v42 = vld [vmem:[%s36670_s2 + $0x68] sm:$0xff]  ;;  %v14844_v5 = vand.u32 4294901760, %v14285_v43 }
 0x616   :  { %28735 = vmatpush1.bf16.msra.mxu0 %v28734_v9  ;;  %28783 = vmatpush1.bf16.msra.mxu1 %v28782_v41  ;;  %v14289_v9 = vld [vmem:[%s36670_s2 + $0x78] sm:$0xff]  ;;  %v34147_v1 = vsub.f32 %v14285_v43, %v14844_v5 }
 0x617   :  { %28737 = vmatprep.subr.bf16.mxu0 %v28736_v30  ;;  %28785 = vmatprep.subr.bf16.mxu1 %v28784_v57 }
 0x619   :  { %13345 = vmatmul.mubr.f32.vlgmr.msra.gmra.mrb[22].mxu0 %v33933_v58  ;;  %13888 = vmatmul.mubr.f32.vlgmr.msra.gmra.mrb[38].mxu1 %v33933_v58 }
 0x61a   :  { %28739 = vmatpush1.bf16.msra.mxu0 %v28738_v48  ;;  %28787 = vmatpush1.bf16.msra.mxu1 %v28786_v39  ;;  %v34114_v48 = vsub.f32 %v14274_v24, %v14295_v3  ;;  %v14282_v39 = vld [vmem:[%s36670_s2 + $0x40] sm:$0xff] }
 0x61b   :  { %28741 = vmatprep.subr.bf16.mxu0 %v28740_v40  ;;  %28789 = vmatprep.subr.bf16.mxu1 %v28788_v35  ;;  %v14838_v35 = vand.u32 4294901760, %v14276_v37  ;;  %v14303_v61 = vand.u32 4294901760, %v14282_v39 }
 0x61c   :  { %13431 = vmatprep.mubr.f32.mxu0 %v36977_v6  ;;  %13974 = vmatprep.mubr.f32.mxu1 %v36977_v6 }
 0x61d   :  { %v34132_v28 = vsub.f32 %v14276_v37, %v14838_v35  ;;  %v34152_v13 = vsub.f32 %v14282_v39, %v14303_v61 }
 0x61e   :  { %28743 = vmatpush1.bf16.msra.mxu0 %v28742_v16  ;;  %28791 = vmatpush1.bf16.msra.mxu1 %v28790_v59  ;;  %v14842_v16 = vand.u32 4294901760, %v14280_v47  ;;  %v14301_v59 = vand.u32 4294901760, %v14283_v10 }
 0x61f   :  { %28745 = vmatprep.subr.bf16.mxu0 %v33818_v11  ;;  %28793 = vmatprep.subr.bf16.mxu1 %v33826_v2 }
 0x620   :  { %v34130_v62 = vpack.c.bf16 %v14842_v16, %v14838_v35  ;;  %v34136_v52 = vsub.f32 %v14283_v10, %v14301_v59 }
 0x621   :  { %13434 = vmatmul.mubr.f32.vlgmr.msra.gmra.mrb[22].mxu0 %v33947_v38  ;;  %13977 = vmatmul.mubr.f32.vlgmr.msra.gmra.mrb[38].mxu1 %v33947_v38 }
 0x622   :  { %28747 = vmatpush1.bf16.msra.mxu0 %v33834_v49  ;;  %28795 = vmatpush1.bf16.msra.mxu1 %v33843_v53 }
 0x623   :  { %28749 = vmatprep.subr.bf16.mxu0 %v33854_v55  ;;  %28797 = vmatprep.subr.bf16.mxu1 %v33861_v23 }
 0x624   :  { %13512 = vmatprep.mubr.f32.mxu0 %v36977_v6  ;;  %14055 = vmatprep.mubr.f32.mxu1 %v36977_v6 }
 0x626   :  { %28751 = vmatpush1.bf16.msra.mxu0 %v33875_v15  ;;  %28799 = vmatpush1.bf16.msra.mxu1 %v33891_v26 }
 0x627   :  { %28753 = vmatprep.subr.bf16.mxu0 %v28752_v14  ;;  %28801 = vmatprep.subr.bf16.mxu1 %v28800_v51  ;;  %v14305_v14 = vand.u32 4294901760, %v14287_v42  ;;  %v14848_v51 = vand.u32 4294901760, %v14289_v9 }
 0x629   :  { %13516 = vmatmul.mubr.f32.vlgmr.msra.gmra.mrb[22].mxu0 %v33966_v17  ;;  %14059 = vmatmul.mubr.f32.vlgmr.msra.gmra.mrb[38].mxu1 %v33966_v17  ;;  %v34143_v4 = vsub.f32 %v14287_v42, %v14305_v14  ;;  %v34150_v44 = vsub.f32 %v14289_v9, %v14848_v51  ;;  %v14928_v9 = vand.u32 4294901760, %v34132_v28 }
 0x62a   :  { %28755 = vmatpush1.bf16.msra.mxu0 %v28754_v8  ;;  %28803 = vmatpush1.bf16.msra.mxu1 %v28802_v21  ;;  %v14284_v8 = vld [vmem:[%s36670_s2 + $0x50] sm:$0xff]  ;;  %v34134_v21 = vsub.f32 %v14280_v47, %v14842_v16  ;;  %v14385_v47 = vand.u32 4294901760, %v34114_v48 }
 0x62b   :  { %28757 = vmatprep.subr.bf16.mxu0 %v28756_v18  ;;  %28805 = vmatprep.subr.bf16.mxu1 %v28804_v33  ;;  %v34141_v18 = vpack.c.bf16 %v14305_v14, %v14301_v59  ;;  %v34145_v33 = vpack.c.bf16 %v14848_v51, %v14844_v5  ;;  %v14846_v50 = vand.u32 4294901760, %v14284_v8  ;;  %v14929_v51 = vsub.f32 %v34132_v28, %v14928_v9 }
 0x62c   :  { %13610 = vmatprep.mubr.f32.mxu0 %v36977_v6  ;;  %14153 = vmatprep.mubr.f32.mxu1 %v36977_v6  ;;  %v14940_v39 = vand.u32 4294901760, %v34134_v21  ;;  %v14386_v59 = vsub.f32 %v34114_v48, %v14385_v47 }
 0x62e   :  { %28759 = vmatpush1.bf16.msra.mxu0 %v28758_v31  ;;  %28807 = vmatpush1.bf16.msra.mxu1 %v28806_v32  ;;  %v14307_v31 = vand.u32 4294901760, %v14286_v45  ;;  %v14850_v32 = vand.u32 4294901760, %v14288_v25 }
 0x62f   :  { %28761 = vmatprep.subr.bf16.mxu0 %v33818_v11  ;;  %28809 = vmatprep.subr.bf16.mxu1 %v33826_v2  ;;  %v14275_v11 = vld [vmem:[%s36670_s2 + $0x8] sm:$0xff] }
 0x630   :  { %v14279_v2 = vld [vmem:[%s36670_s2 + $0x28] sm:$0xff]  ;;  %v34166_v24 = vpack.c.bf16 %v14850_v32, %v14846_v50 }
 0x631   :  { %13612 = vmatmul.mubr.f32.vlgmr.msra.gmra.mrb[22].mxu0 %v33933_v58  ;;  %14155 = vmatmul.mubr.f32.vlgmr.msra.gmra.mrb[38].mxu1 %v33933_v58 }
 0x632   :  { %28763 = vmatpush1.bf16.msra.mxu0 %v33834_v49  ;;  %28811 = vmatpush1.bf16.msra.mxu1 %v33843_v53  ;;  %v14277_v49 = vld [vmem:[%s36670_s2 + $0x18] sm:$0xff]  ;;  %v14293_v53 = vand.u32 4294901760, %v14275_v11 }
 0x633   :  { %28765 = vmatprep.subr.bf16.mxu0 %v33854_v55  ;;  %28813 = vmatprep.subr.bf16.mxu1 %v33861_v23  ;;  %v14297_v55 = vand.u32 4294901760, %v14279_v2  ;;  %v14281_v23 = vld [vmem:[%s36670_s2 + $0x38] sm:$0xff]  ;;  %v14836_v20 = vand.u32 4294901760, %v14277_v49 }
 0x634   :  { %13690 = vmatprep.mubr.f32.mxu0 %v36977_v6  ;;  %14233 = vmatprep.mubr.f32.mxu1 %v36977_v6  ;;  %v14840_v63 = vand.u32 4294901760, %v14281_v23  ;;  %v34093_v27 = vsub.f32 %v14275_v11, %v14293_v53 }
 0x635   :  { %v34091_v60 = vpack.c.bf16 %v14297_v55, %v14293_v53  ;;  %v34095_v46 = vsub.f32 %v14279_v2, %v14297_v55  ;;  %v34097_v19 = vsub.f32 %v14277_v49, %v14836_v20  ;;  %v34159_v53 = vpack.c.bf16 %v14307_v31, %v14303_v61 }
 0x636   :  { %28767 = vmatpush1.bf16.msra.mxu0 %v33875_v15  ;;  %28815 = vmatpush1.bf16.msra.mxu1 %v33891_v26  ;;  %v14278_v15 = vld [vmem:[%s36670_s2 + $0x20] sm:$0xff]  ;;  %v34108_v41 = vpack.c.bf16 %v14840_v63, %v14836_v20  ;;  %v34110_v30 = vsub.f32 %v14281_v23, %v14840_v63  ;;  %v36812_v11 = vand.u32 4294901760, %v34093_v27  ;;  %v34161_v55 = vsub.f32 %v14286_v45, %v14307_v31 }
 0x637   :  { %v14299_v26 = vand.u32 4294901760, %v14278_v15  ;;  %28817 = vmatprep.subr.bf16.mxu0 %v34091_v60  ;;  %v36811_v2 = vand.u32 4294901760, %v34095_v46  ;;  %v36810_v49 = vand.u32 4294901760, %v34097_v19  ;;  %v34163_v23 = vsub.f32 %v14284_v8, %v14846_v50 }
 0x638   :  { %28865 = vmatprep.subr.bf16.mxu1 %v34108_v41  ;;  %v36809_v20 = vand.u32 4294901760, %v34110_v30  ;;  %v14380_v63 = vsub.f32 %v34093_v27, %v36812_v11  ;;  %v14941_v45 = vsub.f32 %v34134_v21, %v14940_v39  ;;  %v14403_v61 = vand.u32 4294901760, %v34136_v52 }
 0x639   :  { %13692 = vmatmul.mubr.f32.vlgmr.msra.gmra.mrb[22].mxu0 %v33933_v58  ;;  %14235 = vmatmul.mubr.f32.vlgmr.msra.gmra.mrb[38].mxu1 %v33933_v58  ;;  %v34112_v57 = vpack.c.bf16 %v14299_v26, %v14295_v3  ;;  %v34120_v40 = vsub.f32 %v14278_v15, %v14299_v26  ;;  %v34168_v15 = vsub.f32 %v14288_v25, %v14850_v32  ;;  %v14387_v25 = vand.u32 4294901760, %v14386_v59 }
 0x63a   :  { %14365 = vmatprep.mubr.f32.mxu0 %v36977_v6  ;;  %14908 = vmatprep.mubr.f32.mxu1 %v36977_v6  ;;  %v14392_v3 = vsub.f32 %v34095_v46, %v36811_v2  ;;  %v14923_v26 = vsub.f32 %v34097_v19, %v36810_v49  ;;  %v14935_v37 = vsub.f32 %v34110_v30, %v36809_v20  ;;  %v14381_v42 = vand.u32 4294901760, %v14380_v63 }
 0x63b   :  { %28819 = vmatpush1.bf16.msra.mxu0 %v34112_v57  ;;  %28867 = vmatpush1.bf16.msra.mxu1 %v34130_v62  ;;  %v14397_v10 = vand.u32 4294901760, %v34120_v40  ;;  %v14415_v50 = vand.u32 4294901760, %v34143_v4  ;;  %v14930_v32 = vand.u32 4294901760, %v14929_v51  ;;  %v14942_v63 = vand.u32 4294901760, %v14941_v45 }
 0x63c   :  { %28821 = vmatprep.subr.bf16.mxu0 %v34141_v18  ;;  %28869 = vmatprep.subr.bf16.mxu1 %v34145_v33  ;;  %v14393_v43 = vand.u32 4294901760, %v14392_v3  ;;  %v14924_v35 = vand.u32 4294901760, %v14923_v26  ;;  %v14936_v16 = vand.u32 4294901760, %v14935_v37  ;;  %v14404_v3 = vsub.f32 %v34136_v52, %v14403_v61 }
 0x63d   :  { %v14398_v14 = vsub.f32 %v34120_v40, %v14397_v10  ;;  %v14946_v26 = vand.u32 4294901760, %v34147_v1  ;;  %v14964_v49 = vand.u32 4294901760, %v34168_v15 }
 0x63e   :  { %v28824_v5 = vpack.c.bf16 %v14393_v43, %v14381_v42  ;;  %v28872_v8 = vpack.c.bf16 %v14936_v16, %v14924_v35  ;;  %v14416_v42 = vsub.f32 %v34143_v4, %v14415_v50  ;;  %v14958_v43 = vand.u32 4294901760, %v34150_v44 }
 0x63f   :  { %28823 = vmatpush1.bf16.msra.mxu0 %v34159_v53  ;;  %28871 = vmatpush1.bf16.msra.mxu1 %v34166_v24  ;;  %v14399_v31 = vand.u32 4294901760, %v14398_v14  ;;  %v14409_v35 = vand.u32 4294901760, %v34152_v13  ;;  %v34201_v16 = vpack.c.bf16 %v14942_v63, %v14930_v32  ;;  %v14405_v59 = vand.u32 4294901760, %v14404_v3  ;;  %v37161_v32 = vld [vmem:[#allocation17_spill] sm:$0xff] }
 0x640   :  { %28825 = vmatprep.subr.bf16.mxu0 %v28824_v5  ;;  %28873 = vmatprep.subr.bf16.mxu1 %v28872_v8  ;;  %v14947_v14 = vsub.f32 %v34147_v1, %v14946_v26  ;;  %v14421_v5 = vand.u32 4294901760, %v34161_v55  ;;  %v14417_v51 = vand.u32 4294901760, %v14416_v42  ;;  %v14959_v45 = vsub.f32 %v34150_v44, %v14958_v43 }
 0x641   :  { %v34196_v37 = vpack.c.bf16 %v14399_v31, %v14387_v25  ;;  %v14410_v8 = vsub.f32 %v34152_v13, %v14409_v35  ;;  %v14952_v25 = vand.u32 4294901760, %v34163_v23  ;;  %v14965_v17 = vsub.f32 %v34168_v15, %v14964_v49 }
 0x642   :  { %v14948_v31 = vand.u32 4294901760, %v14947_v14  ;;  %v14422_v20 = vsub.f32 %v34161_v55, %v14421_v5  ;;  %v34212_v63 = vpack.c.bf16 %v14417_v51, %v14405_v59  ;;  %v14960_v3 = vand.u32 4294901760, %v14959_v45 }
 0x643   :  { %v14411_v2 = vand.u32 4294901760, %v14410_v8  ;;  %v14953_v42 = vsub.f32 %v34163_v23, %v14952_v25  ;;  %v14966_v45 = vand.u32 4294901760, %v14965_v17  ;;  %v37159_v59 = vand.u32 4294901760, %v34097_v19 }
 0x644   :  { %v14423_v11 = vand.u32 4294901760, %v14422_v20  ;;  %v28876_v58 = vpack.c.bf16 %v14960_v3, %v14948_v31  ;;  %v37157_v31 = vand.u32 4294901760, %v34093_v27  ;;  %v37158_v3 = vand.u32 4294901760, %v34095_v46 }
 0x645   :  { %v14954_v7 = vand.u32 4294901760, %v14953_v42  ;;  %v37160_v17 = vand.u32 4294901760, %v34110_v30  ;;  %v34244_v20 = vpack.c.bf16 %v14940_v39, %v14928_v9  ;;  %v34246_v8 = vpack.c.bf16 %v14415_v50, %v14403_v61 }
 0x646   :  { %v28830_v51 = vpack.c.bf16 %v14423_v11, %v14411_v2  ;;  %v34234_v42 = vpack.c.bf16 %v37158_v3, %v37157_v31  ;;  %v34242_v2 = vpack.c.bf16 %v14397_v10, %v14385_v47  ;;  %v34248_v38 = vpack.c.bf16 %v14958_v43, %v14946_v26 }
 0x647   :  { %v28878_v14 = vpack.c.bf16 %v14966_v45, %v14954_v7  ;;  %v34240_v11 = vpack.c.bf16 %v37160_v17, %v37159_v59  ;;  %v34250_v7 = vpack.c.bf16 %v14421_v5, %v14409_v35  ;;  %v34252_v45 = vpack.c.bf16 %v14964_v49, %v14952_v25  ;;  %v37162_v59 = vld [vmem:[#allocation18_spill] sm:$0xff] }
 0x6ac   :  { %v11458_v31 = vpop.f32.mrb[8].mxu0  ;;  %v12001_v3 = vpop.f32.mrb[24].mxu1 }
 0x6ad   :  { %v29939_v36 = vadd.f32 %v37161_v32, %v11458_v31  ;;  %v11460_v54 = vpop.f32.mrb[9].mxu0  ;;  %v12003_v56 = vpop.f32.mrb[25].mxu1  ;;  %v29962_v9 = vadd.f32 %v12001_v3, %v37010_v34 }
 0x6ae   :  { %v29941_v17 = vadd.f32 %v37162_v59, %v11460_v54  ;;  %v29963_v39 = vadd.f32 %v12003_v56, %v37011_v29 }
 0x6af   :  { %v27492_v47 = vmul.f32 -1.442695, %v29939_v36  ;;  %v27494_v61 = vmul.f32 -1.442695, %v29962_v9 }
 0x6b0   :  { %v27493_v10 = vmul.f32 -1.442695, %v29941_v17 }
 0x6b1   :  { %30808 = vpow2.f32 %v27492_v47 }
 0x6b2   :  { %30810 = vpow2.f32 %v27493_v10 }
 0x6b3   :  { %30812 = vtanh.f32 %v29963_v39 }
 0x6b4   :  { %30814 = vpow2.f32 %v27494_v61 }
 0x6bb   :  { %v30809_v50 = vpop.eup %30808 }
 0x6bc   :  { %v12019_v49 = vadd.f32 1.0, %v30809_v50  ;;  %v30811_v26 = vpop.eup %30810  ;;  %v37163_v50 = vpack.c.bf16 %v34095_v46, %v34093_v27  ;;  %v37167_v27 = vpack.c.bf16 %v34143_v4, %v34136_v52  ;;  %v37168_v46 = vpack.c.bf16 %v34150_v44, %v34147_v1 }
 0x6bd   :  { %v12020_v43 = vadd.f32 1.0, %v30811_v26  ;;  %v30813_v35 = vpop.eup %30812 }
 0x6be   :  { %30816 = vrcp.f32 %v12019_v49  ;;  %v30815_v5 = vpop.eup %30814  ;;  %v37164_v49 = vpack.c.bf16 %v34110_v30, %v34097_v19  ;;  %v15408_v19 = vld [vmem:[#allocation6 + $0x8] sm:$0xff] }
 0x6bf   :  { %30818 = vrcp.f32 %v12020_v43  ;;  %v12021_v32 = vadd.f32 1.0, %v30815_v5  ;;  %v15412_v30 = vld [vmem:[#allocation6 + $0x28] sm:$0xff]  ;;  %v15423_v52 = vand.u32 4294901760, %v15408_v19 }
 0x6c0   :  { %v15427_v4 = vand.u32 4294901760, %v15412_v30  ;;  %v15420_v5 = vld [vmem:[#allocation6 + $0x68] sm:$0xff] }
 0x6c1   :  { %30820 = vrcp.f32 %v12021_v32 }
 0x6c8   :  { %v30817_v54 = vpop.eup %30816 }
 0x6c9   :  { %v12030_v36 = vmul.f32 %v30817_v54, %v30813_v35  ;;  %v30819_v25 = vpop.eup %30818  ;;  %v15416_v35 = vld [vmem:[#allocation6 + $0x48] sm:$0xff]  ;;  %v34332_v54 = vpack.c.bf16 %v15427_v4, %v15423_v52 }
 0x6ca   :  { %v12029_v31 = vmul.f32 %v30819_v25, %v33536_v0 }
 0x6cb   :  { %v30821_v56 = vpop.eup %30820 }
 0x6cc   :  { %v34259_v3 = vadd.f32 %v12030_v36, %v12029_v31  ;;  %v15418_v31 = vld [vmem:[#allocation6 + $0x58] sm:$0xff] }
 0x6ce   :  { %30822 = vtanh.f32 %v34259_v3 }
 0x6d8   :  { %v30823_v59 = vpop.eup %30822 }
 0x6d9   :  { %v12033_v17 = vmul.f32 %v30823_v59, %v30821_v56  ;;  %v15422_v56 = vld [vmem:[#allocation6 + $0x78] sm:$0xff]  ;;  %v15415_v59 = vld [vmem:[#allocation6 + $0x40] sm:$0xff] }
 0x6db   :  { %v14291_v47 = vsel %vm1906_vm1, %v12033_v17, 0 }
 0x6dc   :  { %v34263_v10 = vand.u32 4294901760, %v14291_v47 }
 0x6de   :  { %v34266_v9 = vsub.f32 %v14291_v47, %v34263_v10  ;;  %v15431_v47 = vand.u32 4294901760, %v15416_v35 }
 0x6e0   :  { %v34269_v39 = vand.u32 4294901760, %v34266_v9 }
 0x6e2   :  { %v14369_v0 = vsub.f32 %v34266_v9, %v34269_v39 }
 0x6e4   :  { %v34273_v61 = vand.u32 4294901760, %v14369_v0  ;;  %v15419_v0 = vld [vmem:[#allocation6 + $0x60] sm:$0xff] }
 0x6e6   :  { %14371 = vmatmul.mubr.f32.vlgmr.msra.gmra.mrb[10].mxu0 %v34273_v61  ;;  %14914 = vmatmul.mubr.f32.vlgmr.msra.gmra.mrb[26].mxu1 %v34273_v61 }
 0x6e7   :  { %28827 = vmatpush1.bf16.msra.mxu0 %v34196_v37  ;;  %28875 = vmatpush1.bf16.msra.mxu1 %v34201_v16  ;;  %v37166_v37 = vpack.c.bf16 %v34134_v21, %v34132_v28  ;;  %v15410_v28 = vld [vmem:[#allocation6 + $0x18] sm:$0xff] }
 0x6e8   :  { %28829 = vmatprep.subr.bf16.mxu0 %v34212_v63  ;;  %28877 = vmatprep.subr.bf16.mxu1 %v28876_v58  ;;  %v37165_v58 = vpack.c.bf16 %v34120_v40, %v34114_v48  ;;  %v37169_v48 = vpack.c.bf16 %v34161_v55, %v34152_v13  ;;  %v37170_v40 = vpack.c.bf16 %v34168_v15, %v34163_v23  ;;  %v15414_v21 = vld [vmem:[#allocation6 + $0x38] sm:$0xff]  ;;  %v15966_v1 = vand.u32 4294901760, %v15410_v28  ;;  %v15407_v13 = vld [vmem:[#allocation6] sm:$0xff] }
 0x6e9   :  { %14481 = vmatprep.mubr.f32.mxu0 %v36977_v6  ;;  %15024 = vmatprep.mubr.f32.mxu1 %v36977_v6  ;;  %v15970_v44 = vand.u32 4294901760, %v15414_v21  ;;  %v15411_v55 = vld [vmem:[#allocation6 + $0x20] sm:$0xff]  ;;  %v34320_v23 = vsub.f32 %v15408_v19, %v15423_v52  ;;  %v34322_v15 = vsub.f32 %v15412_v30, %v15427_v4  ;;  %v15425_v16 = vand.u32 4294901760, %v15407_v13  ;;  %v15417_v52 = vld [vmem:[#allocation6 + $0x50] sm:$0xff] }
 0x6ea   :  { %v15429_v63 = vand.u32 4294901760, %v15411_v55  ;;  %v34324_v26 = vsub.f32 %v15410_v28, %v15966_v1  ;;  %v15978_v19 = vand.u32 4294901760, %v15422_v56  ;;  %v15433_v30 = vand.u32 4294901760, %v15415_v59 }
 0x6eb   :  { %28831 = vmatpush1.bf16.msra.mxu0 %v28830_v51  ;;  %28879 = vmatpush1.bf16.msra.mxu1 %v28878_v14  ;;  %v15409_v14 = vld [vmem:[#allocation6 + $0x10] sm:$0xff]  ;;  %v34326_v43 = vsub.f32 %v15414_v21, %v15970_v44  ;;  %v34334_v36 = vpack.c.bf16 %v15970_v44, %v15966_v1  ;;  %v15437_v21 = vand.u32 4294901760, %v15419_v0 }
 0x6ec   :  { %28833 = vmatprep.subr.bf16.mxu0 %v37163_v50  ;;  %28881 = vmatprep.subr.bf16.mxu1 %v37164_v49  ;;  %v15413_v51 = vld [vmem:[#allocation6 + $0x30] sm:$0xff]  ;;  %v15968_v25 = vand.u32 4294901760, %v15409_v14  ;;  %v34336_v17 = vpack.c.bf16 %v15429_v63, %v15425_v16  ;;  %v15509_v50 = vand.u32 4294901760, %v34320_v23  ;;  %v15521_v49 = vand.u32 4294901760, %v34322_v15 }
 0x6ed   :  { %v15972_v32 = vand.u32 4294901760, %v15413_v51 }
 0x6ee   :  { %14483 = vmatmul.mubr.f32.vlgmr.msra.gmra.mrb[10].mxu0 %v34263_v10  ;;  %15026 = vmatmul.mubr.f32.vlgmr.msra.gmra.mrb[26].mxu1 %v34263_v10 }
 0x6ef   :  { %28835 = vmatpush1.bf16.msra.mxu0 %v37165_v58  ;;  %28883 = vmatpush1.bf16.msra.mxu1 %v37166_v37  ;;  %v36827_v58 = vand.u32 4294901760, %v34324_v26  ;;  %v36825_v37 = vand.u32 4294901760, %v34326_v43  ;;  %v34356_v28 = vsub.f32 %v15413_v51, %v15972_v32  ;;  %v34386_v51 = vsub.f32 %v15422_v56, %v15978_v19 }
 0x6f0   :  { %28837 = vmatprep.subr.bf16.mxu0 %v37167_v27  ;;  %28885 = vmatprep.subr.bf16.mxu1 %v37168_v46  ;;  %v34348_v27 = vsub.f32 %v15411_v55, %v15429_v63  ;;  %v15974_v46 = vand.u32 4294901760, %v15418_v31  ;;  %v15976_v63 = vand.u32 4294901760, %v15417_v52 }
 0x6f1   :  { %14569 = vmatprep.mubr.f32.mxu0 %v36977_v6  ;;  %15112 = vmatprep.mubr.f32.mxu1 %v36977_v6  ;;  %v16053_v44 = vsub.f32 %v34324_v26, %v36827_v58  ;;  %v36821_v56 = vand.u32 4294901760, %v34356_v28 }
 0x6f2   :  { %v34380_v55 = vpack.c.bf16 %v15978_v19, %v15974_v46 }
 0x6f3   :  { %28839 = vmatpush1.bf16.msra.mxu0 %v37169_v48  ;;  %28887 = vmatpush1.bf16.msra.mxu1 %v37170_v40  ;;  %v34352_v48 = vpack.c.bf16 %v15972_v32, %v15968_v25  ;;  %v34354_v40 = vsub.f32 %v15409_v14, %v15968_v25  ;;  %v36823_v32 = vand.u32 4294901760, %v34348_v27 }
 0x6f4   :  { %28841 = vmatprep.subr.bf16.mxu0 %v34091_v60  ;;  %28889 = vmatprep.subr.bf16.mxu1 %v34108_v41 }
 0x6f6   :  { %14572 = vmatmul.mubr.f32.vlgmr.msra.gmra.mrb[10].mxu0 %v34266_v9  ;;  %15115 = vmatmul.mubr.f32.vlgmr.msra.gmra.mrb[26].mxu1 %v34266_v9 }
 0x6f7   :  { %28843 = vmatpush1.bf16.msra.mxu0 %v34112_v57  ;;  %28891 = vmatpush1.bf16.msra.mxu1 %v34130_v62 }
 0x6f8   :  { %28845 = vmatprep.subr.bf16.mxu0 %v34141_v18  ;;  %28893 = vmatprep.subr.bf16.mxu1 %v34145_v33 }
 0x6f9   :  { %14650 = vmatprep.mubr.f32.mxu0 %v36977_v6  ;;  %15193 = vmatprep.mubr.f32.mxu1 %v36977_v6 }
 0x6fb   :  { %28847 = vmatpush1.bf16.msra.mxu0 %v34159_v53  ;;  %28895 = vmatpush1.bf16.msra.mxu1 %v34166_v24 }
 0x6fc   :  { %28849 = vmatprep.subr.bf16.mxu0 %v34234_v42  ;;  %28897 = vmatprep.subr.bf16.mxu1 %v34240_v11  ;;  %v34342_v42 = vsub.f32 %v15407_v13, %v15425_v16  ;;  %v15435_v11 = vand.u32 4294901760, %v15420_v5  ;;  %v16065_v13 = vsub.f32 %v34326_v43, %v36825_v37  ;;  %v34382_v16 = vsub.f32 %v15418_v31, %v15974_v46 }
 0x6fd   :  { %v36822_v31 = vand.u32 4294901760, %v34354_v40 }
 0x6fe   :  { %14654 = vmatmul.mubr.f32.vlgmr.msra.gmra.mrb[10].mxu0 %v34269_v39  ;;  %15197 = vmatmul.mubr.f32.vlgmr.msra.gmra.mrb[26].mxu1 %v34269_v39  ;;  %v34368_v4 = vpack.c.bf16 %v15435_v11, %v15431_v47  ;;  %v34370_v1 = vsub.f32 %v15420_v5, %v15435_v11  ;;  %v34390_v5 = vsub.f32 %v15415_v59, %v15433_v30 }
 0x6ff   :  { %28851 = vmatpush1.bf16.msra.mxu0 %v34242_v2  ;;  %28899 = vmatpush1.bf16.msra.mxu1 %v34244_v20  ;;  %v15421_v2 = vld [vmem:[#allocation6 + $0x70] sm:$0xff]  ;;  %v34360_v20 = vsub.f32 %v15416_v35, %v15431_v47  ;;  %v34388_v35 = vpack.c.bf16 %v15437_v21, %v15433_v30  ;;  %v34401_v59 = vsub.f32 %v15419_v0, %v15437_v21  ;;  %v36832_v0 = vand.u32 4294901760, %v34386_v51 }
 0x700   :  { %28853 = vmatprep.subr.bf16.mxu0 %v34246_v8  ;;  %28901 = vmatprep.subr.bf16.mxu1 %v34248_v38  ;;  %v15510_v8 = vsub.f32 %v34320_v23, %v15509_v50  ;;  %v15522_v38 = vsub.f32 %v34322_v15, %v15521_v49  ;;  %v15980_v14 = vand.u32 4294901760, %v15421_v2  ;;  %v34403_v11 = vsub.f32 %v15417_v52, %v15976_v63 }
 0x701   :  { %14748 = vmatprep.mubr.f32.mxu0 %v36977_v6  ;;  %15291 = vmatprep.mubr.f32.mxu1 %v36977_v6  ;;  %v36819_v47 = vand.u32 4294901760, %v34360_v20  ;;  %v36820_v19 = vand.u32 4294901760, %v34370_v1 }
 0x702   :  { %v15511_v25 = vand.u32 4294901760, %v15510_v8  ;;  %v34405_v46 = vsub.f32 %v15421_v2, %v15980_v14  ;;  %v34410_v30 = vpack.c.bf16 %v15980_v14, %v15976_v63  ;;  %v16071_v2 = vsub.f32 %v34356_v28, %v36821_v56 }
 0x703   :  { %28855 = vmatpush1.bf16.msra.mxu0 %v34250_v7  ;;  %28903 = vmatpush1.bf16.msra.mxu1 %v34252_v45  ;;  %v36824_v7 = vand.u32 4294901760, %v34342_v42  ;;  %v15523_v45 = vand.u32 4294901760, %v15522_v38  ;;  %v15534_v8 = vsub.f32 %v34360_v20, %v36819_v47  ;;  %v36831_v38 = vand.u32 4294901760, %v34390_v5 }
 0x704   :  { %28857 = vmatprep.subr.bf16.mxu0 %v34091_v60  ;;  %28905 = vmatprep.subr.bf16.mxu1 %v34108_v41  ;;  %v16054_v60 = vand.u32 4294901760, %v16053_v44  ;;  %v16066_v41 = vand.u32 4294901760, %v16065_v13  ;;  %v15546_v63 = vsub.f32 %v34370_v1, %v36820_v19  ;;  %v36830_v14 = vand.u32 4294901760, %v34401_v59 }
 0x705   :  { %v28920_v21 = vpack.c.bf16 %v15523_v45, %v15511_v25  ;;  %v36829_v25 = vand.u32 4294901760, %v34403_v11  ;;  %v36828_v45 = vand.u32 4294901760, %v34405_v46  ;;  %v15535_v37 = vand.u32 4294901760, %v15534_v8 }
 0x706   :  { %14750 = vmatmul.mubr.f32.vlgmr.msra.gmra.mrb[10].mxu0 %v34263_v10  ;;  %15293 = vmatmul.mubr.f32.vlgmr.msra.gmra.mrb[26].mxu1 %v34263_v10  ;;  %v28968_v52 = vpack.c.bf16 %v16066_v41, %v16054_v60 }
 0x707   :  { %28859 = vmatpush1.bf16.msra.mxu0 %v34112_v57  ;;  %28907 = vmatpush1.bf16.msra.mxu1 %v34130_v62  ;;  %v15516_v57 = vsub.f32 %v34342_v42, %v36824_v7  ;;  %v36826_v62 = vand.u32 4294901760, %v34382_v16  ;;  %v16072_v7 = vand.u32 4294901760, %v16071_v2 }
 0x708   :  { %28861 = vmatprep.subr.bf16.mxu0 %v34141_v18  ;;  %28909 = vmatprep.subr.bf16.mxu1 %v34145_v33  ;;  %v15528_v18 = vsub.f32 %v34348_v27, %v36823_v32  ;;  %v16059_v33 = vsub.f32 %v34354_v40, %v36822_v31 }
 0x709   :  { %14828 = vmatprep.mubr.f32.mxu0 %v36977_v6  ;;  %15371 = vmatprep.mubr.f32.mxu1 %v36977_v6  ;;  %v15517_v56 = vand.u32 4294901760, %v15516_v57  ;;  %v15552_v57 = vsub.f32 %v34401_v59, %v36830_v14 }
 0x70a   :  { %v15529_v31 = vand.u32 4294901760, %v15528_v18  ;;  %v16060_v32 = vand.u32 4294901760, %v16059_v33  ;;  %v16083_v18 = vsub.f32 %v34403_v11, %v36829_v25  ;;  %v16095_v33 = vsub.f32 %v34405_v46, %v36828_v45 }
 0x70b   :  { %28863 = vmatpush1.bf16.msra.mxu0 %v34159_v53  ;;  %28911 = vmatpush1.bf16.msra.mxu1 %v34166_v24  ;;  %v16077_v53 = vsub.f32 %v34382_v16, %v36826_v62  ;;  %v16089_v24 = vsub.f32 %v34386_v51, %v36832_v0  ;;  %v15540_v62 = vsub.f32 %v34390_v5, %v36831_v38  ;;  %v37171_v38 = vld [vmem:[#allocation11_spill] sm:$0xff] }
 0x70c   :  { %v13693_v44 = vpop.f32.mrb[22].mxu0  ;;  %v14236_v13 = vpop.f32.mrb[38].mxu1  ;;  %28913 = vmatprep.subr.bf16.mxu0 %v34332_v54  ;;  %28961 = vmatprep.subr.bf16.mxu1 %v34334_v36  ;;  %v16084_v25 = vand.u32 4294901760, %v16083_v18  ;;  %v16096_v14 = vand.u32 4294901760, %v16095_v33  ;;  %v16514_v18 = vld [vmem:[#allocation8 + $0x28] sm:$0xff]  ;;  %v16512_v33 = vld [vmem:[#allocation8 + $0x18] sm:$0xff] }
 0x70d   :  { %v29982_v60 = vadd.f32 %v13693_v44, %v32215_v12  ;;  %v13695_v41 = vpop.f32.mrb[23].mxu0  ;;  %v14238_v47 = vpop.f32.mrb[39].mxu1  ;;  %v16078_v2 = vand.u32 4294901760, %v16077_v53  ;;  %v16090_v8 = vand.u32 4294901760, %v16089_v24  ;;  %v15541_v45 = vand.u32 4294901760, %v15540_v62 }
 0x70e   :  { %v29983_v19 = vadd.f32 %v13695_v41, %v37075_v22  ;;  %14830 = vmatmul.mubr.f32.vlgmr.msra.gmra.mrb[10].mxu0 %v34263_v10  ;;  %15373 = vmatmul.mubr.f32.vlgmr.msra.gmra.mrb[26].mxu1 %v34263_v10  ;;  %v28970_v41 = vpack.c.bf16 %v16072_v7, %v16060_v32  ;;  %v29984_v0 = vadd.f32 %v14236_v13, %v37171_v38 }
 0x70f   :  { %v27495_v44 = vmul.f32 -1.442695, %v29982_v60  ;;  %28915 = vmatpush1.bf16.msra.mxu0 %v34336_v17  ;;  %28963 = vmatpush1.bf16.msra.mxu1 %v34352_v48  ;;  %v28922_v60 = vpack.c.bf16 %v15529_v31, %v15517_v56  ;;  %v28972_v53 = vpack.c.bf16 %v16090_v8, %v16078_v2  ;;  %v28974_v31 = vpack.c.bf16 %v16096_v14, %v16084_v25  ;;  %v16509_v8 = vld [vmem:[#allocation8] sm:$0xff] }
 0x710   :  { %v27496_v58 = vmul.f32 -1.442695, %v29983_v19  ;;  %28917 = vmatprep.subr.bf16.mxu0 %v34368_v4  ;;  %28965 = vmatprep.subr.bf16.mxu1 %v34380_v55  ;;  %v15547_v19 = vand.u32 4294901760, %v15546_v63  ;;  %v27497_v56 = vmul.f32 -1.442695, %v29984_v0  ;;  %v28928_v62 = vpack.c.bf16 %v34322_v15, %v34320_v23 }
 0x711   :  { %30824 = vpow2.f32 %v27495_v44  ;;  %15495 = vmatprep.mubr.f32.mxu0 %v36977_v6  ;;  %16038 = vmatprep.mubr.f32.mxu1 %v36977_v6  ;;  %v15553_v44 = vand.u32 4294901760, %v15552_v57  ;;  %v28978_v0 = vpack.c.bf16 %v34356_v28, %v34354_v40  ;;  %v28932_v13 = vpack.c.bf16 %v34370_v1, %v34360_v20  ;;  %v16510_v57 = vld [vmem:[#allocation8 + $0x8] sm:$0xff] }
 0x712   :  { %30826 = vpow2.f32 %v27496_v58  ;;  %v28924_v63 = vpack.c.bf16 %v15547_v19, %v15535_v37  ;;  %v37172_v58 = vld [vmem:[#allocation48_spill] sm:$0xff]  ;;  %v28976_v37 = vpack.c.bf16 %v34326_v43, %v34324_v26  ;;  %v28980_v14 = vpack.c.bf16 %v34386_v51, %v34382_v16  ;;  %v16516_v19 = vld [vmem:[#allocation8 + $0x38] sm:$0xff] }
 0x713   :  { %28919 = vmatpush1.bf16.msra.mxu0 %v34388_v35  ;;  %28967 = vmatpush1.bf16.msra.mxu1 %v34410_v30  ;;  %v29985_v7 = vadd.f32 %v14238_v47, %v37172_v58  ;;  %v28926_v32 = vpack.c.bf16 %v15553_v44, %v15541_v45  ;;  %v28930_v47 = vpack.c.bf16 %v34348_v27, %v34342_v42  ;;  %v37177_v15 = vand.u32 4294901760, %v34354_v40 }
 0x714   :  { %28921 = vmatprep.subr.bf16.mxu0 %v28920_v21  ;;  %28969 = vmatprep.subr.bf16.mxu1 %v28968_v52  ;;  %v28934_v45 = vpack.c.bf16 %v34401_v59, %v34390_v5  ;;  %v28982_v24 = vpack.c.bf16 %v34405_v46, %v34403_v11  ;;  %v28944_v44 = vpack.c.bf16 %v15521_v49, %v15509_v50  ;;  %v37178_v50 = vand.u32 4294901760, %v34356_v28 }
 0x715   :  { %30828 = vtanh.f32 %v29985_v7  ;;  %v17071_v49 = vand.u32 4294901760, %v16512_v33  ;;  %v37181_v28 = vand.u32 4294901760, %v34382_v16 }
 0x716   :  { %15501 = vmatmul.mubr.f32.vlgmr.msra.gmra.mrb[24].mxu0 %v34273_v61  ;;  %16044 = vmatmul.mubr.f32.vlgmr.msra.gmra.mrb[40].mxu1 %v34273_v61  ;;  %30830 = vpow2.f32 %v27497_v56 }
 0x717   :  { %28923 = vmatpush1.bf16.msra.mxu0 %v28922_v60  ;;  %28971 = vmatpush1.bf16.msra.mxu1 %v28970_v41  ;;  %v16513_v60 = vld [vmem:[#allocation8 + $0x20] sm:$0xff] }
 0x718   :  { %28925 = vmatprep.subr.bf16.mxu0 %v28924_v63  ;;  %28973 = vmatprep.subr.bf16.mxu1 %v28972_v53  ;;  %v37173_v63 = vand.u32 4294901760, %v34324_v26  ;;  %v37174_v53 = vand.u32 4294901760, %v34326_v43  ;;  %v28994_v26 = vpack.c.bf16 %v37178_v50, %v37177_v15  ;;  %v17075_v43 = vand.u32 4294901760, %v16516_v19  ;;  %v16520_v15 = vld [vmem:[#allocation8 + $0x58] sm:$0xff] }
 0x719   :  { %15611 = vmatprep.mubr.f32.mxu0 %v36977_v6  ;;  %16154 = vmatprep.mubr.f32.mxu1 %v36977_v6  ;;  %v16524_v50 = vld [vmem:[#allocation8 + $0x78] sm:$0xff] }
 0x71a   :  { %v28992_v7 = vpack.c.bf16 %v37174_v53, %v37173_v63 }
 0x71b   :  { %v30825_v61 = vpop.eup %30824  ;;  %28927 = vmatpush1.bf16.msra.mxu0 %v28926_v32  ;;  %28975 = vmatpush1.bf16.msra.mxu1 %v28974_v31  ;;  %v16528_v32 = vand.u32 4294901760, %v16510_v57  ;;  %v16532_v31 = vand.u32 4294901760, %v16514_v18 }
 0x71c   :  { %v14254_v21 = vadd.f32 1.0, %v30825_v61  ;;  %v30827_v52 = vpop.eup %30826  ;;  %28929 = vmatprep.subr.bf16.mxu0 %v28928_v62  ;;  %28977 = vmatprep.subr.bf16.mxu1 %v28976_v37  ;;  %v37175_v62 = vand.u32 4294901760, %v34342_v42  ;;  %v37179_v61 = vand.u32 4294901760, %v34360_v20  ;;  %v37183_v20 = vand.u32 4294901760, %v34390_v5 }
 0x71d   :  { %v14255_v25 = vadd.f32 1.0, %v30827_v52  ;;  %v16515_v52 = vld [vmem:[#allocation8 + $0x30] sm:$0xff]  ;;  %v34545_v16 = vsub.f32 %v16514_v18, %v16532_v31  ;;  %v34549_v5 = vpack.c.bf16 %v17075_v43, %v17071_v49 }
 0x71e   :  { %30832 = vrcp.f32 %v14254_v21  ;;  %15613 = vmatmul.mubr.f32.vlgmr.msra.gmra.mrb[24].mxu0 %v34263_v10  ;;  %16156 = vmatmul.mubr.f32.vlgmr.msra.gmra.mrb[40].mxu1 %v34263_v10  ;;  %v37180_v21 = vand.u32 4294901760, %v34370_v1  ;;  %v37184_v1 = vand.u32 4294901760, %v34401_v59  ;;  %v34551_v59 = vsub.f32 %v16512_v33, %v17071_v49  ;;  %v16521_v33 = vld [vmem:[#allocation8 + $0x60] sm:$0xff] }
 0x71f   :  { %30834 = vrcp.f32 %v14255_v25  ;;  %28931 = vmatpush1.bf16.msra.mxu0 %v28930_v47  ;;  %28979 = vmatpush1.bf16.msra.mxu1 %v28978_v0  ;;  %v30829_v2 = vpop.eup %30828  ;;  %v16530_v47 = vand.u32 4294901760, %v16509_v8  ;;  %v16511_v0 = vld [vmem:[#allocation8 + $0x10] sm:$0xff] }
 0x720   :  { %28933 = vmatprep.subr.bf16.mxu0 %v28932_v13  ;;  %28981 = vmatprep.subr.bf16.mxu1 %v28980_v14  ;;  %v30831_v41 = vpop.eup %30830  ;;  %v28948_v42 = vpack.c.bf16 %v37180_v21, %v37179_v61  ;;  %v37182_v14 = vand.u32 4294901760, %v34386_v51  ;;  %v16518_v51 = vld [vmem:[#allocation8 + $0x48] sm:$0xff] }
 0x721   :  { %15699 = vmatprep.mubr.f32.mxu0 %v36977_v6  ;;  %16242 = vmatprep.mubr.f32.mxu1 %v36977_v6  ;;  %v14256_v13 = vadd.f32 1.0, %v30831_v41  ;;  %v37187_v41 = vld [vmem:[#allocation32_spill] sm:$0xff] }
 0x722   :  { %v28996_v25 = vpack.c.bf16 %v37182_v14, %v37181_v28 }
 0x723   :  { %28935 = vmatpush1.bf16.msra.mxu0 %v28934_v45  ;;  %28983 = vmatpush1.bf16.msra.mxu1 %v28982_v24  ;;  %v28950_v45 = vpack.c.bf16 %v37184_v1, %v37183_v20  ;;  %v37185_v24 = vand.u32 4294901760, %v34403_v11  ;;  %v17073_v11 = vand.u32 4294901760, %v16511_v0  ;;  %30836 = vrcp.f32 %v14256_v13 }
 0x724   :  { %28937 = vmatprep.subr.bf16.mxu0 %v34332_v54  ;;  %28985 = vmatprep.subr.bf16.mxu1 %v34334_v36  ;;  %v16626_v13 = vand.u32 4294901760, %v34545_v16 }
 0x726   :  { %15702 = vmatmul.mubr.f32.vlgmr.msra.gmra.mrb[24].mxu0 %v34266_v9  ;;  %16245 = vmatmul.mubr.f32.vlgmr.msra.gmra.mrb[40].mxu1 %v34266_v9  ;;  %v37176_v9 = vand.u32 4294901760, %v34348_v27  ;;  %v16534_v27 = vand.u32 4294901760, %v16513_v60 }
 0x727   :  { %28939 = vmatpush1.bf16.msra.mxu0 %v34336_v17  ;;  %28987 = vmatpush1.bf16.msra.mxu1 %v34352_v48 }
 0x728   :  { %v30833_v56 = vpop.eup %30832  ;;  %v28946_v23 = vpack.c.bf16 %v37176_v9, %v37175_v62  ;;  %28941 = vmatprep.subr.bf16.mxu0 %v34368_v4  ;;  %28989 = vmatprep.subr.bf16.mxu1 %v34380_v55  ;;  %v34543_v62 = vsub.f32 %v16510_v57, %v16528_v32  ;;  %v16522_v9 = vld [vmem:[#allocation8 + $0x68] sm:$0xff]  ;;  %v34555_v57 = vsub.f32 %v16516_v19, %v17075_v43  ;;  %v17083_v19 = vand.u32 4294901760, %v16524_v50  ;;  %v16519_v43 = vld [vmem:[#allocation8 + $0x50] sm:$0xff] }
 0x729   :  { %v14265_v37 = vmul.f32 %v30833_v56, %v30829_v2  ;;  %v30835_v40 = vpop.eup %30834  ;;  %15780 = vmatprep.mubr.f32.mxu0 %v36977_v6  ;;  %16323 = vmatprep.mubr.f32.mxu1 %v36977_v6  ;;  %v37186_v2 = vand.u32 4294901760, %v34405_v46  ;;  %v34541_v56 = vpack.c.bf16 %v16532_v31, %v16528_v32  ;;  %v17077_v46 = vand.u32 4294901760, %v16515_v52 }
 0x72a   :  { %v14264_v53 = vmul.f32 %v30835_v40, %v37187_v41  ;;  %v34557_v18 = vpack.c.bf16 %v16534_v27, %v16530_v47  ;;  %v34559_v32 = vsub.f32 %v16509_v8, %v16530_v47  ;;  %v16536_v31 = vand.u32 4294901760, %v16518_v51  ;;  %v16517_v40 = vld [vmem:[#allocation8 + $0x40] sm:$0xff] }
 0x72b   :  { %v28998_v63 = vpack.c.bf16 %v37186_v2, %v37185_v24  ;;  %28943 = vmatpush1.bf16.msra.mxu0 %v34388_v35  ;;  %28991 = vmatpush1.bf16.msra.mxu1 %v34410_v30  ;;  %v16540_v21 = vand.u32 4294901760, %v16522_v9  ;;  %v34564_v49 = vsub.f32 %v16513_v60, %v16534_v27  ;;  %v34568_v8 = vsub.f32 %v16511_v0, %v17073_v11 }
 0x72c   :  { %v34553_v61 = vadd.f32 %v14265_v37, %v14264_v53  ;;  %28945 = vmatprep.subr.bf16.mxu0 %v28944_v44  ;;  %28993 = vmatprep.subr.bf16.mxu1 %v28992_v7  ;;  %v17079_v44 = vand.u32 4294901760, %v16520_v15  ;;  %v34566_v7 = vpack.c.bf16 %v17077_v46, %v17073_v11  ;;  %v16523_v37 = vld [vmem:[#allocation8 + $0x70] sm:$0xff]  ;;  %v16614_v47 = vand.u32 4294901760, %v34543_v62 }
 0x72d   :  { %v34572_v28 = vsub.f32 %v16515_v52, %v17077_v46  ;;  %v16542_v60 = vand.u32 4294901760, %v16521_v33  ;;  %v17157_v27 = vand.u32 4294901760, %v34551_v59  ;;  %v34581_v0 = vsub.f32 %v16522_v9, %v16540_v21 }
 0x72e   :  { %37188 = vst [vmem:[#allocation39_spill] sm:$0xff] %v34553_v61  ;;  %30838 = vtanh.f32 %v34553_v61  ;;  %15784 = vmatmul.mubr.f32.vlgmr.msra.gmra.mrb[24].mxu0 %v34269_v39  ;;  %16327 = vmatmul.mubr.f32.vlgmr.msra.gmra.mrb[40].mxu1 %v34269_v39  ;;  %v16538_v39 = vand.u32 4294901760, %v16517_v40  ;;  %v36839_v14 = vand.u32 4294901760, %v34555_v57  ;;  %v34586_v52 = vsub.f32 %v16520_v15, %v17079_v44 }
 0x72f   :  { %28947 = vmatpush1.bf16.msra.mxu0 %v28946_v23  ;;  %28995 = vmatpush1.bf16.msra.mxu1 %v28994_v26  ;;  %v34577_v23 = vpack.c.bf16 %v16540_v21, %v16536_v31  ;;  %v34579_v26 = vsub.f32 %v16518_v51, %v16536_v31  ;;  %v17085_v20 = vand.u32 4294901760, %v16523_v37  ;;  %v34588_v1 = vsub.f32 %v16524_v50, %v17083_v19  ;;  %v30837_v50 = vpop.eup %30836 }
 0x730   :  { %28949 = vmatprep.subr.bf16.mxu0 %v28948_v42  ;;  %28997 = vmatprep.subr.bf16.mxu1 %v28996_v25  ;;  %v34584_v42 = vpack.c.bf16 %v17083_v19, %v17079_v44  ;;  %v17081_v25 = vand.u32 4294901760, %v16519_v43  ;;  %v16615_v24 = vsub.f32 %v34543_v62, %v16614_v47  ;;  %v16627_v2 = vsub.f32 %v34545_v16, %v16626_v13 }
 0x731   :  { %15878 = vmatprep.mubr.f32.mxu0 %v36977_v6  ;;  %16421 = vmatprep.mubr.f32.mxu1 %v36977_v6  ;;  %v34598_v41 = vpack.c.bf16 %v16542_v60, %v16538_v39  ;;  %v34600_v53 = vsub.f32 %v16517_v40, %v16538_v39  ;;  %v17170_v51 = vsub.f32 %v34555_v57, %v36839_v14  ;;  %v36837_v9 = vand.u32 4294901760, %v34559_v32 }
 0x732   :  { %v36835_v11 = vand.u32 4294901760, %v34568_v8  ;;  %v36834_v46 = vand.u32 4294901760, %v34572_v28  ;;  %v36833_v15 = vand.u32 4294901760, %v34579_v26  ;;  %v34621_v31 = vsub.f32 %v16519_v43, %v17081_v25 }
 0x733   :  { %28951 = vmatpush1.bf16.msra.mxu0 %v28950_v45  ;;  %28999 = vmatpush1.bf16.msra.mxu1 %v28998_v63  ;;  %v17158_v45 = vsub.f32 %v34551_v59, %v17157_v27  ;;  %v34605_v63 = vsub.f32 %v16521_v33, %v16542_v60  ;;  %v34623_v21 = vsub.f32 %v16523_v37, %v17085_v20  ;;  %v16616_v40 = vand.u32 4294901760, %v16615_v24 }
 0x734   :  { %28953 = vmatprep.subr.bf16.mxu0 %v34332_v54  ;;  %29001 = vmatprep.subr.bf16.mxu1 %v34334_v36  ;;  %v36836_v54 = vand.u32 4294901760, %v34564_v49  ;;  %v34614_v36 = vpack.c.bf16 %v17085_v20, %v17081_v25  ;;  %v16628_v33 = vand.u32 4294901760, %v16627_v2  ;;  %v36838_v39 = vand.u32 4294901760, %v34581_v0 }
 0x735   :  { %v17159_v19 = vand.u32 4294901760, %v17158_v45  ;;  %v36840_v60 = vand.u32 4294901760, %v34586_v52  ;;  %v17171_v43 = vand.u32 4294901760, %v17170_v51  ;;  %v16621_v37 = vsub.f32 %v34559_v32, %v36837_v9 }
 0x736   :  { %15880 = vmatmul.mubr.f32.vlgmr.msra.gmra.mrb[24].mxu0 %v34263_v10  ;;  %16423 = vmatmul.mubr.f32.vlgmr.msra.gmra.mrb[40].mxu1 %v34263_v10  ;;  %v17176_v25 = vsub.f32 %v34572_v28, %v36834_v46  ;;  %v16639_v20 = vsub.f32 %v34579_v26, %v36833_v15  ;;  %v36844_v24 = vand.u32 4294901760, %v34600_v53  ;;  %v36843_v45 = vand.u32 4294901760, %v34605_v63 }
 0x737   :  { %28955 = vmatpush1.bf16.msra.mxu0 %v34336_v17  ;;  %29003 = vmatpush1.bf16.msra.mxu1 %v34352_v48  ;;  %v17193_v17 = vand.u32 4294901760, %v34588_v1  ;;  %v36842_v51 = vand.u32 4294901760, %v34621_v31  ;;  %v29016_v15 = vpack.c.bf16 %v16628_v33, %v16616_v40  ;;  %v29064_v46 = vpack.c.bf16 %v17171_v43, %v17159_v19 }
 0x738   :  { %v30839_v44 = vpop.eup %30838  ;;  %28957 = vmatprep.subr.bf16.mxu0 %v34368_v4  ;;  %29005 = vmatprep.subr.bf16.mxu1 %v34380_v55  ;;  %v16633_v4 = vsub.f32 %v34564_v49, %v36836_v54  ;;  %v17164_v55 = vsub.f32 %v34568_v8, %v36835_v11  ;;  %v16622_v11 = vand.u32 4294901760, %v16621_v37  ;;  %v17177_v14 = vand.u32 4294901760, %v17176_v25 }
 0x739   :  { %15958 = vmatprep.mubr.f32.mxu0 %v36977_v6  ;;  %16501 = vmatprep.mubr.f32.mxu1 %v36977_v6  ;;  %v14268_v48 = vmul.f32 %v30839_v44, %v30837_v50  ;;  %v36841_v50 = vand.u32 4294901760, %v34623_v21  ;;  %v16640_v40 = vand.u32 4294901760, %v16639_v20  ;;  %v16657_v33 = vsub.f32 %v34605_v63, %v36843_v45 }
 0x73a   :  { %v16634_v54 = vand.u32 4294901760, %v16633_v4 }
 0x73b   :  { %28959 = vmatpush1.bf16.msra.mxu0 %v34388_v35  ;;  %29007 = vmatpush1.bf16.msra.mxu1 %v34410_v30  ;;  %v16526_v2 = vsel %vm1906_vm1, %v14268_v48, 0  ;;  %v16651_v35 = vsub.f32 %v34581_v0, %v36838_v39  ;;  %v17182_v30 = vsub.f32 %v34586_v52, %v36840_v60  ;;  %v17194_v48 = vsub.f32 %v34588_v1, %v17193_v17 }
 0x73c   :  { %29009 = vmatprep.subr.bf16.mxu0 %v34541_v56  ;;  %29057 = vmatprep.subr.bf16.mxu1 %v34549_v5  ;;  %v34656_v44 = vand.u32 4294901760, %v16526_v2  ;;  %v17165_v39 = vand.u32 4294901760, %v17164_v55  ;;  %v16645_v60 = vsub.f32 %v34600_v53, %v36844_v24  ;;  %v17200_v19 = vsub.f32 %v34623_v21, %v36841_v50 }
 0x73d   :  { %v16652_v37 = vand.u32 4294901760, %v16651_v35  ;;  %v17183_v4 = vand.u32 4294901760, %v17182_v30  ;;  %v17195_v55 = vand.u32 4294901760, %v17194_v48  ;;  %v29018_v20 = vpack.c.bf16 %v16634_v54, %v16622_v11 }
 0x73e   :  { %37189 = vst [vmem:[#allocation40_spill] sm:$0xff] %v34656_v44  ;;  %15960 = vmatmul.mubr.f32.vlgmr.msra.gmra.mrb[24].mxu0 %v34263_v10  ;;  %16503 = vmatmul.mubr.f32.vlgmr.msra.gmra.mrb[40].mxu1 %v34263_v10  ;;  %v34670_v9 = vsub.f32 %v16526_v2, %v34656_v44  ;;  %v17188_v10 = vsub.f32 %v34621_v31, %v36842_v51  ;;  %v16646_v50 = vand.u32 4294901760, %v16645_v60  ;;  %v16658_v51 = vand.u32 4294901760, %v16657_v33 }
 0x73f   :  { %29011 = vmatpush1.bf16.msra.mxu0 %v34557_v18  ;;  %29059 = vmatpush1.bf16.msra.mxu1 %v34566_v7  ;;  %v29066_v2 = vpack.c.bf16 %v17177_v14, %v17165_v39  ;;  %v17201_v24 = vand.u32 4294901760, %v17200_v19  ;;  %v29020_v30 = vpack.c.bf16 %v16652_v37, %v16640_v40  ;;  %v29068_v48 = vpack.c.bf16 %v17195_v55, %v17183_v4 }
 0x740   :  { %37190 = vst [vmem:[#allocation41_spill] sm:$0xff] %v34670_v9  ;;  %29013 = vmatprep.subr.bf16.mxu0 %v34577_v23  ;;  %29061 = vmatprep.subr.bf16.mxu1 %v34584_v42  ;;  %v34689_v43 = vand.u32 4294901760, %v34670_v9  ;;  %v17189_v45 = vand.u32 4294901760, %v17188_v10  ;;  %v29022_v14 = vpack.c.bf16 %v16658_v51, %v16646_v50  ;;  %v29024_v11 = vpack.c.bf16 %v34545_v16, %v34543_v62 }
 0x741   :  { %16600 = vmatprep.mubr.f32.mxu0 %v36977_v6  ;;  %17143 = vmatprep.mubr.f32.mxu1 %v36977_v6  ;;  %v29072_v39 = vpack.c.bf16 %v34555_v57, %v34551_v59  ;;  %v29028_v60 = vpack.c.bf16 %v34581_v0, %v34579_v26  ;;  %v29078_v51 = vpack.c.bf16 %v34623_v21, %v34621_v31  ;;  %v37193_v40 = vand.u32 4294901760, %v34555_v57 }
 0x742   :  { %37191 = vst [vmem:[#allocation42_spill] sm:$0xff] %v34689_v43  ;;  %v16604_v25 = vsub.f32 %v34670_v9, %v34689_v43  ;;  %v29070_v54 = vpack.c.bf16 %v17201_v24, %v17189_v45  ;;  %v29076_v24 = vpack.c.bf16 %v34588_v1, %v34586_v52  ;;  %v29030_v45 = vpack.c.bf16 %v34605_v63, %v34600_v53  ;;  %v17647_v1 = vld [vmem:[%s36670_s2] sm:$0xff] }
 0x743   :  { %29015 = vmatpush1.bf16.msra.mxu0 %v34598_v41  ;;  %29063 = vmatpush1.bf16.msra.mxu1 %v34614_v36  ;;  %v29040_v50 = vpack.c.bf16 %v16626_v13, %v16614_v47  ;;  %v29088_v33 = vpack.c.bf16 %v37193_v40, %v17157_v27  ;;  %v37194_v10 = vand.u32 4294901760, %v34559_v32  ;;  %v37195_v62 = vand.u32 4294901760, %v34564_v49 }
 0x744   :  { %v34697_v35 = vand.u32 4294901760, %v16604_v25  ;;  %29017 = vmatprep.subr.bf16.mxu0 %v29016_v15  ;;  %29065 = vmatprep.subr.bf16.mxu1 %v29064_v46  ;;  %v29026_v46 = vpack.c.bf16 %v34564_v49, %v34559_v32  ;;  %v29074_v15 = vpack.c.bf16 %v34572_v28, %v34568_v8  ;;  %v37196_v16 = vand.u32 4294901760, %v34568_v8 }
 0x745   :  { %v29042_v19 = vpack.c.bf16 %v37195_v62, %v37194_v10  ;;  %v37197_v59 = vand.u32 4294901760, %v34572_v28  ;;  %v37198_v57 = vand.u32 4294901760, %v34579_v26  ;;  %v37199_v13 = vand.u32 4294901760, %v34581_v0  ;;  %v17659_v10 = vld [vmem:[%s36670_s2 + $0x60] sm:$0xff] }
 0x746   :  { %37192 = vst [vmem:[#allocation43_spill] sm:$0xff] %v34697_v35  ;;  %16606 = vmatmul.mubr.f32.vlgmr.msra.gmra.mrb[24].mxu0 %v34697_v35  ;;  %17149 = vmatmul.mubr.f32.vlgmr.msra.gmra.mrb[40].mxu1 %v34697_v35  ;;  %v37200_v37 = vand.u32 4294901760, %v34586_v52  ;;  %v37201_v49 = vand.u32 4294901760, %v34600_v53  ;;  %v37202_v8 = vand.u32 4294901760, %v34605_v63  ;;  %v37203_v26 = vand.u32 4294901760, %v34621_v31  ;;  %v17649_v31 = vld [vmem:[%s36670_s2 + $0x10] sm:$0xff] }
 0x747   :  { %29019 = vmatpush1.bf16.msra.mxu0 %v29018_v20  ;;  %29067 = vmatpush1.bf16.msra.mxu1 %v29066_v2  ;;  %v29090_v47 = vpack.c.bf16 %v37197_v59, %v37196_v16  ;;  %v29044_v27 = vpack.c.bf16 %v37199_v13, %v37198_v57  ;;  %v37204_v0 = vand.u32 4294901760, %v34623_v21  ;;  %v17668_v63 = vand.u32 4294901760, %v17647_v1  ;;  %v17653_v21 = vld [vmem:[%s36670_s2 + $0x30] sm:$0xff] }
 0x748   :  { %29021 = vmatprep.subr.bf16.mxu0 %v29020_v30  ;;  %29069 = vmatprep.subr.bf16.mxu1 %v29068_v48  ;;  %v29092_v32 = vpack.c.bf16 %v17193_v17, %v37200_v37  ;;  %v29046_v28 = vpack.c.bf16 %v37202_v8, %v37201_v49  ;;  %v17656_v17 = vld [vmem:[%s36670_s2 + $0x48] sm:$0xff]  ;;  %v17658_v48 = vld [vmem:[%s36670_s2 + $0x58] sm:$0xff]  ;;  %v17661_v13 = vld [vmem:[%s36670_s2 + $0x70] sm:$0xff] }
 0x749   :  { %16716 = vmatprep.mubr.f32.mxu0 %v36977_v6  ;;  %17259 = vmatprep.mubr.f32.mxu1 %v36977_v6  ;;  %v29094_v4 = vpack.c.bf16 %v37204_v0, %v37203_v26  ;;  %v17660_v30 = vld [vmem:[%s36670_s2 + $0x68] sm:$0xff]  ;;  %v18217_v40 = vand.u32 4294901760, %v17658_v48 }
 0x74b   :  { %29023 = vmatpush1.bf16.msra.mxu0 %v29022_v14  ;;  %29071 = vmatpush1.bf16.msra.mxu1 %v29070_v54  ;;  %v17662_v14 = vld [vmem:[%s36670_s2 + $0x78] sm:$0xff]  ;;  %v34870_v49 = vsub.f32 %v17658_v48, %v18217_v40 }
 0x74c   :  { %29025 = vmatprep.subr.bf16.mxu0 %v29024_v11  ;;  %29073 = vmatprep.subr.bf16.mxu1 %v29072_v39 }
 0x74e   :  { %16718 = vmatmul.mubr.f32.vlgmr.msra.gmra.mrb[24].mxu0 %v34656_v44  ;;  %17261 = vmatmul.mubr.f32.vlgmr.msra.gmra.mrb[40].mxu1 %v34656_v44 }
 0x74f   :  { %29027 = vmatpush1.bf16.msra.mxu0 %v29026_v46  ;;  %29075 = vmatpush1.bf16.msra.mxu1 %v29074_v15  ;;  %v34837_v46 = vsub.f32 %v17647_v1, %v17668_v63  ;;  %v17655_v15 = vld [vmem:[%s36670_s2 + $0x40] sm:$0xff] }
 0x750   :  { %29029 = vmatprep.subr.bf16.mxu0 %v29028_v60  ;;  %29077 = vmatprep.subr.bf16.mxu1 %v29076_v24  ;;  %v18211_v24 = vand.u32 4294901760, %v17649_v31  ;;  %v17676_v62 = vand.u32 4294901760, %v17655_v15 }
 0x751   :  { %16804 = vmatprep.mubr.f32.mxu0 %v36977_v6  ;;  %17347 = vmatprep.mubr.f32.mxu1 %v36977_v6 }
 0x752   :  { %v34855_v59 = vsub.f32 %v17649_v31, %v18211_v24  ;;  %v34875_v26 = vsub.f32 %v17655_v15, %v17676_v62 }
 0x753   :  { %29031 = vmatpush1.bf16.msra.mxu0 %v29030_v45  ;;  %29079 = vmatpush1.bf16.msra.mxu1 %v29078_v51  ;;  %v18215_v45 = vand.u32 4294901760, %v17653_v21  ;;  %v17674_v51 = vand.u32 4294901760, %v17656_v17 }
 0x754   :  { %29033 = vmatprep.subr.bf16.mxu0 %v34541_v56  ;;  %29081 = vmatprep.subr.bf16.mxu1 %v34549_v5 }
 0x755   :  { %v34853_v16 = vpack.c.bf16 %v18215_v45, %v18211_v24  ;;  %v34859_v57 = vsub.f32 %v17656_v17, %v17674_v51 }
 0x756   :  { %16807 = vmatmul.mubr.f32.vlgmr.msra.gmra.mrb[24].mxu0 %v34670_v9  ;;  %17350 = vmatmul.mubr.f32.vlgmr.msra.gmra.mrb[40].mxu1 %v34670_v9 }
 0x757   :  { %29035 = vmatpush1.bf16.msra.mxu0 %v34557_v18  ;;  %29083 = vmatpush1.bf16.msra.mxu1 %v34566_v7 }
 0x758   :  { %29037 = vmatprep.subr.bf16.mxu0 %v34577_v23  ;;  %29085 = vmatprep.subr.bf16.mxu1 %v34584_v42 }
 0x759   :  { %16885 = vmatprep.mubr.f32.mxu0 %v36977_v6  ;;  %17428 = vmatprep.mubr.f32.mxu1 %v36977_v6 }
 0x75b   :  { %29039 = vmatpush1.bf16.msra.mxu0 %v34598_v41  ;;  %29087 = vmatpush1.bf16.msra.mxu1 %v34614_v36 }
 0x75c   :  { %29041 = vmatprep.subr.bf16.mxu0 %v29040_v50  ;;  %29089 = vmatprep.subr.bf16.mxu1 %v29088_v33  ;;  %v17678_v50 = vand.u32 4294901760, %v17660_v30  ;;  %v18221_v33 = vand.u32 4294901760, %v17662_v14 }
 0x75e   :  { %16889 = vmatmul.mubr.f32.vlgmr.msra.gmra.mrb[24].mxu0 %v34689_v43  ;;  %17432 = vmatmul.mubr.f32.vlgmr.msra.gmra.mrb[40].mxu1 %v34689_v43  ;;  %v34866_v37 = vsub.f32 %v17660_v30, %v17678_v50  ;;  %v34873_v8 = vsub.f32 %v17662_v14, %v18221_v33  ;;  %v18301_v14 = vand.u32 4294901760, %v34855_v59 }
 0x75f   :  { %29043 = vmatpush1.bf16.msra.mxu0 %v29042_v19  ;;  %29091 = vmatpush1.bf16.msra.mxu1 %v29090_v47  ;;  %v17657_v19 = vld [vmem:[%s36670_s2 + $0x50] sm:$0xff]  ;;  %v34857_v47 = vsub.f32 %v17653_v21, %v18215_v45  ;;  %v17758_v21 = vand.u32 4294901760, %v34837_v46 }
 0x760   :  { %29045 = vmatprep.subr.bf16.mxu0 %v29044_v27  ;;  %29093 = vmatprep.subr.bf16.mxu1 %v29092_v32  ;;  %v34864_v27 = vpack.c.bf16 %v17678_v50, %v17674_v51  ;;  %v34868_v32 = vpack.c.bf16 %v18221_v33, %v18217_v40  ;;  %v18219_v0 = vand.u32 4294901760, %v17657_v19  ;;  %v18302_v33 = vsub.f32 %v34855_v59, %v18301_v14 }
 0x761   :  { %16983 = vmatprep.mubr.f32.mxu0 %v36977_v6  ;;  %17526 = vmatprep.mubr.f32.mxu1 %v36977_v6  ;;  %v18313_v15 = vand.u32 4294901760, %v34857_v47  ;;  %v17759_v51 = vsub.f32 %v34837_v46, %v17758_v21 }
 0x763   :  { %29047 = vmatpush1.bf16.msra.mxu0 %v29046_v28  ;;  %29095 = vmatpush1.bf16.msra.mxu1 %v29094_v4  ;;  %v17680_v28 = vand.u32 4294901760, %v17659_v10  ;;  %v18223_v4 = vand.u32 4294901760, %v17661_v13 }
 0x764   :  { %29049 = vmatprep.subr.bf16.mxu0 %v34541_v56  ;;  %29097 = vmatprep.subr.bf16.mxu1 %v34549_v5  ;;  %v17648_v56 = vld [vmem:[%s36670_s2 + $0x8] sm:$0xff] }
 0x765   :  { %v17652_v5 = vld [vmem:[%s36670_s2 + $0x28] sm:$0xff]  ;;  %v34889_v1 = vpack.c.bf16 %v18223_v4, %v18219_v0 }
 0x766   :  { %16985 = vmatmul.mubr.f32.vlgmr.msra.gmra.mrb[24].mxu0 %v34656_v44  ;;  %17528 = vmatmul.mubr.f32.vlgmr.msra.gmra.mrb[40].mxu1 %v34656_v44 }
 0x767   :  { %29051 = vmatpush1.bf16.msra.mxu0 %v34557_v18  ;;  %29099 = vmatpush1.bf16.msra.mxu1 %v34566_v7  ;;  %v17650_v18 = vld [vmem:[%s36670_s2 + $0x18] sm:$0xff]  ;;  %v17666_v7 = vand.u32 4294901760, %v17648_v56 }
 0x768   :  { %29053 = vmatprep.subr.bf16.mxu0 %v34577_v23  ;;  %29101 = vmatprep.subr.bf16.mxu1 %v34584_v42  ;;  %v17670_v23 = vand.u32 4294901760, %v17652_v5  ;;  %v17654_v42 = vld [vmem:[%s36670_s2 + $0x38] sm:$0xff]  ;;  %v18209_v52 = vand.u32 4294901760, %v17650_v18 }
 0x769   :  { %17063 = vmatprep.mubr.f32.mxu0 %v36977_v6  ;;  %17606 = vmatprep.mubr.f32.mxu1 %v36977_v6  ;;  %v18213_v53 = vand.u32 4294901760, %v17654_v42  ;;  %v34816_v25 = vsub.f32 %v17648_v56, %v17666_v7 }
 0x76a   :  { %v34814_v55 = vpack.c.bf16 %v17670_v23, %v17666_v7  ;;  %v34818_v20 = vsub.f32 %v17652_v5, %v17670_v23  ;;  %v34820_v2 = vsub.f32 %v17650_v18, %v18209_v52  ;;  %v34882_v7 = vpack.c.bf16 %v17680_v28, %v17676_v62 }
 0x76b   :  { %29055 = vmatpush1.bf16.msra.mxu0 %v34598_v41  ;;  %29103 = vmatpush1.bf16.msra.mxu1 %v34614_v36  ;;  %v17651_v41 = vld [vmem:[%s36670_s2 + $0x20] sm:$0xff]  ;;  %v34831_v54 = vpack.c.bf16 %v18213_v53, %v18209_v52  ;;  %v34833_v11 = vsub.f32 %v17654_v42, %v18213_v53  ;;  %v36848_v56 = vand.u32 4294901760, %v34816_v25  ;;  %v34884_v23 = vsub.f32 %v17659_v10, %v17680_v28 }
 0x76c   :  { %v17672_v36 = vand.u32 4294901760, %v17651_v41  ;;  %29105 = vmatprep.subr.bf16.mxu0 %v34814_v55  ;;  %v36847_v5 = vand.u32 4294901760, %v34818_v20  ;;  %v36846_v18 = vand.u32 4294901760, %v34820_v2  ;;  %v34886_v42 = vsub.f32 %v17657_v19, %v18219_v0 }
 0x76d   :  { %29153 = vmatprep.subr.bf16.mxu1 %v34831_v54  ;;  %v36845_v52 = vand.u32 4294901760, %v34833_v11  ;;  %v17753_v53 = vsub.f32 %v34816_v25, %v36848_v56  ;;  %v18314_v10 = vsub.f32 %v34857_v47, %v18313_v15  ;;  %v17776_v62 = vand.u32 4294901760, %v34859_v57 }
 0x76e   :  { %17065 = vmatmul.mubr.f32.vlgmr.msra.gmra.mrb[24].mxu0 %v34656_v44  ;;  %17608 = vmatmul.mubr.f32.vlgmr.msra.gmra.mrb[40].mxu1 %v34656_v44  ;;  %v34835_v39 = vpack.c.bf16 %v17672_v36, %v17668_v63  ;;  %v34843_v60 = vsub.f32 %v17651_v41, %v17672_v36  ;;  %v34891_v41 = vsub.f32 %v17661_v13, %v18223_v4  ;;  %v17760_v13 = vand.u32 4294901760, %v17759_v51 }
 0x76f   :  { %17738 = vmatprep.mubr.f32.mxu0 %v36977_v6  ;;  %18281 = vmatprep.mubr.f32.mxu1 %v36977_v6  ;;  %v17765_v63 = vsub.f32 %v34818_v20, %v36847_v5  ;;  %v18296_v36 = vsub.f32 %v34820_v2, %v36846_v18  ;;  %v18308_v31 = vsub.f32 %v34833_v11, %v36845_v52  ;;  %v17754_v30 = vand.u32 4294901760, %v17753_v53 }
 0x770   :  { %29107 = vmatpush1.bf16.msra.mxu0 %v34835_v39  ;;  %29155 = vmatpush1.bf16.msra.mxu1 %v34853_v16  ;;  %v17770_v17 = vand.u32 4294901760, %v34843_v60  ;;  %v17788_v0 = vand.u32 4294901760, %v34866_v37  ;;  %v18303_v4 = vand.u32 4294901760, %v18302_v33  ;;  %v18315_v53 = vand.u32 4294901760, %v18314_v10 }
 0x771   :  { %29109 = vmatprep.subr.bf16.mxu0 %v34864_v27  ;;  %29157 = vmatprep.subr.bf16.mxu1 %v34868_v32  ;;  %v17766_v48 = vand.u32 4294901760, %v17765_v63  ;;  %v18297_v24 = vand.u32 4294901760, %v18296_v36  ;;  %v18309_v45 = vand.u32 4294901760, %v18308_v31  ;;  %v17777_v63 = vsub.f32 %v34859_v57, %v17776_v62 }
 0x772   :  { %v17771_v50 = vsub.f32 %v34843_v60, %v17770_v17  ;;  %v18319_v36 = vand.u32 4294901760, %v34870_v49  ;;  %v18337_v18 = vand.u32 4294901760, %v34891_v41 }
 0x773   :  { %v29112_v40 = vpack.c.bf16 %v17766_v48, %v17754_v30  ;;  %v29160_v19 = vpack.c.bf16 %v18309_v45, %v18297_v24  ;;  %v17789_v30 = vsub.f32 %v34866_v37, %v17788_v0  ;;  %v18331_v48 = vand.u32 4294901760, %v34873_v8 }
 0x774   :  { %29111 = vmatpush1.bf16.msra.mxu0 %v34882_v7  ;;  %29159 = vmatpush1.bf16.msra.mxu1 %v34889_v1  ;;  %v17772_v28 = vand.u32 4294901760, %v17771_v50  ;;  %v17782_v24 = vand.u32 4294901760, %v34875_v26  ;;  %v34924_v45 = vpack.c.bf16 %v18315_v53, %v18303_v4  ;;  %v17778_v51 = vand.u32 4294901760, %v17777_v63  ;;  %v37209_v4 = vld [vmem:[#allocation19_spill] sm:$0xff] }
 0x775   :  { %29113 = vmatprep.subr.bf16.mxu0 %v29112_v40  ;;  %29161 = vmatprep.subr.bf16.mxu1 %v29160_v19  ;;  %v18320_v50 = vsub.f32 %v34870_v49, %v18319_v36  ;;  %v17794_v40 = vand.u32 4294901760, %v34884_v23  ;;  %v17790_v33 = vand.u32 4294901760, %v17789_v30  ;;  %v18332_v10 = vsub.f32 %v34873_v8, %v18331_v48 }
 0x776   :  { %v34919_v31 = vpack.c.bf16 %v17772_v28, %v17760_v13  ;;  %v17783_v19 = vsub.f32 %v34875_v26, %v17782_v24  ;;  %v18325_v13 = vand.u32 4294901760, %v34886_v42  ;;  %v18338_v43 = vsub.f32 %v34891_v41, %v18337_v18 }
 0x777   :  { %v18321_v28 = vand.u32 4294901760, %v18320_v50  ;;  %v17795_v52 = vsub.f32 %v34884_v23, %v17794_v40  ;;  %v34935_v53 = vpack.c.bf16 %v17790_v33, %v17778_v51  ;;  %v18333_v63 = vand.u32 4294901760, %v18332_v10 }
 0x778   :  { %v17784_v5 = vand.u32 4294901760, %v17783_v19  ;;  %v18326_v30 = vsub.f32 %v34886_v42, %v18325_v13  ;;  %v18339_v10 = vand.u32 4294901760, %v18338_v43  ;;  %v37207_v51 = vand.u32 4294901760, %v34820_v2 }
 0x779   :  { %v17796_v56 = vand.u32 4294901760, %v17795_v52  ;;  %v29164_v44 = vpack.c.bf16 %v18333_v63, %v18321_v28  ;;  %v37205_v28 = vand.u32 4294901760, %v34816_v25  ;;  %v37206_v63 = vand.u32 4294901760, %v34818_v20 }
 0x77a   :  { %v18327_v35 = vand.u32 4294901760, %v18326_v30  ;;  %v37208_v43 = vand.u32 4294901760, %v34833_v11  ;;  %v34967_v52 = vpack.c.bf16 %v18313_v15, %v18301_v14  ;;  %v34969_v19 = vpack.c.bf16 %v17788_v0, %v17776_v62 }
 0x77b   :  { %v29118_v33 = vpack.c.bf16 %v17796_v56, %v17784_v5  ;;  %v34957_v30 = vpack.c.bf16 %v37206_v63, %v37205_v28  ;;  %v34965_v5 = vpack.c.bf16 %v17770_v17, %v17758_v21  ;;  %v34971_v9 = vpack.c.bf16 %v18331_v48, %v18319_v36 }
 0x77c   :  { %v29166_v50 = vpack.c.bf16 %v18339_v10, %v18327_v35  ;;  %v34963_v56 = vpack.c.bf16 %v37208_v43, %v37207_v51  ;;  %v34973_v35 = vpack.c.bf16 %v17794_v40, %v17782_v24  ;;  %v34975_v10 = vpack.c.bf16 %v18337_v18, %v18325_v13  ;;  %v37210_v51 = vld [vmem:[#allocation20_spill] sm:$0xff] }
 0x7e1   :  { %v14831_v28 = vpop.f32.mrb[10].mxu0  ;;  %v15374_v63 = vpop.f32.mrb[26].mxu1 }
 0x7e2   :  { %v29943_v61 = vadd.f32 %v37209_v4, %v14831_v28  ;;  %v14833_v58 = vpop.f32.mrb[11].mxu0  ;;  %v15376_v38 = vpop.f32.mrb[27].mxu1  ;;  %v29964_v14 = vadd.f32 %v15374_v63, %v37010_v34 }
 0x7e3   :  { %v29945_v43 = vadd.f32 %v37210_v51, %v14833_v58  ;;  %v29965_v15 = vadd.f32 %v15376_v38, %v37011_v29 }
 0x7e4   :  { %v27498_v21 = vmul.f32 -1.442695, %v29943_v61  ;;  %v27500_v62 = vmul.f32 -1.442695, %v29964_v14 }
 0x7e5   :  { %v27499_v17 = vmul.f32 -1.442695, %v29945_v43 }
 0x7e6   :  { %30840 = vpow2.f32 %v27498_v21 }
 0x7e7   :  { %30842 = vpow2.f32 %v27499_v17 }
 0x7e8   :  { %30844 = vtanh.f32 %v29965_v15 }
 0x7e9   :  { %30846 = vpow2.f32 %v27500_v62 }
 0x7f0   :  { %v30841_v0 = vpop.eup %30840 }
 0x7f1   :  { %v15392_v18 = vadd.f32 1.0, %v30841_v0  ;;  %v30843_v36 = vpop.eup %30842  ;;  %v37211_v0 = vpack.c.bf16 %v34818_v20, %v34816_v25  ;;  %v37215_v25 = vpack.c.bf16 %v34866_v37, %v34859_v57  ;;  %v37216_v20 = vpack.c.bf16 %v34873_v8, %v34870_v49 }
 0x7f2   :  { %v15393_v48 = vadd.f32 1.0, %v30843_v36  ;;  %v30845_v24 = vpop.eup %30844 }
 0x7f3   :  { %30848 = vrcp.f32 %v15392_v18  ;;  %v30847_v40 = vpop.eup %30846  ;;  %v37212_v18 = vpack.c.bf16 %v34833_v11, %v34820_v2  ;;  %v18781_v2 = vld [vmem:[#allocation6 + $0x8] sm:$0xff] }
 0x7f4   :  { %30850 = vrcp.f32 %v15393_v48  ;;  %v15394_v4 = vadd.f32 1.0, %v30847_v40  ;;  %v18785_v11 = vld [vmem:[#allocation6 + $0x28] sm:$0xff]  ;;  %v18796_v57 = vand.u32 4294901760, %v18781_v2 }
 0x7f5   :  { %v18800_v37 = vand.u32 4294901760, %v18785_v11  ;;  %v18793_v40 = vld [vmem:[#allocation6 + $0x68] sm:$0xff] }
 0x7f6   :  { %30852 = vrcp.f32 %v15394_v4 }
 0x7fd   :  { %v30849_v58 = vpop.eup %30848 }
 0x7fe   :  { %v15403_v61 = vmul.f32 %v30849_v58, %v30845_v24  ;;  %v30851_v13 = vpop.eup %30850  ;;  %v18789_v24 = vld [vmem:[#allocation6 + $0x48] sm:$0xff]  ;;  %v35055_v58 = vpack.c.bf16 %v18800_v37, %v18796_v57 }
 0x7ff   :  { %v15402_v28 = vmul.f32 %v30851_v13, %v34259_v3 }
 0x800   :  { %v30853_v38 = vpop.eup %30852 }
 0x801   :  { %v34982_v63 = vadd.f32 %v15403_v61, %v15402_v28  ;;  %v18791_v28 = vld [vmem:[#allocation6 + $0x58] sm:$0xff] }
 0x803   :  { %30854 = vtanh.f32 %v34982_v63 }
 0x80d   :  { %v30855_v51 = vpop.eup %30854 }
 0x80e   :  { %v15406_v43 = vmul.f32 %v30855_v51, %v30853_v38  ;;  %v18795_v38 = vld [vmem:[#allocation6 + $0x78] sm:$0xff]  ;;  %v18788_v51 = vld [vmem:[#allocation6 + $0x40] sm:$0xff] }
 0x810   :  { %v17664_v21 = vsel %vm1906_vm1, %v15406_v43, 0 }
 0x811   :  { %v34986_v17 = vand.u32 4294901760, %v17664_v21 }
 0x813   :  { %v34989_v14 = vsub.f32 %v17664_v21, %v34986_v17  ;;  %v18804_v21 = vand.u32 4294901760, %v18789_v24 }
 0x815   :  { %v34992_v15 = vand.u32 4294901760, %v34989_v14 }
 0x817   :  { %v17742_v3 = vsub.f32 %v34989_v14, %v34992_v15 }
 0x819   :  { %v34996_v62 = vand.u32 4294901760, %v17742_v3  ;;  %v18792_v3 = vld [vmem:[#allocation6 + $0x60] sm:$0xff] }
 0x81b   :  { %17744 = vmatmul.mubr.f32.vlgmr.msra.gmra.mrb[12].mxu0 %v34996_v62  ;;  %18287 = vmatmul.mubr.f32.vlgmr.msra.gmra.mrb[28].mxu1 %v34996_v62 }
 0x81c   :  { %29115 = vmatpush1.bf16.msra.mxu0 %v34919_v31  ;;  %29163 = vmatpush1.bf16.msra.mxu1 %v34924_v45  ;;  %v37214_v31 = vpack.c.bf16 %v34857_v47, %v34855_v59  ;;  %v18783_v59 = vld [vmem:[#allocation6 + $0x18] sm:$0xff] }
 0x81d   :  { %29117 = vmatprep.subr.bf16.mxu0 %v34935_v53  ;;  %29165 = vmatprep.subr.bf16.mxu1 %v29164_v44  ;;  %v37213_v44 = vpack.c.bf16 %v34843_v60, %v34837_v46  ;;  %v37217_v46 = vpack.c.bf16 %v34884_v23, %v34875_v26  ;;  %v37218_v60 = vpack.c.bf16 %v34891_v41, %v34886_v42  ;;  %v18787_v47 = vld [vmem:[#allocation6 + $0x38] sm:$0xff]  ;;  %v19339_v49 = vand.u32 4294901760, %v18783_v59  ;;  %v18780_v26 = vld [vmem:[#allocation6] sm:$0xff] }
 0x81e   :  { %17854 = vmatprep.mubr.f32.mxu0 %v36977_v6  ;;  %18397 = vmatprep.mubr.f32.mxu1 %v36977_v6  ;;  %v19343_v8 = vand.u32 4294901760, %v18787_v47  ;;  %v18784_v23 = vld [vmem:[#allocation6 + $0x20] sm:$0xff]  ;;  %v35043_v42 = vsub.f32 %v18781_v2, %v18796_v57  ;;  %v35045_v41 = vsub.f32 %v18785_v11, %v18800_v37  ;;  %v18798_v45 = vand.u32 4294901760, %v18780_v26  ;;  %v18790_v57 = vld [vmem:[#allocation6 + $0x50] sm:$0xff] }
 0x81f   :  { %v18802_v53 = vand.u32 4294901760, %v18784_v23  ;;  %v35047_v36 = vsub.f32 %v18783_v59, %v19339_v49  ;;  %v19351_v2 = vand.u32 4294901760, %v18795_v38  ;;  %v18806_v11 = vand.u32 4294901760, %v18788_v51 }
 0x820   :  { %29119 = vmatpush1.bf16.msra.mxu0 %v29118_v33  ;;  %29167 = vmatpush1.bf16.msra.mxu1 %v29166_v50  ;;  %v18782_v50 = vld [vmem:[#allocation6 + $0x10] sm:$0xff]  ;;  %v35049_v48 = vsub.f32 %v18787_v47, %v19343_v8  ;;  %v35057_v61 = vpack.c.bf16 %v19343_v8, %v19339_v49  ;;  %v18810_v47 = vand.u32 4294901760, %v18792_v3 }
 0x821   :  { %29121 = vmatprep.subr.bf16.mxu0 %v37211_v0  ;;  %29169 = vmatprep.subr.bf16.mxu1 %v37212_v18  ;;  %v18786_v33 = vld [vmem:[#allocation6 + $0x30] sm:$0xff]  ;;  %v19341_v13 = vand.u32 4294901760, %v18782_v50  ;;  %v35059_v43 = vpack.c.bf16 %v18802_v53, %v18798_v45  ;;  %v18882_v0 = vand.u32 4294901760, %v35043_v42  ;;  %v18894_v18 = vand.u32 4294901760, %v35045_v41 }
 0x822   :  { %v19345_v4 = vand.u32 4294901760, %v18786_v33 }
 0x823   :  { %17856 = vmatmul.mubr.f32.vlgmr.msra.gmra.mrb[12].mxu0 %v34986_v17  ;;  %18399 = vmatmul.mubr.f32.vlgmr.msra.gmra.mrb[28].mxu1 %v34986_v17 }
 0x824   :  { %29123 = vmatpush1.bf16.msra.mxu0 %v37213_v44  ;;  %29171 = vmatpush1.bf16.msra.mxu1 %v37214_v31  ;;  %v36863_v44 = vand.u32 4294901760, %v35047_v36  ;;  %v36861_v31 = vand.u32 4294901760, %v35049_v48  ;;  %v35079_v59 = vsub.f32 %v18786_v33, %v19345_v4  ;;  %v35109_v33 = vsub.f32 %v18795_v38, %v19351_v2 }
 0x825   :  { %29125 = vmatprep.subr.bf16.mxu0 %v37215_v25  ;;  %29173 = vmatprep.subr.bf16.mxu1 %v37216_v20  ;;  %v35071_v25 = vsub.f32 %v18784_v23, %v18802_v53  ;;  %v19347_v20 = vand.u32 4294901760, %v18791_v28  ;;  %v19349_v53 = vand.u32 4294901760, %v18790_v57 }
 0x826   :  { %17942 = vmatprep.mubr.f32.mxu0 %v36977_v6  ;;  %18485 = vmatprep.mubr.f32.mxu1 %v36977_v6  ;;  %v19426_v8 = vsub.f32 %v35047_v36, %v36863_v44  ;;  %v36857_v38 = vand.u32 4294901760, %v35079_v59 }
 0x827   :  { %v35103_v23 = vpack.c.bf16 %v19351_v2, %v19347_v20 }
 0x828   :  { %29127 = vmatpush1.bf16.msra.mxu0 %v37217_v46  ;;  %29175 = vmatpush1.bf16.msra.mxu1 %v37218_v60  ;;  %v35075_v46 = vpack.c.bf16 %v19345_v4, %v19341_v13  ;;  %v35077_v60 = vsub.f32 %v18782_v50, %v19341_v13  ;;  %v36859_v4 = vand.u32 4294901760, %v35071_v25 }
 0x829   :  { %29129 = vmatprep.subr.bf16.mxu0 %v34814_v55  ;;  %29177 = vmatprep.subr.bf16.mxu1 %v34831_v54 }
 0x82b   :  { %17945 = vmatmul.mubr.f32.vlgmr.msra.gmra.mrb[12].mxu0 %v34989_v14  ;;  %18488 = vmatmul.mubr.f32.vlgmr.msra.gmra.mrb[28].mxu1 %v34989_v14 }
 0x82c   :  { %29131 = vmatpush1.bf16.msra.mxu0 %v34835_v39  ;;  %29179 = vmatpush1.bf16.msra.mxu1 %v34853_v16 }
 0x82d   :  { %29133 = vmatprep.subr.bf16.mxu0 %v34864_v27  ;;  %29181 = vmatprep.subr.bf16.mxu1 %v34868_v32 }
 0x82e   :  { %18023 = vmatprep.mubr.f32.mxu0 %v36977_v6  ;;  %18566 = vmatprep.mubr.f32.mxu1 %v36977_v6 }
 0x830   :  { %29135 = vmatpush1.bf16.msra.mxu0 %v34882_v7  ;;  %29183 = vmatpush1.bf16.msra.mxu1 %v34889_v1 }
 0x831   :  { %29137 = vmatprep.subr.bf16.mxu0 %v34957_v30  ;;  %29185 = vmatprep.subr.bf16.mxu1 %v34963_v56  ;;  %v35065_v30 = vsub.f32 %v18780_v26, %v18798_v45  ;;  %v18808_v56 = vand.u32 4294901760, %v18793_v40  ;;  %v19438_v26 = vsub.f32 %v35049_v48, %v36861_v31  ;;  %v35105_v45 = vsub.f32 %v18791_v28, %v19347_v20 }
 0x832   :  { %v36858_v28 = vand.u32 4294901760, %v35077_v60 }
 0x833   :  { %18027 = vmatmul.mubr.f32.vlgmr.msra.gmra.mrb[12].mxu0 %v34992_v15  ;;  %18570 = vmatmul.mubr.f32.vlgmr.msra.gmra.mrb[28].mxu1 %v34992_v15  ;;  %v35091_v37 = vpack.c.bf16 %v18808_v56, %v18804_v21  ;;  %v35093_v49 = vsub.f32 %v18793_v40, %v18808_v56  ;;  %v35113_v40 = vsub.f32 %v18788_v51, %v18806_v11 }
 0x834   :  { %29139 = vmatpush1.bf16.msra.mxu0 %v34965_v5  ;;  %29187 = vmatpush1.bf16.msra.mxu1 %v34967_v52  ;;  %v18794_v5 = vld [vmem:[#allocation6 + $0x70] sm:$0xff]  ;;  %v35083_v52 = vsub.f32 %v18789_v24, %v18804_v21  ;;  %v35111_v24 = vpack.c.bf16 %v18810_v47, %v18806_v11  ;;  %v35124_v51 = vsub.f32 %v18792_v3, %v18810_v47  ;;  %v36868_v3 = vand.u32 4294901760, %v35109_v33 }
 0x835   :  { %29141 = vmatprep.subr.bf16.mxu0 %v34969_v19  ;;  %29189 = vmatprep.subr.bf16.mxu1 %v34971_v9  ;;  %v18883_v19 = vsub.f32 %v35043_v42, %v18882_v0  ;;  %v18895_v9 = vsub.f32 %v35045_v41, %v18894_v18  ;;  %v19353_v50 = vand.u32 4294901760, %v18794_v5  ;;  %v35126_v56 = vsub.f32 %v18790_v57, %v19349_v53 }
 0x836   :  { %18121 = vmatprep.mubr.f32.mxu0 %v36977_v6  ;;  %18664 = vmatprep.mubr.f32.mxu1 %v36977_v6  ;;  %v36855_v21 = vand.u32 4294901760, %v35083_v52  ;;  %v36856_v2 = vand.u32 4294901760, %v35093_v49 }
 0x837   :  { %v18884_v13 = vand.u32 4294901760, %v18883_v19  ;;  %v35128_v20 = vsub.f32 %v18794_v5, %v19353_v50  ;;  %v35133_v11 = vpack.c.bf16 %v19353_v50, %v19349_v53  ;;  %v19444_v5 = vsub.f32 %v35079_v59, %v36857_v38 }
 0x838   :  { %29143 = vmatpush1.bf16.msra.mxu0 %v34973_v35  ;;  %29191 = vmatpush1.bf16.msra.mxu1 %v34975_v10  ;;  %v36860_v35 = vand.u32 4294901760, %v35065_v30  ;;  %v18896_v10 = vand.u32 4294901760, %v18895_v9  ;;  %v18907_v19 = vsub.f32 %v35083_v52, %v36855_v21  ;;  %v36867_v9 = vand.u32 4294901760, %v35113_v40 }
 0x839   :  { %29145 = vmatprep.subr.bf16.mxu0 %v34814_v55  ;;  %29193 = vmatprep.subr.bf16.mxu1 %v34831_v54  ;;  %v19427_v55 = vand.u32 4294901760, %v19426_v8  ;;  %v19439_v54 = vand.u32 4294901760, %v19438_v26  ;;  %v18919_v53 = vsub.f32 %v35093_v49, %v36856_v2  ;;  %v36866_v50 = vand.u32 4294901760, %v35124_v51 }
 0x83a   :  { %v29208_v47 = vpack.c.bf16 %v18896_v10, %v18884_v13  ;;  %v36865_v13 = vand.u32 4294901760, %v35126_v56  ;;  %v36864_v10 = vand.u32 4294901760, %v35128_v20  ;;  %v18908_v31 = vand.u32 4294901760, %v18907_v19 }
 0x83b   :  { %18123 = vmatmul.mubr.f32.vlgmr.msra.gmra.mrb[12].mxu0 %v34986_v17  ;;  %18666 = vmatmul.mubr.f32.vlgmr.msra.gmra.mrb[28].mxu1 %v34986_v17  ;;  %v29256_v57 = vpack.c.bf16 %v19439_v54, %v19427_v55 }
 0x83c   :  { %29147 = vmatpush1.bf16.msra.mxu0 %v34835_v39  ;;  %29195 = vmatpush1.bf16.msra.mxu1 %v34853_v16  ;;  %v18889_v39 = vsub.f32 %v35065_v30, %v36860_v35  ;;  %v36862_v16 = vand.u32 4294901760, %v35105_v45  ;;  %v19445_v35 = vand.u32 4294901760, %v19444_v5 }
 0x83d   :  { %29149 = vmatprep.subr.bf16.mxu0 %v34864_v27  ;;  %29197 = vmatprep.subr.bf16.mxu1 %v34868_v32  ;;  %v18901_v27 = vsub.f32 %v35071_v25, %v36859_v4  ;;  %v19432_v32 = vsub.f32 %v35077_v60, %v36858_v28 }
 0x83e   :  { %18201 = vmatprep.mubr.f32.mxu0 %v36977_v6  ;;  %18744 = vmatprep.mubr.f32.mxu1 %v36977_v6  ;;  %v18890_v38 = vand.u32 4294901760, %v18889_v39  ;;  %v18925_v39 = vsub.f32 %v35124_v51, %v36866_v50 }
 0x83f   :  { %v18902_v28 = vand.u32 4294901760, %v18901_v27  ;;  %v19433_v4 = vand.u32 4294901760, %v19432_v32  ;;  %v19456_v27 = vsub.f32 %v35126_v56, %v36865_v13  ;;  %v19468_v32 = vsub.f32 %v35128_v20, %v36864_v10 }
 0x840   :  { %29151 = vmatpush1.bf16.msra.mxu0 %v34882_v7  ;;  %29199 = vmatpush1.bf16.msra.mxu1 %v34889_v1  ;;  %v19450_v7 = vsub.f32 %v35105_v45, %v36862_v16  ;;  %v19462_v1 = vsub.f32 %v35109_v33, %v36868_v3  ;;  %v18913_v16 = vsub.f32 %v35113_v40, %v36867_v9  ;;  %v37219_v9 = vld [vmem:[#allocation11_spill] sm:$0xff] }
 0x841   :  { %v17066_v8 = vpop.f32.mrb[24].mxu0  ;;  %v17609_v26 = vpop.f32.mrb[40].mxu1  ;;  %29201 = vmatprep.subr.bf16.mxu0 %v35055_v58  ;;  %29249 = vmatprep.subr.bf16.mxu1 %v35057_v61  ;;  %v19457_v13 = vand.u32 4294901760, %v19456_v27  ;;  %v19469_v50 = vand.u32 4294901760, %v19468_v32  ;;  %v19887_v27 = vld [vmem:[#allocation8 + $0x28] sm:$0xff]  ;;  %v19885_v32 = vld [vmem:[#allocation8 + $0x18] sm:$0xff] }
 0x842   :  { %v29986_v55 = vadd.f32 %v17066_v8, %v32215_v12  ;;  %v17068_v54 = vpop.f32.mrb[25].mxu0  ;;  %v17611_v21 = vpop.f32.mrb[41].mxu1  ;;  %v19451_v5 = vand.u32 4294901760, %v19450_v7  ;;  %v19463_v19 = vand.u32 4294901760, %v19462_v1  ;;  %v18914_v10 = vand.u32 4294901760, %v18913_v16 }
 0x843   :  { %v29987_v2 = vadd.f32 %v17068_v54, %v37075_v22  ;;  %18203 = vmatmul.mubr.f32.vlgmr.msra.gmra.mrb[12].mxu0 %v34986_v17  ;;  %18746 = vmatmul.mubr.f32.vlgmr.msra.gmra.mrb[28].mxu1 %v34986_v17  ;;  %v29258_v54 = vpack.c.bf16 %v19445_v35, %v19433_v4  ;;  %v29988_v3 = vadd.f32 %v17609_v26, %v37219_v9 }
 0x844   :  { %v27501_v8 = vmul.f32 -1.442695, %v29986_v55  ;;  %29203 = vmatpush1.bf16.msra.mxu0 %v35059_v43  ;;  %29251 = vmatpush1.bf16.msra.mxu1 %v35075_v46  ;;  %v29210_v55 = vpack.c.bf16 %v18902_v28, %v18890_v38  ;;  %v29260_v7 = vpack.c.bf16 %v19463_v19, %v19451_v5  ;;  %v29262_v28 = vpack.c.bf16 %v19469_v50, %v19457_v13  ;;  %v19882_v19 = vld [vmem:[#allocation8] sm:$0xff] }
 0x845   :  { %v27502_v44 = vmul.f32 -1.442695, %v29987_v2  ;;  %29205 = vmatprep.subr.bf16.mxu0 %v35091_v37  ;;  %29253 = vmatprep.subr.bf16.mxu1 %v35103_v23  ;;  %v18920_v2 = vand.u32 4294901760, %v18919_v53  ;;  %v27503_v38 = vmul.f32 -1.442695, %v29988_v3  ;;  %v29216_v16 = vpack.c.bf16 %v35045_v41, %v35043_v42 }
 0x846   :  { %30856 = vpow2.f32 %v27501_v8  ;;  %18868 = vmatprep.mubr.f32.mxu0 %v36977_v6  ;;  %19411 = vmatprep.mubr.f32.mxu1 %v36977_v6  ;;  %v18926_v8 = vand.u32 4294901760, %v18925_v39  ;;  %v29266_v3 = vpack.c.bf16 %v35079_v59, %v35077_v60  ;;  %v29220_v26 = vpack.c.bf16 %v35093_v49, %v35083_v52  ;;  %v19883_v39 = vld [vmem:[#allocation8 + $0x8] sm:$0xff] }
 0x847   :  { %30858 = vpow2.f32 %v27502_v44  ;;  %v29212_v53 = vpack.c.bf16 %v18920_v2, %v18908_v31  ;;  %v37220_v44 = vld [vmem:[#allocation48_spill] sm:$0xff]  ;;  %v29264_v31 = vpack.c.bf16 %v35049_v48, %v35047_v36  ;;  %v29268_v50 = vpack.c.bf16 %v35109_v33, %v35105_v45  ;;  %v19889_v2 = vld [vmem:[#allocation8 + $0x38] sm:$0xff] }
 0x848   :  { %29207 = vmatpush1.bf16.msra.mxu0 %v35111_v24  ;;  %29255 = vmatpush1.bf16.msra.mxu1 %v35133_v11  ;;  %v29989_v35 = vadd.f32 %v17611_v21, %v37220_v44  ;;  %v29214_v4 = vpack.c.bf16 %v18926_v8, %v18914_v10  ;;  %v29218_v21 = vpack.c.bf16 %v35071_v25, %v35065_v30  ;;  %v37225_v41 = vand.u32 4294901760, %v35077_v60 }
 0x849   :  { %29209 = vmatprep.subr.bf16.mxu0 %v29208_v47  ;;  %29257 = vmatprep.subr.bf16.mxu1 %v29256_v57  ;;  %v29222_v10 = vpack.c.bf16 %v35124_v51, %v35113_v40  ;;  %v29270_v1 = vpack.c.bf16 %v35128_v20, %v35126_v56  ;;  %v29232_v8 = vpack.c.bf16 %v18894_v18, %v18882_v0  ;;  %v37226_v0 = vand.u32 4294901760, %v35079_v59 }
 0x84a   :  { %30860 = vtanh.f32 %v29989_v35  ;;  %v20444_v18 = vand.u32 4294901760, %v19885_v32  ;;  %v37229_v59 = vand.u32 4294901760, %v35105_v45 }
 0x84b   :  { %18874 = vmatmul.mubr.f32.vlgmr.msra.gmra.mrb[26].mxu0 %v34996_v62  ;;  %19417 = vmatmul.mubr.f32.vlgmr.msra.gmra.mrb[42].mxu1 %v34996_v62  ;;  %30862 = vpow2.f32 %v27503_v38 }
 0x84c   :  { %29211 = vmatpush1.bf16.msra.mxu0 %v29210_v55  ;;  %29259 = vmatpush1.bf16.msra.mxu1 %v29258_v54  ;;  %v19886_v55 = vld [vmem:[#allocation8 + $0x20] sm:$0xff] }
 0x84d   :  { %29213 = vmatprep.subr.bf16.mxu0 %v29212_v53  ;;  %29261 = vmatprep.subr.bf16.mxu1 %v29260_v7  ;;  %v37221_v53 = vand.u32 4294901760, %v35047_v36  ;;  %v37222_v7 = vand.u32 4294901760, %v35049_v48  ;;  %v29282_v36 = vpack.c.bf16 %v37226_v0, %v37225_v41  ;;  %v20448_v48 = vand.u32 4294901760, %v19889_v2  ;;  %v19893_v41 = vld [vmem:[#allocation8 + $0x58] sm:$0xff] }
 0x84e   :  { %18984 = vmatprep.mubr.f32.mxu0 %v36977_v6  ;;  %19527 = vmatprep.mubr.f32.mxu1 %v36977_v6  ;;  %v19897_v0 = vld [vmem:[#allocation8 + $0x78] sm:$0xff] }
 0x84f   :  { %v29280_v35 = vpack.c.bf16 %v37222_v7, %v37221_v53 }
 0x850   :  { %v30857_v62 = vpop.eup %30856  ;;  %29215 = vmatpush1.bf16.msra.mxu0 %v29214_v4  ;;  %29263 = vmatpush1.bf16.msra.mxu1 %v29262_v28  ;;  %v19901_v4 = vand.u32 4294901760, %v19883_v39  ;;  %v19905_v28 = vand.u32 4294901760, %v19887_v27 }
 0x851   :  { %v17627_v47 = vadd.f32 1.0, %v30857_v62  ;;  %v30859_v57 = vpop.eup %30858  ;;  %29217 = vmatprep.subr.bf16.mxu0 %v29216_v16  ;;  %29265 = vmatprep.subr.bf16.mxu1 %v29264_v31  ;;  %v37223_v16 = vand.u32 4294901760, %v35065_v30  ;;  %v37227_v62 = vand.u32 4294901760, %v35083_v52  ;;  %v37231_v52 = vand.u32 4294901760, %v35113_v40 }
 0x852   :  { %v17628_v13 = vadd.f32 1.0, %v30859_v57  ;;  %v19888_v57 = vld [vmem:[#allocation8 + $0x30] sm:$0xff]  ;;  %v35268_v45 = vsub.f32 %v19887_v27, %v19905_v28  ;;  %v35272_v40 = vpack.c.bf16 %v20448_v48, %v20444_v18 }
 0x853   :  { %30864 = vrcp.f32 %v17627_v47  ;;  %18986 = vmatmul.mubr.f32.vlgmr.msra.gmra.mrb[26].mxu0 %v34986_v17  ;;  %19529 = vmatmul.mubr.f32.vlgmr.msra.gmra.mrb[42].mxu1 %v34986_v17  ;;  %v37228_v47 = vand.u32 4294901760, %v35093_v49  ;;  %v37232_v49 = vand.u32 4294901760, %v35124_v51  ;;  %v35274_v51 = vsub.f32 %v19885_v32, %v20444_v18  ;;  %v19894_v32 = vld [vmem:[#allocation8 + $0x60] sm:$0xff] }
 0x854   :  { %30866 = vrcp.f32 %v17628_v13  ;;  %29219 = vmatpush1.bf16.msra.mxu0 %v29218_v21  ;;  %29267 = vmatpush1.bf16.msra.mxu1 %v29266_v3  ;;  %v30861_v5 = vpop.eup %30860  ;;  %v19903_v21 = vand.u32 4294901760, %v19882_v19  ;;  %v19884_v3 = vld [vmem:[#allocation8 + $0x10] sm:$0xff] }
 0x855   :  { %29221 = vmatprep.subr.bf16.mxu0 %v29220_v26  ;;  %29269 = vmatprep.subr.bf16.mxu1 %v29268_v50  ;;  %v30863_v54 = vpop.eup %30862  ;;  %v29236_v30 = vpack.c.bf16 %v37228_v47, %v37227_v62  ;;  %v37230_v50 = vand.u32 4294901760, %v35109_v33  ;;  %v19891_v33 = vld [vmem:[#allocation8 + $0x48] sm:$0xff] }
 0x856   :  { %19072 = vmatprep.mubr.f32.mxu0 %v36977_v6  ;;  %19615 = vmatprep.mubr.f32.mxu1 %v36977_v6  ;;  %v17629_v26 = vadd.f32 1.0, %v30863_v54  ;;  %v37235_v54 = vld [vmem:[#allocation39_spill] sm:$0xff] }
 0x857   :  { %v29284_v13 = vpack.c.bf16 %v37230_v50, %v37229_v59 }
 0x858   :  { %29223 = vmatpush1.bf16.msra.mxu0 %v29222_v10  ;;  %29271 = vmatpush1.bf16.msra.mxu1 %v29270_v1  ;;  %v29238_v10 = vpack.c.bf16 %v37232_v49, %v37231_v52  ;;  %v37233_v1 = vand.u32 4294901760, %v35126_v56  ;;  %v20446_v56 = vand.u32 4294901760, %v19884_v3  ;;  %30868 = vrcp.f32 %v17629_v26 }
 0x859   :  { %29225 = vmatprep.subr.bf16.mxu0 %v35055_v58  ;;  %29273 = vmatprep.subr.bf16.mxu1 %v35057_v61  ;;  %v19999_v26 = vand.u32 4294901760, %v35268_v45 }
 0x85b   :  { %19075 = vmatmul.mubr.f32.vlgmr.msra.gmra.mrb[26].mxu0 %v34989_v14  ;;  %19618 = vmatmul.mubr.f32.vlgmr.msra.gmra.mrb[42].mxu1 %v34989_v14  ;;  %v37224_v14 = vand.u32 4294901760, %v35071_v25  ;;  %v19907_v25 = vand.u32 4294901760, %v19886_v55 }
 0x85c   :  { %29227 = vmatpush1.bf16.msra.mxu0 %v35059_v43  ;;  %29275 = vmatpush1.bf16.msra.mxu1 %v35075_v46 }
 0x85d   :  { %v30865_v38 = vpop.eup %30864  ;;  %v29234_v42 = vpack.c.bf16 %v37224_v14, %v37223_v16  ;;  %29229 = vmatprep.subr.bf16.mxu0 %v35091_v37  ;;  %29277 = vmatprep.subr.bf16.mxu1 %v35103_v23  ;;  %v35266_v16 = vsub.f32 %v19883_v39, %v19901_v4  ;;  %v19895_v14 = vld [vmem:[#allocation8 + $0x68] sm:$0xff]  ;;  %v35278_v39 = vsub.f32 %v19889_v2, %v20448_v48  ;;  %v20456_v2 = vand.u32 4294901760, %v19897_v0  ;;  %v19892_v48 = vld [vmem:[#allocation8 + $0x50] sm:$0xff] }
 0x85e   :  { %v17638_v31 = vmul.f32 %v30865_v38, %v30861_v5  ;;  %v30867_v60 = vpop.eup %30866  ;;  %19153 = vmatprep.mubr.f32.mxu0 %v36977_v6  ;;  %19696 = vmatprep.mubr.f32.mxu1 %v36977_v6  ;;  %v37234_v5 = vand.u32 4294901760, %v35128_v20  ;;  %v35264_v38 = vpack.c.bf16 %v19905_v28, %v19901_v4  ;;  %v20450_v20 = vand.u32 4294901760, %v19888_v57 }
 0x85f   :  { %v17637_v7 = vmul.f32 %v30867_v60, %v37235_v54  ;;  %v35280_v27 = vpack.c.bf16 %v19907_v25, %v19903_v21  ;;  %v35282_v4 = vsub.f32 %v19882_v19, %v19903_v21  ;;  %v19909_v28 = vand.u32 4294901760, %v19891_v33  ;;  %v19890_v60 = vld [vmem:[#allocation8 + $0x40] sm:$0xff] }
 0x860   :  { %v29286_v53 = vpack.c.bf16 %v37234_v5, %v37233_v1  ;;  %29231 = vmatpush1.bf16.msra.mxu0 %v35111_v24  ;;  %29279 = vmatpush1.bf16.msra.mxu1 %v35133_v11  ;;  %v19913_v47 = vand.u32 4294901760, %v19895_v14  ;;  %v35287_v18 = vsub.f32 %v19886_v55, %v19907_v25  ;;  %v35291_v19 = vsub.f32 %v19884_v3, %v20446_v56 }
 0x861   :  { %v35276_v62 = vadd.f32 %v17638_v31, %v17637_v7  ;;  %29233 = vmatprep.subr.bf16.mxu0 %v29232_v8  ;;  %29281 = vmatprep.subr.bf16.mxu1 %v29280_v35  ;;  %v20452_v8 = vand.u32 4294901760, %v19893_v41  ;;  %v35289_v35 = vpack.c.bf16 %v20450_v20, %v20446_v56  ;;  %v19896_v31 = vld [vmem:[#allocation8 + $0x70] sm:$0xff]  ;;  %v19987_v21 = vand.u32 4294901760, %v35266_v16 }
 0x862   :  { %v35295_v59 = vsub.f32 %v19888_v57, %v20450_v20  ;;  %v19915_v55 = vand.u32 4294901760, %v19894_v32  ;;  %v20530_v25 = vand.u32 4294901760, %v35274_v51  ;;  %v35304_v3 = vsub.f32 %v19895_v14, %v19913_v47 }
 0x863   :  { %37236 = vst [vmem:[#allocation44_spill] sm:$0xff] %v35276_v62  ;;  %30870 = vtanh.f32 %v35276_v62  ;;  %19157 = vmatmul.mubr.f32.vlgmr.msra.gmra.mrb[26].mxu0 %v34992_v15  ;;  %19700 = vmatmul.mubr.f32.vlgmr.msra.gmra.mrb[42].mxu1 %v34992_v15  ;;  %v19911_v15 = vand.u32 4294901760, %v19890_v60  ;;  %v36875_v50 = vand.u32 4294901760, %v35278_v39  ;;  %v35309_v57 = vsub.f32 %v19893_v41, %v20452_v8 }
 0x864   :  { %29235 = vmatpush1.bf16.msra.mxu0 %v29234_v42  ;;  %29283 = vmatpush1.bf16.msra.mxu1 %v29282_v36  ;;  %v35300_v42 = vpack.c.bf16 %v19913_v47, %v19909_v28  ;;  %v35302_v36 = vsub.f32 %v19891_v33, %v19909_v28  ;;  %v20458_v52 = vand.u32 4294901760, %v19896_v31  ;;  %v35311_v49 = vsub.f32 %v19897_v0, %v20456_v2  ;;  %v30869_v0 = vpop.eup %30868 }
 0x865   :  { %29237 = vmatprep.subr.bf16.mxu0 %v29236_v30  ;;  %29285 = vmatprep.subr.bf16.mxu1 %v29284_v13  ;;  %v35307_v30 = vpack.c.bf16 %v20456_v2, %v20452_v8  ;;  %v20454_v13 = vand.u32 4294901760, %v19892_v48  ;;  %v19988_v1 = vsub.f32 %v35266_v16, %v19987_v21  ;;  %v20000_v5 = vsub.f32 %v35268_v45, %v19999_v26 }
 0x866   :  { %19251 = vmatprep.mubr.f32.mxu0 %v36977_v6  ;;  %19794 = vmatprep.mubr.f32.mxu1 %v36977_v6  ;;  %v35321_v54 = vpack.c.bf16 %v19915_v55, %v19911_v15  ;;  %v35323_v7 = vsub.f32 %v19890_v60, %v19911_v15  ;;  %v20543_v33 = vsub.f32 %v35278_v39, %v36875_v50  ;;  %v36873_v14 = vand.u32 4294901760, %v35282_v4 }
 0x867   :  { %v36871_v56 = vand.u32 4294901760, %v35291_v19  ;;  %v36870_v20 = vand.u32 4294901760, %v35295_v59  ;;  %v36869_v41 = vand.u32 4294901760, %v35302_v36  ;;  %v35344_v28 = vsub.f32 %v19892_v48, %v20454_v13 }
 0x868   :  { %29239 = vmatpush1.bf16.msra.mxu0 %v29238_v10  ;;  %29287 = vmatpush1.bf16.msra.mxu1 %v29286_v53  ;;  %v20531_v10 = vsub.f32 %v35274_v51, %v20530_v25  ;;  %v35328_v53 = vsub.f32 %v19894_v32, %v19915_v55  ;;  %v35346_v47 = vsub.f32 %v19896_v31, %v20458_v52  ;;  %v19989_v60 = vand.u32 4294901760, %v19988_v1 }
 0x869   :  { %29241 = vmatprep.subr.bf16.mxu0 %v35055_v58  ;;  %29289 = vmatprep.subr.bf16.mxu1 %v35057_v61  ;;  %v36872_v58 = vand.u32 4294901760, %v35287_v18  ;;  %v35337_v61 = vpack.c.bf16 %v20458_v52, %v20454_v13  ;;  %v20001_v32 = vand.u32 4294901760, %v20000_v5  ;;  %v36874_v15 = vand.u32 4294901760, %v35304_v3 }
 0x86a   :  { %v20532_v2 = vand.u32 4294901760, %v20531_v10  ;;  %v36876_v55 = vand.u32 4294901760, %v35309_v57  ;;  %v20544_v48 = vand.u32 4294901760, %v20543_v33  ;;  %v19994_v31 = vsub.f32 %v35282_v4, %v36873_v14 }
 0x86b   :  { %19253 = vmatmul.mubr.f32.vlgmr.msra.gmra.mrb[26].mxu0 %v34986_v17  ;;  %19796 = vmatmul.mubr.f32.vlgmr.msra.gmra.mrb[42].mxu1 %v34986_v17  ;;  %v20549_v13 = vsub.f32 %v35295_v59, %v36870_v20  ;;  %v20012_v52 = vsub.f32 %v35302_v36, %v36869_v41  ;;  %v36880_v1 = vand.u32 4294901760, %v35323_v7  ;;  %v36879_v10 = vand.u32 4294901760, %v35328_v53 }
 0x86c   :  { %29243 = vmatpush1.bf16.msra.mxu0 %v35059_v43  ;;  %29291 = vmatpush1.bf16.msra.mxu1 %v35075_v46  ;;  %v20566_v43 = vand.u32 4294901760, %v35311_v49  ;;  %v36878_v33 = vand.u32 4294901760, %v35344_v28  ;;  %v29304_v41 = vpack.c.bf16 %v20001_v32, %v19989_v60  ;;  %v29352_v20 = vpack.c.bf16 %v20544_v48, %v20532_v2 }
 0x86d   :  { %v30871_v8 = vpop.eup %30870  ;;  %29245 = vmatprep.subr.bf16.mxu0 %v35091_v37  ;;  %29293 = vmatprep.subr.bf16.mxu1 %v35103_v23  ;;  %v20006_v37 = vsub.f32 %v35287_v18, %v36872_v58  ;;  %v20537_v23 = vsub.f32 %v35291_v19, %v36871_v56  ;;  %v19995_v56 = vand.u32 4294901760, %v19994_v31  ;;  %v20550_v50 = vand.u32 4294901760, %v20549_v13 }
 0x86e   :  { %19331 = vmatprep.mubr.f32.mxu0 %v36977_v6  ;;  %19874 = vmatprep.mubr.f32.mxu1 %v36977_v6  ;;  %v17641_v46 = vmul.f32 %v30871_v8, %v30869_v0  ;;  %v36877_v0 = vand.u32 4294901760, %v35346_v47  ;;  %v20013_v60 = vand.u32 4294901760, %v20012_v52  ;;  %v20030_v32 = vsub.f32 %v35328_v53, %v36879_v10 }
 0x86f   :  { %v20007_v58 = vand.u32 4294901760, %v20006_v37 }
 0x870   :  { %29247 = vmatpush1.bf16.msra.mxu0 %v35111_v24  ;;  %29295 = vmatpush1.bf16.msra.mxu1 %v35133_v11  ;;  %v19899_v5 = vsel %vm1906_vm1, %v17641_v46, 0  ;;  %v20024_v24 = vsub.f32 %v35304_v3, %v36874_v15  ;;  %v20555_v11 = vsub.f32 %v35309_v57, %v36876_v55  ;;  %v20567_v46 = vsub.f32 %v35311_v49, %v20566_v43 }
 0x871   :  { %29297 = vmatprep.subr.bf16.mxu0 %v35264_v38  ;;  %29345 = vmatprep.subr.bf16.mxu1 %v35272_v40  ;;  %v35379_v8 = vand.u32 4294901760, %v19899_v5  ;;  %v20538_v15 = vand.u32 4294901760, %v20537_v23  ;;  %v20018_v55 = vsub.f32 %v35323_v7, %v36880_v1  ;;  %v20573_v2 = vsub.f32 %v35346_v47, %v36877_v0 }
 0x872   :  { %v20025_v31 = vand.u32 4294901760, %v20024_v24  ;;  %v20556_v37 = vand.u32 4294901760, %v20555_v11  ;;  %v20568_v23 = vand.u32 4294901760, %v20567_v46  ;;  %v29306_v52 = vpack.c.bf16 %v20007_v58, %v19995_v56 }
 0x873   :  { %37237 = vst [vmem:[#allocation45_spill] sm:$0xff] %v35379_v8  ;;  %19333 = vmatmul.mubr.f32.vlgmr.msra.gmra.mrb[26].mxu0 %v34986_v17  ;;  %19876 = vmatmul.mubr.f32.vlgmr.msra.gmra.mrb[42].mxu1 %v34986_v17  ;;  %v35393_v14 = vsub.f32 %v19899_v5, %v35379_v8  ;;  %v20561_v17 = vsub.f32 %v35344_v28, %v36878_v33  ;;  %v20019_v0 = vand.u32 4294901760, %v20018_v55  ;;  %v20031_v33 = vand.u32 4294901760, %v20030_v32 }
 0x874   :  { %29299 = vmatpush1.bf16.msra.mxu0 %v35280_v27  ;;  %29347 = vmatpush1.bf16.msra.mxu1 %v35289_v35  ;;  %v29354_v5 = vpack.c.bf16 %v20550_v50, %v20538_v15  ;;  %v20574_v1 = vand.u32 4294901760, %v20573_v2  ;;  %v29308_v11 = vpack.c.bf16 %v20025_v31, %v20013_v60  ;;  %v29356_v46 = vpack.c.bf16 %v20568_v23, %v20556_v37 }
 0x875   :  { %37238 = vst [vmem:[#allocation46_spill] sm:$0xff] %v35393_v14  ;;  %29301 = vmatprep.subr.bf16.mxu0 %v35300_v42  ;;  %29349 = vmatprep.subr.bf16.mxu1 %v35307_v30  ;;  %v35412_v48 = vand.u32 4294901760, %v35393_v14  ;;  %v20562_v10 = vand.u32 4294901760, %v20561_v17  ;;  %v29310_v50 = vpack.c.bf16 %v20031_v33, %v20019_v0  ;;  %v29312_v56 = vpack.c.bf16 %v35268_v45, %v35266_v16 }
 0x876   :  { %19973 = vmatprep.mubr.f32.mxu0 %v36977_v6  ;;  %20516 = vmatprep.mubr.f32.mxu1 %v36977_v6  ;;  %v29360_v15 = vpack.c.bf16 %v35278_v39, %v35274_v51  ;;  %v29316_v55 = vpack.c.bf16 %v35304_v3, %v35302_v36  ;;  %v29366_v33 = vpack.c.bf16 %v35346_v47, %v35344_v28  ;;  %v37241_v60 = vand.u32 4294901760, %v35278_v39 }
 0x877   :  { %37239 = vst [vmem:[#allocation13_spill] sm:$0xff] %v35412_v48  ;;  %v19977_v13 = vsub.f32 %v35393_v14, %v35412_v48  ;;  %v29358_v58 = vpack.c.bf16 %v20574_v1, %v20562_v10  ;;  %v29364_v1 = vpack.c.bf16 %v35311_v49, %v35309_v57  ;;  %v29318_v10 = vpack.c.bf16 %v35328_v53, %v35323_v7  ;;  %v21020_v49 = vld [vmem:[%s36670_s2] sm:$0xff] }
 0x878   :  { %29303 = vmatpush1.bf16.msra.mxu0 %v35321_v54  ;;  %29351 = vmatpush1.bf16.msra.mxu1 %v35337_v61  ;;  %v29328_v0 = vpack.c.bf16 %v19999_v26, %v19987_v21  ;;  %v29376_v32 = vpack.c.bf16 %v37241_v60, %v20530_v25  ;;  %v37242_v17 = vand.u32 4294901760, %v35282_v4  ;;  %v37243_v16 = vand.u32 4294901760, %v35287_v18 }
 0x879   :  { %v35420_v24 = vand.u32 4294901760, %v19977_v13  ;;  %29305 = vmatprep.subr.bf16.mxu0 %v29304_v41  ;;  %29353 = vmatprep.subr.bf16.mxu1 %v29352_v20  ;;  %v29314_v20 = vpack.c.bf16 %v35287_v18, %v35282_v4  ;;  %v29362_v41 = vpack.c.bf16 %v35295_v59, %v35291_v19  ;;  %v37244_v45 = vand.u32 4294901760, %v35291_v19 }
 0x87a   :  { %v29330_v2 = vpack.c.bf16 %v37243_v16, %v37242_v17  ;;  %v37245_v51 = vand.u32 4294901760, %v35295_v59  ;;  %v37246_v39 = vand.u32 4294901760, %v35302_v36  ;;  %v37247_v26 = vand.u32 4294901760, %v35304_v3  ;;  %v21032_v17 = vld [vmem:[%s36670_s2 + $0x60] sm:$0xff] }
 0x87b   :  { %37240 = vst [vmem:[#allocation14_spill] sm:$0xff] %v35420_v24  ;;  %19979 = vmatmul.mubr.f32.vlgmr.msra.gmra.mrb[26].mxu0 %v35420_v24  ;;  %20522 = vmatmul.mubr.f32.vlgmr.msra.gmra.mrb[42].mxu1 %v35420_v24  ;;  %v37248_v31 = vand.u32 4294901760, %v35309_v57  ;;  %v37249_v18 = vand.u32 4294901760, %v35323_v7  ;;  %v37250_v19 = vand.u32 4294901760, %v35328_v53  ;;  %v37251_v36 = vand.u32 4294901760, %v35344_v28  ;;  %v21022_v28 = vld [vmem:[%s36670_s2 + $0x10] sm:$0xff] }
 0x87c   :  { %29307 = vmatpush1.bf16.msra.mxu0 %v29306_v52  ;;  %29355 = vmatpush1.bf16.msra.mxu1 %v29354_v5  ;;  %v29378_v21 = vpack.c.bf16 %v37245_v51, %v37244_v45  ;;  %v29332_v25 = vpack.c.bf16 %v37247_v26, %v37246_v39  ;;  %v37252_v3 = vand.u32 4294901760, %v35346_v47  ;;  %v21041_v53 = vand.u32 4294901760, %v21020_v49  ;;  %v21026_v47 = vld [vmem:[%s36670_s2 + $0x30] sm:$0xff] }
 0x87d   :  { %29309 = vmatprep.subr.bf16.mxu0 %v29308_v11  ;;  %29357 = vmatprep.subr.bf16.mxu1 %v29356_v46  ;;  %v29380_v4 = vpack.c.bf16 %v20566_v43, %v37248_v31  ;;  %v29334_v59 = vpack.c.bf16 %v37250_v19, %v37249_v18  ;;  %v21029_v43 = vld [vmem:[%s36670_s2 + $0x48] sm:$0xff]  ;;  %v21031_v46 = vld [vmem:[%s36670_s2 + $0x58] sm:$0xff]  ;;  %v21034_v26 = vld [vmem:[%s36670_s2 + $0x70] sm:$0xff] }
 0x87e   :  { %20089 = vmatprep.mubr.f32.mxu0 %v36977_v6  ;;  %20632 = vmatprep.mubr.f32.mxu1 %v36977_v6  ;;  %v29382_v37 = vpack.c.bf16 %v37252_v3, %v37251_v36  ;;  %v21033_v11 = vld [vmem:[%s36670_s2 + $0x68] sm:$0xff]  ;;  %v21590_v60 = vand.u32 4294901760, %v21031_v46 }
 0x880   :  { %29311 = vmatpush1.bf16.msra.mxu0 %v29310_v50  ;;  %29359 = vmatpush1.bf16.msra.mxu1 %v29358_v58  ;;  %v21035_v50 = vld [vmem:[%s36670_s2 + $0x78] sm:$0xff]  ;;  %v35593_v18 = vsub.f32 %v21031_v46, %v21590_v60 }
 0x881   :  { %29313 = vmatprep.subr.bf16.mxu0 %v29312_v56  ;;  %29361 = vmatprep.subr.bf16.mxu1 %v29360_v15 }
 0x883   :  { %20091 = vmatmul.mubr.f32.vlgmr.msra.gmra.mrb[26].mxu0 %v35379_v8  ;;  %20634 = vmatmul.mubr.f32.vlgmr.msra.gmra.mrb[42].mxu1 %v35379_v8 }
 0x884   :  { %29315 = vmatpush1.bf16.msra.mxu0 %v29314_v20  ;;  %29363 = vmatpush1.bf16.msra.mxu1 %v29362_v41  ;;  %v35560_v20 = vsub.f32 %v21020_v49, %v21041_v53  ;;  %v21028_v41 = vld [vmem:[%s36670_s2 + $0x40] sm:$0xff] }
 0x885   :  { %29317 = vmatprep.subr.bf16.mxu0 %v29316_v55  ;;  %29365 = vmatprep.subr.bf16.mxu1 %v29364_v1  ;;  %v21584_v1 = vand.u32 4294901760, %v21022_v28  ;;  %v21049_v16 = vand.u32 4294901760, %v21028_v41 }
 0x886   :  { %20177 = vmatprep.mubr.f32.mxu0 %v36977_v6  ;;  %20720 = vmatprep.mubr.f32.mxu1 %v36977_v6 }
 0x887   :  { %v35578_v51 = vsub.f32 %v21022_v28, %v21584_v1  ;;  %v35598_v36 = vsub.f32 %v21028_v41, %v21049_v16 }
 0x888   :  { %29319 = vmatpush1.bf16.msra.mxu0 %v29318_v10  ;;  %29367 = vmatpush1.bf16.msra.mxu1 %v29366_v33  ;;  %v21588_v10 = vand.u32 4294901760, %v21026_v47  ;;  %v21047_v33 = vand.u32 4294901760, %v21029_v43 }
 0x889   :  { %29321 = vmatprep.subr.bf16.mxu0 %v35264_v38  ;;  %29369 = vmatprep.subr.bf16.mxu1 %v35272_v40 }
 0x88a   :  { %v35576_v45 = vpack.c.bf16 %v21588_v10, %v21584_v1  ;;  %v35582_v39 = vsub.f32 %v21029_v43, %v21047_v33 }
 0x88b   :  { %20180 = vmatmul.mubr.f32.vlgmr.msra.gmra.mrb[26].mxu0 %v35393_v14  ;;  %20723 = vmatmul.mubr.f32.vlgmr.msra.gmra.mrb[42].mxu1 %v35393_v14 }
 0x88c   :  { %29323 = vmatpush1.bf16.msra.mxu0 %v35280_v27  ;;  %29371 = vmatpush1.bf16.msra.mxu1 %v35289_v35 }
 0x88d   :  { %29325 = vmatprep.subr.bf16.mxu0 %v35300_v42  ;;  %29373 = vmatprep.subr.bf16.mxu1 %v35307_v30 }
 0x88e   :  { %20258 = vmatprep.mubr.f32.mxu0 %v36977_v6  ;;  %20801 = vmatprep.mubr.f32.mxu1 %v36977_v6 }
 0x890   :  { %29327 = vmatpush1.bf16.msra.mxu0 %v35321_v54  ;;  %29375 = vmatpush1.bf16.msra.mxu1 %v35337_v61 }
 0x891   :  { %29329 = vmatprep.subr.bf16.mxu0 %v29328_v0  ;;  %29377 = vmatprep.subr.bf16.mxu1 %v29376_v32  ;;  %v21051_v0 = vand.u32 4294901760, %v21033_v11  ;;  %v21594_v32 = vand.u32 4294901760, %v21035_v50 }
 0x893   :  { %20262 = vmatmul.mubr.f32.vlgmr.msra.gmra.mrb[26].mxu0 %v35412_v48  ;;  %20805 = vmatmul.mubr.f32.vlgmr.msra.gmra.mrb[42].mxu1 %v35412_v48  ;;  %v35589_v31 = vsub.f32 %v21033_v11, %v21051_v0  ;;  %v35596_v19 = vsub.f32 %v21035_v50, %v21594_v32  ;;  %v21674_v50 = vand.u32 4294901760, %v35578_v51 }
 0x894   :  { %29331 = vmatpush1.bf16.msra.mxu0 %v29330_v2  ;;  %29379 = vmatpush1.bf16.msra.mxu1 %v29378_v21  ;;  %v21030_v2 = vld [vmem:[%s36670_s2 + $0x50] sm:$0xff]  ;;  %v35580_v21 = vsub.f32 %v21026_v47, %v21588_v10  ;;  %v21131_v47 = vand.u32 4294901760, %v35560_v20 }
 0x895   :  { %29333 = vmatprep.subr.bf16.mxu0 %v29332_v25  ;;  %29381 = vmatprep.subr.bf16.mxu1 %v29380_v4  ;;  %v35587_v25 = vpack.c.bf16 %v21051_v0, %v21047_v33  ;;  %v35591_v4 = vpack.c.bf16 %v21594_v32, %v21590_v60  ;;  %v21592_v3 = vand.u32 4294901760, %v21030_v2  ;;  %v21675_v32 = vsub.f32 %v35578_v51, %v21674_v50 }
 0x896   :  { %20356 = vmatprep.mubr.f32.mxu0 %v36977_v6  ;;  %20899 = vmatprep.mubr.f32.mxu1 %v36977_v6  ;;  %v21686_v41 = vand.u32 4294901760, %v35580_v21  ;;  %v21132_v33 = vsub.f32 %v35560_v20, %v21131_v47 }
 0x898   :  { %29335 = vmatpush1.bf16.msra.mxu0 %v29334_v59  ;;  %29383 = vmatpush1.bf16.msra.mxu1 %v29382_v37  ;;  %v21053_v59 = vand.u32 4294901760, %v21032_v17  ;;  %v21596_v37 = vand.u32 4294901760, %v21034_v26 }
 0x899   :  { %29337 = vmatprep.subr.bf16.mxu0 %v35264_v38  ;;  %29385 = vmatprep.subr.bf16.mxu1 %v35272_v40  ;;  %v21021_v38 = vld [vmem:[%s36670_s2 + $0x8] sm:$0xff] }
 0x89a   :  { %v21025_v40 = vld [vmem:[%s36670_s2 + $0x28] sm:$0xff]  ;;  %v35612_v49 = vpack.c.bf16 %v21596_v37, %v21592_v3 }
 0x89b   :  { %20358 = vmatmul.mubr.f32.vlgmr.msra.gmra.mrb[26].mxu0 %v35379_v8  ;;  %20901 = vmatmul.mubr.f32.vlgmr.msra.gmra.mrb[42].mxu1 %v35379_v8 }
 0x89c   :  { %29339 = vmatpush1.bf16.msra.mxu0 %v35280_v27  ;;  %29387 = vmatpush1.bf16.msra.mxu1 %v35289_v35  ;;  %v21023_v27 = vld [vmem:[%s36670_s2 + $0x18] sm:$0xff]  ;;  %v21039_v35 = vand.u32 4294901760, %v21021_v38 }
 0x89d   :  { %29341 = vmatprep.subr.bf16.mxu0 %v35300_v42  ;;  %29389 = vmatprep.subr.bf16.mxu1 %v35307_v30  ;;  %v21043_v42 = vand.u32 4294901760, %v21025_v40  ;;  %v21027_v30 = vld [vmem:[%s36670_s2 + $0x38] sm:$0xff]  ;;  %v21582_v57 = vand.u32 4294901760, %v21023_v27 }
 0x89e   :  { %20436 = vmatprep.mubr.f32.mxu0 %v36977_v6  ;;  %20979 = vmatprep.mubr.f32.mxu1 %v36977_v6  ;;  %v21586_v7 = vand.u32 4294901760, %v21027_v30  ;;  %v35539_v13 = vsub.f32 %v21021_v38, %v21039_v35 }
 0x89f   :  { %v35537_v23 = vpack.c.bf16 %v21043_v42, %v21039_v35  ;;  %v35541_v52 = vsub.f32 %v21025_v40, %v21043_v42  ;;  %v35543_v5 = vsub.f32 %v21023_v27, %v21582_v57  ;;  %v35605_v35 = vpack.c.bf16 %v21053_v59, %v21049_v16 }
 0x8a0   :  { %29343 = vmatpush1.bf16.msra.mxu0 %v35321_v54  ;;  %29391 = vmatpush1.bf16.msra.mxu1 %v35337_v61  ;;  %v21024_v54 = vld [vmem:[%s36670_s2 + $0x20] sm:$0xff]  ;;  %v35554_v58 = vpack.c.bf16 %v21586_v7, %v21582_v57  ;;  %v35556_v56 = vsub.f32 %v21027_v30, %v21586_v7  ;;  %v36884_v38 = vand.u32 4294901760, %v35539_v13  ;;  %v35607_v42 = vsub.f32 %v21032_v17, %v21053_v59 }
 0x8a1   :  { %v21045_v61 = vand.u32 4294901760, %v21024_v54  ;;  %29393 = vmatprep.subr.bf16.mxu0 %v35537_v23  ;;  %v36883_v40 = vand.u32 4294901760, %v35541_v52  ;;  %v36882_v27 = vand.u32 4294901760, %v35543_v5  ;;  %v35609_v30 = vsub.f32 %v21030_v2, %v21592_v3 }
 0x8a2   :  { %29441 = vmatprep.subr.bf16.mxu1 %v35554_v58  ;;  %v36881_v57 = vand.u32 4294901760, %v35556_v56  ;;  %v21126_v7 = vsub.f32 %v35539_v13, %v36884_v38  ;;  %v21687_v17 = vsub.f32 %v35580_v21, %v21686_v41  ;;  %v21149_v16 = vand.u32 4294901760, %v35582_v39 }
 0x8a3   :  { %20438 = vmatmul.mubr.f32.vlgmr.msra.gmra.mrb[26].mxu0 %v35379_v8  ;;  %20981 = vmatmul.mubr.f32.vlgmr.msra.gmra.mrb[42].mxu1 %v35379_v8  ;;  %v35558_v15 = vpack.c.bf16 %v21045_v61, %v21041_v53  ;;  %v35566_v55 = vsub.f32 %v21024_v54, %v21045_v61  ;;  %v35614_v54 = vsub.f32 %v21034_v26, %v21596_v37  ;;  %v21133_v26 = vand.u32 4294901760, %v21132_v33 }
 0x8a4   :  { %21111 = vmatprep.mubr.f32.mxu0 %v36977_v6  ;;  %21654 = vmatprep.mubr.f32.mxu1 %v36977_v6  ;;  %v21138_v53 = vsub.f32 %v35541_v52, %v36883_v40  ;;  %v21669_v61 = vsub.f32 %v35543_v5, %v36882_v27  ;;  %v21681_v28 = vsub.f32 %v35556_v56, %v36881_v57  ;;  %v21127_v11 = vand.u32 4294901760, %v21126_v7 }
 0x8a5   :  { %29395 = vmatpush1.bf16.msra.mxu0 %v35558_v15  ;;  %29443 = vmatpush1.bf16.msra.mxu1 %v35576_v45  ;;  %v21143_v43 = vand.u32 4294901760, %v35566_v55  ;;  %v21161_v3 = vand.u32 4294901760, %v35589_v31  ;;  %v21676_v37 = vand.u32 4294901760, %v21675_v32  ;;  %v21688_v7 = vand.u32 4294901760, %v21687_v17 }
 0x8a6   :  { %29397 = vmatprep.subr.bf16.mxu0 %v35587_v25  ;;  %29445 = vmatprep.subr.bf16.mxu1 %v35591_v4  ;;  %v21139_v46 = vand.u32 4294901760, %v21138_v53  ;;  %v21670_v1 = vand.u32 4294901760, %v21669_v61  ;;  %v21682_v10 = vand.u32 4294901760, %v21681_v28  ;;  %v21150_v53 = vsub.f32 %v35582_v39, %v21149_v16 }
 0x8a7   :  { %v21144_v0 = vsub.f32 %v35566_v55, %v21143_v43  ;;  %v21692_v61 = vand.u32 4294901760, %v35593_v18  ;;  %v21710_v27 = vand.u32 4294901760, %v35614_v54 }
 0x8a8   :  { %v29400_v60 = vpack.c.bf16 %v21139_v46, %v21127_v11  ;;  %v29448_v2 = vpack.c.bf16 %v21682_v10, %v21670_v1  ;;  %v21162_v11 = vsub.f32 %v35589_v31, %v21161_v3  ;;  %v21704_v46 = vand.u32 4294901760, %v35596_v19 }
 0x8a9   :  { %29399 = vmatpush1.bf16.msra.mxu0 %v35605_v35  ;;  %29447 = vmatpush1.bf16.msra.mxu1 %v35612_v49  ;;  %v21145_v59 = vand.u32 4294901760, %v21144_v0  ;;  %v21155_v1 = vand.u32 4294901760, %v35598_v36  ;;  %v35647_v10 = vpack.c.bf16 %v21688_v7, %v21676_v37  ;;  %v21151_v33 = vand.u32 4294901760, %v21150_v53  ;;  %v37257_v37 = vld [vmem:[#allocation21_spill] sm:$0xff] }
 0x8aa   :  { %29401 = vmatprep.subr.bf16.mxu0 %v29400_v60  ;;  %29449 = vmatprep.subr.bf16.mxu1 %v29448_v2  ;;  %v21693_v0 = vsub.f32 %v35593_v18, %v21692_v61  ;;  %v21167_v60 = vand.u32 4294901760, %v35607_v42  ;;  %v21163_v32 = vand.u32 4294901760, %v21162_v11  ;;  %v21705_v17 = vsub.f32 %v35596_v19, %v21704_v46 }
 0x8ab   :  { %v35642_v28 = vpack.c.bf16 %v21145_v59, %v21133_v26  ;;  %v21156_v2 = vsub.f32 %v35598_v36, %v21155_v1  ;;  %v21698_v26 = vand.u32 4294901760, %v35609_v30  ;;  %v21711_v48 = vsub.f32 %v35614_v54, %v21710_v27 }
 0x8ac   :  { %v21694_v59 = vand.u32 4294901760, %v21693_v0  ;;  %v21168_v57 = vsub.f32 %v35607_v42, %v21167_v60  ;;  %v35658_v7 = vpack.c.bf16 %v21163_v32, %v21151_v33  ;;  %v21706_v53 = vand.u32 4294901760, %v21705_v17 }
 0x8ad   :  { %v21157_v40 = vand.u32 4294901760, %v21156_v2  ;;  %v21699_v11 = vsub.f32 %v35609_v30, %v21698_v26  ;;  %v21712_v17 = vand.u32 4294901760, %v21711_v48  ;;  %v37255_v33 = vand.u32 4294901760, %v35543_v5 }
 0x8ae   :  { %v21169_v38 = vand.u32 4294901760, %v21168_v57  ;;  %v29452_v8 = vpack.c.bf16 %v21706_v53, %v21694_v59  ;;  %v37253_v59 = vand.u32 4294901760, %v35539_v13  ;;  %v37254_v53 = vand.u32 4294901760, %v35541_v52 }
 0x8af   :  { %v21700_v24 = vand.u32 4294901760, %v21699_v11  ;;  %v37256_v48 = vand.u32 4294901760, %v35556_v56  ;;  %v35690_v57 = vpack.c.bf16 %v21686_v41, %v21674_v50  ;;  %v35692_v2 = vpack.c.bf16 %v21161_v3, %v21149_v16 }
 0x8b0   :  { %v29406_v32 = vpack.c.bf16 %v21169_v38, %v21157_v40  ;;  %v35680_v11 = vpack.c.bf16 %v37254_v53, %v37253_v59  ;;  %v35688_v40 = vpack.c.bf16 %v21143_v43, %v21131_v47  ;;  %v35694_v14 = vpack.c.bf16 %v21704_v46, %v21692_v61 }
 0x8b1   :  { %v29454_v0 = vpack.c.bf16 %v21712_v17, %v21700_v24  ;;  %v35686_v38 = vpack.c.bf16 %v37256_v48, %v37255_v33  ;;  %v35696_v24 = vpack.c.bf16 %v21167_v60, %v21155_v1  ;;  %v35698_v17 = vpack.c.bf16 %v21710_v27, %v21698_v26  ;;  %v37258_v33 = vld [vmem:[#allocation22_spill] sm:$0xff] }
 0x916   :  { %v18204_v59 = vpop.f32.mrb[12].mxu0  ;;  %v18747_v53 = vpop.f32.mrb[28].mxu1 }
 0x917   :  { %v29947_v62 = vadd.f32 %v37257_v37, %v18204_v59  ;;  %v18206_v44 = vpop.f32.mrb[13].mxu0  ;;  %v18749_v9 = vpop.f32.mrb[29].mxu1  ;;  %v29966_v50 = vadd.f32 %v18747_v53, %v37010_v34 }
 0x918   :  { %v29949_v48 = vadd.f32 %v37258_v33, %v18206_v44  ;;  %v29967_v41 = vadd.f32 %v18749_v9, %v37011_v29 }
 0x919   :  { %v27504_v47 = vmul.f32 -1.442695, %v29947_v62  ;;  %v27506_v16 = vmul.f32 -1.442695, %v29966_v50 }
 0x91a   :  { %v27505_v43 = vmul.f32 -1.442695, %v29949_v48 }
 0x91b   :  { %30872 = vpow2.f32 %v27504_v47 }
 0x91c   :  { %30874 = vpow2.f32 %v27505_v43 }
 0x91d   :  { %30876 = vtanh.f32 %v29967_v41 }
 0x91e   :  { %30878 = vpow2.f32 %v27506_v16 }
 0x925   :  { %v30873_v3 = vpop.eup %30872 }
 0x926   :  { %v18765_v27 = vadd.f32 1.0, %v30873_v3  ;;  %v30875_v61 = vpop.eup %30874  ;;  %v37259_v3 = vpack.c.bf16 %v35541_v52, %v35539_v13  ;;  %v37263_v13 = vpack.c.bf16 %v35589_v31, %v35582_v39  ;;  %v37264_v52 = vpack.c.bf16 %v35596_v19, %v35593_v18 }
 0x927   :  { %v18766_v46 = vadd.f32 1.0, %v30875_v61  ;;  %v30877_v1 = vpop.eup %30876 }
 0x928   :  { %30880 = vrcp.f32 %v18765_v27  ;;  %v30879_v60 = vpop.eup %30878  ;;  %v37260_v27 = vpack.c.bf16 %v35556_v56, %v35543_v5  ;;  %v22154_v5 = vld [vmem:[#allocation6 + $0x8] sm:$0xff] }
 0x929   :  { %30882 = vrcp.f32 %v18766_v46  ;;  %v18767_v37 = vadd.f32 1.0, %v30879_v60  ;;  %v22158_v56 = vld [vmem:[#allocation6 + $0x28] sm:$0xff]  ;;  %v22169_v39 = vand.u32 4294901760, %v22154_v5 }
 0x92a   :  { %v22173_v31 = vand.u32 4294901760, %v22158_v56  ;;  %v22166_v60 = vld [vmem:[#allocation6 + $0x68] sm:$0xff] }
 0x92b   :  { %30884 = vrcp.f32 %v18767_v37 }
 0x932   :  { %v30881_v44 = vpop.eup %30880 }
 0x933   :  { %v18776_v62 = vmul.f32 %v30881_v44, %v30877_v1  ;;  %v30883_v26 = vpop.eup %30882  ;;  %v22162_v1 = vld [vmem:[#allocation6 + $0x48] sm:$0xff]  ;;  %v35778_v44 = vpack.c.bf16 %v22173_v31, %v22169_v39 }
 0x934   :  { %v18775_v59 = vmul.f32 %v30883_v26, %v34982_v63 }
 0x935   :  { %v30885_v9 = vpop.eup %30884 }
 0x936   :  { %v35705_v53 = vadd.f32 %v18776_v62, %v18775_v59  ;;  %v22164_v59 = vld [vmem:[#allocation6 + $0x58] sm:$0xff] }
 0x938   :  { %30886 = vtanh.f32 %v35705_v53 }
 0x942   :  { %v30887_v33 = vpop.eup %30886 }
 0x943   :  { %v18779_v48 = vmul.f32 %v30887_v33, %v30885_v9  ;;  %v22168_v9 = vld [vmem:[#allocation6 + $0x78] sm:$0xff]  ;;  %v22161_v33 = vld [vmem:[#allocation6 + $0x40] sm:$0xff] }
 0x945   :  { %v21037_v47 = vsel %vm1906_vm1, %v18779_v48, 0 }
 0x946   :  { %v35709_v43 = vand.u32 4294901760, %v21037_v47 }
 0x948   :  { %v35712_v50 = vsub.f32 %v21037_v47, %v35709_v43  ;;  %v22177_v47 = vand.u32 4294901760, %v22162_v1 }
 0x94a   :  { %v35715_v41 = vand.u32 4294901760, %v35712_v50 }
 0x94c   :  { %v21115_v63 = vsub.f32 %v35712_v50, %v35715_v41 }
 0x94e   :  { %v35719_v16 = vand.u32 4294901760, %v21115_v63  ;;  %v22165_v63 = vld [vmem:[#allocation6 + $0x60] sm:$0xff] }
 0x950   :  { %21117 = vmatmul.mubr.f32.vlgmr.msra.gmra.mrb[14].mxu0 %v35719_v16  ;;  %21660 = vmatmul.mubr.f32.vlgmr.msra.gmra.mrb[30].mxu1 %v35719_v16 }
 0x951   :  { %29403 = vmatpush1.bf16.msra.mxu0 %v35642_v28  ;;  %29451 = vmatpush1.bf16.msra.mxu1 %v35647_v10  ;;  %v37262_v28 = vpack.c.bf16 %v35580_v21, %v35578_v51  ;;  %v22156_v51 = vld [vmem:[#allocation6 + $0x18] sm:$0xff] }
 0x952   :  { %29405 = vmatprep.subr.bf16.mxu0 %v35658_v7  ;;  %29453 = vmatprep.subr.bf16.mxu1 %v29452_v8  ;;  %v37261_v8 = vpack.c.bf16 %v35566_v55, %v35560_v20  ;;  %v37265_v20 = vpack.c.bf16 %v35607_v42, %v35598_v36  ;;  %v37266_v55 = vpack.c.bf16 %v35614_v54, %v35609_v30  ;;  %v22160_v21 = vld [vmem:[#allocation6 + $0x38] sm:$0xff]  ;;  %v22712_v18 = vand.u32 4294901760, %v22156_v51  ;;  %v22153_v36 = vld [vmem:[#allocation6] sm:$0xff] }
 0x953   :  { %21227 = vmatprep.mubr.f32.mxu0 %v36977_v6  ;;  %21770 = vmatprep.mubr.f32.mxu1 %v36977_v6  ;;  %v22716_v19 = vand.u32 4294901760, %v22160_v21  ;;  %v22157_v42 = vld [vmem:[#allocation6 + $0x20] sm:$0xff]  ;;  %v35766_v30 = vsub.f32 %v22154_v5, %v22169_v39  ;;  %v35768_v54 = vsub.f32 %v22158_v56, %v22173_v31  ;;  %v22171_v10 = vand.u32 4294901760, %v22153_v36  ;;  %v22163_v39 = vld [vmem:[#allocation6 + $0x50] sm:$0xff] }
 0x954   :  { %v22175_v7 = vand.u32 4294901760, %v22157_v42  ;;  %v35770_v61 = vsub.f32 %v22156_v51, %v22712_v18  ;;  %v22724_v5 = vand.u32 4294901760, %v22168_v9  ;;  %v22179_v56 = vand.u32 4294901760, %v22161_v33 }
 0x955   :  { %29407 = vmatpush1.bf16.msra.mxu0 %v29406_v32  ;;  %29455 = vmatpush1.bf16.msra.mxu1 %v29454_v0  ;;  %v22155_v0 = vld [vmem:[#allocation6 + $0x10] sm:$0xff]  ;;  %v35772_v46 = vsub.f32 %v22160_v21, %v22716_v19  ;;  %v35780_v62 = vpack.c.bf16 %v22716_v19, %v22712_v18  ;;  %v22183_v21 = vand.u32 4294901760, %v22165_v63 }
 0x956   :  { %29409 = vmatprep.subr.bf16.mxu0 %v37259_v3  ;;  %29457 = vmatprep.subr.bf16.mxu1 %v37260_v27  ;;  %v22159_v32 = vld [vmem:[#allocation6 + $0x30] sm:$0xff]  ;;  %v22714_v26 = vand.u32 4294901760, %v22155_v0  ;;  %v35782_v48 = vpack.c.bf16 %v22175_v7, %v22171_v10  ;;  %v22255_v3 = vand.u32 4294901760, %v35766_v30  ;;  %v22267_v27 = vand.u32 4294901760, %v35768_v54 }
 0x957   :  { %v22718_v37 = vand.u32 4294901760, %v22159_v32 }
 0x958   :  { %21229 = vmatmul.mubr.f32.vlgmr.msra.gmra.mrb[14].mxu0 %v35709_v43  ;;  %21772 = vmatmul.mubr.f32.vlgmr.msra.gmra.mrb[30].mxu1 %v35709_v43 }
 0x959   :  { %29411 = vmatpush1.bf16.msra.mxu0 %v37261_v8  ;;  %29459 = vmatpush1.bf16.msra.mxu1 %v37262_v28  ;;  %v36899_v8 = vand.u32 4294901760, %v35770_v61  ;;  %v36897_v28 = vand.u32 4294901760, %v35772_v46  ;;  %v35802_v51 = vsub.f32 %v22159_v32, %v22718_v37  ;;  %v35832_v32 = vsub.f32 %v22168_v9, %v22724_v5 }
 0x95a   :  { %29413 = vmatprep.subr.bf16.mxu0 %v37263_v13  ;;  %29461 = vmatprep.subr.bf16.mxu1 %v37264_v52  ;;  %v35794_v13 = vsub.f32 %v22157_v42, %v22175_v7  ;;  %v22720_v52 = vand.u32 4294901760, %v22164_v59  ;;  %v22722_v7 = vand.u32 4294901760, %v22163_v39 }
 0x95b   :  { %21315 = vmatprep.mubr.f32.mxu0 %v36977_v6  ;;  %21858 = vmatprep.mubr.f32.mxu1 %v36977_v6  ;;  %v22799_v19 = vsub.f32 %v35770_v61, %v36899_v8  ;;  %v36893_v9 = vand.u32 4294901760, %v35802_v51 }
 0x95c   :  { %v35826_v42 = vpack.c.bf16 %v22724_v5, %v22720_v52 }
 0x95d   :  { %29415 = vmatpush1.bf16.msra.mxu0 %v37265_v20  ;;  %29463 = vmatpush1.bf16.msra.mxu1 %v37266_v55  ;;  %v35798_v20 = vpack.c.bf16 %v22718_v37, %v22714_v26  ;;  %v35800_v55 = vsub.f32 %v22155_v0, %v22714_v26  ;;  %v36895_v37 = vand.u32 4294901760, %v35794_v13 }
 0x95e   :  { %29417 = vmatprep.subr.bf16.mxu0 %v35537_v23  ;;  %29465 = vmatprep.subr.bf16.mxu1 %v35554_v58 }
 0x960   :  { %21318 = vmatmul.mubr.f32.vlgmr.msra.gmra.mrb[14].mxu0 %v35712_v50  ;;  %21861 = vmatmul.mubr.f32.vlgmr.msra.gmra.mrb[30].mxu1 %v35712_v50 }
 0x961   :  { %29419 = vmatpush1.bf16.msra.mxu0 %v35558_v15  ;;  %29467 = vmatpush1.bf16.msra.mxu1 %v35576_v45 }
 0x962   :  { %29421 = vmatprep.subr.bf16.mxu0 %v35587_v25  ;;  %29469 = vmatprep.subr.bf16.mxu1 %v35591_v4 }
 0x963   :  { %21396 = vmatprep.mubr.f32.mxu0 %v36977_v6  ;;  %21939 = vmatprep.mubr.f32.mxu1 %v36977_v6 }
 0x965   :  { %29423 = vmatpush1.bf16.msra.mxu0 %v35605_v35  ;;  %29471 = vmatpush1.bf16.msra.mxu1 %v35612_v49 }
 0x966   :  { %29425 = vmatprep.subr.bf16.mxu0 %v35680_v11  ;;  %29473 = vmatprep.subr.bf16.mxu1 %v35686_v38  ;;  %v35788_v11 = vsub.f32 %v22153_v36, %v22171_v10  ;;  %v22181_v38 = vand.u32 4294901760, %v22166_v60  ;;  %v22811_v36 = vsub.f32 %v35772_v46, %v36897_v28  ;;  %v35828_v10 = vsub.f32 %v22164_v59, %v22720_v52 }
 0x967   :  { %v36894_v59 = vand.u32 4294901760, %v35800_v55 }
 0x968   :  { %21400 = vmatmul.mubr.f32.vlgmr.msra.gmra.mrb[14].mxu0 %v35715_v41  ;;  %21943 = vmatmul.mubr.f32.vlgmr.msra.gmra.mrb[30].mxu1 %v35715_v41  ;;  %v35814_v31 = vpack.c.bf16 %v22181_v38, %v22177_v47  ;;  %v35816_v18 = vsub.f32 %v22166_v60, %v22181_v38  ;;  %v35836_v60 = vsub.f32 %v22161_v33, %v22179_v56 }
 0x969   :  { %29427 = vmatpush1.bf16.msra.mxu0 %v35688_v40  ;;  %29475 = vmatpush1.bf16.msra.mxu1 %v35690_v57  ;;  %v22167_v40 = vld [vmem:[#allocation6 + $0x70] sm:$0xff]  ;;  %v35806_v57 = vsub.f32 %v22162_v1, %v22177_v47  ;;  %v35834_v1 = vpack.c.bf16 %v22183_v21, %v22179_v56  ;;  %v35847_v33 = vsub.f32 %v22165_v63, %v22183_v21  ;;  %v36904_v63 = vand.u32 4294901760, %v35832_v32 }
 0x96a   :  { %29429 = vmatprep.subr.bf16.mxu0 %v35692_v2  ;;  %29477 = vmatprep.subr.bf16.mxu1 %v35694_v14  ;;  %v22256_v2 = vsub.f32 %v35766_v30, %v22255_v3  ;;  %v22268_v14 = vsub.f32 %v35768_v54, %v22267_v27  ;;  %v22726_v0 = vand.u32 4294901760, %v22167_v40  ;;  %v35849_v38 = vsub.f32 %v22163_v39, %v22722_v7 }
 0x96b   :  { %21494 = vmatprep.mubr.f32.mxu0 %v36977_v6  ;;  %22037 = vmatprep.mubr.f32.mxu1 %v36977_v6  ;;  %v36891_v47 = vand.u32 4294901760, %v35806_v57  ;;  %v36892_v5 = vand.u32 4294901760, %v35816_v18 }
 0x96c   :  { %v22257_v26 = vand.u32 4294901760, %v22256_v2  ;;  %v35851_v52 = vsub.f32 %v22167_v40, %v22726_v0  ;;  %v35856_v56 = vpack.c.bf16 %v22726_v0, %v22722_v7  ;;  %v22817_v40 = vsub.f32 %v35802_v51, %v36893_v9 }
 0x96d   :  { %29431 = vmatpush1.bf16.msra.mxu0 %v35696_v24  ;;  %29479 = vmatpush1.bf16.msra.mxu1 %v35698_v17  ;;  %v36896_v24 = vand.u32 4294901760, %v35788_v11  ;;  %v22269_v17 = vand.u32 4294901760, %v22268_v14  ;;  %v22280_v2 = vsub.f32 %v35806_v57, %v36891_v47  ;;  %v36903_v14 = vand.u32 4294901760, %v35836_v60 }
 0x96e   :  { %29433 = vmatprep.subr.bf16.mxu0 %v35537_v23  ;;  %29481 = vmatprep.subr.bf16.mxu1 %v35554_v58  ;;  %v22800_v23 = vand.u32 4294901760, %v22799_v19  ;;  %v22812_v58 = vand.u32 4294901760, %v22811_v36  ;;  %v22292_v7 = vsub.f32 %v35816_v18, %v36892_v5  ;;  %v36902_v0 = vand.u32 4294901760, %v35847_v33 }
 0x96f   :  { %v35865_v21 = vpack.c.bf16 %v22269_v17, %v22257_v26  ;;  %v36901_v26 = vand.u32 4294901760, %v35849_v38  ;;  %v36900_v17 = vand.u32 4294901760, %v35851_v52  ;;  %v22281_v28 = vand.u32 4294901760, %v22280_v2 }
 0x970   :  { %21496 = vmatmul.mubr.f32.vlgmr.msra.gmra.mrb[14].mxu0 %v35709_v43  ;;  %22039 = vmatmul.mubr.f32.vlgmr.msra.gmra.mrb[30].mxu1 %v35709_v43  ;;  %v35873_v39 = vpack.c.bf16 %v22812_v58, %v22800_v23 }
 0x971   :  { %29435 = vmatpush1.bf16.msra.mxu0 %v35558_v15  ;;  %29483 = vmatpush1.bf16.msra.mxu1 %v35576_v45  ;;  %v22262_v15 = vsub.f32 %v35788_v11, %v36896_v24  ;;  %v36898_v45 = vand.u32 4294901760, %v35828_v10  ;;  %v22818_v24 = vand.u32 4294901760, %v22817_v40 }
 0x972   :  { %29437 = vmatprep.subr.bf16.mxu0 %v35587_v25  ;;  %29485 = vmatprep.subr.bf16.mxu1 %v35591_v4  ;;  %v22274_v25 = vsub.f32 %v35794_v13, %v36895_v37  ;;  %v22805_v4 = vsub.f32 %v35800_v55, %v36894_v59 }
 0x973   :  { %21574 = vmatprep.mubr.f32.mxu0 %v36977_v6  ;;  %22117 = vmatprep.mubr.f32.mxu1 %v36977_v6  ;;  %v22263_v9 = vand.u32 4294901760, %v22262_v15  ;;  %v22298_v15 = vsub.f32 %v35847_v33, %v36902_v0 }
 0x974   :  { %v22275_v59 = vand.u32 4294901760, %v22274_v25  ;;  %v22806_v37 = vand.u32 4294901760, %v22805_v4  ;;  %v22829_v25 = vsub.f32 %v35849_v38, %v36901_v26  ;;  %v22841_v4 = vsub.f32 %v35851_v52, %v36900_v17 }
 0x975   :  { %29439 = vmatpush1.bf16.msra.mxu0 %v35605_v35  ;;  %29487 = vmatpush1.bf16.msra.mxu1 %v35612_v49  ;;  %v22823_v35 = vsub.f32 %v35828_v10, %v36898_v45  ;;  %v22835_v49 = vsub.f32 %v35832_v32, %v36904_v63  ;;  %v22286_v45 = vsub.f32 %v35836_v60, %v36903_v14  ;;  %v22299_v17 = vand.u32 4294901760, %v22298_v15 }
 0x976   :  { %v20439_v19 = vpop.f32.mrb[26].mxu0  ;;  %v20982_v36 = vpop.f32.mrb[42].mxu1  ;;  %29489 = vmatprep.subr.bf16.mxu0 %v35778_v44  ;;  %29537 = vmatprep.subr.bf16.mxu1 %v35780_v62  ;;  %v22830_v26 = vand.u32 4294901760, %v22829_v25  ;;  %v22842_v0 = vand.u32 4294901760, %v22841_v4  ;;  %v35968_v15 = vpack.c.bf16 %v35816_v18, %v35806_v57  ;;  %v35972_v25 = vpack.c.bf16 %v35832_v32, %v35828_v10 }
 0x977   :  { %v29990_v23 = vadd.f32 %v20439_v19, %v32215_v12  ;;  %v20441_v58 = vpop.f32.mrb[27].mxu0  ;;  %v20984_v47 = vpop.f32.mrb[43].mxu1  ;;  %v22824_v40 = vand.u32 4294901760, %v22823_v35  ;;  %v22836_v2 = vand.u32 4294901760, %v22835_v49  ;;  %v37284_v14 = vand.u32 4294901760, %v35770_v61 }
 0x978   :  { %v29991_v5 = vadd.f32 %v20441_v58, %v37075_v22  ;;  %21576 = vmatmul.mubr.f32.vlgmr.msra.gmra.mrb[14].mxu0 %v35709_v43  ;;  %22119 = vmatmul.mubr.f32.vlgmr.msra.gmra.mrb[30].mxu1 %v35709_v43  ;;  %v35922_v58 = vpack.c.bf16 %v22818_v24, %v22806_v37  ;;  %v37272_v24 = vld [vmem:[#allocation48_spill] sm:$0xff]  ;;  %37279 = vst [vmem:[#allocation21_spill] sm:$0xff] %v35968_v15  ;;  %37280 = vst [vmem:[#allocation22_spill] sm:$0xff] %v35972_v25  ;;  %v37285_v63 = vand.u32 4294901760, %v35772_v46 }
 0x979   :  { %v27507_v19 = vmul.f32 -1.442695, %v29990_v23  ;;  %29491 = vmatpush1.bf16.msra.mxu0 %v35782_v48  ;;  %29539 = vmatpush1.bf16.msra.mxu1 %v35798_v20  ;;  %v35920_v23 = vpack.c.bf16 %v22275_v59, %v22263_v9  ;;  %v29993_v37 = vadd.f32 %v20984_v47, %v37272_v24  ;;  %v35940_v9 = vpack.c.bf16 %v22842_v0, %v22830_v26 }
 0x97a   :  { %v27508_v8 = vmul.f32 -1.442695, %v29991_v5  ;;  %29493 = vmatprep.subr.bf16.mxu0 %v35814_v31  ;;  %29541 = vmatprep.subr.bf16.mxu1 %v35826_v42  ;;  %v22293_v5 = vand.u32 4294901760, %v22292_v7  ;;  %37268 = vst [vmem:[#allocation15_spill] sm:$0xff] %v35922_v58  ;;  %v37269_v7 = vld [vmem:[#allocation11_spill] sm:$0xff]  ;;  %v35958_v0 = vpack.c.bf16 %v35794_v13, %v35788_v11  ;;  %v35962_v26 = vpack.c.bf16 %v35802_v51, %v35800_v55 }
 0x97b   :  { %30888 = vpow2.f32 %v27507_v19  ;;  %22241 = vmatprep.mubr.f32.mxu0 %v36977_v6  ;;  %22784 = vmatprep.mubr.f32.mxu1 %v36977_v6  ;;  %37267 = vst [vmem:[#allocation49_spill] sm:$0xff] %v35920_v23  ;;  %v22287_v19 = vand.u32 4294901760, %v22286_v45  ;;  %v29992_v35 = vadd.f32 %v20982_v36, %v37269_v7  ;;  %37274 = vst [vmem:[#allocation18_spill] sm:$0xff] %v35940_v9 }
 0x97c   :  { %30890 = vpow2.f32 %v27508_v8  ;;  %v35929_v49 = vpack.c.bf16 %v22293_v5, %v22281_v28  ;;  %v35931_v8 = vpack.c.bf16 %v22836_v2, %v22824_v40  ;;  %v35946_v28 = vpack.c.bf16 %v35768_v54, %v35766_v30  ;;  %37277 = vst [vmem:[#allocation20_spill] sm:$0xff] %v35958_v0  ;;  %37278 = vst [vmem:[#allocation39_spill] sm:$0xff] %v35962_v26  ;;  %v23256_v2 = vld [vmem:[#allocation8 + $0x8] sm:$0xff] }
 0x97d   :  { %29495 = vmatpush1.bf16.msra.mxu0 %v35834_v1  ;;  %29543 = vmatpush1.bf16.msra.mxu1 %v35856_v56  ;;  %v35938_v59 = vpack.c.bf16 %v22299_v17, %v22287_v19  ;;  %v27509_v45 = vmul.f32 -1.442695, %v29992_v35  ;;  %30892 = vtanh.f32 %v29993_v37  ;;  %v35980_v5 = vpack.c.bf16 %v35847_v33, %v35836_v60  ;;  %v23260_v19 = vld [vmem:[#allocation8 + $0x28] sm:$0xff]  ;;  %v23258_v35 = vld [vmem:[#allocation8 + $0x18] sm:$0xff] }
 0x97e   :  { %29497 = vmatprep.subr.bf16.mxu0 %v35865_v21  ;;  %29545 = vmatprep.subr.bf16.mxu1 %v35873_v39  ;;  %37270 = vst [vmem:[#allocation16_spill] sm:$0xff] %v35929_v49  ;;  %37271 = vst [vmem:[#allocation33_spill] sm:$0xff] %v35931_v8  ;;  %v35984_v40 = vpack.c.bf16 %v35851_v52, %v35849_v38  ;;  %v23262_v37 = vld [vmem:[#allocation8 + $0x38] sm:$0xff]  ;;  %v36006_v24 = vpack.c.bf16 %v37285_v63, %v37284_v14  ;;  %v23274_v7 = vand.u32 4294901760, %v23256_v2 }
 0x97f   :  { %37273 = vst [vmem:[#allocation17_spill] sm:$0xff] %v35938_v59  ;;  %37275 = vst [vmem:[#allocation32_spill] sm:$0xff] %v35946_v28  ;;  %30894 = vpow2.f32 %v27509_v45  ;;  %v23278_v22 = vand.u32 4294901760, %v23260_v19  ;;  %v37288_v30 = vand.u32 4294901760, %v35794_v13  ;;  %v23821_v63 = vand.u32 4294901760, %v23262_v37 }
 0x980   :  { %22247 = vmatmul.mubr.f32.vlgmr.msra.gmra.mrb[28].mxu0 %v35719_v16  ;;  %22790 = vmatmul.mubr.f32.vlgmr.msra.gmra.mrb[44].mxu1 %v35719_v16  ;;  %v35950_v16 = vpack.c.bf16 %v35772_v46, %v35770_v61  ;;  %37281 = vst [vmem:[#allocation50_spill] sm:$0xff] %v35980_v5  ;;  %37282 = vst [vmem:[#allocation51_spill] sm:$0xff] %v35984_v40  ;;  %v37291_v61 = vand.u32 4294901760, %v35802_v51 }
 0x981   :  { %29499 = vmatpush1.bf16.msra.mxu0 %v35920_v23  ;;  %29547 = vmatpush1.bf16.msra.mxu1 %v35922_v58  ;;  %37286 = vst [vmem:[#allocation53_spill] sm:$0xff] %v36006_v24 }
 0x982   :  { %29501 = vmatprep.subr.bf16.mxu0 %v35929_v49  ;;  %29549 = vmatprep.subr.bf16.mxu1 %v35931_v8  ;;  %37276 = vst [vmem:[#allocation19_spill] sm:$0xff] %v35950_v16 }
 0x983   :  { %22357 = vmatprep.mubr.f32.mxu0 %v36977_v6  ;;  %22900 = vmatprep.mubr.f32.mxu1 %v36977_v6 }
 0x985   :  { %v30889_v47 = vpop.eup %30888  ;;  %29503 = vmatpush1.bf16.msra.mxu0 %v35938_v59  ;;  %29551 = vmatpush1.bf16.msra.mxu1 %v35940_v9 }
 0x986   :  { %v21000_v36 = vadd.f32 1.0, %v30889_v47  ;;  %v30891_v17 = vpop.eup %30890  ;;  %29505 = vmatprep.subr.bf16.mxu0 %v35946_v28  ;;  %29553 = vmatprep.subr.bf16.mxu1 %v35950_v16  ;;  %v23255_v47 = vld [vmem:[#allocation8] sm:$0xff] }
 0x987   :  { %v21001_v4 = vadd.f32 1.0, %v30891_v17  ;;  %v30893_v45 = vpop.eup %30892 }
 0x988   :  { %30896 = vrcp.f32 %v21000_v36  ;;  %22359 = vmatmul.mubr.f32.vlgmr.msra.gmra.mrb[28].mxu0 %v35709_v43  ;;  %22902 = vmatmul.mubr.f32.vlgmr.msra.gmra.mrb[44].mxu1 %v35709_v43  ;;  %v23259_v36 = vld [vmem:[#allocation8 + $0x20] sm:$0xff] }
 0x989   :  { %30898 = vrcp.f32 %v21001_v4  ;;  %29507 = vmatpush1.bf16.msra.mxu0 %v35958_v0  ;;  %29555 = vmatpush1.bf16.msra.mxu1 %v35962_v26  ;;  %v30895_v17 = vpop.eup %30894  ;;  %v36000_v4 = vpack.c.bf16 %v22267_v27, %v22255_v3  ;;  %v37290_v3 = vand.u32 4294901760, %v35800_v55  ;;  %v23817_v27 = vand.u32 4294901760, %v23258_v35  ;;  %v23257_v55 = vld [vmem:[#allocation8 + $0x10] sm:$0xff] }
 0x98a   :  { %29509 = vmatprep.subr.bf16.mxu0 %v35968_v15  ;;  %29557 = vmatprep.subr.bf16.mxu1 %v35972_v25  ;;  %v37305_v15 = vld [vmem:[#allocation44_spill] sm:$0xff]  ;;  %v36051_v0 = vpack.c.bf16 %v23278_v22, %v23274_v7 }
 0x98b   :  { %22445 = vmatprep.mubr.f32.mxu0 %v36977_v6  ;;  %22988 = vmatprep.mubr.f32.mxu1 %v36977_v6  ;;  %37283 = vst [vmem:[#allocation52_spill] sm:$0xff] %v36000_v4  ;;  %v36020_v46 = vpack.c.bf16 %v37291_v61, %v37290_v3  ;;  %v21002_v3 = vadd.f32 1.0, %v30895_v17  ;;  %v37303_v17 = vand.u32 4294901760, %v35851_v52  ;;  %v23819_v52 = vand.u32 4294901760, %v23257_v55 }
 0x98d   :  { %29511 = vmatpush1.bf16.msra.mxu0 %v35980_v5  ;;  %29559 = vmatpush1.bf16.msra.mxu1 %v35984_v40  ;;  %37292 = vst [vmem:[#allocation55_spill] sm:$0xff] %v36020_v46  ;;  %v37293_v40 = vand.u32 4294901760, %v35806_v57  ;;  %v23261_v5 = vld [vmem:[#allocation8 + $0x30] sm:$0xff]  ;;  %v37299_v57 = vand.u32 4294901760, %v35836_v60  ;;  %v23268_v60 = vld [vmem:[#allocation8 + $0x68] sm:$0xff]  ;;  %30900 = vrcp.f32 %v21002_v3 }
 0x98e   :  { %29513 = vmatprep.subr.bf16.mxu0 %v35778_v44  ;;  %29561 = vmatprep.subr.bf16.mxu1 %v35780_v62  ;;  %v23269_v3 = vld [vmem:[#allocation8 + $0x70] sm:$0xff] }
 0x990   :  { %22448 = vmatmul.mubr.f32.vlgmr.msra.gmra.mrb[28].mxu0 %v35712_v50  ;;  %22991 = vmatmul.mubr.f32.vlgmr.msra.gmra.mrb[44].mxu1 %v35712_v50  ;;  %v37287_v50 = vand.u32 4294901760, %v35788_v11  ;;  %v37294_v11 = vand.u32 4294901760, %v35816_v18  ;;  %v37300_v18 = vand.u32 4294901760, %v35847_v33  ;;  %v36059_v33 = vpack.c.bf16 %v23821_v63, %v23817_v27 }
 0x991   :  { %29515 = vmatpush1.bf16.msra.mxu0 %v35782_v48  ;;  %29563 = vmatpush1.bf16.msra.mxu1 %v35798_v20 }
 0x992   :  { %v30897_v12 = vpop.eup %30896  ;;  %v36014_v54 = vpack.c.bf16 %v37288_v30, %v37287_v50  ;;  %29517 = vmatprep.subr.bf16.mxu0 %v35814_v31  ;;  %29565 = vmatprep.subr.bf16.mxu1 %v35826_v42  ;;  %v36028_v13 = vpack.c.bf16 %v37294_v11, %v37293_v40  ;;  %v23276_v50 = vand.u32 4294901760, %v23255_v47  ;;  %v23280_v30 = vand.u32 4294901760, %v23259_v36 }
 0x993   :  { %v21011_v14 = vmul.f32 %v30897_v12, %v30893_v45  ;;  %v30899_v51 = vpop.eup %30898  ;;  %22526 = vmatprep.mubr.f32.mxu0 %v36977_v6  ;;  %23069 = vmatprep.mubr.f32.mxu1 %v36977_v6  ;;  %v37296_v12 = vand.u32 4294901760, %v35828_v10  ;;  %v37297_v45 = vand.u32 4294901760, %v35832_v32  ;;  %v36042_v40 = vpack.c.bf16 %v37300_v18, %v37299_v57  ;;  %v23266_v57 = vld [vmem:[#allocation8 + $0x58] sm:$0xff]  ;;  %v23267_v18 = vld [vmem:[#allocation8 + $0x60] sm:$0xff] }
 0x994   :  { %37289 = vst [vmem:[#allocation54_spill] sm:$0xff] %v36014_v54  ;;  %37295 = vst [vmem:[#allocation56_spill] sm:$0xff] %v36028_v13  ;;  %v37302_v11 = vand.u32 4294901760, %v35849_v38  ;;  %v21010_v26 = vmul.f32 %v30899_v51, %v37305_v15  ;;  %v36053_v10 = vsub.f32 %v23256_v2, %v23274_v7  ;;  %v36055_v32 = vsub.f32 %v23260_v19, %v23278_v22  ;;  %v23270_v15 = vld [vmem:[#allocation8 + $0x78] sm:$0xff] }
 0x995   :  { %v36036_v61 = vpack.c.bf16 %v37297_v45, %v37296_v12  ;;  %37301 = vst [vmem:[#allocation58_spill] sm:$0xff] %v36042_v40  ;;  %v23264_v12 = vld [vmem:[#allocation8 + $0x48] sm:$0xff]  ;;  %29519 = vmatpush1.bf16.msra.mxu0 %v35834_v1  ;;  %29567 = vmatpush1.bf16.msra.mxu1 %v35856_v56  ;;  %v36061_v38 = vsub.f32 %v23258_v35, %v23817_v27  ;;  %v23823_v45 = vand.u32 4294901760, %v23261_v5  ;;  %v23286_v35 = vand.u32 4294901760, %v23268_v60  ;;  %v23263_v27 = vld [vmem:[#allocation8 + $0x40] sm:$0xff] }
 0x996   :  { %v36048_v25 = vpack.c.bf16 %v37303_v17, %v37302_v11  ;;  %v36063_v51 = vadd.f32 %v21011_v14, %v21010_v26  ;;  %29521 = vmatprep.subr.bf16.mxu0 %v36000_v4  ;;  %29569 = vmatprep.subr.bf16.mxu1 %v36006_v24  ;;  %v36067_v22 = vsub.f32 %v23262_v37, %v23821_v63  ;;  %v23282_v19 = vand.u32 4294901760, %v23264_v12 }
 0x997   :  { %37298 = vst [vmem:[#allocation57_spill] sm:$0xff] %v36036_v61  ;;  %v36069_v7 = vpack.c.bf16 %v23280_v30, %v23276_v50  ;;  %v36071_v2 = vsub.f32 %v23255_v47, %v23276_v50  ;;  %v36076_v26 = vsub.f32 %v23259_v36, %v23280_v30  ;;  %v23825_v14 = vand.u32 4294901760, %v23266_v57  ;;  %v23265_v50 = vld [vmem:[#allocation8 + $0x50] sm:$0xff] }
 0x998   :  { %37304 = vst [vmem:[#allocation59_spill] sm:$0xff] %v36048_v25  ;;  %37306 = vst [vmem:[#allocation44_spill] sm:$0xff] %v36063_v51  ;;  %30902 = vtanh.f32 %v36063_v51  ;;  %22530 = vmatmul.mubr.f32.vlgmr.msra.gmra.mrb[28].mxu0 %v35715_v41  ;;  %23073 = vmatmul.mubr.f32.vlgmr.msra.gmra.mrb[44].mxu1 %v35715_v41  ;;  %v23829_v37 = vand.u32 4294901760, %v23270_v15  ;;  %v36080_v47 = vpack.c.bf16 %v23823_v45, %v23819_v52  ;;  %v23284_v36 = vand.u32 4294901760, %v23263_v27 }
 0x999   :  { %29523 = vmatpush1.bf16.msra.mxu0 %v36014_v54  ;;  %29571 = vmatpush1.bf16.msra.mxu1 %v36020_v46  ;;  %v36082_v63 = vsub.f32 %v23257_v55, %v23819_v52  ;;  %v36088_v41 = vsub.f32 %v23261_v5, %v23823_v45  ;;  %v23288_v30 = vand.u32 4294901760, %v23267_v18  ;;  %v36093_v55 = vpack.c.bf16 %v23286_v35, %v23282_v19 }
 0x99a   :  { %29525 = vmatprep.subr.bf16.mxu0 %v36028_v13  ;;  %29573 = vmatprep.subr.bf16.mxu1 %v36036_v61  ;;  %v36095_v52 = vsub.f32 %v23264_v12, %v23282_v19  ;;  %v36097_v11 = vsub.f32 %v23268_v60, %v23286_v35  ;;  %v36919_v17 = vand.u32 4294901760, %v36067_v22  ;;  %v36100_v13 = vpack.c.bf16 %v23829_v37, %v23825_v14 }
 0x99b   :  { %22624 = vmatprep.mubr.f32.mxu0 %v36977_v6  ;;  %23167 = vmatprep.mubr.f32.mxu1 %v36977_v6  ;;  %v36102_v5 = vsub.f32 %v23266_v57, %v23825_v14  ;;  %v23827_v45 = vand.u32 4294901760, %v23265_v50  ;;  %v23831_v61 = vand.u32 4294901760, %v23269_v3  ;;  %v36106_v51 = vsub.f32 %v23270_v15, %v23829_v37 }
 0x99c   :  { %v37307_v46 = vand.u32 4294901760, %v36053_v10  ;;  %v37308_v60 = vand.u32 4294901760, %v36055_v32  ;;  %v36116_v57 = vpack.c.bf16 %v23288_v30, %v23284_v36  ;;  %v36118_v35 = vsub.f32 %v23263_v27, %v23284_v36 }
 0x99d   :  { %29527 = vmatpush1.bf16.msra.mxu0 %v36042_v40  ;;  %29575 = vmatpush1.bf16.msra.mxu1 %v36048_v25  ;;  %v37309_v14 = vand.u32 4294901760, %v36061_v38  ;;  %v36123_v37 = vsub.f32 %v23267_v18, %v23288_v30  ;;  %v36132_v27 = vpack.c.bf16 %v23831_v61, %v23827_v45  ;;  %v30901_v30 = vpop.eup %30900  ;;  %v36141_v25 = vsub.f32 %v23269_v3, %v23831_v61 }
 0x99e   :  { %v23361_v12 = vsub.f32 %v36053_v10, %v37307_v46  ;;  %v23373_v19 = vsub.f32 %v36055_v32, %v37308_v60  ;;  %29529 = vmatprep.subr.bf16.mxu0 %v35778_v44  ;;  %29577 = vmatprep.subr.bf16.mxu1 %v35780_v62  ;;  %v23916_v46 = vsub.f32 %v36067_v22, %v36919_v17  ;;  %v37310_v3 = vand.u32 4294901760, %v36071_v2 }
 0x99f   :  { %v23904_v15 = vsub.f32 %v36061_v38, %v37309_v14  ;;  %v36139_v17 = vsub.f32 %v23265_v50, %v23827_v45  ;;  %v37313_v24 = vand.u32 4294901760, %v36088_v41  ;;  %v37314_v4 = vand.u32 4294901760, %v36095_v52 }
 0x9a0   :  { %22626 = vmatmul.mubr.f32.vlgmr.msra.gmra.mrb[28].mxu0 %v35709_v43  ;;  %23169 = vmatmul.mubr.f32.vlgmr.msra.gmra.mrb[44].mxu1 %v35709_v43  ;;  %v23362_v60 = vand.u32 4294901760, %v23361_v12  ;;  %v23374_v40 = vand.u32 4294901760, %v23373_v19  ;;  %v23917_v50 = vand.u32 4294901760, %v23916_v46  ;;  %v23367_v45 = vsub.f32 %v36071_v2, %v37310_v3 }
 0x9a1   :  { %29531 = vmatpush1.bf16.msra.mxu0 %v35782_v48  ;;  %29579 = vmatpush1.bf16.msra.mxu1 %v35798_v20  ;;  %v23905_v36 = vand.u32 4294901760, %v23904_v15  ;;  %v37311_v12 = vand.u32 4294901760, %v36076_v26  ;;  %v37312_v15 = vand.u32 4294901760, %v36082_v63  ;;  %v23922_v14 = vsub.f32 %v36088_v41, %v37313_v24 }
 0x9a2   :  { %v30903_v54 = vpop.eup %30902  ;;  %29533 = vmatprep.subr.bf16.mxu0 %v35814_v31  ;;  %29581 = vmatprep.subr.bf16.mxu1 %v35826_v42  ;;  %v37316_v16 = vand.u32 4294901760, %v36102_v5  ;;  %v37317_v3 = vand.u32 4294901760, %v36106_v51  ;;  %v36185_v28 = vpack.c.bf16 %v23374_v40, %v23362_v60  ;;  %v23368_v9 = vand.u32 4294901760, %v23367_v45 }
 0x9a3   :  { %22704 = vmatprep.mubr.f32.mxu0 %v36977_v6  ;;  %23247 = vmatprep.mubr.f32.mxu1 %v36977_v6  ;;  %v21014_v61 = vmul.f32 %v30903_v54, %v30901_v30  ;;  %v23379_v19 = vsub.f32 %v36076_v26, %v37311_v12  ;;  %v23910_v18 = vsub.f32 %v36082_v63, %v37312_v15  ;;  %v23923_v49 = vand.u32 4294901760, %v23922_v14 }
 0x9a4   :  { %v23385_v54 = vsub.f32 %v36095_v52, %v37314_v4  ;;  %v37315_v4 = vand.u32 4294901760, %v36097_v11  ;;  %v23940_v12 = vsub.f32 %v36106_v51, %v37317_v3  ;;  %v36187_v15 = vpack.c.bf16 %v23917_v50, %v23905_v36 }
 0x9a5   :  { %29535 = vmatpush1.bf16.msra.mxu0 %v35834_v1  ;;  %29583 = vmatpush1.bf16.msra.mxu1 %v35856_v56  ;;  %v23272_v30 = vsel %vm1906_vm1, %v21014_v61, 0  ;;  %v23928_v61 = vsub.f32 %v36102_v5, %v37316_v16  ;;  %v23380_v59 = vand.u32 4294901760, %v23379_v19  ;;  %v23911_v8 = vand.u32 4294901760, %v23910_v18 }
 0x9a6   :  { %29585 = vmatprep.subr.bf16.mxu0 %v36051_v0  ;;  %29633 = vmatprep.subr.bf16.mxu1 %v36059_v33  ;;  %v36174_v24 = vand.u32 4294901760, %v23272_v30  ;;  %v23397_v46 = vsub.f32 %v36097_v11, %v37315_v4  ;;  %v37319_v16 = vand.u32 4294901760, %v36118_v35  ;;  %v23386_v40 = vand.u32 4294901760, %v23385_v54 }
 0x9a7   :  { %v37320_v60 = vand.u32 4294901760, %v36123_v37  ;;  %v37322_v18 = vand.u32 4294901760, %v36141_v25  ;;  %v23929_v54 = vand.u32 4294901760, %v23928_v61 }
 0x9a8   :  { %22706 = vmatmul.mubr.f32.vlgmr.msra.gmra.mrb[28].mxu0 %v35709_v43  ;;  %23249 = vmatmul.mubr.f32.vlgmr.msra.gmra.mrb[44].mxu1 %v35709_v43  ;;  %v36192_v4 = vsub.f32 %v23272_v30, %v36174_v24  ;;  %v23391_v58 = vsub.f32 %v36118_v35, %v37319_v16  ;;  %v37321_v43 = vand.u32 4294901760, %v36139_v17  ;;  %v23398_v19 = vand.u32 4294901760, %v23397_v46 }
 0x9a9   :  { %29587 = vmatpush1.bf16.msra.mxu0 %v36069_v7  ;;  %29635 = vmatpush1.bf16.msra.mxu1 %v36080_v47  ;;  %v23403_v36 = vsub.f32 %v36123_v37, %v37320_v60  ;;  %v23946_v14 = vsub.f32 %v36141_v25, %v37322_v18  ;;  %v23941_v30 = vand.u32 4294901760, %v23940_v12  ;;  %v36217_v16 = vpack.c.bf16 %v23380_v59, %v23368_v9 }
 0x9aa   :  { %37318 = vst [vmem:[#allocation60_spill] sm:$0xff] %v36192_v4  ;;  %v23934_v50 = vsub.f32 %v36139_v17, %v37321_v43  ;;  %29589 = vmatprep.subr.bf16.mxu0 %v36093_v55  ;;  %29637 = vmatprep.subr.bf16.mxu1 %v36100_v13  ;;  %v36211_v45 = vand.u32 4294901760, %v36192_v4  ;;  %v36219_v60 = vpack.c.bf16 %v23923_v49, %v23911_v8  ;;  %v23392_v43 = vand.u32 4294901760, %v23391_v58 }
 0x9ab   :  { %23346 = vmatprep.mubr.f32.mxu0 %v36977_v6  ;;  %23889 = vmatprep.mubr.f32.mxu1 %v36977_v6  ;;  %v23404_v18 = vand.u32 4294901760, %v23403_v36  ;;  %v23947_v61 = vand.u32 4294901760, %v23946_v14  ;;  %v36227_v23 = vpack.c.bf16 %v23398_v19, %v23386_v40  ;;  %v36229_v59 = vpack.c.bf16 %v23941_v30, %v23929_v54 }
 0x9ac   :  { %v23350_v3 = vsub.f32 %v36192_v4, %v36211_v45  ;;  %v23935_v46 = vand.u32 4294901760, %v23934_v50  ;;  %v36243_v8 = vpack.c.bf16 %v36055_v32, %v36053_v10  ;;  %v36247_v9 = vpack.c.bf16 %v36067_v22, %v36061_v38 }
 0x9ad   :  { %29591 = vmatpush1.bf16.msra.mxu0 %v36116_v57  ;;  %29639 = vmatpush1.bf16.msra.mxu1 %v36132_v27  ;;  %v36235_v58 = vpack.c.bf16 %v23404_v18, %v23392_v43  ;;  %v36255_v40 = vpack.c.bf16 %v36076_v26, %v36071_v2  ;;  %v36259_v36 = vpack.c.bf16 %v36088_v41, %v36082_v63  ;;  %v37323_v30 = vand.u32 4294901760, %v36053_v10 }
 0x9ae   :  { %v36223_v12 = vand.u32 4294901760, %v23350_v3  ;;  %29593 = vmatprep.subr.bf16.mxu0 %v36185_v28  ;;  %29641 = vmatprep.subr.bf16.mxu1 %v36187_v15  ;;  %v36237_v49 = vpack.c.bf16 %v23947_v61, %v23935_v46  ;;  %v36265_v50 = vpack.c.bf16 %v36097_v11, %v36095_v52  ;;  %v36269_v14 = vpack.c.bf16 %v36106_v51, %v36102_v5 }
 0x9af   :  { %v36277_v19 = vpack.c.bf16 %v36123_v37, %v36118_v35  ;;  %v36281_v54 = vpack.c.bf16 %v36141_v25, %v36139_v17  ;;  %v37324_v3 = vand.u32 4294901760, %v36055_v32  ;;  %v37325_v18 = vand.u32 4294901760, %v36061_v38 }
 0x9b0   :  { %23352 = vmatmul.mubr.f32.vlgmr.msra.gmra.mrb[28].mxu0 %v36223_v12  ;;  %23895 = vmatmul.mubr.f32.vlgmr.msra.gmra.mrb[44].mxu1 %v36223_v12  ;;  %v37326_v46 = vand.u32 4294901760, %v36067_v22  ;;  %v37327_v10 = vand.u32 4294901760, %v36071_v2  ;;  %v37328_v32 = vand.u32 4294901760, %v36076_v26  ;;  %v37329_v38 = vand.u32 4294901760, %v36082_v63 }
 0x9b1   :  { %29595 = vmatpush1.bf16.msra.mxu0 %v36217_v16  ;;  %29643 = vmatpush1.bf16.msra.mxu1 %v36219_v60  ;;  %v36301_v43 = vpack.c.bf16 %v37324_v3, %v37323_v30  ;;  %v37330_v22 = vand.u32 4294901760, %v36088_v41  ;;  %v37333_v2 = vand.u32 4294901760, %v36102_v5  ;;  %v37334_v26 = vand.u32 4294901760, %v36106_v51 }
 0x9b2   :  { %29597 = vmatprep.subr.bf16.mxu0 %v36227_v23  ;;  %29645 = vmatprep.subr.bf16.mxu1 %v36229_v59  ;;  %v36307_v61 = vpack.c.bf16 %v37326_v46, %v37325_v18  ;;  %v36317_v30 = vpack.c.bf16 %v37328_v32, %v37327_v10  ;;  %v37331_v18 = vand.u32 4294901760, %v36095_v52  ;;  %v37332_v46 = vand.u32 4294901760, %v36097_v11 }
 0x9b3   :  { %23462 = vmatprep.mubr.f32.mxu0 %v36977_v6  ;;  %24005 = vmatprep.mubr.f32.mxu1 %v36977_v6  ;;  %v36323_v3 = vpack.c.bf16 %v37330_v22, %v37329_v38  ;;  %v36337_v10 = vpack.c.bf16 %v37334_v26, %v37333_v2  ;;  %v37335_v63 = vand.u32 4294901760, %v36118_v35  ;;  %v37336_v11 = vand.u32 4294901760, %v36123_v37  ;;  %v37339_v35 = vld [vmem:[#allocation23_spill] sm:$0xff]  ;;  %v37340_v22 = vld [vmem:[#allocation24_spill] sm:$0xff] }
 0x9b4   :  { %v37337_v52 = vand.u32 4294901760, %v36139_v17  ;;  %v37338_v51 = vand.u32 4294901760, %v36141_v25 }
 0x9b5   :  { %29599 = vmatpush1.bf16.msra.mxu0 %v36235_v58  ;;  %29647 = vmatpush1.bf16.msra.mxu1 %v36237_v49  ;;  %v36347_v41 = vpack.c.bf16 %v37336_v11, %v37335_v63 }
 0x9b6   :  { %29601 = vmatprep.subr.bf16.mxu0 %v36243_v8  ;;  %29649 = vmatprep.subr.bf16.mxu1 %v36247_v9  ;;  %v36353_v5 = vpack.c.bf16 %v37338_v51, %v37337_v52 }
 0x9b8   :  { %23464 = vmatmul.mubr.f32.vlgmr.msra.gmra.mrb[28].mxu0 %v36174_v24  ;;  %24007 = vmatmul.mubr.f32.vlgmr.msra.gmra.mrb[44].mxu1 %v36174_v24 }
 0x9b9   :  { %29603 = vmatpush1.bf16.msra.mxu0 %v36255_v40  ;;  %29651 = vmatpush1.bf16.msra.mxu1 %v36259_v36 }
 0x9ba   :  { %29605 = vmatprep.subr.bf16.mxu0 %v36265_v50  ;;  %29653 = vmatprep.subr.bf16.mxu1 %v36269_v14 }
 0x9bb   :  { %23550 = vmatprep.mubr.f32.mxu0 %v36977_v6  ;;  %24093 = vmatprep.mubr.f32.mxu1 %v36977_v6 }
 0x9bd   :  { %29607 = vmatpush1.bf16.msra.mxu0 %v36277_v19  ;;  %29655 = vmatpush1.bf16.msra.mxu1 %v36281_v54 }
 0x9be   :  { %29609 = vmatprep.subr.bf16.mxu0 %v36051_v0  ;;  %29657 = vmatprep.subr.bf16.mxu1 %v36059_v33 }
 0x9c0   :  { %23553 = vmatmul.mubr.f32.vlgmr.msra.gmra.mrb[28].mxu0 %v36192_v4  ;;  %24096 = vmatmul.mubr.f32.vlgmr.msra.gmra.mrb[44].mxu1 %v36192_v4  ;;  %v36331_v4 = vpack.c.bf16 %v37332_v46, %v37331_v18 }
 0x9c1   :  { %29611 = vmatpush1.bf16.msra.mxu0 %v36069_v7  ;;  %29659 = vmatpush1.bf16.msra.mxu1 %v36080_v47 }
 0x9c2   :  { %29613 = vmatprep.subr.bf16.mxu0 %v36093_v55  ;;  %29661 = vmatprep.subr.bf16.mxu1 %v36100_v13 }
 0x9c3   :  { %23631 = vmatprep.mubr.f32.mxu0 %v36977_v6  ;;  %24174 = vmatprep.mubr.f32.mxu1 %v36977_v6 }
 0x9c5   :  { %29615 = vmatpush1.bf16.msra.mxu0 %v36116_v57  ;;  %29663 = vmatpush1.bf16.msra.mxu1 %v36132_v27 }
 0x9c6   :  { %29617 = vmatprep.subr.bf16.mxu0 %v36301_v43  ;;  %29665 = vmatprep.subr.bf16.mxu1 %v36307_v61 }
 0x9c8   :  { %23635 = vmatmul.mubr.f32.vlgmr.msra.gmra.mrb[28].mxu0 %v36211_v45  ;;  %24178 = vmatmul.mubr.f32.vlgmr.msra.gmra.mrb[44].mxu1 %v36211_v45 }
 0x9c9   :  { %29619 = vmatpush1.bf16.msra.mxu0 %v36317_v30  ;;  %29667 = vmatpush1.bf16.msra.mxu1 %v36323_v3 }
 0x9ca   :  { %29621 = vmatprep.subr.bf16.mxu0 %v36331_v4  ;;  %29669 = vmatprep.subr.bf16.mxu1 %v36337_v10 }
 0x9cb   :  { %23729 = vmatprep.mubr.f32.mxu0 %v36977_v6  ;;  %24272 = vmatprep.mubr.f32.mxu1 %v36977_v6 }
 0x9cd   :  { %29623 = vmatpush1.bf16.msra.mxu0 %v36347_v41  ;;  %29671 = vmatpush1.bf16.msra.mxu1 %v36353_v5 }
 0x9ce   :  { %29625 = vmatprep.subr.bf16.mxu0 %v36051_v0  ;;  %29673 = vmatprep.subr.bf16.mxu1 %v36059_v33 }
 0x9d0   :  { %23731 = vmatmul.mubr.f32.vlgmr.msra.gmra.mrb[28].mxu0 %v36174_v24  ;;  %24274 = vmatmul.mubr.f32.vlgmr.msra.gmra.mrb[44].mxu1 %v36174_v24 }
 0x9d1   :  { %29627 = vmatpush1.bf16.msra.mxu0 %v36069_v7  ;;  %29675 = vmatpush1.bf16.msra.mxu1 %v36080_v47 }
 0x9d2   :  { %29629 = vmatprep.subr.bf16.mxu0 %v36093_v55  ;;  %29677 = vmatprep.subr.bf16.mxu1 %v36100_v13 }
 0x9d3   :  { %23809 = vmatprep.mubr.f32.mxu0 %v36977_v6  ;;  %24352 = vmatprep.mubr.f32.mxu1 %v36977_v6 }
 0x9d5   :  { %29631 = vmatpush1.bf16.msra.mxu0 %v36116_v57  ;;  %29679 = vmatpush1.bf16.msra.mxu1 %v36132_v27 }
 0x9d6   :  { %29681 = vmatprep.subr.bf16.mxu0 %v35778_v44  ;;  %29729 = vmatprep.subr.bf16.mxu1 %v35780_v62 }
 0x9d8   :  { %23811 = vmatmul.mubr.f32.vlgmr.msra.gmra.mrb[28].mxu0 %v36174_v24  ;;  %24354 = vmatmul.mubr.f32.vlgmr.msra.gmra.mrb[44].mxu1 %v36174_v24 }
 0x9d9   :  { %29683 = vmatpush1.bf16.msra.mxu0 %v35782_v48  ;;  %29731 = vmatpush1.bf16.msra.mxu1 %v35798_v20 }
 0x9da   :  { %29685 = vmatprep.subr.bf16.mxu0 %v35814_v31  ;;  %29733 = vmatprep.subr.bf16.mxu1 %v35826_v42 }
 0x9db   :  { %24480 = vmatprep.mubr.f32.mxu0 %v36977_v6  ;;  %25023 = vmatprep.mubr.f32.mxu1 %v36977_v6 }
 0x9dd   :  { %29687 = vmatpush1.bf16.msra.mxu0 %v35834_v1  ;;  %29735 = vmatpush1.bf16.msra.mxu1 %v35856_v56 }
 0x9de   :  { %29689 = vmatprep.subr.bf16.mxu0 %v35865_v21  ;;  %29737 = vmatprep.subr.bf16.mxu1 %v35873_v39 }
 0xa4b   :  { %v21577_v25 = vpop.f32.mrb[14].mxu0  ;;  %v22120_v17 = vpop.f32.mrb[30].mxu1 }
 0xa4c   :  { %v29951_v37 = vadd.f32 %v37339_v35, %v21577_v25  ;;  %v21579_v32 = vpop.f32.mrb[15].mxu0  ;;  %v22122_v38 = vpop.f32.mrb[31].mxu1  ;;  %v29968_v26 = vadd.f32 %v22120_v17, %v37010_v34 }
 0xa4d   :  { %v29953_v18 = vadd.f32 %v37340_v22, %v21579_v32  ;;  %v29969_v63 = vadd.f32 %v22122_v38, %v37011_v29 }
 0xa4e   :  { %v27510_v46 = vmul.f32 -1.442695, %v29951_v37  ;;  %v27512_v11 = vmul.f32 -1.442695, %v29968_v26 }
 0xa4f   :  { %v27511_v2 = vmul.f32 -1.442695, %v29953_v18 }
 0xa50   :  { %30904 = vpow2.f32 %v27510_v46 }
 0xa51   :  { %30906 = vpow2.f32 %v27511_v2 }
 0xa52   :  { %30908 = vtanh.f32 %v29969_v63 }
 0xa53   :  { %30910 = vpow2.f32 %v27512_v11 }
 0xa5a   :  { %v30905_v21 = vpop.eup %30904 }
 0xa5b   :  { %v22138_v52 = vadd.f32 1.0, %v30905_v21  ;;  %v30907_v39 = vpop.eup %30906 }
 0xa5c   :  { %v22139_v51 = vadd.f32 1.0, %v30907_v39  ;;  %v30909_v25 = vpop.eup %30908  ;;  %v37341_v39 = vld [vmem:[#allocation49_spill] sm:$0xff] }
 0xa5d   :  { %30912 = vrcp.f32 %v22138_v52  ;;  %v30911_v35 = vpop.eup %30910 }
 0xa5e   :  { %30914 = vrcp.f32 %v22139_v51  ;;  %v22140_v18 = vadd.f32 1.0, %v30911_v35  ;;  %v37343_v51 = vld [vmem:[#allocation16_spill] sm:$0xff]  ;;  %v37345_v35 = vld [vmem:[#allocation17_spill] sm:$0xff] }
 0xa60   :  { %30916 = vrcp.f32 %v22140_v18  ;;  %v37349_v18 = vld [vmem:[#allocation20_spill] sm:$0xff] }
 0xa67   :  { %v30913_v32 = vpop.eup %30912 }
 0xa68   :  { %v22149_v37 = vmul.f32 %v30913_v32, %v30909_v25  ;;  %v30915_v22 = vpop.eup %30914  ;;  %v37344_v25 = vld [vmem:[#allocation33_spill] sm:$0xff]  ;;  %v37346_v32 = vld [vmem:[#allocation18_spill] sm:$0xff] }
 0xa69   :  { %v22148_v46 = vmul.f32 %v30915_v22, %v35705_v53  ;;  %v37342_v53 = vld [vmem:[#allocation15_spill] sm:$0xff] }
 0xa6a   :  { %v30917_v29 = vpop.eup %30916  ;;  %v37348_v22 = vld [vmem:[#allocation19_spill] sm:$0xff] }
 0xa6b   :  { %v22150_v34 = vadd.f32 %v22149_v37, %v22148_v46  ;;  %v37347_v37 = vld [vmem:[#allocation32_spill] sm:$0xff]  ;;  %v37350_v46 = vld [vmem:[#allocation39_spill] sm:$0xff] }
 0xa6d   :  { %30918 = vtanh.f32 %v22150_v34  ;;  %v37351_v34 = vld [vmem:[#allocation21_spill] sm:$0xff] }
 0xa77   :  { %v30919_v17 = vpop.eup %30918 }
 0xa78   :  { %v22152_v38 = vmul.f32 %v30919_v17, %v30917_v29  ;;  %v37352_v29 = vld [vmem:[#allocation22_spill] sm:$0xff] }
 0xa79   :  { %v37353_v17 = vld [vmem:[#allocation50_spill] sm:$0xff] }
 0xa7a   :  { %v24406_v2 = vsel %vm1906_vm1, %v22152_v38, 0  ;;  %v37354_v38 = vld [vmem:[#allocation51_spill] sm:$0xff] }
 0xa7b   :  { %v36393_v26 = vand.u32 4294901760, %v24406_v2 }
 0xa7d   :  { %v24482_v63 = vsub.f32 %v24406_v2, %v36393_v26  ;;  %v37355_v2 = vld [vmem:[#allocation52_spill] sm:$0xff] }
 0xa7f   :  { %v24483_v11 = vand.u32 4294901760, %v24482_v63 }
 0xa81   :  { %v24484_v21 = vsub.f32 %v24482_v63, %v24483_v11 }
 0xa83   :  { %v24485_v52 = vand.u32 4294901760, %v24484_v21  ;;  %v37356_v21 = vld [vmem:[#allocation53_spill] sm:$0xff] }
 0xa85   :  { %24486 = vmatmul.mubr.f32.vlgmr.msra.gmra.mrb[30].mxu0 %v24485_v52  ;;  %25029 = vmatmul.mubr.f32.vlgmr.msra.gmra.mrb[46].mxu1 %v24485_v52  ;;  %v37358_v52 = vld [vmem:[#allocation55_spill] sm:$0xff] }
 0xa86   :  { %29691 = vmatpush1.bf16.msra.mxu0 %v37341_v39  ;;  %29739 = vmatpush1.bf16.msra.mxu1 %v37342_v53  ;;  %v37359_v39 = vld [vmem:[#allocation56_spill] sm:$0xff]  ;;  %v37360_v53 = vld [vmem:[#allocation57_spill] sm:$0xff] }
 0xa87   :  { %29693 = vmatprep.subr.bf16.mxu0 %v37343_v51  ;;  %29741 = vmatprep.subr.bf16.mxu1 %v37344_v25  ;;  %v37361_v51 = vld [vmem:[#allocation58_spill] sm:$0xff]  ;;  %v37362_v25 = vld [vmem:[#allocation59_spill] sm:$0xff] }
 0xa88   :  { %24596 = vmatprep.mubr.f32.mxu0 %v36977_v6  ;;  %25139 = vmatprep.mubr.f32.mxu1 %v36977_v6 }
 0xa8a   :  { %29695 = vmatpush1.bf16.msra.mxu0 %v37345_v35  ;;  %29743 = vmatpush1.bf16.msra.mxu1 %v37346_v32 }
 0xa8b   :  { %29697 = vmatprep.subr.bf16.mxu0 %v37347_v37  ;;  %29745 = vmatprep.subr.bf16.mxu1 %v37348_v22 }
 0xa8d   :  { %24598 = vmatmul.mubr.f32.vlgmr.msra.gmra.mrb[30].mxu0 %v36393_v26  ;;  %25141 = vmatmul.mubr.f32.vlgmr.msra.gmra.mrb[46].mxu1 %v36393_v26 }
 0xa8e   :  { %29699 = vmatpush1.bf16.msra.mxu0 %v37349_v18  ;;  %29747 = vmatpush1.bf16.msra.mxu1 %v37350_v46 }
 0xa8f   :  { %29701 = vmatprep.subr.bf16.mxu0 %v37351_v34  ;;  %29749 = vmatprep.subr.bf16.mxu1 %v37352_v29 }
 0xa90   :  { %24684 = vmatprep.mubr.f32.mxu0 %v36977_v6  ;;  %25227 = vmatprep.mubr.f32.mxu1 %v36977_v6 }
 0xa92   :  { %29703 = vmatpush1.bf16.msra.mxu0 %v37353_v17  ;;  %29751 = vmatpush1.bf16.msra.mxu1 %v37354_v38 }
 0xa93   :  { %29705 = vmatprep.subr.bf16.mxu0 %v35778_v44  ;;  %29753 = vmatprep.subr.bf16.mxu1 %v35780_v62 }
 0xa95   :  { %24687 = vmatmul.mubr.f32.vlgmr.msra.gmra.mrb[30].mxu0 %v24482_v63  ;;  %25230 = vmatmul.mubr.f32.vlgmr.msra.gmra.mrb[46].mxu1 %v24482_v63  ;;  %v37357_v63 = vld [vmem:[#allocation54_spill] sm:$0xff] }
 0xa96   :  { %29707 = vmatpush1.bf16.msra.mxu0 %v35782_v48  ;;  %29755 = vmatpush1.bf16.msra.mxu1 %v35798_v20 }
 0xa97   :  { %29709 = vmatprep.subr.bf16.mxu0 %v35814_v31  ;;  %29757 = vmatprep.subr.bf16.mxu1 %v35826_v42 }
 0xa98   :  { %24765 = vmatprep.mubr.f32.mxu0 %v36977_v6  ;;  %25308 = vmatprep.mubr.f32.mxu1 %v36977_v6 }
 0xa9a   :  { %29711 = vmatpush1.bf16.msra.mxu0 %v35834_v1  ;;  %29759 = vmatpush1.bf16.msra.mxu1 %v35856_v56 }
 0xa9b   :  { %29713 = vmatprep.subr.bf16.mxu0 %v37355_v2  ;;  %29761 = vmatprep.subr.bf16.mxu1 %v37356_v21 }
 0xa9d   :  { %24769 = vmatmul.mubr.f32.vlgmr.msra.gmra.mrb[30].mxu0 %v24483_v11  ;;  %25312 = vmatmul.mubr.f32.vlgmr.msra.gmra.mrb[46].mxu1 %v24483_v11 }
 0xa9e   :  { %29715 = vmatpush1.bf16.msra.mxu0 %v37357_v63  ;;  %29763 = vmatpush1.bf16.msra.mxu1 %v37358_v52 }
 0xa9f   :  { %29717 = vmatprep.subr.bf16.mxu0 %v37359_v39  ;;  %29765 = vmatprep.subr.bf16.mxu1 %v37360_v53 }
 0xaa0   :  { %24863 = vmatprep.mubr.f32.mxu0 %v36977_v6  ;;  %25406 = vmatprep.mubr.f32.mxu1 %v36977_v6 }
 0xaa2   :  { %29719 = vmatpush1.bf16.msra.mxu0 %v37361_v51  ;;  %29767 = vmatpush1.bf16.msra.mxu1 %v37362_v25 }
 0xaa3   :  { %29721 = vmatprep.subr.bf16.mxu0 %v35778_v44  ;;  %29769 = vmatprep.subr.bf16.mxu1 %v35780_v62  ;;  %v37363_v62 = vld [vmem:[#allocation12_spill] sm:$0xff] }
 0xaa5   :  { %24865 = vmatmul.mubr.f32.vlgmr.msra.gmra.mrb[30].mxu0 %v36393_v26  ;;  %25408 = vmatmul.mubr.f32.vlgmr.msra.gmra.mrb[46].mxu1 %v36393_v26 }
 0xaa6   :  { %29723 = vmatpush1.bf16.msra.mxu0 %v35782_v48  ;;  %29771 = vmatpush1.bf16.msra.mxu1 %v35798_v20  ;;  %v37364_v20 = vld [vmem:[#allocation47_spill] sm:$0xff] }
 0xaa7   :  { %29725 = vmatprep.subr.bf16.mxu0 %v35814_v31  ;;  %29773 = vmatprep.subr.bf16.mxu1 %v35826_v42 }
 0xaa8   :  { %24943 = vmatprep.mubr.f32.mxu0 %v36977_v6  ;;  %25486 = vmatprep.mubr.f32.mxu1 %v36977_v6 }
 0xaaa   :  { %29727 = vmatpush1.bf16.msra.mxu0 %v35834_v1  ;;  %29775 = vmatpush1.bf16.msra.mxu1 %v35856_v56  ;;  %v37365_v1 = vld [vmem:[#allocation11_spill] sm:$0xff] }
 0xaab   :  { %v23812_v11 = vpop.f32.mrb[28].mxu0  ;;  %v24355_v44 = vpop.f32.mrb[44].mxu1  ;;  %29777 = vmatprep.subr.bf16.mxu0 %v36051_v0  ;;  %29825 = vmatprep.subr.bf16.mxu1 %v36059_v33 }
 0xaac   :  { %v29994_v35 = vadd.f32 %v23812_v11, %v37363_v62  ;;  %v23814_v32 = vpop.f32.mrb[29].mxu0  ;;  %v24357_v48 = vpop.f32.mrb[45].mxu1  ;;  %v29996_v56 = vadd.f32 %v24355_v44, %v37365_v1 }
 0xaad   :  { %v29995_v31 = vadd.f32 %v23814_v32, %v37364_v20  ;;  %24945 = vmatmul.mubr.f32.vlgmr.msra.gmra.mrb[30].mxu0 %v36393_v26  ;;  %25488 = vmatmul.mubr.f32.vlgmr.msra.gmra.mrb[46].mxu1 %v36393_v26  ;;  %v37366_v26 = vld [vmem:[#allocation48_spill] sm:$0xff] }
 0xaae   :  { %v27513_v42 = vmul.f32 -1.442695, %v29994_v35  ;;  %29779 = vmatpush1.bf16.msra.mxu0 %v36069_v7  ;;  %29827 = vmatpush1.bf16.msra.mxu1 %v36080_v47  ;;  %v29997_v22 = vadd.f32 %v24357_v48, %v37366_v26  ;;  %v27515_v18 = vmul.f32 -1.442695, %v29996_v56 }
 0xaaf   :  { %v27514_v37 = vmul.f32 -1.442695, %v29995_v31  ;;  %29781 = vmatprep.subr.bf16.mxu0 %v36093_v55  ;;  %29829 = vmatprep.subr.bf16.mxu1 %v36100_v13 }
 0xab0   :  { %30920 = vpow2.f32 %v27513_v42  ;;  %25585 = vmatprep.mubr.f32.mxu0 %v36977_v6  ;;  %26128 = vmatprep.mubr.f32.mxu1 %v36977_v6 }
 0xab1   :  { %30922 = vpow2.f32 %v27514_v37 }
 0xab2   :  { %29783 = vmatpush1.bf16.msra.mxu0 %v36116_v57  ;;  %29831 = vmatpush1.bf16.msra.mxu1 %v36132_v27  ;;  %30924 = vtanh.f32 %v29997_v22 }
 0xab3   :  { %29785 = vmatprep.subr.bf16.mxu0 %v36185_v28  ;;  %29833 = vmatprep.subr.bf16.mxu1 %v36187_v15  ;;  %30926 = vpow2.f32 %v27515_v18  ;;  %v37367_v28 = vld [vmem:[#allocation44_spill] sm:$0xff] }
 0xaba   :  { %v30921_v46 = vpop.eup %30920 }
 0xabb   :  { %v24373_v34 = vadd.f32 1.0, %v30921_v46  ;;  %v30923_v29 = vpop.eup %30922 }
 0xabc   :  { %v24374_v17 = vadd.f32 1.0, %v30923_v29  ;;  %v30925_v38 = vpop.eup %30924 }
 0xabd   :  { %30928 = vrcp.f32 %v24373_v34  ;;  %v30927_v2 = vpop.eup %30926 }
 0xabe   :  { %30930 = vrcp.f32 %v24374_v17  ;;  %v24375_v39 = vadd.f32 1.0, %v30927_v2 }
 0xac0   :  { %30932 = vrcp.f32 %v24375_v39 }
 0xac7   :  { %v30929_v21 = vpop.eup %30928 }
 0xac8   :  { %v24384_v63 = vmul.f32 %v30929_v21, %v30925_v38  ;;  %v30931_v52 = vpop.eup %30930 }
 0xac9   :  { %v24383_v53 = vmul.f32 %v30931_v52, %v37367_v28 }
 0xaca   :  { %v30933_v51 = vpop.eup %30932 }
 0xacb   :  { %v36467_v15 = vadd.f32 %v24384_v63, %v24383_v53 }
 0xacd   :  { %30934 = vtanh.f32 %v36467_v15 }
 0xad7   :  { %v30935_v25 = vpop.eup %30934 }
 0xad8   :  { %v24387_v11 = vmul.f32 %v30935_v25, %v30933_v51 }
 0xada   :  { %v25511_v44 = vsel %vm1906_vm1, %v24387_v11, 0 }
 0xadb   :  { %v36471_v35 = vand.u32 4294901760, %v25511_v44 }
 0xadd   :  { %v36474_v32 = vsub.f32 %v25511_v44, %v36471_v35 }
 0xadf   :  { %v36477_v48 = vand.u32 4294901760, %v36474_v32 }
 0xae1   :  { %v25589_v31 = vsub.f32 %v36474_v32, %v36477_v48 }
 0xae3   :  { %v36481_v42 = vand.u32 4294901760, %v25589_v31 }
 0xae5   :  { %25591 = vmatmul.mubr.f32.vlgmr.msra.gmra.mrb[30].mxu0 %v36481_v42  ;;  %26134 = vmatmul.mubr.f32.vlgmr.msra.gmra.mrb[46].mxu1 %v36481_v42 }
 0xae6   :  { %29787 = vmatpush1.bf16.msra.mxu0 %v36217_v16  ;;  %29835 = vmatpush1.bf16.msra.mxu1 %v36219_v60  ;;  %v26637_v16 = vld [vmem:[%s36675_s7 + $0x8] sm:$0xff] }
 0xae7   :  { %29789 = vmatprep.subr.bf16.mxu0 %v36227_v23  ;;  %29837 = vmatprep.subr.bf16.mxu1 %v36229_v59  ;;  %v26636_v23 = vld [vmem:[%s36675_s7] sm:$0xff]  ;;  %v26675_v60 = vand.u32 4294901760, %v26637_v16  ;;  %v26638_v59 = vld [vmem:[%s36675_s7 + $0x10] sm:$0xff] }
 0xae8   :  { %25701 = vmatprep.mubr.f32.mxu0 %v36977_v6  ;;  %26244 = vmatprep.mubr.f32.mxu1 %v36977_v6 }
 0xaea   :  { %29791 = vmatpush1.bf16.msra.mxu0 %v36235_v58  ;;  %29839 = vmatpush1.bf16.msra.mxu1 %v36237_v49  ;;  %v26639_v58 = vld [vmem:[%s36675_s7 + $0x18] sm:$0xff] }
 0xaeb   :  { %29793 = vmatprep.subr.bf16.mxu0 %v36243_v8  ;;  %29841 = vmatprep.subr.bf16.mxu1 %v36247_v9  ;;  %v26681_v49 = vand.u32 4294901760, %v26639_v58  ;;  %v26829_v8 = vsub.f32 %v26637_v16, %v26675_v60 }
 0xaed   :  { %25703 = vmatmul.mubr.f32.vlgmr.msra.gmra.mrb[30].mxu0 %v36471_v35  ;;  %26246 = vmatmul.mubr.f32.vlgmr.msra.gmra.mrb[46].mxu1 %v36471_v35 }
 0xaee   :  { %29795 = vmatpush1.bf16.msra.mxu0 %v36255_v40  ;;  %29843 = vmatpush1.bf16.msra.mxu1 %v36259_v36  ;;  %v36572_v40 = vsub.f32 %v26639_v58, %v26681_v49 }
 0xaef   :  { %29797 = vmatprep.subr.bf16.mxu0 %v36265_v50  ;;  %29845 = vmatprep.subr.bf16.mxu1 %v36269_v14  ;;  %v26830_v50 = vand.u32 4294901760, %v26829_v8 }
 0xaf0   :  { %25789 = vmatprep.mubr.f32.mxu0 %v36977_v6  ;;  %26332 = vmatprep.mubr.f32.mxu1 %v36977_v6 }
 0xaf2   :  { %29799 = vmatpush1.bf16.msra.mxu0 %v36277_v19  ;;  %29847 = vmatpush1.bf16.msra.mxu1 %v36281_v54  ;;  %v26844_v19 = vand.u32 4294901760, %v36572_v40 }
 0xaf3   :  { %29801 = vmatprep.subr.bf16.mxu0 %v36051_v0  ;;  %29849 = vmatprep.subr.bf16.mxu1 %v36059_v33 }
 0xaf5   :  { %25792 = vmatmul.mubr.f32.vlgmr.msra.gmra.mrb[30].mxu0 %v36474_v32  ;;  %26335 = vmatmul.mubr.f32.vlgmr.msra.gmra.mrb[46].mxu1 %v36474_v32 }
 0xaf6   :  { %29803 = vmatpush1.bf16.msra.mxu0 %v36069_v7  ;;  %29851 = vmatpush1.bf16.msra.mxu1 %v36080_v47 }
 0xaf7   :  { %29805 = vmatprep.subr.bf16.mxu0 %v36093_v55  ;;  %29853 = vmatprep.subr.bf16.mxu1 %v36100_v13 }
 0xaf8   :  { %25870 = vmatprep.mubr.f32.mxu0 %v36977_v6  ;;  %26413 = vmatprep.mubr.f32.mxu1 %v36977_v6 }
 0xafa   :  { %29807 = vmatpush1.bf16.msra.mxu0 %v36116_v57  ;;  %29855 = vmatpush1.bf16.msra.mxu1 %v36132_v27 }
 0xafb   :  { %29809 = vmatprep.subr.bf16.mxu0 %v36301_v43  ;;  %29857 = vmatprep.subr.bf16.mxu1 %v36307_v61  ;;  %v26831_v43 = vsub.f32 %v26829_v8, %v26830_v50  ;;  %v26845_v61 = vsub.f32 %v36572_v40, %v26844_v19 }
 0xafd   :  { %25874 = vmatmul.mubr.f32.vlgmr.msra.gmra.mrb[30].mxu0 %v36477_v48  ;;  %26417 = vmatmul.mubr.f32.vlgmr.msra.gmra.mrb[46].mxu1 %v36477_v48 }
 0xafe   :  { %29811 = vmatpush1.bf16.msra.mxu0 %v36317_v30  ;;  %29859 = vmatpush1.bf16.msra.mxu1 %v36323_v3  ;;  %v26832_v3 = vand.u32 4294901760, %v26831_v43  ;;  %v37382_v43 = vld [vmem:[#allocation46_spill] sm:$0xff] }
 0xaff   :  { %29813 = vmatprep.subr.bf16.mxu0 %v36331_v4  ;;  %29861 = vmatprep.subr.bf16.mxu1 %v36337_v10  ;;  %v26672_v4 = vand.u32 4294901760, %v26636_v23 }
 0xb00   :  { %25968 = vmatprep.mubr.f32.mxu0 %v36977_v6  ;;  %26511 = vmatprep.mubr.f32.mxu1 %v36977_v6 }
 0xb02   :  { %29815 = vmatpush1.bf16.msra.mxu0 %v36347_v41  ;;  %29863 = vmatpush1.bf16.msra.mxu1 %v36353_v5  ;;  %v26846_v41 = vand.u32 4294901760, %v26845_v61  ;;  %v37384_v61 = vld [vmem:[#allocation27_spill] sm:$0xff] }
 0xb03   :  { %29817 = vmatprep.subr.bf16.mxu0 %v36051_v0  ;;  %29865 = vmatprep.subr.bf16.mxu1 %v36059_v33  ;;  %v36549_v0 = vpack.c.bf16 %v26675_v60, %v26672_v4  ;;  %v26678_v33 = vand.u32 4294901760, %v26638_v59 }
 0xb05   :  { %25970 = vmatmul.mubr.f32.vlgmr.msra.gmra.mrb[30].mxu0 %v36471_v35  ;;  %26513 = vmatmul.mubr.f32.vlgmr.msra.gmra.mrb[46].mxu1 %v36471_v35  ;;  %v36570_v9 = vsub.f32 %v26638_v59, %v26678_v33 }
 0xb06   :  { %29819 = vmatpush1.bf16.msra.mxu0 %v36069_v7  ;;  %29867 = vmatpush1.bf16.msra.mxu1 %v36080_v47  ;;  %v36556_v7 = vpack.c.bf16 %v26681_v49, %v26678_v33  ;;  %v37370_v47 = vld [vmem:[#allocation37_spill] sm:$0xff] }
 0xb07   :  { %29821 = vmatprep.subr.bf16.mxu0 %v36093_v55  ;;  %29869 = vmatprep.subr.bf16.mxu1 %v36100_v13  ;;  %v37368_v13 = vld [vmem:[#allocation28_spill] sm:$0xff]  ;;  %v37371_v55 = vld [vmem:[#allocation43_spill] sm:$0xff]  ;;  %v26837_v14 = vand.u32 4294901760, %v36570_v9  ;;  %v29892_v22 = vpack.c.bf16 %v36572_v40, %v36570_v9 }
 0xb08   :  { %26048 = vmatprep.mubr.f32.mxu0 %v36977_v6  ;;  %26591 = vmatprep.mubr.f32.mxu1 %v36977_v6  ;;  %v37369_v6 = vld [vmem:[#allocation31_spill] sm:$0xff] }
 0xb0a   :  { %29823 = vmatpush1.bf16.msra.mxu0 %v36116_v57  ;;  %29871 = vmatpush1.bf16.msra.mxu1 %v36132_v27  ;;  %v37372_v57 = vld [vmem:[#allocation14_spill] sm:$0xff]  ;;  %v26822_v27 = vsub.f32 %v26636_v23, %v26672_v4 }
 0xb0b   :  { %29873 = vmatprep.subr.bf16.mxu0 %v36549_v0 }
 0xb0c   :  { %v26823_v36 = vand.u32 4294901760, %v26822_v27  ;;  %v29888_v56 = vpack.c.bf16 %v26829_v8, %v26822_v27  ;;  %v37378_v8 = vld [vmem:[#allocation26_spill] sm:$0xff] }
 0xb0d   :  { %26050 = vmatmul.mubr.f32.vlgmr.msra.gmra.mrb[30].mxu0 %v36471_v35  ;;  %26593 = vmatmul.mubr.f32.vlgmr.msra.gmra.mrb[46].mxu1 %v36471_v35 }
 0xb0e   :  { %29875 = vmatpush3.bf16.msra.mxu0 %v36549_v0  ;;  %27600 = vmatprep.mubr.f32.mxu0 %v37368_v13  ;;  %v26824_v54 = vsub.f32 %v26822_v27, %v26823_v36  ;;  %v36584_v18 = vpack.c.bf16 %v26830_v50, %v26823_v36  ;;  %v37377_v27 = vld [vmem:[#allocation45_spill] sm:$0xff]  ;;  %v37380_v50 = vld [vmem:[#allocation35_spill] sm:$0xff] }
 0xb0f   :  { %29877 = vmatprep.subr.bf16.mxu0 %v36556_v7  ;;  %v37379_v36 = vld [vmem:[#allocation29_spill] sm:$0xff] }
 0xb10   :  { %v26825_v30 = vand.u32 4294901760, %v26824_v54  ;;  %v37381_v54 = vld [vmem:[#allocation41_spill] sm:$0xff] }
 0xb12   :  { %29879 = vmatpush3.bf16.msra.mxu0 %v36556_v7  ;;  %v29880_v5 = vpack.c.bf16 %v26832_v3, %v26825_v30  ;;  %v29908_v30 = vpack.c.bf16 %v26844_v19, %v26837_v14  ;;  %v37385_v3 = vld [vmem:[#allocation30_spill] sm:$0xff] }
 0xb14   :  { %29881 = vmatprep.subr.bf16.mxu0 %v29880_v5 }
 0xb15   :  { %27601 = vmatmul.mubr.f32.vlgmr.msra.gmra.mrb[32].mxu0 %v37369_v6 }
 0xb16   :  { %27603 = vmatprep.mubr.f32.mxu0 %v37370_v47  ;;  %29883 = vmatpush3.bf16.msra.mxu0 %v29880_v5  ;;  %v37373_v47 = vld [vmem:[#allocation25_spill] sm:$0xff] }
 0xb17   :  { %v37388_v5 = vld [vmem:[#allocation13_spill] sm:$0xff] }
 0xb19   :  { %27604 = vmatmul.mubr.f32.gmra.mrb[34].mxu0 %v37371_v55  ;;  %v37374_v55 = vld [vmem:[#allocation38_spill] sm:$0xff] }
 0xb1a   :  { %27606 = vmatprep.mubr.f32.mxu0 %v37372_v57  ;;  %v37375_v57 = vld [vmem:[#allocation34_spill] sm:$0xff] }
 0xb1d   :  { %27607 = vmatmul.mubr.f32.gmra.mrb[36].mxu0 %v36223_v12  ;;  %v26838_v12 = vsub.f32 %v36570_v9, %v26837_v14 }
 0xb1e   :  { %27609 = vmatprep.mubr.f32.mxu0 %v36481_v42 }
 0xb1f   :  { %v26839_v10 = vand.u32 4294901760, %v26838_v12  ;;  %v37383_v12 = vld [vmem:[#allocation60_spill] sm:$0xff] }
 0xb21   :  { %v29884_v37 = vpack.c.bf16 %v26846_v41, %v26839_v10  ;;  %v37386_v10 = vld [vmem:[#allocation36_spill] sm:$0xff]  ;;  %v37387_v41 = vld [vmem:[#allocation42_spill] sm:$0xff] }
 0xb23   :  { %29885 = vmatprep.subr.bf16.mxu0 %v29884_v37 }
 0xb24   :  { %29887 = vmatpush3.bf16.msra.mxu0 %v29884_v37 }
 0xb25   :  { %29889 = vmatprep.subr.bf16.mxu0 %v29888_v56 }
 0xbe0   :  { %v26051_v46 = vpop.f32.mrb[30].mxu0  ;;  %v26594_v34 = vpop.f32.mrb[46].mxu1 }
 0xbe1   :  { %v29998_v29 = vadd.f32 %v26051_v46, %v37363_v62  ;;  %v26053_v17 = vpop.f32.mrb[31].mxu0  ;;  %v26596_v38 = vpop.f32.mrb[47].mxu1  ;;  %v30000_v52 = vadd.f32 %v26594_v34, %v37365_v1 }
 0xbe2   :  { %v29999_v2 = vadd.f32 %v26053_v17, %v37364_v20  ;;  %v30001_v39 = vadd.f32 %v26596_v38, %v37366_v26 }
 0xbe3   :  { %v27516_v21 = vmul.f32 -1.442695, %v29998_v29  ;;  %v27518_v28 = vmul.f32 -1.442695, %v30000_v52 }
 0xbe4   :  { %v27517_v63 = vmul.f32 -1.442695, %v29999_v2 }
 0xbe5   :  { %30936 = vpow2.f32 %v27516_v21 }
 0xbe6   :  { %30938 = vpow2.f32 %v27517_v63 }
 0xbe7   :  { %30940 = vtanh.f32 %v30001_v39 }
 0xbe8   :  { %30942 = vpow2.f32 %v27518_v28 }
 0xbef   :  { %v30937_v53 = vpop.eup %30936 }
 0xbf0   :  { %v26612_v51 = vadd.f32 1.0, %v30937_v53  ;;  %v30939_v25 = vpop.eup %30938 }
 0xbf1   :  { %v26613_v62 = vadd.f32 1.0, %v30939_v25  ;;  %v30941_v11 = vpop.eup %30940 }
 0xbf2   :  { %30944 = vrcp.f32 %v26612_v51  ;;  %v30943_v44 = vpop.eup %30942 }
 0xbf3   :  { %30946 = vrcp.f32 %v26613_v62  ;;  %v26614_v23 = vadd.f32 1.0, %v30943_v44 }
 0xbf5   :  { %30948 = vrcp.f32 %v26614_v23 }
 0xbfc   :  { %v30945_v20 = vpop.eup %30944 }
 0xbfd   :  { %v26623_v31 = vmul.f32 %v30945_v20, %v30941_v11  ;;  %v30947_v42 = vpop.eup %30946 }
 0xbfe   :  { %v26622_v16 = vmul.f32 %v30947_v42, %v36467_v15  ;;  %v37376_v15 = vld [vmem:[#allocation40_spill] sm:$0xff] }
 0xbff   :  { %v30949_v26 = vpop.eup %30948 }
 0xc00   :  { %v26624_v1 = vadd.f32 %v26623_v31, %v26622_v16 }
 0xc02   :  { %30950 = vtanh.f32 %v26624_v1 }
 0xc0c   :  { %v30951_v4 = vpop.eup %30950 }
 0xc0d   :  { %v26626_v60 = vmul.f32 %v30951_v4, %v30949_v26 }
 0xc0f   :  { %v26669_v59 = vsel %vm1906_vm1, %v26626_v60, 0 }
 0xc10   :  { %v26810_v58 = vand.u32 4294901760, %v26669_v59 }
 0xc12   :  { %v26811_v33 = vsub.f32 %v26669_v59, %v26810_v58 }
 0xc14   :  { %v26812_v49 = vand.u32 4294901760, %v26811_v33 }
 0xc16   :  { %v26813_v13 = vsub.f32 %v26811_v33, %v26812_v49 }
 0xc18   :  { %v26814_v6 = vand.u32 4294901760, %v26813_v13 }
 0xc1a   :  { %27610 = vmatmul.mubr.f32.gmra.mrb[38].mxu0 %v26814_v6 }
 0xc1b   :  { %27620 = vmatprep.mubr.f32.mxu0 %v37373_v47 }
 0xc1e   :  { %27621 = vmatmul.mubr.f32.vlgmr.msra.gmra.mrb[32].mxu0 %v37374_v55 }
 0xc1f   :  { %27623 = vmatprep.mubr.f32.mxu0 %v37375_v57  ;;  %29891 = vmatpush3.bf16.msra.mxu0 %v29888_v56 }
 0xc20   :  { %29893 = vmatprep.subr.bf16.mxu0 %v29892_v22 }
 0xc22   :  { %27624 = vmatmul.mubr.f32.gmra.mrb[34].mxu0 %v37376_v15 }
 0xc23   :  { %27626 = vmatprep.mubr.f32.mxu0 %v37377_v27  ;;  %29895 = vmatpush3.bf16.msra.mxu0 %v29892_v22 }
 0xc24   :  { %29897 = vmatprep.subr.bf16.mxu0 %v36549_v0 }
 0xc26   :  { %27627 = vmatmul.mubr.f32.gmra.mrb[36].mxu0 %v36174_v24 }
 0xc27   :  { %27629 = vmatprep.mubr.f32.mxu0 %v36471_v35 }
 0xc2a   :  { %27630 = vmatmul.mubr.f32.gmra.mrb[38].mxu0 %v26810_v58 }
 0xc2b   :  { %27640 = vmatprep.mubr.f32.mxu0 %v37378_v8 }
 0xc2e   :  { %27641 = vmatmul.mubr.f32.vlgmr.msra.gmra.mrb[32].mxu0 %v37379_v36 }
 0xc2f   :  { %27643 = vmatprep.mubr.f32.mxu0 %v37380_v50  ;;  %29899 = vmatpush3.bf16.msra.mxu0 %v36549_v0 }
 0xc30   :  { %29901 = vmatprep.subr.bf16.mxu0 %v36556_v7 }
 0xc32   :  { %27644 = vmatmul.mubr.f32.gmra.mrb[34].mxu0 %v37381_v54 }
 0xc33   :  { %27646 = vmatprep.mubr.f32.mxu0 %v37382_v43  ;;  %29903 = vmatpush3.bf16.msra.mxu0 %v36556_v7 }
 0xc34   :  { %29905 = vmatprep.subr.bf16.mxu0 %v36584_v18 }
 0xc36   :  { %27647 = vmatmul.mubr.f32.gmra.mrb[36].mxu0 %v37383_v12 }
 0xc37   :  { %27649 = vmatprep.mubr.f32.mxu0 %v36474_v32 }
 0xc3a   :  { %27650 = vmatmul.mubr.f32.gmra.mrb[38].mxu0 %v26811_v33 }
 0xc3b   :  { %27660 = vmatprep.mubr.f32.mxu0 %v37384_v61 }
 0xc3e   :  { %27661 = vmatmul.mubr.f32.vlgmr.msra.gmra.mrb[32].mxu0 %v37385_v3 }
 0xc3f   :  { %27663 = vmatprep.mubr.f32.mxu0 %v37386_v10  ;;  %29907 = vmatpush3.bf16.msra.mxu0 %v36584_v18 }
 0xc40   :  { %29909 = vmatprep.subr.bf16.mxu0 %v29908_v30 }
 0xc42   :  { %27664 = vmatmul.mubr.f32.gmra.mrb[34].mxu0 %v37387_v41 }
 0xc43   :  { %27666 = vmatprep.mubr.f32.mxu0 %v37388_v5  ;;  %29911 = vmatpush3.bf16.msra.mxu0 %v29908_v30 }
 0xc44   :  { %29913 = vmatprep.subr.bf16.mxu0 %v36549_v0 }
 0xc46   :  { %27667 = vmatmul.mubr.f32.gmra.mrb[36].mxu0 %v36211_v45  ;;  %v27519_v45 = vld [vmem:[%s36676_s8] ss:$0 sm:$0xff] }
 0xc47   :  { %27669 = vmatprep.mubr.f32.mxu0 %v36477_v48 }
 0xc4a   :  { %27670 = vmatmul.mubr.f32.gmra.mrb[38].mxu0 %v26812_v49 }
 0xc4b   :  { %27680 = vmatprep.mubr.f32.mxu0 %v37373_v47 }
 0xc4e   :  { %27681 = vmatmul.mubr.f32.vlgmr.msra.gmra.mrb[32].mxu0 %v37374_v55 }
 0xc4f   :  { %27683 = vmatprep.mubr.f32.mxu0 %v37375_v57  ;;  %29915 = vmatpush3.bf16.msra.mxu0 %v36549_v0 }
 0xc50   :  { %29917 = vmatprep.subr.bf16.mxu0 %v36556_v7 }
 0xc52   :  { %27684 = vmatmul.mubr.f32.gmra.mrb[34].mxu0 %v37376_v15 }
 0xc53   :  { %27686 = vmatprep.mubr.f32.mxu0 %v37377_v27  ;;  %29919 = vmatpush3.bf16.msra.mxu0 %v36556_v7 }
 0xc56   :  { %27687 = vmatmul.mubr.f32.gmra.mrb[36].mxu0 %v36174_v24 }
 0xc57   :  { %27689 = vmatprep.mubr.f32.mxu0 %v36471_v35 }
 0xc5a   :  { %27690 = vmatmul.mubr.f32.gmra.mrb[38].mxu0 %v26810_v58 }
 0xc5b   :  { %27700 = vmatprep.mubr.f32.mxu0 %v37373_v47 }
 0xc5e   :  { %27701 = vmatmul.mubr.f32.vlgmr.msra.gmra.mrb[32].mxu0 %v37374_v55 }
 0xc5f   :  { %27703 = vmatprep.mubr.f32.mxu0 %v37375_v57 }
 0xc62   :  { %27704 = vmatmul.mubr.f32.gmra.mrb[34].mxu0 %v37376_v15 }
 0xc63   :  { %27706 = vmatprep.mubr.f32.mxu0 %v37377_v27 }
 0xc66   :  { %27707 = vmatmul.mubr.f32.gmra.mrb[36].mxu0 %v36174_v24 }
 0xc67   :  { %27709 = vmatprep.mubr.f32.mxu0 %v36471_v35 }
 0xc6a   :  { %27710 = vmatmul.mubr.f32.gmra.mrb[38].mxu0 %v26810_v58 }
 0xd31   :  { %v27702_v32 = vpop.f32.mrb[32].mxu0 }
 0xd32   :  { %v30002_v48 = vadd.f32 %v27702_v32, %v27519_v45  ;;  %v27411_v0 = vpop.f32.mrb[33].mxu0 }
 0xd33   :  { %v30003_v7 = vadd.f32 %v27519_v45, %v27411_v0 }
 0xd34   :  { %27458 = vst [vmem:[%s36677_s9 + $0x8] sm:$0xff] %v30002_v48 }
 0xd35   :  { %27457 = vst [vmem:[%s36677_s9] sm:$0xff] %v30003_v7  ;;  %v27705_v24 = vpop.f32.mrb[34].mxu0 }
 0xd36   :  { %v30004_v9 = vadd.f32 %v27705_v24, %v27519_v45  ;;  %v27423_v35 = vpop.f32.mrb[35].mxu0 }
 0xd37   :  { %v30005_v40 = vadd.f32 %v27519_v45, %v27423_v35 }
 0xd38   :  { %27460 = vst [vmem:[%s36677_s9 + $0x18] sm:$0xff] %v30004_v9 }
 0xd39   :  { %27459 = vst [vmem:[%s36677_s9 + $0x10] sm:$0xff] %v30005_v40  ;;  %v27708_v14 = vpop.f32.mrb[36].mxu0 }
 0xd3a   :  { %v30006_v19 = vadd.f32 %v27708_v14, %v27519_v45  ;;  %v27435_v37 = vpop.f32.mrb[37].mxu0 }
 0xd3b   :  { %v30007_v56 = vadd.f32 %v27519_v45, %v27435_v37 }
 0xd3c   :  { %27462 = vst [vmem:[%s36677_s9 + $0x28] sm:$0xff] %v30006_v19 }
 0xd3d   :  { %27461 = vst [vmem:[%s36677_s9 + $0x20] sm:$0xff] %v30007_v56  ;;  %v27711_v22 = vpop.f32.mrb[38].mxu0 }
 0xd3e   :  { %v30008_v18 = vadd.f32 %v27711_v22, %v27519_v45  ;;  %v27447_v46 = vpop.f32.mrb[39].mxu0 }
 0xd3f   :  { %v30009_v34 = vadd.f32 %v27519_v45, %v27447_v46 }
 0xd40   :  { %27464 = vst [vmem:[%s36677_s9 + $0x38] sm:$0xff] %v30008_v18 }
 0xd41   :  { %27463 = vst [vmem:[%s36677_s9 + $0x30] sm:$0xff] %v30009_v34 }
 0xd42   :  { %27469 = vsyncpa [#allocation5], 1 }
 0xd43   :  { %27470 = vsyncpa [#allocation7], 1 }

</bundles_post_ra>
